<compile_context>
chip_gen: v7x
topology: tpu7x:2x2x1
jax: 0.10.0
libtpu: 0.0.40
codegen_flags: <defaults>
</compile_context>

<pallas_src>
import functools

import jax
import jax.numpy as jnp
from jax import lax
from jax.experimental import pallas as pl
from jax.experimental.pallas import tpu as pltpu

HIGH = lax.Precision.HIGHEST


def _st_gcn_kernel(x_ref, wgb_ref, akron_ref, biasg_ref, wtb_ref, bias2_ref,
                   mask_ref, a1_ref, ao_ref, o_ref, g_scr, *,
                   K, kt, Nb, C_out, T, V, Tt):
    TV = T * V
    TtV = Tt * V
    nTc = T // Tt
    a1 = a1_ref[0, 0]

    # --- ConvTemporalGraphical: 1x1 conv (BN1 scale folded into wgb rows) +
    # einsum 'nkctv,kvw->nctw', chunked over T.  Per chunk and per k:
    #   y_k = kron(I_Nb, W_k) @ x_chunk          (bf16 MXU, f32 acc)
    #   g  += y_k @ kron(I_Tt, A[k])             (bf16 MXU, f32 acc)
    # biasg (gcn bias pushed through A + BN1 shift) seeds the accumulator.
    for tc in range(nTc):
        lo = tc * TtV
        xc = x_ref[:, lo:lo + TtV].astype(jnp.bfloat16)      # (Nb*C_in, TtV)
        acc = biasg_ref[...]                                 # (Nb*C_out, TtV) f32
        for k in range(K):
            yk = jnp.dot(wgb_ref[k], xc,
                         preferred_element_type=jnp.float32)
            acc = acc + jnp.dot(yk.astype(jnp.bfloat16), akron_ref[k],
                                preferred_element_type=jnp.float32)
        # PReLU inside tcn (f32 VPU).
        acc = jnp.where(acc >= 0, acc, a1 * acc)
        g_scr[:, lo:lo + TtV] = acc

    # --- tcn temporal (kt,1) conv, SAME padding, stride 1: shift by +/- s*V
    # lanes with pltpu.roll (XLU), zero the out-of-range lanes with a host
    # precomputed mask (VPU mul), then a block-diagonal channel matmul per tap
    # (BN2 scale folded, bf16 MXU operands).
    pad = (kt - 1) // 2
    g = g_scr[...]                                           # (Nb*C_out, TV) f32
    h = jnp.dot(wtb_ref[pad], g.astype(jnp.bfloat16),
                preferred_element_type=jnp.float32)
    for dt in range(kt):
        s = dt - pad                                         # temporal offset
        if s == 0:
            continue
        gs = pltpu.roll(g, (-s * V) % TV, 1)                 # lane roll by s*V
        gs = gs * mask_ref[dt]                               # (1, TV) boundary mask
        h = h + jnp.dot(wtb_ref[dt], gs.astype(jnp.bfloat16),
                        preferred_element_type=jnp.float32)

    # --- folded (tcn conv bias + BN2 affine) + identity residual + PReLU.
    # Residual re-reads x_ref (f32, exact); Dropout is identity at inference.
    h = h + bias2_ref[...] + x_ref[...]
    ao = ao_ref[0, 0]
    o_ref[...] = jnp.where(h >= 0, h, ao * h)


def _pick_tt(T, V):
    """Largest divisor of T with Tt*V <= 128 lanes (MXU-friendly chunk width)."""
    best = 1
    for tt in range(1, T + 1):
        if T % tt == 0 and tt * V <= 128:
            best = tt
    return best


def st_gcn_forward(x, A, p, kt=3, batch_block=32):
    """x: (N, C_in, T, V), A: (K, V, V). Returns (N, C_out, T, V).

    Eval-mode st_gcn forward with the identity residual path
    (in_channels == out_channels, stride == 1, residual=True, use_mdn=False).
    """
    N, C_in, T, V = x.shape
    K = A.shape[0]
    C_out = p["scale1"].shape[0]
    assert C_in == C_out, "identity residual path requires C_in == C_out"
    TV = T * V
    Nb = max(1, int(batch_block))
    Tt = _pick_tt(T, V)
    TtV = Tt * V
    pad = (kt - 1) // 2

    # TODO(synk): stride > 1 and the conv+BN residual branch of st_gcn (taken
    # when in_channels != out_channels), training-mode BatchNorm statistics
    # and active Dropout are not implemented (eval-mode, identity residual).
    # TODO(synk): for very large T*V, additionally tile T across the grid
    # (with a +/-pad*V halo for the temporal conv) so g fits VMEM.

    # Pad the batch to a multiple of the per-step block and flatten to the
    # lane-dense layout used in-kernel: rows = (sample, channel), lanes = T*V.
    Npad = ((N + Nb - 1) // Nb) * Nb
    xf = x.astype(jnp.float32)
    if Npad != N:
        xf = jnp.concatenate(
            [xf, jnp.zeros((Npad - N, C_in, T, V), jnp.float32)], axis=0)
    x2 = xf.reshape(Npad * C_in, TV)

    f32 = jnp.float32
    bf16 = jnp.bfloat16
    A = A.astype(f32)
    s1 = p["scale1"].astype(f32)                      # (C_out, 1)
    h1 = p["shift1"].astype(f32)
    s2 = p["scale2"].astype(f32)
    h2 = p["shift2"].astype(f32)
    eye_nb = jnp.eye(Nb, dtype=f32)

    # gcn 1x1 conv weights, BN1 scale folded, block-diagonal over samples;
    # wgb[k]: rows (n, c_out), columns (n, c_in).  bf16 MXU operand.
    wg_f = p["wg"].astype(f32).reshape(K, C_out, C_in) * s1.reshape(1, C_out, 1)
    wgb = (eye_nb[None, :, None, :, None] * wg_f[:, None, :, None, :]
           ).reshape(K, Nb * C_out, Nb * C_in).astype(bf16)

    # Small shared block-diagonal slab kron(I_Tt, A[k]) applied to every
    # T-chunk (the full kron(I_T, A) is never materialised).
    eye_tt = jnp.eye(Tt, dtype=f32)
    akron = jnp.stack([jnp.kron(eye_tt, A[k]) for k in range(K)],
                      axis=0).astype(bf16)                     # (K, TtV, TtV)

    # gcn conv bias pushed through A (column sums over the source node) plus
    # BN1 affine; the (c, v) pattern repeats every V lanes so one Tt-wide slab
    # serves every chunk; tiled over the Nb samples of a block.
    cs = A.sum(axis=1)                                         # (K, V)
    bg2 = p["bg"].astype(f32).reshape(K, C_out)
    bias_v = jnp.einsum('kc,kw->cw', bg2, cs)                  # (C_out, V)
    biasg = s1 * jnp.tile(bias_v, (1, Tt)) + h1                # (C_out, TtV)
    biasg = jnp.tile(biasg, (Nb, 1))                           # (Nb*C_out, TtV)

    # tcn temporal conv weights (BN2 scale folded), block-diagonal over samples.
    wt_f = p["wt"].astype(f32) * s2.reshape(1, C_out, 1)       # (kt, C_out, C_out)
    wtb = (eye_nb[None, :, None, :, None] * wt_f[:, None, :, None, :]
           ).reshape(kt, Nb * C_out, Nb * C_out).astype(bf16)

    # tcn conv bias + BN2 shift, folded into one per-channel bias.
    bias2 = jnp.tile(s2 * p["bt"].astype(f32) + h2, (Nb, 1))   # (Nb*C_out, 1)

    # Host-precomputed boundary masks for the +/- s*V rolls (replaces iota).
    col = jnp.arange(TV)
    mrows = []
    for dt in range(kt):
        s = dt - pad
        lo_m = max(0, -s) * V
        hi_m = min(T, T - s) * V
        mrows.append(((col >= lo_m) & (col < hi_m)).astype(f32))
    mask = jnp.stack(mrows, axis=0).reshape(kt, 1, TV)

    def _rep(shape):
        rank = len(shape)
        return pl.BlockSpec(shape, lambda n, _r=rank: (0,) * _r)

    smem_spec = pl.BlockSpec(memory_space=pltpu.MemorySpace.SMEM)

    kernel = functools.partial(_st_gcn_kernel, K=K, kt=kt, Nb=Nb, C_out=C_out,
                               T=T, V=V, Tt=Tt)

    out = pl.pallas_call(
        kernel,
        out_shape=jax.ShapeDtypeStruct((Npad * C_out, TV), jnp.float32),
        grid=(Npad // Nb,),
        in_specs=[
            pl.BlockSpec((Nb * C_in, TV), lambda n: (n, 0)),    # x block (f32)
            _rep((K, Nb * C_out, Nb * C_in)),                   # wgb (bf16)
            _rep((K, TtV, TtV)),                                # akron (bf16)
            _rep((Nb * C_out, TtV)),                            # biasg (f32)
            _rep((kt, Nb * C_out, Nb * C_out)),                 # wtb (bf16)
            _rep((Nb * C_out, 1)),                              # bias2 (f32)
            _rep((kt, 1, TV)),                                  # tap masks (f32)
            smem_spec,                                          # alpha1
            smem_spec,                                          # alpha_out
        ],
        out_specs=pl.BlockSpec((Nb * C_out, TV), lambda n: (n, 0)),
        scratch_shapes=[pltpu.VMEM((Nb * C_out, TV), jnp.float32)],  # g
        compiler_params=pltpu.CompilerParams(
            dimension_semantics=("parallel",),
            vmem_limit_bytes=32 * 1024 * 1024),
    )(x2, wgb, akron, biasg, wtb, bias2, mask, p["alpha1"], p["alpha_out"])

    return out.reshape(Npad, C_out, T, V)[:N]


def init_params(key, C_in, C_out, K, kt):
    """Deterministic synthetic parameters (eval-mode BN folded to scale/shift)."""
    ks = jax.random.split(key, 14)
    eps = 1e-5
    p = {}
    # gcn 1x1 conv: weight (K*C_out, C_in, 1, 1) -> (K*C_out, C_in)
    p["wg"] = 0.1 * jax.random.normal(ks[0], (K * C_out, C_in), jnp.float32)
    p["bg"] = 0.1 * jax.random.normal(ks[1], (K * C_out, 1), jnp.float32)
    # BatchNorm2d #1 (eval mode)
    g1 = 1.0 + 0.1 * jax.random.normal(ks[2], (C_out,), jnp.float32)
    b1 = 0.1 * jax.random.normal(ks[3], (C_out,), jnp.float32)
    m1 = 0.1 * jax.random.normal(ks[4], (C_out,), jnp.float32)
    v1 = 1.0 + 0.1 * jnp.abs(jax.random.normal(ks[5], (C_out,), jnp.float32))
    s1 = g1 / jnp.sqrt(v1 + eps)
    p["scale1"] = s1.reshape(C_out, 1)
    p["shift1"] = (b1 - m1 * s1).reshape(C_out, 1)
    # PReLU inside tcn (single parameter, PyTorch init 0.25)
    p["alpha1"] = jnp.full((1, 1), 0.25, jnp.float32)
    # temporal conv: PyTorch weight (C_out, C_out, kt, 1) -> wt[dt] = W[:, :, dt, 0]
    p["wt"] = 0.1 * jax.random.normal(ks[6], (kt, C_out, C_out), jnp.float32)
    p["bt"] = 0.1 * jax.random.normal(ks[7], (C_out, 1), jnp.float32)
    # BatchNorm2d #2 (eval mode)
    g2 = 1.0 + 0.1 * jax.random.normal(ks[8], (C_out,), jnp.float32)
    b2 = 0.1 * jax.random.normal(ks[9], (C_out,), jnp.float32)
    m2 = 0.1 * jax.random.normal(ks[10], (C_out,), jnp.float32)
    v2 = 1.0 + 0.1 * jnp.abs(jax.random.normal(ks[11], (C_out,), jnp.float32))
    s2 = g2 / jnp.sqrt(v2 + eps)
    p["scale2"] = s2.reshape(C_out, 1)
    p["shift2"] = (b2 - m2 * s2).reshape(C_out, 1)
    # outer PReLU
    p["alpha_out"] = jnp.full((1, 1), 0.25, jnp.float32)
    return p


def st_gcn_reference(x, A, p, kt=3):
    """Pure-JAX reference mirroring the PyTorch forward (eval mode)."""
    N, C_in, T, V = x.shape
    K = A.shape[0]
    C_out = p["scale1"].shape[0]
    pad = (kt - 1) // 2
    y = jnp.einsum('oi,nitv->notv', p["wg"], x, precision=HIGH) \
        + p["bg"].reshape(1, -1, 1, 1)
    y = y.reshape(N, K, C_out, T, V)
    g = jnp.einsum('nkctv,kvw->nctw', y, A, precision=HIGH)
    g = g * p["scale1"].reshape(1, C_out, 1, 1) + p["shift1"].reshape(1, C_out, 1, 1)
    g = jnp.where(g >= 0, g, p["alpha1"][0, 0] * g)
    gp = jnp.pad(g, ((0, 0), (0, 0), (pad, pad), (0, 0)))
    h = jnp.zeros((N, C_out, T, V), jnp.float32) + p["bt"].reshape(1, C_out, 1, 1)
    for dt in range(kt):
        h = h + jnp.einsum('oi,nitv->notv', p["wt"][dt], gp[:, :, dt:dt + T, :],
                           precision=HIGH)
    h = h * p["scale2"].reshape(1, C_out, 1, 1) + p["shift2"].reshape(1, C_out, 1, 1)
    h = h + x  # residual (identity branch)
    return jnp.where(h >= 0, h, p["alpha_out"][0, 0] * h)


if __name__ == "__main__":
    key = jax.random.PRNGKey(0)
    kx, ka, kp = jax.random.split(key, 3)

    # in_channels == out_channels, stride 1 -> identity residual branch.
    # batch_block=32 gives Nb*C = 256 matmul rows (full v6e/v7x MXU tile) and a
    # grid of 2 "parallel" batch blocks (both v7x TensorCores busy).
    N, C, T, V, K, KT = 64, 8, 16, 16, 3, 3
    x = jax.random.normal(kx, (N, C, T, V), jnp.float32)
    A = 0.3 * jax.random.normal(ka, (K, V, V), jnp.float32)
    params = init_params(kp, C, C, K, KT)

    out = st_gcn_forward(x, A, params, kt=KT, batch_block=32)
    out = jax.block_until_ready(out)

    ref = st_gcn_reference(x, A, params, kt=KT)
    assert out.shape == (N, C, T, V)
    err = float(jnp.max(jnp.abs(out - ref)))
    # Kernel runs every MXU matmul with bf16 operands (f32 accumulation) as a
    # deliberate inference-precision tradeoff; the reference is f32/HIGHEST,
    # so allow bf16-level drift.
    assert jnp.allclose(out, ref, rtol=3e-2, atol=3e-2), err
    print("KERNEL_OK")
</pallas_src>

<mosaic_0001>
module attributes {stable_mosaic.version = 11 : i64} {
  func.func @_st_gcn_kernel(%arg0: i32, %arg1: memref<256x256xf32, #tpu.memory_space<vmem>>, %arg2: memref<3x256x256xbf16, #tpu.memory_space<vmem>>, %arg3: memref<3x128x128xbf16, #tpu.memory_space<vmem>>, %arg4: memref<256x128xf32, #tpu.memory_space<vmem>>, %arg5: memref<3x256x256xbf16, #tpu.memory_space<vmem>>, %arg6: memref<256x1xf32, #tpu.memory_space<vmem>>, %arg7: memref<3x1x256xf32, #tpu.memory_space<vmem>>, %arg8: memref<1x1xf32, #tpu.memory_space<smem>>, %arg9: memref<1x1xf32, #tpu.memory_space<smem>>, %arg10: memref<256x256xf32, #tpu.memory_space<vmem>>, %arg11: memref<256x256xf32, #tpu.memory_space<vmem>>) attributes {dimension_semantics = [#tpu.dimension_semantics<parallel>], iteration_bounds = array<i64: 2>, scalar_prefetch = 0 : i64, scratch_operands = 1 : i64, tpu.core_type = #tpu.core_type<tc>, window_params = [{transform_indices = @transform_0, window_bounds = array<i64: 256, 256>}, {pipeline_mode = #tpu.pipeline_mode<synchronous>, transform_indices = @transform_1, window_bounds = array<i64: 3, 256, 256>}, {pipeline_mode = #tpu.pipeline_mode<synchronous>, transform_indices = @transform_2, window_bounds = array<i64: 3, 128, 128>}, {pipeline_mode = #tpu.pipeline_mode<synchronous>, transform_indices = @transform_3, window_bounds = array<i64: 256, 128>}, {pipeline_mode = #tpu.pipeline_mode<synchronous>, transform_indices = @transform_4, window_bounds = array<i64: 3, 256, 256>}, {pipeline_mode = #tpu.pipeline_mode<synchronous>, transform_indices = @transform_5, window_bounds = array<i64: 256, 1>}, {pipeline_mode = #tpu.pipeline_mode<synchronous>, transform_indices = @transform_6, window_bounds = array<i64: 3, 1, 256>}, {transform_indices = @transform_7, window_bounds = array<i64: 1, 1>}, {transform_indices = @transform_8, window_bounds = array<i64: 1, 1>}, {transform_indices = @transform_9, window_bounds = array<i64: 256, 256>}]} {
    %c0 = arith.constant 0 : index
    %c0_0 = arith.constant 0 : index
    %0 = memref.load %arg8[%c0, %c0_0] : memref<1x1xf32, #tpu.memory_space<smem>>
    %c0_1 = arith.constant 0 : index
    %c0_2 = arith.constant 0 : index
    %1 = vector.load %arg1[%c0_1, %c0_2] : memref<256x256xf32, #tpu.memory_space<vmem>>, vector<256x128xf32>
    %2 = arith.truncf %1 : vector<256x128xf32> to vector<256x128xbf16>
    %c0_3 = arith.constant 0 : index
    %c0_4 = arith.constant 0 : index
    %3 = vector.load %arg4[%c0_3, %c0_4] : memref<256x128xf32, #tpu.memory_space<vmem>>, vector<256x128xf32>
    %c0_5 = arith.constant 0 : index
    %c0_6 = arith.constant 0 : index
    %c0_7 = arith.constant 0 : index
    %4 = vector.load %arg2[%c0_5, %c0_6, %c0_7] : memref<3x256x256xbf16, #tpu.memory_space<vmem>>, vector<1x256x256xbf16>
    %5 = vector.shape_cast %4 : vector<1x256x256xbf16> to vector<256x256xbf16>
    %cst = arith.constant dense<0.000000e+00> : vector<256x128xf32>
    %6 = tpu.matmul %5, %2, %cst {dimension_numbers = #tpu.dot_dimension_numbers<[1], [0], [0], [1], [0, 0, 1, 1], [], []>} : vector<256x256xbf16>, vector<256x128xbf16>, vector<256x128xf32> -> vector<256x128xf32>
    %7 = arith.truncf %6 : vector<256x128xf32> to vector<256x128xbf16>
    %c0_8 = arith.constant 0 : index
    %c0_9 = arith.constant 0 : index
    %c0_10 = arith.constant 0 : index
    %8 = vector.load %arg3[%c0_8, %c0_9, %c0_10] : memref<3x128x128xbf16, #tpu.memory_space<vmem>>, vector<1x128x128xbf16>
    %9 = vector.shape_cast %8 : vector<1x128x128xbf16> to vector<128x128xbf16>
    %cst_11 = arith.constant dense<0.000000e+00> : vector<256x128xf32>
    %10 = tpu.matmul %7, %9, %cst_11 {dimension_numbers = #tpu.dot_dimension_numbers<[1], [0], [0], [1], [0, 0, 1, 1], [], []>} : vector<256x128xbf16>, vector<128x128xbf16>, vector<256x128xf32> -> vector<256x128xf32>
    %11 = arith.addf %3, %10 : vector<256x128xf32>
    %c1 = arith.constant 1 : index
    %c0_12 = arith.constant 0 : index
    %c0_13 = arith.constant 0 : index
    %12 = vector.load %arg2[%c1, %c0_12, %c0_13] : memref<3x256x256xbf16, #tpu.memory_space<vmem>>, vector<1x256x256xbf16>
    %13 = vector.shape_cast %12 : vector<1x256x256xbf16> to vector<256x256xbf16>
    %cst_14 = arith.constant dense<0.000000e+00> : vector<256x128xf32>
    %14 = tpu.matmul %13, %2, %cst_14 {dimension_numbers = #tpu.dot_dimension_numbers<[1], [0], [0], [1], [0, 0, 1, 1], [], []>} : vector<256x256xbf16>, vector<256x128xbf16>, vector<256x128xf32> -> vector<256x128xf32>
    %15 = arith.truncf %14 : vector<256x128xf32> to vector<256x128xbf16>
    %c1_15 = arith.constant 1 : index
    %c0_16 = arith.constant 0 : index
    %c0_17 = arith.constant 0 : index
    %16 = vector.load %arg3[%c1_15, %c0_16, %c0_17] : memref<3x128x128xbf16, #tpu.memory_space<vmem>>, vector<1x128x128xbf16>
    %17 = vector.shape_cast %16 : vector<1x128x128xbf16> to vector<128x128xbf16>
    %cst_18 = arith.constant dense<0.000000e+00> : vector<256x128xf32>
    %18 = tpu.matmul %15, %17, %cst_18 {dimension_numbers = #tpu.dot_dimension_numbers<[1], [0], [0], [1], [0, 0, 1, 1], [], []>} : vector<256x128xbf16>, vector<128x128xbf16>, vector<256x128xf32> -> vector<256x128xf32>
    %19 = arith.addf %11, %18 : vector<256x128xf32>
    %c2 = arith.constant 2 : index
    %c0_19 = arith.constant 0 : index
    %c0_20 = arith.constant 0 : index
    %20 = vector.load %arg2[%c2, %c0_19, %c0_20] : memref<3x256x256xbf16, #tpu.memory_space<vmem>>, vector<1x256x256xbf16>
    %21 = vector.shape_cast %20 : vector<1x256x256xbf16> to vector<256x256xbf16>
    %cst_21 = arith.constant dense<0.000000e+00> : vector<256x128xf32>
    %22 = tpu.matmul %21, %2, %cst_21 {dimension_numbers = #tpu.dot_dimension_numbers<[1], [0], [0], [1], [0, 0, 1, 1], [], []>} : vector<256x256xbf16>, vector<256x128xbf16>, vector<256x128xf32> -> vector<256x128xf32>
    %23 = arith.truncf %22 : vector<256x128xf32> to vector<256x128xbf16>
    %c2_22 = arith.constant 2 : index
    %c0_23 = arith.constant 0 : index
    %c0_24 = arith.constant 0 : index
    %24 = vector.load %arg3[%c2_22, %c0_23, %c0_24] : memref<3x128x128xbf16, #tpu.memory_space<vmem>>, vector<1x128x128xbf16>
    %25 = vector.shape_cast %24 : vector<1x128x128xbf16> to vector<128x128xbf16>
    %cst_25 = arith.constant dense<0.000000e+00> : vector<256x128xf32>
    %26 = tpu.matmul %23, %25, %cst_25 {dimension_numbers = #tpu.dot_dimension_numbers<[1], [0], [0], [1], [0, 0, 1, 1], [], []>} : vector<256x128xbf16>, vector<128x128xbf16>, vector<256x128xf32> -> vector<256x128xf32>
    %27 = arith.addf %19, %26 : vector<256x128xf32>
    %cst_26 = arith.constant 0.000000e+00 : f32
    %28 = vector.broadcast %cst_26 : f32 to vector<256x128xf32>
    %29 = arith.cmpf oge, %27, %28 : vector<256x128xf32>
    %30 = vector.broadcast %0 : f32 to vector<256x128xf32>
    %31 = arith.mulf %30, %27 : vector<256x128xf32>
    %32 = arith.select %29, %27, %31 : vector<256x128xi1>, vector<256x128xf32>
    %c0_27 = arith.constant 0 : index
    %c0_28 = arith.constant 0 : index
    %33 = vector.load %arg11[%c0_27, %c0_28] : memref<256x256xf32, #tpu.memory_space<vmem>>, vector<256x128xf32>
    tpu.vector_store %arg11[%c0_27, %c0_28], %32 {strides = array<i32>} : memref<256x256xf32, #tpu.memory_space<vmem>>, vector<256x128xf32>,
    %c0_29 = arith.constant 0 : index
    %c128 = arith.constant 128 : index
    %34 = vector.load %arg1[%c0_29, %c128] : memref<256x256xf32, #tpu.memory_space<vmem>>, vector<256x128xf32>
    %35 = arith.truncf %34 : vector<256x128xf32> to vector<256x128xbf16>
    %c0_30 = arith.constant 0 : index
    %c0_31 = arith.constant 0 : index
    %36 = vector.load %arg4[%c0_30, %c0_31] : memref<256x128xf32, #tpu.memory_space<vmem>>, vector<256x128xf32>
    %c0_32 = arith.constant 0 : index
    %c0_33 = arith.constant 0 : index
    %c0_34 = arith.constant 0 : index
    %37 = vector.load %arg2[%c0_32, %c0_33, %c0_34] : memref<3x256x256xbf16, #tpu.memory_space<vmem>>, vector<1x256x256xbf16>
    %38 = vector.shape_cast %37 : vector<1x256x256xbf16> to vector<256x256xbf16>
    %cst_35 = arith.constant dense<0.000000e+00> : vector<256x128xf32>
    %39 = tpu.matmul %38, %35, %cst_35 {dimension_numbers = #tpu.dot_dimension_numbers<[1], [0], [0], [1], [0, 0, 1, 1], [], []>} : vector<256x256xbf16>, vector<256x128xbf16>, vector<256x128xf32> -> vector<256x128xf32>
    %40 = arith.truncf %39 : vector<256x128xf32> to vector<256x128xbf16>
    %c0_36 = arith.constant 0 : index
    %c0_37 = arith.constant 0 : index
    %c0_38 = arith.constant 0 : index
    %41 = vector.load %arg3[%c0_36, %c0_37, %c0_38] : memref<3x128x128xbf16, #tpu.memory_space<vmem>>, vector<1x128x128xbf16>
    %42 = vector.shape_cast %41 : vector<1x128x128xbf16> to vector<128x128xbf16>
    %cst_39 = arith.constant dense<0.000000e+00> : vector<256x128xf32>
    %43 = tpu.matmul %40, %42, %cst_39 {dimension_numbers = #tpu.dot_dimension_numbers<[1], [0], [0], [1], [0, 0, 1, 1], [], []>} : vector<256x128xbf16>, vector<128x128xbf16>, vector<256x128xf32> -> vector<256x128xf32>
    %44 = arith.addf %36, %43 : vector<256x128xf32>
    %c1_40 = arith.constant 1 : index
    %c0_41 = arith.constant 0 : index
    %c0_42 = arith.constant 0 : index
    %45 = vector.load %arg2[%c1_40, %c0_41, %c0_42] : memref<3x256x256xbf16, #tpu.memory_space<vmem>>, vector<1x256x256xbf16>
    %46 = vector.shape_cast %45 : vector<1x256x256xbf16> to vector<256x256xbf16>
    %cst_43 = arith.constant dense<0.000000e+00> : vector<256x128xf32>
    %47 = tpu.matmul %46, %35, %cst_43 {dimension_numbers = #tpu.dot_dimension_numbers<[1], [0], [0], [1], [0, 0, 1, 1], [], []>} : vector<256x256xbf16>, vector<256x128xbf16>, vector<256x128xf32> -> vector<256x128xf32>
    %48 = arith.truncf %47 : vector<256x128xf32> to vector<256x128xbf16>
    %c1_44 = arith.constant 1 : index
    %c0_45 = arith.constant 0 : index
    %c0_46 = arith.constant 0 : index
    %49 = vector.load %arg3[%c1_44, %c0_45, %c0_46] : memref<3x128x128xbf16, #tpu.memory_space<vmem>>, vector<1x128x128xbf16>
    %50 = vector.shape_cast %49 : vector<1x128x128xbf16> to vector<128x128xbf16>
    %cst_47 = arith.constant dense<0.000000e+00> : vector<256x128xf32>
    %51 = tpu.matmul %48, %50, %cst_47 {dimension_numbers = #tpu.dot_dimension_numbers<[1], [0], [0], [1], [0, 0, 1, 1], [], []>} : vector<256x128xbf16>, vector<128x128xbf16>, vector<256x128xf32> -> vector<256x128xf32>
    %52 = arith.addf %44, %51 : vector<256x128xf32>
    %c2_48 = arith.constant 2 : index
    %c0_49 = arith.constant 0 : index
    %c0_50 = arith.constant 0 : index
    %53 = vector.load %arg2[%c2_48, %c0_49, %c0_50] : memref<3x256x256xbf16, #tpu.memory_space<vmem>>, vector<1x256x256xbf16>
    %54 = vector.shape_cast %53 : vector<1x256x256xbf16> to vector<256x256xbf16>
    %cst_51 = arith.constant dense<0.000000e+00> : vector<256x128xf32>
    %55 = tpu.matmul %54, %35, %cst_51 {dimension_numbers = #tpu.dot_dimension_numbers<[1], [0], [0], [1], [0, 0, 1, 1], [], []>} : vector<256x256xbf16>, vector<256x128xbf16>, vector<256x128xf32> -> vector<256x128xf32>
    %56 = arith.truncf %55 : vector<256x128xf32> to vector<256x128xbf16>
    %c2_52 = arith.constant 2 : index
    %c0_53 = arith.constant 0 : index
    %c0_54 = arith.constant 0 : index
    %57 = vector.load %arg3[%c2_52, %c0_53, %c0_54] : memref<3x128x128xbf16, #tpu.memory_space<vmem>>, vector<1x128x128xbf16>
    %58 = vector.shape_cast %57 : vector<1x128x128xbf16> to vector<128x128xbf16>
    %cst_55 = arith.constant dense<0.000000e+00> : vector<256x128xf32>
    %59 = tpu.matmul %56, %58, %cst_55 {dimension_numbers = #tpu.dot_dimension_numbers<[1], [0], [0], [1], [0, 0, 1, 1], [], []>} : vector<256x128xbf16>, vector<128x128xbf16>, vector<256x128xf32> -> vector<256x128xf32>
    %60 = arith.addf %52, %59 : vector<256x128xf32>
    %cst_56 = arith.constant 0.000000e+00 : f32
    %61 = vector.broadcast %cst_56 : f32 to vector<256x128xf32>
    %62 = arith.cmpf oge, %60, %61 : vector<256x128xf32>
    %63 = vector.broadcast %0 : f32 to vector<256x128xf32>
    %64 = arith.mulf %63, %60 : vector<256x128xf32>
    %65 = arith.select %62, %60, %64 : vector<256x128xi1>, vector<256x128xf32>
    %c0_57 = arith.constant 0 : index
    %c128_58 = arith.constant 128 : index
    %66 = vector.load %arg11[%c0_57, %c128_58] : memref<256x256xf32, #tpu.memory_space<vmem>>, vector<256x128xf32>
    tpu.vector_store %arg11[%c0_57, %c128_58], %65 {strides = array<i32>} : memref<256x256xf32, #tpu.memory_space<vmem>>, vector<256x128xf32>,
    %c0_59 = arith.constant 0 : index
    %c0_60 = arith.constant 0 : index
    %67 = vector.load %arg11[%c0_59, %c0_60] : memref<256x256xf32, #tpu.memory_space<vmem>>, vector<256x256xf32>
    %c1_61 = arith.constant 1 : index
    %c0_62 = arith.constant 0 : index
    %c0_63 = arith.constant 0 : index
    %68 = vector.load %arg5[%c1_61, %c0_62, %c0_63] : memref<3x256x256xbf16, #tpu.memory_space<vmem>>, vector<1x256x256xbf16>
    %69 = vector.shape_cast %68 : vector<1x256x256xbf16> to vector<256x256xbf16>
    %70 = arith.truncf %67 : vector<256x256xf32> to vector<256x256xbf16>
    %cst_64 = arith.constant dense<0.000000e+00> : vector<256x256xf32>
    %71 = tpu.matmul %69, %70, %cst_64 {dimension_numbers = #tpu.dot_dimension_numbers<[1], [0], [0], [1], [0, 0, 1, 1], [], []>} : vector<256x256xbf16>, vector<256x256xbf16>, vector<256x256xf32> -> vector<256x256xf32>
    %c16_i32 = arith.constant 16 : i32
    %72 = tpu.dynamic_rotate %67 by %c16_i32 dim 1 : vector<256x256xf32>, i32 -> vector<256x256xf32>
    %c0_65 = arith.constant 0 : index
    %c0_66 = arith.constant 0 : index
    %c0_67 = arith.constant 0 : index
    %73 = vector.load %arg7[%c0_65, %c0_66, %c0_67] : memref<3x1x256xf32, #tpu.memory_space<vmem>>, vector<1x1x256xf32>
    %74 = vector.shape_cast %73 : vector<1x1x256xf32> to vector<1x256xf32>
    %75 = vector.broadcast %74 : vector<1x256xf32> to vector<256x256xf32>
    %76 = arith.mulf %72, %75 : vector<256x256xf32>
    %c0_68 = arith.constant 0 : index
    %c0_69 = arith.constant 0 : index
    %c0_70 = arith.constant 0 : index
    %77 = vector.load %arg5[%c0_68, %c0_69, %c0_70] : memref<3x256x256xbf16, #tpu.memory_space<vmem>>, vector<1x256x256xbf16>
    %78 = vector.shape_cast %77 : vector<1x256x256xbf16> to vector<256x256xbf16>
    %79 = arith.truncf %76 : vector<256x256xf32> to vector<256x256xbf16>
    %cst_71 = arith.constant dense<0.000000e+00> : vector<256x256xf32>
    %80 = tpu.matmul %78, %79, %cst_71 {dimension_numbers = #tpu.dot_dimension_numbers<[1], [0], [0], [1], [0, 0, 1, 1], [], []>} : vector<256x256xbf16>, vector<256x256xbf16>, vector<256x256xf32> -> vector<256x256xf32>
    %81 = arith.addf %71, %80 : vector<256x256xf32>
    %c240_i32 = arith.constant 240 : i32
    %82 = tpu.dynamic_rotate %67 by %c240_i32 dim 1 : vector<256x256xf32>, i32 -> vector<256x256xf32>
    %c2_72 = arith.constant 2 : index
    %c0_73 = arith.constant 0 : index
    %c0_74 = arith.constant 0 : index
    %83 = vector.load %arg7[%c2_72, %c0_73, %c0_74] : memref<3x1x256xf32, #tpu.memory_space<vmem>>, vector<1x1x256xf32>
    %84 = vector.shape_cast %83 : vector<1x1x256xf32> to vector<1x256xf32>
    %85 = vector.broadcast %84 : vector<1x256xf32> to vector<256x256xf32>
    %86 = arith.mulf %82, %85 : vector<256x256xf32>
    %c2_75 = arith.constant 2 : index
    %c0_76 = arith.constant 0 : index
    %c0_77 = arith.constant 0 : index
    %87 = vector.load %arg5[%c2_75, %c0_76, %c0_77] : memref<3x256x256xbf16, #tpu.memory_space<vmem>>, vector<1x256x256xbf16>
    %88 = vector.shape_cast %87 : vector<1x256x256xbf16> to vector<256x256xbf16>
    %89 = arith.truncf %86 : vector<256x256xf32> to vector<256x256xbf16>
    %cst_78 = arith.constant dense<0.000000e+00> : vector<256x256xf32>
    %90 = tpu.matmul %88, %89, %cst_78 {dimension_numbers = #tpu.dot_dimension_numbers<[1], [0], [0], [1], [0, 0, 1, 1], [], []>} : vector<256x256xbf16>, vector<256x256xbf16>, vector<256x256xf32> -> vector<256x256xf32>
    %91 = arith.addf %81, %90 : vector<256x256xf32>
    %c0_79 = arith.constant 0 : index
    %c0_80 = arith.constant 0 : index
    %92 = vector.load %arg6[%c0_79, %c0_80] : memref<256x1xf32, #tpu.memory_space<vmem>>, vector<256x1xf32>
    %93 = vector.broadcast %92 : vector<256x1xf32> to vector<256x256xf32>
    %94 = arith.addf %91, %93 : vector<256x256xf32>
    %c0_81 = arith.constant 0 : index
    %c0_82 = arith.constant 0 : index
    %95 = vector.load %arg1[%c0_81, %c0_82] : memref<256x256xf32, #tpu.memory_space<vmem>>, vector<256x256xf32>
    %96 = arith.addf %94, %95 : vector<256x256xf32>
    %c0_83 = arith.constant 0 : index
    %c0_84 = arith.constant 0 : index
    %97 = memref.load %arg9[%c0_83, %c0_84] : memref<1x1xf32, #tpu.memory_space<smem>>
    %cst_85 = arith.constant 0.000000e+00 : f32
    %98 = vector.broadcast %cst_85 : f32 to vector<256x256xf32>
    %99 = arith.cmpf oge, %96, %98 : vector<256x256xf32>
    %100 = vector.broadcast %97 : f32 to vector<256x256xf32>
    %101 = arith.mulf %100, %96 : vector<256x256xf32>
    %102 = arith.select %99, %96, %101 : vector<256x256xi1>, vector<256x256xf32>
    %c0_86 = arith.constant 0 : index
    %c0_87 = arith.constant 0 : index
    %103 = vector.load %arg10[%c0_86, %c0_87] : memref<256x256xf32, #tpu.memory_space<vmem>>, vector<256x256xf32>
    tpu.vector_store %arg10[%c0_86, %c0_87], %102 {strides = array<i32>} : memref<256x256xf32, #tpu.memory_space<vmem>>, vector<256x256xf32>,
    return
  }
  func.func @transform_0(%arg0: i32) -> (i32, i32) {
    %c0_i32 = arith.constant 0 : i32
    %c0_i32_0 = arith.constant 0 : i32
    return %arg0, %c0_i32 : i32, i32
  }
  func.func @transform_1(%arg0: i32) -> (i32, i32, i32) {
    %c0_i32 = arith.constant 0 : i32
    %c0_i32_0 = arith.constant 0 : i32
    %c0_i32_1 = arith.constant 0 : i32
    %c0_i32_2 = arith.constant 0 : i32
    return %c0_i32, %c0_i32_0, %c0_i32_1 : i32, i32, i32
  }
  func.func @transform_2(%arg0: i32) -> (i32, i32, i32) {
    %c0_i32 = arith.constant 0 : i32
    %c0_i32_0 = arith.constant 0 : i32
    %c0_i32_1 = arith.constant 0 : i32
    %c0_i32_2 = arith.constant 0 : i32
    return %c0_i32, %c0_i32_0, %c0_i32_1 : i32, i32, i32
  }
  func.func @transform_3(%arg0: i32) -> (i32, i32) {
    %c0_i32 = arith.constant 0 : i32
    %c0_i32_0 = arith.constant 0 : i32
    %c0_i32_1 = arith.constant 0 : i32
    return %c0_i32, %c0_i32_0 : i32, i32
  }
  func.func @transform_4(%arg0: i32) -> (i32, i32, i32) {
    %c0_i32 = arith.constant 0 : i32
    %c0_i32_0 = arith.constant 0 : i32
    %c0_i32_1 = arith.constant 0 : i32
    %c0_i32_2 = arith.constant 0 : i32
    return %c0_i32, %c0_i32_0, %c0_i32_1 : i32, i32, i32
  }
  func.func @transform_5(%arg0: i32) -> (i32, i32) {
    %c0_i32 = arith.constant 0 : i32
    %c0_i32_0 = arith.constant 0 : i32
    %c0_i32_1 = arith.constant 0 : i32
    return %c0_i32, %c0_i32_0 : i32, i32
  }
  func.func @transform_6(%arg0: i32) -> (i32, i32, i32) {
    %c0_i32 = arith.constant 0 : i32
    %c0_i32_0 = arith.constant 0 : i32
    %c0_i32_1 = arith.constant 0 : i32
    %c0_i32_2 = arith.constant 0 : i32
    return %c0_i32, %c0_i32_0, %c0_i32_1 : i32, i32, i32
  }
  func.func @transform_7(%arg0: i32) -> (i32, i32) {
    %c0_i32 = arith.constant 0 : i32
    %c0_i32_0 = arith.constant 0 : i32
    %c0_i32_1 = arith.constant 0 : i32
    return %c0_i32, %c0_i32_0 : i32, i32
  }
  func.func @transform_8(%arg0: i32) -> (i32, i32) {
    %c0_i32 = arith.constant 0 : i32
    %c0_i32_0 = arith.constant 0 : i32
    %c0_i32_1 = arith.constant 0 : i32
    return %c0_i32, %c0_i32_0 : i32, i32
  }
  func.func @transform_9(%arg0: i32) -> (i32, i32) {
    %c0_i32 = arith.constant 0 : i32
    %c0_i32_0 = arith.constant 0 : i32
    return %arg0, %c0_i32 : i32, i32
  }
}

</mosaic_0001>

<bundles_post_ra>
// kernel: tpu_custom_call.1
= control target key start
LH: loop header
LB: loop body
LE: loop exit
PB: predicated region body
PF: predicated region fallthrough
CT: control target
= control target key end

     0   :  { %s12700_s0 = inlined_call_operand.hbm [shape: f32[512,256], index: 0, kind: input, shape index: {}]   ;;  %s12701_s1 = inlined_call_operand.hbm [shape: bf16[3,256,256], index: 1, kind: input, shape index: {}]   ;;  %s12702_s2 = inlined_call_operand.hbm [shape: bf16[3,128,128], index: 2, kind: input, shape index: {}]   ;;  %s12703_s3 = inlined_call_operand.vmem [shape: f32[256,128], index: 3, kind: input, shape index: {}]   ;;  %s12704_s4 = inlined_call_operand.hbm [shape: bf16[3,256,256], index: 4, kind: input, shape index: {}]   ;;  %s12705_s5 = inlined_call_operand.vmem [shape: f32[256,1], index: 5, kind: input, shape index: {}]   ;;  %s12706_s6 = inlined_call_operand.vmem [shape: f32[3,1,256], index: 6, kind: input, shape index: {}]   ;;  %s12707_s7 = inlined_call_operand.<no memory space> [shape: f32[1,1], index: 7, kind: input, shape index: {}]   ;;  %s12708_s8 = inlined_call_operand.<no memory space> [shape: f32[1,1], index: 8, kind: input, shape index: {}]   ;;  %s12709_s9 = inlined_call_operand.hbm [shape: f32[512,256], index: 9, kind: output, shape index: {}]  }
   0x1   :  { %12857 = sst [smem:[#allocation68_spill]] %s12701_s1 }
   0x2   :  { %14 = sst [smem:[#allocation3]] %s12707_s7 }
   0x3   :  { %15 = sst [smem:[#allocation4]] %s12708_s8 }
   0x4   :  { %16 = vsyncpa [#allocation6], 0 }
   0x5   :  { %18 = vsyncpa [#allocation6 + $0x1], 0 }
   0x6   :  { %19 = vsyncpa [#allocation9], 0 }
   0x7   :  { %20 = vsyncpa [#allocation12], 0 }
   0x8   :  { %21 = vsyncpa [#allocation7], 0 }
   0x9   :  { %23 = vsyncpa [#allocation7 + $0x1], 0  ;;  %s9827_s13 = smov 0   ;;  %s9829_s14 = smov 0  }
   0xa   :  { %s9831_s15 = smov 0   ;;  %s9833_s16 = smov 0  }
   0xb LB: > { %s9848_s7 = sadd.s32 4294967295, %s9754_s16   ;;  %s7260_s8 = sadd.s32 4294967294, %s9754_s16   ;;  %s9754_s16 = sphi %s9833_s16, %s13133_s16   ;;  %s9750_s15 = sphi %s9831_s15, %s13132_s15   ;;  %s9746_s14 = sphi %s9829_s14, %s13131_s14   ;;  %s9742_s13 = sphi %s9827_s13, %s13130_s13  }
   0xc   : > { %p49_p0 = scmp.ne.s32.totalorder %s9746_s14, %s9742_s13  ;;  %p12710_p1 = scmp.eq.s32.totalorder %s9848_s7, 0 }
   0xd   : > { %p247_p3 = scmp.eq.s32.totalorder %s7260_s8, 1  ;;  %p7261_p5 = scmp.ge.s32.totalorder %s9754_s16, 1 }
   0xe   : > { %p9857_p4 = por %p12710_p1, %p49_p0  ;;  %p254_p7 = scmp.lt.s32.totalorder %s9754_s16, 3 }
   0xf   : > { %p9862_p6 = por %p247_p3, %p49_p0  ;;  %s9756_s20 = smov [#allocation8]  }
  0x10   : > { %s12858_s17 = scalar_select %p9857_p4, 1, 0 }
  0x11   : > { %s12859_s18 = scalar_select %p9862_p6, 1, 0 }
  0x12   : > { %p9867_p8 = pnand %p7261_p5, %p254_p7  ;;  %s266_s21 = sshll.u32 %s9756_s20, 4  ;;  %s9871_s21 = int_to_ptr.vmem [resolvable:$true] %s266_s21 }
  0x13   : > { %12860 = sst [smem:[#allocation18_spill]] %s12859_s18  ;;  %s9757_s23 = smov [#allocation10]  }
  0x14   : > { %s12861_s19 = scalar_select %p9867_p8, 1, 0 }
  0x15   : > { %p9063_p9 = pneg %p9867_p8  ;;  %s279_s24 = sshll.u32 %s9757_s23, 4  ;;  %s9882_s24 = int_to_ptr.vmem [resolvable:$true] %s279_s24 }
  0x16   : > { %s12863_s1 = sld [smem:[#allocation68_spill]] }
  0x17   : > { %p9878_p11 = pnand %p9063_p9, %p12710_p1 }
  0x19   : > { %p9892_p13 = pneg %p9878_p11 }
  0x1c   : > { %s9566_s27 = scalar_lea.hbm %s12863_s1, 12288 }
  0x1d   : > { %p9567_p12 = scmp.ne.s32.totalorder %s12863_s1, %s9566_s27  ;;  %p9573_p5 = scmp.lt.u32.totalorder %s9566_s27, %s12863_s1 }
  0x1f   : > { %p9569_p0 = pnand %p9892_p13, %p9567_p12 }
  0x21   : > { %p9570_p3 = pneg %p9569_p0 }
  0x23   : > { %p9575_p7 = pnand %p9573_p5, %p9570_p3 }
  0x25   : > { %9578 = shalt.err (!%p9575_p7)
}
  0x26   : > { %s9579_s12 = scalar_lea.vmem %s9871_s21, 12288  ;;  %p9587_p2 = scmp.lt.s32.totalorder %s9871_s21, %s9871_s21 }
  0x27   : > { %p9580_p9 = scmp.ne.s32.totalorder %s9871_s21, %s9579_s12  ;;  %p9588_p6 = scmp.lt.s32.totalorder %s9579_s12, %s9579_s12 }
  0x29   : > { %p9582_p10 = pnand %p9580_p9, %p9892_p13  ;;  %p9589_p12 = por %p9588_p6, %p9587_p2 }
  0x2b   : > { %p9583_p1 = pneg %p9582_p10 }
  0x2d   : > { %p9590_p0 = pnand %p9589_p12, %p9583_p1 }
  0x2f   : > { %9593 = shalt.err (!%p9590_p0)
}
  0x30   : > { %s12711_s8 = smov 128   ;;  %s12712_s20 = smov 8  }
  0x31   : > { %9066 = dma.hbm_to_vmem [thread:$0]  (!%p9878_p11), %s12863_s1, 12288, %s9871_s21, [#allocation9], %s12711_s8, %s12711_s8, %s12712_s20  }
  0x32   : > { %s9594_s28 = scalar_lea.hbm %s12702_s2, 3072 }
  0x33   : > { %p9595_p1 = scmp.ne.s32.totalorder %s12702_s2, %s9594_s28  ;;  %p9601_p10 = scmp.lt.u32.totalorder %s9594_s28, %s12702_s2 }
  0x35   : > { %p9597_p2 = pnand %p9595_p1, %p9892_p13 }
  0x37   : > { %p9598_p6 = pneg %p9597_p2 }
  0x39   : > { %p9603_p3 = pnand %p9601_p10, %p9598_p6 }
  0x3b   : > { %9606 = shalt.err (!%p9603_p3)
}
  0x3c   : > { %s9607_s21 = scalar_lea.vmem %s9882_s24, 3072  ;;  %p9615_p12 = scmp.lt.s32.totalorder %s9882_s24, %s9882_s24 }
  0x3d   : > { %p9608_p5 = scmp.ne.s32.totalorder %s9882_s24, %s9607_s21  ;;  %p9616_p0 = scmp.lt.s32.totalorder %s9607_s21, %s9607_s21 }
  0x3f   : > { %p9610_p7 = pnand %p9608_p5, %p9892_p13  ;;  %p9617_p1 = por %p9616_p0, %p9615_p12 }
  0x41   : > { %p9611_p9 = pneg %p9610_p7 }
  0x43   : > { %p9618_p2 = pnand %p9617_p1, %p9611_p9 }
  0x45   : > { %9621 = shalt.err (!%p9618_p2)
}
  0x46   : > { %s9760_s23 = smov 64   ;;  %s9761_s25 = smov 4  }
  0x47   : > { %9069 = dma.hbm_to_vmem [thread:$0]  (!%p9878_p11), %s12702_s2, 3072, %s9882_s24, [#allocation9], %s9760_s23, %s9760_s23, %s9761_s25  }
  0x48   : > { %s9762_s28 = smov [#allocation11]   ;;  %s9940_s10 = sadd.s32 1, %s9754_s16  }
  0x49   : > { %s295_s29 = sshll.u32 %s9762_s28, 4  ;;  %s9622_s21 = scalar_lea.hbm %s12704_s4, 12288  ;;  %s296_s29 = int_to_ptr.vmem [resolvable:$true] %s295_s29 }
  0x4a   : > { %p9623_p6 = scmp.ne.s32.totalorder %s12704_s4, %s9622_s21  ;;  %p9629_p5 = scmp.lt.u32.totalorder %s9622_s21, %s12704_s4 }
  0x4c   : > { %p9625_p10 = pnand %p9623_p6, %p9892_p13 }
  0x4e   : > { %p9626_p3 = pneg %p9625_p10 }
  0x50   : > { %p9631_p7 = pnand %p9629_p5, %p9626_p3 }
  0x52   : > { %9634 = shalt.err (!%p9631_p7)
}
  0x53   : > { %s9635_s24 = scalar_lea.vmem %s296_s29, 12288  ;;  %p9643_p1 = scmp.lt.s32.totalorder %s296_s29, %s296_s29 }
  0x54   : > { %p9636_p9 = scmp.ne.s32.totalorder %s296_s29, %s9635_s24  ;;  %p9644_p2 = scmp.lt.s32.totalorder %s9635_s24, %s9635_s24 }
  0x56   : > { %p9638_p12 = pnand %p9636_p9, %p9892_p13  ;;  %p9645_p4 = por %p9644_p2, %p9643_p1 }
  0x58   : > { %p9639_p0 = pneg %p9638_p12 }
  0x5a   : > { %p9646_p8 = pnand %p9645_p4, %p9639_p0 }
  0x5c   : > { %9649 = shalt.err (!%p9646_p8)
}
  0x5d   : > { %s12865_s8 = smov 8   ;;  %s12866_s20 = smov 128  }
  0x5e   : > { %9072 = dma.hbm_to_vmem [thread:$0]  (!%p9878_p11), %s12704_s4, 12288, %s296_s29, [#allocation12], %s12866_s20, %s12866_s20, %s12865_s8  }
  0x5f   : > { %s33_s30 = ssub.s32 %s9754_s16, %s9940_s10  ;;  %s36_s22 = sadd.s32 1, %s9750_s15 }
  0x60   : > { %p34_p4 = scmp.eq.s32.totalorder %s33_s30, 0  ;;  %p43_p8 = scmp.ne.s32.totalorder %s9750_s15, %s9746_s14 }
  0x61   : > { %p44_p13 = scmp.eq.s32.totalorder %s9754_s16, 0  ;;  %p9084_p6 = scmp.lt.s32.totalorder %s9754_s16, 2 }
  0x62   : > { %s9971_s23 = scalar_select %p34_p4, %s9750_s15, %s36_s22  }
  0x63   : > { %p45_p10 = por %p44_p13, %p43_p8  ;;  %p12867_p3 = scmp.eq.s32.totalorder %s9848_s7, 1 }
  0x64   : > { %s321_s26 = sand.u32 1, %s9750_s15   ;;  %s7620_s27 = sshll.u32 %s9754_s16, 13 }
  0x65   : > { %p9975_p5 = por %p12867_p3, %p43_p8  ;;  %s7266_s28 = sshll.u32 %s321_s26, 9 }
  0x66   : > { %s9984_s29 = scalar_lea.hbm %s12700_s0, %s7620_s27  ;;  %s325_s21 = scalar_lea.vmem [#allocation5], %s7266_s28 }
  0x67   : > { %s333_s24 = sshll.u32 %s325_s21, 4  ;;  %p9986_p11 = pnand %p9084_p6, %p45_p10  ;;  %s9990_s24 = int_to_ptr.vmem [resolvable:$true] %s333_s24 }
  0x68   : > { %s9992_s20 = scalar_lea.sflag [#allocation6], %s321_s26  ;;  %s9650_s1 = scalar_lea.hbm %s9984_s29, 8192 }
  0x69   : > { %p9651_p7 = scmp.ne.s32.totalorder %s9984_s29, %s9650_s1  ;;  %p9652_p9 = pneg %p9986_p11 }
  0x6a   : > { %s9655_s22 = scalar_lea.hbm %s12700_s0, 16384  ;;  %p9656_p1 = scmp.lt.u32.totalorder %s9984_s29, %s12700_s0 }
  0x6b   : > { %p9653_p12 = pnand %p9652_p9, %p9651_p7  ;;  %p9657_p2 = scmp.lt.u32.totalorder %s9655_s22, %s9650_s1 }
  0x6c   : > { %p9659_p8 = scmp.lt.u32.totalorder %s9650_s1, %s9984_s29 }
  0x6d   : > { %p9654_p0 = pneg %p9653_p12  ;;  %p9658_p4 = por %p9657_p2, %p9656_p1 }
  0x6f   : > { %p9660_p13 = por %p9659_p8, %p9658_p4 }
  0x71   : > { %p9661_p6 = pnand %p9660_p13, %p9654_p0 }
  0x73   : > { %9664 = shalt.err (!%p9661_p6)
}
  0x74   : > { %s9665_s26 = scalar_lea.vmem %s9990_s24, 8192  ;;  %s9763_s11 = smov [#allocation5]  }
  0x75   : > { %p9666_p10 = scmp.ne.s32.totalorder %s9990_s24, %s9665_s26  ;;  %s9670_s12 = sshll.u32 %s9763_s11, 4  ;;  %s9671_s12 = int_to_ptr.vmem [resolvable:$false] %s9670_s12 }
  0x76   : > { %s9672_s21 = scalar_lea.vmem %s9671_s12, 16384  ;;  %p9673_p12 = scmp.lt.s32.totalorder %s9990_s24, %s9671_s12 }
  0x77   : > { %p9668_p3 = pnand %p9666_p10, %p9652_p9  ;;  %p9674_p1 = scmp.lt.s32.totalorder %s9672_s21, %s9665_s26 }
  0x79   : > { %p9669_p7 = pneg %p9668_p3  ;;  %p9675_p2 = por %p9674_p1, %p9673_p12 }
  0x7b   : > { %p9676_p4 = pnand %p9675_p2, %p9669_p7 }
  0x7d   : > { %9679 = shalt.err (!%p9676_p4)
}
  0x7e   : > { %s9764_s1 = smov 256   ;;  %s9765_s18 = smov 16  }
  0x7f   : > { %9076 = dma.hbm_to_vmem [thread:$0]  (!%p9986_p11), %s9984_s29, 8192, %s9990_s24, %s9992_s20, %s9764_s1, %s9764_s1, %s9765_s18  }
  0x80   : > { %p12870_p9 = scmp.ne.s32.totalorder %s12861_s19, 0 }
  0x82   : > { %345 = sbr.rel (%p12870_p9) target bundleno = 2369 (0x941), region = 56 }
  0x89   : > { %s10023_s30 = sand.u32 1, %s9746_s14   ;;  %p12871_p0 = scmp.ne.s32.totalorder %s12858_s17, 0 }
  0x8a   : > { %s7271_s22 = sshll.u32 %s10023_s30, 9  ;;  %s348_s27 = scalar_lea.sflag [#allocation6], %s10023_s30 }
  0x8b   : > { %s10029_s28 = scalar_lea.vmem [#allocation5], %s7271_s22 }
  0x8c   : > { %9725 = dma.done.wait (%p12871_p0), %s348_s27, 8192  }
  0x8d   : > { %9727 = vsyncadd (%p12871_p0), %s348_s27, 4294959104  ;;  %p12872_p11 = scmp.eq.s32.totalorder %s9848_s7, 0 }
  0x8f   : > { %9729 = dma.done.wait (%p12872_p11), [#allocation9], 15360   ;;  %p12873_p8 = pmov %p12872_p11 }
  0x91   : > { %9731 = vsyncadd (%p12873_p8), [#allocation9], 4294951936  ;;  %p12874_p13 = pmov %p12873_p8 }
  0x92   : > { %p12875_p6 = pmov %p12873_p8 }
  0x93   : > { %9733 = dma.done.wait (%p12874_p13), [#allocation12], 12288  }
  0x94   : > { %9735 = vsyncadd (%p12875_p6), [#allocation12], 4294955008  ;;  %v418_v0 = vld [vmem:[%s10029_s28 + $0x100] sm:$0xff]  ;;  %v419_v1 = vld [vmem:[%s10029_s28 + $0x110] sm:$0xff]  ;;  %s401_s17 = sld [smem:[#allocation3]]  ;;  %s9766_s21 = smov 16  }
  0x95   : > { %v402_v2 = vld [vmem:[%s10029_s28] sm:$0xff]  ;;  %v10046_v3 = vpack.c.bf16 %v419_v1, %v418_v0  ;;  %v403_v4 = vld [vmem:[%s10029_s28 + $0x10] sm:$0xff]  ;;  %v9185_v52 = vld [vmem:[#allocation10 + $0x8] sm:$0xff]   ;;  %s9767_s11 = smov 112   ;;  %s6885_s29 = sld [smem:[#allocation4]] }
  0x96   : > { %v420_v5 = vld [vmem:[%s10029_s28 + $0x120] sm:$0xff]  ;;  %v421_v6 = vld [vmem:[%s10029_s28 + $0x130] sm:$0xff]  ;;  %v10051_v7 = vpack.c.bf16 %v403_v4, %v402_v2  ;;  %v9187_v56 = vld [vmem:[#allocation10 + $0x18] sm:$0xff]   ;;  %s12461_s24 = scalar_lea.vmem [#allocation13], %s7271_s22  ;;  %s7622_s22 = sshll.u32 %s9848_s7, 13 }
  0x97   : > { %v10053_v8 = vpack.c.bf16 %v421_v6, %v420_v5  ;;  %v404_v9 = vld [vmem:[%s10029_s28 + $0x20] sm:$0xff]  ;;  %v405_v10 = vld [vmem:[%s10029_s28 + $0x30] sm:$0xff]  ;;  %7623 = vmatprep.subr.bf16.mxu1 %v10046_v3  ;;  %7895 = vmatprep.subr.bf16.mxu0 %v10046_v3  ;;  %s7158_s8 = sshll.u32 %s12461_s24, 4  ;;  %s12650_s20 = scalar_lea.hbm %s12709_s9, %s7622_s22  ;;  %s12653_s8 = int_to_ptr.vmem [resolvable:$true] %s7158_s8 }
  0x98   : > { %v422_v11 = vld [vmem:[%s10029_s28 + $0x140] sm:$0xff]  ;;  %v423_v12 = vld [vmem:[%s10029_s28 + $0x150] sm:$0xff]  ;;  %7624 = vmatpush3.bf16.msra.mxu1 %v10051_v7  ;;  %v10062_v13 = vpack.c.bf16 %v405_v10, %v404_v9  ;;  %7896 = vmatpush3.bf16.msra.mxu0 %v10051_v7  ;;  %s7144_s26 = scalar_lea.sflag [#allocation7], %s10023_s30  ;;  %s9769_s12 = smov [#allocation13]  }
  0x99   : > { %7625 = vmatprep.subr.bf16.mxu1 %v10053_v8  ;;  %v10066_v14 = vpack.c.bf16 %v423_v12, %v422_v11  ;;  %v406_v15 = vld [vmem:[%s10029_s28 + $0x40] sm:$0xff]  ;;  %v407_v16 = vld [vmem:[%s10029_s28 + $0x50] sm:$0xff]  ;;  %7897 = vmatprep.subr.bf16.mxu0 %v10053_v8  ;;  %s9684_s1 = sshll.u32 %s9769_s12, 4  ;;  %s9685_s1 = int_to_ptr.vmem [resolvable:$false] %s9684_s1 }
  0x9a   : > { %v424_v17 = vld [vmem:[%s10029_s28 + $0x160] sm:$0xff]  ;;  %v425_v18 = vld [vmem:[%s10029_s28 + $0x170] sm:$0xff]  ;;  %v10074_v19 = vpack.c.bf16 %v407_v16, %v406_v15  ;;  %s9686_s18 = scalar_lea.vmem %s9685_s1, 16384  ;;  %p9687_p12 = scmp.lt.s32.totalorder %s12653_s8, %s9685_s1 }
  0x9b   : > { %v10078_v20 = vpack.c.bf16 %v425_v18, %v424_v17  ;;  %v408_v21 = vld [vmem:[%s10029_s28 + $0x60] sm:$0xff]  ;;  %v409_v22 = vld [vmem:[%s10029_s28 + $0x70] sm:$0xff] }
  0x9c   : > { %7626 = vmatpush3.bf16.msra.mxu1 %v10062_v13  ;;  %7898 = vmatpush3.bf16.msra.mxu0 %v10062_v13  ;;  %v426_v23 = vld [vmem:[%s10029_s28 + $0x180] sm:$0xff]  ;;  %v427_v24 = vld [vmem:[%s10029_s28 + $0x190] sm:$0xff]  ;;  %v10086_v26 = vpack.c.bf16 %v409_v22, %v408_v21  ;;  %v9189_v21 = vld [vmem:[#allocation10 + $0x28] sm:$0xff]  }
  0x9d   : > { %7627 = vmatprep.subr.bf16.mxu1 %v10066_v14  ;;  %7899 = vmatprep.subr.bf16.mxu0 %v10066_v14  ;;  %v9138_v25 = vld [vmem:[#allocation8 + $0x4] ss:$8 sps:$4 sm:$0xff]   ;;  %v10091_v28 = vpack.c.bf16 %v427_v24, %v426_v23  ;;  %v411_v29 = vld [vmem:[%s10029_s28 + $0x90] sm:$0xff]  ;;  %v9136_v49 = vld [vmem:[#allocation8] ss:$8 sps:$4 sm:$0xff]  }
  0x9e   : > { %v410_v27 = vld [vmem:[%s10029_s28 + $0x80] sm:$0xff]  ;;  %706 = vmatprep.mubr.bf16.mxu1 %v9138_v25  ;;  %v429_v31 = vld [vmem:[%s10029_s28 + $0x1b0] sm:$0xff]  ;;  %v9191_v25 = vld [vmem:[#allocation10 + $0x38] sm:$0xff]  }
  0x9f   : > { %v428_v30 = vld [vmem:[%s10029_s28 + $0x1a0] sm:$0xff]  ;;  %v10098_v32 = vpack.c.bf16 %v411_v29, %v410_v27  ;;  %v413_v35 = vld [vmem:[%s10029_s28 + $0xb0] sm:$0xff] }
  0xa0   : > { %7628 = vmatpush3.bf16.msra.mxu1 %v10074_v19  ;;  %7900 = vmatpush3.bf16.msra.mxu0 %v10074_v19  ;;  %v412_v33 = vld [vmem:[%s10029_s28 + $0xa0] sm:$0xff]  ;;  %v10103_v34 = vpack.c.bf16 %v429_v31, %v428_v30  ;;  %v431_v37 = vld [vmem:[%s10029_s28 + $0x1d0] sm:$0xff] }
  0xa1   : > { %7629 = vmatprep.subr.bf16.mxu1 %v10078_v20  ;;  %7901 = vmatprep.subr.bf16.mxu0 %v10078_v20  ;;  %v430_v36 = vld [vmem:[%s10029_s28 + $0x1c0] sm:$0xff]  ;;  %v10110_v38 = vpack.c.bf16 %v413_v35, %v412_v33  ;;  %v415_v41 = vld [vmem:[%s10029_s28 + $0xd0] sm:$0xff] }
  0xa2   : > { %v414_v39 = vld [vmem:[%s10029_s28 + $0xc0] sm:$0xff]  ;;  %v10115_v40 = vpack.c.bf16 %v431_v37, %v430_v36  ;;  %v433_v43 = vld [vmem:[%s10029_s28 + $0x1f0] sm:$0xff] }
  0xa3   : > { %v432_v42 = vld [vmem:[%s10029_s28 + $0x1e0] sm:$0xff]  ;;  %v10122_v44 = vpack.c.bf16 %v415_v41, %v414_v39  ;;  %v417_v47 = vld [vmem:[%s10029_s28 + $0xf0] sm:$0xff] }
  0xa4   : > { %7630 = vmatpush3.bf16.msra.mxu1 %v10086_v26  ;;  %7902 = vmatpush3.bf16.msra.mxu0 %v10086_v26  ;;  %v416_v45 = vld [vmem:[%s10029_s28 + $0xe0] sm:$0xff]  ;;  %v10127_v46 = vpack.c.bf16 %v433_v43, %v432_v42  ;;  %v9139_v50 = vld [vmem:[#allocation8 + $0x14] ss:$8 sps:$4 sm:$0xff]   ;;  %v9141_v54 = vld [vmem:[#allocation8 + $0x10] ss:$8 sps:$4 sm:$0xff]  }
  0xa5   : > { %7631 = vmatprep.subr.bf16.mxu1 %v10091_v28  ;;  %7903 = vmatprep.subr.bf16.mxu0 %v10091_v28  ;;  %v10132_v48 = vpack.c.bf16 %v417_v47, %v416_v45  ;;  %v9184_v51 = vld [vmem:[#allocation10] sm:$0xff]   ;;  %v9186_v53 = vld [vmem:[#allocation10 + $0x10] sm:$0xff]   ;;  %v2509_v42 = vld [vmem:[%s10029_s28 + $0x108] sm:$0xff] }
  0xa6   : > { %v9142_v55 = vld [vmem:[#allocation8 + $0x24] ss:$8 sps:$4 sm:$0xff]   ;;  %v9144_v57 = vld [vmem:[#allocation8 + $0x20] ss:$8 sps:$4 sm:$0xff]   ;;  %v9145_v58 = vld [vmem:[#allocation8 + $0x34] ss:$8 sps:$4 sm:$0xff]  }
  0xa7   : > { %v9147_v59 = vld [vmem:[#allocation8 + $0x30] ss:$8 sps:$4 sm:$0xff]   ;;  %v9148_v60 = vld [vmem:[#allocation8 + $0x44] ss:$8 sps:$4 sm:$0xff]   ;;  %v9150_v61 = vld [vmem:[#allocation8 + $0x40] ss:$8 sps:$4 sm:$0xff]  }
  0xa8   : > { %7632 = vmatpush3.bf16.msra.mxu1 %v10098_v32  ;;  %7904 = vmatpush3.bf16.msra.mxu0 %v10098_v32  ;;  %v9151_v62 = vld [vmem:[#allocation8 + $0x54] ss:$8 sps:$4 sm:$0xff]   ;;  %v9153_v63 = vld [vmem:[#allocation8 + $0x50] ss:$8 sps:$4 sm:$0xff]   ;;  %v9154_v0 = vld [vmem:[#allocation8 + $0x64] ss:$8 sps:$4 sm:$0xff]  }
  0xa9   : > { %7633 = vmatprep.subr.bf16.mxu1 %v10103_v34  ;;  %7905 = vmatprep.subr.bf16.mxu0 %v10103_v34  ;;  %v9156_v1 = vld [vmem:[#allocation8 + $0x60] ss:$8 sps:$4 sm:$0xff]   ;;  %v9157_v2 = vld [vmem:[#allocation8 + $0x74] ss:$8 sps:$4 sm:$0xff]   ;;  %v9159_v4 = vld [vmem:[#allocation8 + $0x70] ss:$8 sps:$4 sm:$0xff]  }
  0xaa   : > { %v9160_v5 = vld [vmem:[#allocation8 + $0x84] ss:$8 sps:$4 sm:$0xff]   ;;  %v9162_v6 = vld [vmem:[#allocation8 + $0x80] ss:$8 sps:$4 sm:$0xff]   ;;  %v9163_v9 = vld [vmem:[#allocation8 + $0x94] ss:$8 sps:$4 sm:$0xff]  }
  0xab   : > { %v9165_v10 = vld [vmem:[#allocation8 + $0x90] ss:$8 sps:$4 sm:$0xff]   ;;  %v9166_v11 = vld [vmem:[#allocation8 + $0xa4] ss:$8 sps:$4 sm:$0xff]   ;;  %v9168_v12 = vld [vmem:[#allocation8 + $0xa0] ss:$8 sps:$4 sm:$0xff]  }
  0xac   : > { %7634 = vmatpush3.bf16.msra.mxu1 %v10110_v38  ;;  %7906 = vmatpush3.bf16.msra.mxu0 %v10110_v38  ;;  %v9169_v15 = vld [vmem:[#allocation8 + $0xb4] ss:$8 sps:$4 sm:$0xff]   ;;  %v9188_v16 = vld [vmem:[#allocation10 + $0x20] sm:$0xff]   ;;  %v9171_v17 = vld [vmem:[#allocation8 + $0xb0] ss:$8 sps:$4 sm:$0xff]  }
  0xad   : > { %7635 = vmatprep.subr.bf16.mxu1 %v10115_v40  ;;  %7907 = vmatprep.subr.bf16.mxu0 %v10115_v40  ;;  %v9172_v18 = vld [vmem:[#allocation8 + $0xc4] ss:$8 sps:$4 sm:$0xff]   ;;  %v9190_v22 = vld [vmem:[#allocation10 + $0x30] sm:$0xff]   ;;  %v9174_v23 = vld [vmem:[#allocation8 + $0xc0] ss:$8 sps:$4 sm:$0xff]  }
  0xae   : > { %v9175_v24 = vld [vmem:[#allocation8 + $0xd4] ss:$8 sps:$4 sm:$0xff]   ;;  %v9177_v27 = vld [vmem:[#allocation8 + $0xd0] ss:$8 sps:$4 sm:$0xff]   ;;  %v9178_v29 = vld [vmem:[#allocation8 + $0xe4] ss:$8 sps:$4 sm:$0xff]  }
  0xaf   : > { %v9180_v30 = vld [vmem:[#allocation8 + $0xe0] ss:$8 sps:$4 sm:$0xff]   ;;  %v9181_v31 = vld [vmem:[#allocation8 + $0xf4] ss:$8 sps:$4 sm:$0xff]   ;;  %v9183_v33 = vld [vmem:[#allocation8 + $0xf0] ss:$8 sps:$4 sm:$0xff]  }
  0xb0   : > { %7636 = vmatpush3.bf16.msra.mxu1 %v10122_v44  ;;  %7908 = vmatpush3.bf16.msra.mxu0 %v10122_v44  ;;  %v9194_v35 = vld [vmem:[#allocation8 + $0x204] ss:$8 sps:$4 sm:$0xff]   ;;  %v9192_v36 = vld [vmem:[#allocation8 + $0x200] ss:$8 sps:$4 sm:$0xff]   ;;  %v9195_v37 = vld [vmem:[#allocation8 + $0x214] ss:$8 sps:$4 sm:$0xff]  }
  0xb1   : > { %7637 = vmatprep.subr.bf16.mxu1 %v10127_v46  ;;  %7909 = vmatprep.subr.bf16.mxu0 %v10127_v46  ;;  %v9197_v39 = vld [vmem:[#allocation8 + $0x210] ss:$8 sps:$4 sm:$0xff]   ;;  %v9200_v41 = vld [vmem:[#allocation8 + $0x220] ss:$8 sps:$4 sm:$0xff]  }
  0xb2   : > { %1961 = vmatprep.mubr.bf16.mxu0 %v9194_v35  ;;  %v2510_v43 = vld [vmem:[%s10029_s28 + $0x118] sm:$0xff]  ;;  %v2493_v45 = vld [vmem:[%s10029_s28 + $0x8] sm:$0xff] }
  0xb3   : > { %v10143_v47 = vpack.c.bf16 %v2510_v43, %v2509_v42 }
  0xb4   : > { %7638 = vmatpush3.bf16.msra.mxu1 %v10132_v48  ;;  %7910 = vmatpush3.bf16.msra.mxu0 %v10132_v48 }
  0xb5   : > { %8439 = vmatprep.subr.bf16.mxu1 %v9184_v51  ;;  %12876 = vst [vmem:[#allocation19_spill] sm:$0xff] %v10143_v47  ;;  %8031 = vmatprep.subr.bf16.mxu0 %v10143_v47 }
  0xb7   : > { %707 = vmatmul.mubr.bf16.vlgmr.msra.gmra.mrb[0].mxu1 %v9136_v49  ;;  %1962 = vmatmul.mubr.bf16.vlgmr.msra.gmra.mrb[0].mxu0 %v9192_v36  ;;  %v2494_v49 = vld [vmem:[%s10029_s28 + $0x18] sm:$0xff] }
  0xb8   : > { %714 = vmatprep.mubr.bf16.mxu1 %v9139_v50  ;;  %8440 = vmatpush3.bf16.msra.mxu1 %v9184_v51  ;;  %v10146_v50 = vpack.c.bf16 %v2494_v49, %v2493_v45  ;;  %v9201_v51 = vld [vmem:[#allocation8 + $0x234] ss:$8 sps:$4 sm:$0xff]  }
  0xb9   : > { %8441 = vmatprep.subr.bf16.mxu1 %v9185_v52  ;;  %1969 = vmatprep.mubr.bf16.mxu0 %v9195_v37  ;;  %v9222_v36 = vld [vmem:[#allocation8 + $0x294] ss:$8 sps:$4 sm:$0xff]  }
  0xba   : > { %12877 = vst [vmem:[#allocation20_spill] sm:$0xff] %v10146_v50  ;;  %8032 = vmatpush3.bf16.msra.mxu0 %v10146_v50 }
  0xbc   : > { %8442 = vmatpush3.bf16.msra.mxu1 %v9185_v52  ;;  %v9203_v52 = vld [vmem:[#allocation8 + $0x230] ss:$8 sps:$4 sm:$0xff]  }
  0xbd   : > { %8443 = vmatprep.subr.bf16.mxu1 %v9186_v53 }
  0xbf   : > { %715 = vmatmul.mubr.bf16.gmra.mrb[4].mxu1 %v9141_v54  ;;  %1970 = vmatmul.mubr.bf16.gmra.mrb[4].mxu0 %v9197_v39  ;;  %v9206_v54 = vld [vmem:[#allocation8 + $0x240] ss:$8 sps:$4 sm:$0xff]   ;;  %v9224_v39 = vld [vmem:[#allocation8 + $0x290] ss:$8 sps:$4 sm:$0xff]  }
  0xc0   : > { %722 = vmatprep.mubr.bf16.mxu1 %v9142_v55  ;;  %8444 = vmatpush3.bf16.msra.mxu1 %v9186_v53  ;;  %v9204_v53 = vld [vmem:[#allocation8 + $0x244] ss:$8 sps:$4 sm:$0xff]  }
  0xc1   : > { %8445 = vmatprep.subr.bf16.mxu1 %v9187_v56  ;;  %v2511_v55 = vld [vmem:[%s10029_s28 + $0x128] sm:$0xff] }
  0xc4   : > { %8446 = vmatpush3.bf16.msra.mxu1 %v9187_v56  ;;  %v2512_v56 = vld [vmem:[%s10029_s28 + $0x138] sm:$0xff] }
  0xc5   : > { %8447 = vmatprep.subr.bf16.mxu1 %v9188_v16 }
  0xc7   : > { %723 = vmatmul.mubr.bf16.gmra.mrb[8].mxu1 %v9144_v57  ;;  %v2495_v57 = vld [vmem:[%s10029_s28 + $0x28] sm:$0xff] }
  0xc8   : > { %730 = vmatprep.mubr.bf16.mxu1 %v9145_v58  ;;  %8448 = vmatpush3.bf16.msra.mxu1 %v9188_v16  ;;  %v10153_v58 = vpack.c.bf16 %v2512_v56, %v2511_v55  ;;  %v2515_v16 = vld [vmem:[%s10029_s28 + $0x168] sm:$0xff]  ;;  %v2518_v55 = vld [vmem:[%s10029_s28 + $0x198] sm:$0xff] }
  0xc9   : > { %8449 = vmatprep.subr.bf16.mxu1 %v9189_v21  ;;  %v2501_v56 = vld [vmem:[%s10029_s28 + $0x88] sm:$0xff] }
  0xca   : > { %12878 = vst [vmem:[#allocation21_spill] sm:$0xff] %v10153_v58  ;;  %8033 = vmatprep.subr.bf16.mxu0 %v10153_v58 }
  0xcc   : > { %8450 = vmatpush3.bf16.msra.mxu1 %v9189_v21  ;;  %v2516_v21 = vld [vmem:[%s10029_s28 + $0x178] sm:$0xff] }
  0xcd   : > { %8451 = vmatprep.subr.bf16.mxu1 %v9190_v22 }
  0xcf   : > { %731 = vmatmul.mubr.bf16.gmra.mrb[12].mxu1 %v9147_v59  ;;  %v2496_v59 = vld [vmem:[%s10029_s28 + $0x38] sm:$0xff] }
  0xd0   : > { %738 = vmatprep.mubr.bf16.mxu1 %v9148_v60  ;;  %8452 = vmatpush3.bf16.msra.mxu1 %v9190_v22  ;;  %v10156_v60 = vpack.c.bf16 %v2496_v59, %v2495_v57 }
  0xd1   : > { %8453 = vmatprep.subr.bf16.mxu1 %v9191_v25 }
  0xd2   : > { %12879 = vst [vmem:[#allocation22_spill] sm:$0xff] %v10156_v60  ;;  %8034 = vmatpush3.bf16.msra.mxu0 %v10156_v60 }
  0xd4   : > { %8454 = vmatpush3.bf16.msra.mxu1 %v9191_v25  ;;  %v2499_v25 = vld [vmem:[%s10029_s28 + $0x68] sm:$0xff] }
  0xd5   : > { %7759 = vmatprep.subr.bf16.mxu1 %v10046_v3  ;;  %v9198_v3 = vld [vmem:[#allocation8 + $0x224] ss:$8 sps:$4 sm:$0xff]  }
  0xd6   : > { %1977 = vmatprep.mubr.bf16.mxu0 %v9198_v3 }
  0xd7   : > { %739 = vmatmul.mubr.bf16.gmra.mrb[16].mxu1 %v9150_v61  ;;  %1978 = vmatmul.mubr.bf16.gmra.mrb[8].mxu0 %v9200_v41  ;;  %v9207_v61 = vld [vmem:[#allocation8 + $0x254] ss:$8 sps:$4 sm:$0xff]  }
  0xd8   : > { %746 = vmatprep.mubr.bf16.mxu1 %v9151_v62  ;;  %1985 = vmatprep.mubr.bf16.mxu0 %v9201_v51  ;;  %v9209_v62 = vld [vmem:[#allocation8 + $0x250] ss:$8 sps:$4 sm:$0xff]   ;;  %v9228_v51 = vld [vmem:[#allocation8 + $0x2a4] ss:$8 sps:$4 sm:$0xff]  }
  0xdf   : > { %747 = vmatmul.mubr.bf16.gmra.mrb[20].mxu1 %v9153_v63  ;;  %1986 = vmatmul.mubr.bf16.gmra.mrb[12].mxu0 %v9203_v52  ;;  %v9210_v63 = vld [vmem:[#allocation8 + $0x264] ss:$8 sps:$4 sm:$0xff]  }
  0xe0   : > { %754 = vmatprep.mubr.bf16.mxu1 %v9154_v0  ;;  %1993 = vmatprep.mubr.bf16.mxu0 %v9204_v53  ;;  %v9212_v0 = vld [vmem:[#allocation8 + $0x260] ss:$8 sps:$4 sm:$0xff]  }
  0xe1   : > { %v2517_v52 = vld [vmem:[%s10029_s28 + $0x188] sm:$0xff] }
  0xe7   : > { %755 = vmatmul.mubr.bf16.gmra.mrb[24].mxu1 %v9156_v1  ;;  %1994 = vmatmul.mubr.bf16.gmra.mrb[16].mxu0 %v9206_v54  ;;  %v2513_v1 = vld [vmem:[%s10029_s28 + $0x148] sm:$0xff] }
  0xe8   : > { %762 = vmatprep.mubr.bf16.mxu1 %v9157_v2  ;;  %2001 = vmatprep.mubr.bf16.mxu0 %v9207_v61  ;;  %v2514_v2 = vld [vmem:[%s10029_s28 + $0x158] sm:$0xff]  ;;  %v9230_v54 = vld [vmem:[#allocation8 + $0x2a0] ss:$8 sps:$4 sm:$0xff]   ;;  %v10185_v61 = vpack.c.bf16 %v2518_v55, %v2517_v52 }
  0xea   : > { %12884 = vst [vmem:[#allocation27_spill] sm:$0xff] %v10185_v61 }
  0xef   : > { %763 = vmatmul.mubr.bf16.gmra.mrb[28].mxu1 %v9159_v4  ;;  %2002 = vmatmul.mubr.bf16.gmra.mrb[20].mxu0 %v9209_v62  ;;  %v2497_v4 = vld [vmem:[%s10029_s28 + $0x48] sm:$0xff]  ;;  %v2502_v62 = vld [vmem:[%s10029_s28 + $0x98] sm:$0xff] }
  0xf0   : > { %770 = vmatprep.mubr.bf16.mxu1 %v9160_v5  ;;  %2009 = vmatprep.mubr.bf16.mxu0 %v9210_v63  ;;  %v10163_v5 = vpack.c.bf16 %v2514_v2, %v2513_v1 }
  0xf2   : > { %12880 = vst [vmem:[#allocation23_spill] sm:$0xff] %v10163_v5  ;;  %8035 = vmatprep.subr.bf16.mxu0 %v10163_v5 }
  0xf7   : > { %771 = vmatmul.mubr.bf16.gmra.mrb[32].mxu1 %v9162_v6  ;;  %2010 = vmatmul.mubr.bf16.gmra.mrb[24].mxu0 %v9212_v0  ;;  %v2498_v6 = vld [vmem:[%s10029_s28 + $0x58] sm:$0xff]  ;;  %v10188_v0 = vpack.c.bf16 %v2502_v62, %v2501_v56 }
  0xf8   : > { %778 = vmatprep.mubr.bf16.mxu1 %v9163_v9  ;;  %v10166_v9 = vpack.c.bf16 %v2498_v6, %v2497_v4  ;;  %v9236_v6 = vld [vmem:[#allocation8 + $0x2b0] ss:$8 sps:$4 sm:$0xff]  }
  0xf9   : > { %12885 = vst [vmem:[#allocation28_spill] sm:$0xff] %v10188_v0 }
  0xfa   : > { %12881 = vst [vmem:[#allocation24_spill] sm:$0xff] %v10166_v9  ;;  %8036 = vmatpush3.bf16.msra.mxu0 %v10166_v9 }
  0xff   : > { %779 = vmatmul.mubr.bf16.gmra.mrb[36].mxu1 %v9165_v10  ;;  %v9213_v10 = vld [vmem:[#allocation8 + $0x274] ss:$8 sps:$4 sm:$0xff]  }
 0x100   : > { %786 = vmatprep.mubr.bf16.mxu1 %v9166_v11  ;;  %v9215_v11 = vld [vmem:[#allocation8 + $0x270] ss:$8 sps:$4 sm:$0xff]   ;;  %2017 = vmatprep.mubr.bf16.mxu0 %v9213_v10 }
 0x101   : > { %2018 = vmatmul.mubr.bf16.gmra.mrb[28].mxu0 %v9215_v11 }
 0x107   : > { %787 = vmatmul.mubr.bf16.gmra.mrb[40].mxu1 %v9168_v12 }
 0x108   : > { %794 = vmatprep.mubr.bf16.mxu1 %v9169_v15  ;;  %v9216_v15 = vld [vmem:[#allocation8 + $0x284] ss:$8 sps:$4 sm:$0xff]  }
 0x109   : > { %2025 = vmatprep.mubr.bf16.mxu0 %v9216_v15 }
 0x10f   : > { %795 = vmatmul.mubr.bf16.gmra.mrb[44].mxu1 %v9171_v17 }
 0x110   : > { %802 = vmatprep.mubr.bf16.mxu1 %v9172_v18  ;;  %v9218_v18 = vld [vmem:[#allocation8 + $0x280] ss:$8 sps:$4 sm:$0xff]  }
 0x111   : > { %2026 = vmatmul.mubr.bf16.gmra.mrb[32].mxu0 %v9218_v18  ;;  %v9242_v18 = vld [vmem:[#allocation8 + $0x2c0] ss:$8 sps:$4 sm:$0xff]  }
 0x112   : > { %2033 = vmatprep.mubr.bf16.mxu0 %v9222_v36 }
 0x117   : > { %803 = vmatmul.mubr.bf16.gmra.mrb[48].mxu1 %v9174_v23 }
 0x118   : > { %810 = vmatprep.mubr.bf16.mxu1 %v9175_v24  ;;  %v10172_v24 = vpack.c.bf16 %v2516_v21, %v2515_v16  ;;  %v2519_v16 = vld [vmem:[%s10029_s28 + $0x1a8] sm:$0xff] }
 0x119   : > { %2034 = vmatmul.mubr.bf16.gmra.mrb[36].mxu0 %v9224_v39  ;;  %v2503_v21 = vld [vmem:[%s10029_s28 + $0xa8] sm:$0xff] }
 0x11a   : > { %12882 = vst [vmem:[#allocation25_spill] sm:$0xff] %v10172_v24  ;;  %8037 = vmatprep.subr.bf16.mxu0 %v10172_v24  ;;  %2041 = vmatprep.mubr.bf16.mxu0 %v9228_v51 }
 0x11f   : > { %811 = vmatmul.mubr.bf16.gmra.mrb[52].mxu1 %v9177_v27  ;;  %v2500_v27 = vld [vmem:[%s10029_s28 + $0x78] sm:$0xff] }
 0x120   : > { %818 = vmatprep.mubr.bf16.mxu1 %v9178_v29 }
 0x121   : > { %2042 = vmatmul.mubr.bf16.gmra.mrb[40].mxu0 %v9230_v54 }
 0x127   : > { %819 = vmatmul.mubr.bf16.gmra.mrb[56].mxu1 %v9180_v30  ;;  %v10176_v30 = vpack.c.bf16 %v2500_v27, %v2499_v25  ;;  %v2504_v25 = vld [vmem:[%s10029_s28 + $0xb8] sm:$0xff] }
 0x128   : > { %826 = vmatprep.mubr.bf16.mxu1 %v9181_v31 }
 0x129   : > { %12883 = vst [vmem:[#allocation26_spill] sm:$0xff] %v10176_v30  ;;  %8038 = vmatpush3.bf16.msra.mxu0 %v10176_v30 }
 0x12a   : > { %8039 = vmatprep.subr.bf16.mxu0 %v10185_v61 }
 0x12d   : > { %8040 = vmatpush3.bf16.msra.mxu0 %v10188_v0 }
 0x12f   : > { %827 = vmatmul.mubr.bf16.gmra.mrb[60].mxu1 %v9183_v33 }
 0x18a   : > { %v7639_v12 = vpop.f32.mrb[0].mxu1 }
 0x18b   : > { %v7640_v17 = vpop.f32.mrb[1].mxu1 }
 0x18c   : > { %v7641_v22 = vadd.f32 %v7640_v17, %v7639_v12  ;;  %v7642_v23 = vpop.f32.mrb[2].mxu1 }
 0x18d   : > { %v7643_v29 = vpop.f32.mrb[3].mxu1 }
 0x18e   : > { %v7644_v31 = vadd.f32 %v7643_v29, %v7642_v23 }
 0x190   : > { %v835_v33 = vpack.c.bf16 %v7644_v31, %v7641_v22 }
 0x192   : > { %v7645_v35 = vpop.f32.mrb[4].mxu1  ;;  %8455 = vmatprep.mubr.bf16.mxu1 %v835_v33 }
 0x193   : > { %v7646_v37 = vpop.f32.mrb[5].mxu1 }
 0x194   : > { %v7647_v3 = vadd.f32 %v7646_v37, %v7645_v35  ;;  %v7648_v41 = vpop.f32.mrb[6].mxu1  ;;  %v9248_v35 = vld [vmem:[#allocation8 + $0x2d0] ss:$8 sps:$4 sm:$0xff]  }
 0x195   : > { %v7649_v42 = vpop.f32.mrb[7].mxu1 }
 0x196   : > { %v7650_v43 = vadd.f32 %v7649_v42, %v7648_v41  ;;  %v9252_v41 = vld [vmem:[#allocation8 + $0x2e4] ss:$8 sps:$4 sm:$0xff]  }
 0x197   : > { %v2521_v42 = vld [vmem:[%s10029_s28 + $0x1c8] sm:$0xff] }
 0x198   : > { %v836_v45 = vpack.c.bf16 %v7650_v43, %v7647_v3  ;;  %v9254_v43 = vld [vmem:[#allocation8 + $0x2e0] ss:$8 sps:$4 sm:$0xff]  }
 0x19a   : > { %v7651_v49 = vpop.f32.mrb[8].mxu1  ;;  %8456 = vmatmul.mubr.bf16.vlgmr.msra.gmra.mrb[64].mxu1 %v836_v45  ;;  %v2522_v45 = vld [vmem:[%s10029_s28 + $0x1d8] sm:$0xff] }
 0x19b   : > { %v7652_v53 = vpop.f32.mrb[9].mxu1  ;;  %7760 = vmatpush3.bf16.msra.mxu1 %v10051_v7 }
 0x19c   : > { %v7653_v57 = vadd.f32 %v7652_v53, %v7651_v49  ;;  %v7654_v59 = vpop.f32.mrb[10].mxu1  ;;  %7761 = vmatprep.subr.bf16.mxu1 %v10053_v8  ;;  %v9234_v8 = vld [vmem:[#allocation8 + $0x2b4] ss:$8 sps:$4 sm:$0xff]   ;;  %v2505_v49 = vld [vmem:[%s10029_s28 + $0xc8] sm:$0xff] }
 0x19d   : > { %v7655_v63 = vpop.f32.mrb[11].mxu1  ;;  %2049 = vmatprep.mubr.bf16.mxu0 %v9234_v8  ;;  %v2506_v53 = vld [vmem:[%s10029_s28 + $0xd8] sm:$0xff] }
 0x19e   : > { %v7656_v1 = vadd.f32 %v7655_v63, %v7654_v59  ;;  %2050 = vmatmul.mubr.bf16.gmra.mrb[44].mxu0 %v9236_v6  ;;  %v10221_v55 = vpack.c.bf16 %v2506_v53, %v2505_v49  ;;  %v9258_v59 = vld [vmem:[#allocation8 + $0x2f4] ss:$8 sps:$4 sm:$0xff]   ;;  %v9260_v63 = vld [vmem:[#allocation8 + $0x2f0] ss:$8 sps:$4 sm:$0xff]   ;;  %v2523_v6 = vld [vmem:[%s10029_s28 + $0x1e8] sm:$0xff] }
 0x19f   : > { %7762 = vmatpush3.bf16.msra.mxu1 %v10062_v13  ;;  %v9276_v49 = vld [vmem:[#allocation8 + $0x34] ss:$8 sps:$4 sm:$0xff]  }
 0x1a0   : > { %v837_v7 = vpack.c.bf16 %v7656_v1, %v7653_v57  ;;  %7763 = vmatprep.subr.bf16.mxu1 %v10066_v14  ;;  %12889 = vst [vmem:[#allocation32_spill] sm:$0xff] %v10221_v55 }
 0x1a2   : > { %v7657_v2 = vpop.f32.mrb[12].mxu1  ;;  %8459 = vmatprep.mubr.bf16.mxu1 %v837_v7 }
 0x1a3   : > { %v7658_v4 = vpop.f32.mrb[13].mxu1  ;;  %7764 = vmatpush3.bf16.msra.mxu1 %v10074_v19  ;;  %v9240_v19 = vld [vmem:[#allocation8 + $0x2c4] ss:$8 sps:$4 sm:$0xff]  }
 0x1a4   : > { %v7659_v10 = vadd.f32 %v7658_v4, %v7657_v2  ;;  %v7660_v11 = vpop.f32.mrb[14].mxu1  ;;  %7765 = vmatprep.subr.bf16.mxu1 %v10078_v20  ;;  %v2520_v20 = vld [vmem:[%s10029_s28 + $0x1b8] sm:$0xff]  ;;  %2057 = vmatprep.mubr.bf16.mxu0 %v9240_v19 }
 0x1a5   : > { %v7661_v13 = vpop.f32.mrb[15].mxu1 }
 0x1a6   : > { %v7662_v12 = vadd.f32 %v7661_v13, %v7660_v11  ;;  %2058 = vmatmul.mubr.bf16.gmra.mrb[48].mxu0 %v9242_v18  ;;  %v9562_v11 = vld [vmem:[#allocation8 + $0x4] ss:$8 sps:$4 sm:$0xff]  }
 0x1a7   : > { %7766 = vmatpush3.bf16.msra.mxu1 %v10086_v26  ;;  %v10203_v26 = vpack.c.bf16 %v2520_v20, %v2519_v16 }
 0x1a8   : > { %v838_v14 = vpack.c.bf16 %v7662_v12, %v7659_v10  ;;  %7767 = vmatprep.subr.bf16.mxu1 %v10091_v28  ;;  %v10206_v28 = vpack.c.bf16 %v2504_v25, %v2503_v21  ;;  %v2524_v10 = vld [vmem:[%s10029_s28 + $0x1f8] sm:$0xff]  ;;  %v2507_v12 = vld [vmem:[%s10029_s28 + $0xe8] sm:$0xff] }
 0x1a9   : > { %12886 = vst [vmem:[#allocation29_spill] sm:$0xff] %v10203_v26  ;;  %8041 = vmatprep.subr.bf16.mxu0 %v10203_v26  ;;  %v10227_v13 = vpack.c.bf16 %v2524_v10, %v2523_v6  ;;  %v9564_v25 = vld [vmem:[#allocation8 + $0x14] ss:$8 sps:$4 sm:$0xff]  }
 0x1aa   : > { %v7663_v15 = vpop.f32.mrb[16].mxu1  ;;  %8460 = vmatmul.mubr.bf16.gmra.mrb[68].mxu1 %v838_v14  ;;  %12887 = vst [vmem:[#allocation30_spill] sm:$0xff] %v10206_v28  ;;  %8042 = vmatpush3.bf16.msra.mxu0 %v10206_v28  ;;  %v2508_v14 = vld [vmem:[%s10029_s28 + $0xf8] sm:$0xff] }
 0x1ab   : > { %v7664_v17 = vpop.f32.mrb[17].mxu1  ;;  %7768 = vmatpush3.bf16.msra.mxu1 %v10098_v32  ;;  %12890 = vst [vmem:[#allocation33_spill] sm:$0xff] %v10227_v13  ;;  %v10231_v19 = vpack.c.bf16 %v2508_v14, %v2507_v12  ;;  %v9290_v14 = vld [vmem:[#allocation8 + $0x50] ss:$8 sps:$4 sm:$0xff]  }
 0x1ac   : > { %v7665_v22 = vadd.f32 %v7664_v17, %v7663_v15  ;;  %v7666_v23 = vpop.f32.mrb[18].mxu1  ;;  %7769 = vmatprep.subr.bf16.mxu1 %v10103_v34  ;;  %v9246_v34 = vld [vmem:[#allocation8 + $0x2d4] ss:$8 sps:$4 sm:$0xff]  }
 0x1ad   : > { %v7667_v27 = vpop.f32.mrb[19].mxu1  ;;  %2065 = vmatprep.mubr.bf16.mxu0 %v9246_v34  ;;  %12891 = vst [vmem:[#allocation34_spill] sm:$0xff] %v10231_v19 }
 0x1ae   : > { %v7668_v29 = vadd.f32 %v7667_v27, %v7666_v23  ;;  %2066 = vmatmul.mubr.bf16.gmra.mrb[52].mxu0 %v9248_v35  ;;  %v9565_v35 = vld [vmem:[#allocation8 + $0x10] ss:$8 sps:$4 sm:$0xff]  }
 0x1af   : > { %7770 = vmatpush3.bf16.msra.mxu1 %v10110_v38  ;;  %2073 = vmatprep.mubr.bf16.mxu0 %v9252_v41 }
 0x1b0   : > { %v839_v32 = vpack.c.bf16 %v7668_v29, %v7665_v22  ;;  %7771 = vmatprep.subr.bf16.mxu1 %v10115_v40  ;;  %v9563_v22 = vld [vmem:[#allocation8] ss:$8 sps:$4 sm:$0xff]  }
 0x1b2   : > { %v7669_v31 = vpop.f32.mrb[20].mxu1  ;;  %8463 = vmatprep.mubr.bf16.mxu1 %v839_v32 }
 0x1b3   : > { %v7670_v33 = vpop.f32.mrb[21].mxu1  ;;  %7772 = vmatpush3.bf16.msra.mxu1 %v10122_v44 }
 0x1b4   : > { %v7671_v36 = vadd.f32 %v7670_v33, %v7669_v31  ;;  %v7672_v37 = vpop.f32.mrb[22].mxu1  ;;  %7773 = vmatprep.subr.bf16.mxu1 %v10127_v46  ;;  %v10218_v46 = vpack.c.bf16 %v2522_v45, %v2521_v42 }
 0x1b5   : > { %v7673_v38 = vpop.f32.mrb[23].mxu1 }
 0x1b6   : > { %v7674_v39 = vadd.f32 %v7673_v38, %v7672_v37  ;;  %12888 = vst [vmem:[#allocation31_spill] sm:$0xff] %v10218_v46  ;;  %8043 = vmatprep.subr.bf16.mxu0 %v10218_v46  ;;  %2074 = vmatmul.mubr.bf16.gmra.mrb[56].mxu0 %v9254_v43  ;;  %v9270_v38 = vld [vmem:[#allocation8 + $0x24] ss:$8 sps:$4 sm:$0xff]  }
 0x1b7   : > { %7774 = vmatpush3.bf16.msra.mxu1 %v10132_v48  ;;  %8044 = vmatpush3.bf16.msra.mxu0 %v10221_v55 }
 0x1b8   : > { %v840_v40 = vpack.c.bf16 %v7674_v39, %v7671_v36  ;;  %2081 = vmatprep.mubr.bf16.mxu0 %v9258_v59  ;;  %8045 = vmatprep.subr.bf16.mxu0 %v10227_v13 }
 0x1ba   : > { %v7675_v3 = vpop.f32.mrb[24].mxu1  ;;  %8464 = vmatmul.mubr.bf16.gmra.mrb[72].mxu1 %v840_v40  ;;  %v9272_v40 = vld [vmem:[#allocation8 + $0x20] ss:$8 sps:$4 sm:$0xff]  }
 0x1bb   : > { %v7676_v44 = vpop.f32.mrb[25].mxu1  ;;  %8046 = vmatpush3.bf16.msra.mxu0 %v10231_v19 }
 0x1bc   : > { %v7677_v51 = vadd.f32 %v7676_v44, %v7675_v3  ;;  %v7678_v52 = vpop.f32.mrb[26].mxu1  ;;  %8167 = vmatprep.subr.bf16.mxu0 %v10143_v47 }
 0x1bd   : > { %v7679_v54 = vpop.f32.mrb[27].mxu1 }
 0x1be   : > { %v7680_v48 = vadd.f32 %v7679_v54, %v7678_v52  ;;  %2082 = vmatmul.mubr.bf16.gmra.mrb[60].mxu0 %v9260_v63  ;;  %v9278_v52 = vld [vmem:[#allocation8 + $0x30] ss:$8 sps:$4 sm:$0xff]  }
 0x1bf   : > { %2797 = vmatprep.mubr.bf16.mxu0 %v9562_v11  ;;  %v9288_v11 = vld [vmem:[#allocation8 + $0x54] ss:$8 sps:$4 sm:$0xff]  }
 0x1c0   : > { %v841_v56 = vpack.c.bf16 %v7680_v48, %v7677_v51 }
 0x1c2   : > { %v7681_v57 = vpop.f32.mrb[28].mxu1  ;;  %8467 = vmatprep.mubr.bf16.mxu1 %v841_v56 }
 0x1c3   : > { %v7682_v62 = vpop.f32.mrb[29].mxu1 }
 0x1c4   : > { %v7683_v1 = vadd.f32 %v7682_v62, %v7681_v57  ;;  %v7684_v7 = vpop.f32.mrb[30].mxu1  ;;  %v9282_v62 = vld [vmem:[#allocation8 + $0x44] ss:$8 sps:$4 sm:$0xff]  }
 0x1c5   : > { %v7685_v2 = vpop.f32.mrb[31].mxu1 }
 0x1c6   : > { %v7686_v8 = vadd.f32 %v7685_v2, %v7684_v7  ;;  %2798 = vmatmul.mubr.bf16.vlgmr.msra.gmra.mrb[64].mxu0 %v9563_v22  ;;  %v9294_v22 = vld [vmem:[#allocation8 + $0x64] ss:$8 sps:$4 sm:$0xff]  }
 0x1c7   : > { %2805 = vmatprep.mubr.bf16.mxu0 %v9564_v25  ;;  %8168 = vmatpush3.bf16.msra.mxu0 %v10146_v50  ;;  %v9296_v25 = vld [vmem:[#allocation8 + $0x60] ss:$8 sps:$4 sm:$0xff]  }
 0x1c8   : > { %v842_v4 = vpack.c.bf16 %v7686_v8, %v7683_v1  ;;  %8169 = vmatprep.subr.bf16.mxu0 %v10153_v58  ;;  %v9284_v1 = vld [vmem:[#allocation8 + $0x40] ss:$8 sps:$4 sm:$0xff]  }
 0x1ca   : > { %v7687_v15 = vpop.f32.mrb[32].mxu1  ;;  %8468 = vmatmul.mubr.bf16.gmra.mrb[76].mxu1 %v842_v4 }
 0x1cb   : > { %v7688_v16 = vpop.f32.mrb[33].mxu1  ;;  %8170 = vmatpush3.bf16.msra.mxu0 %v10156_v60 }
 0x1cc   : > { %v7689_v17 = vadd.f32 %v7688_v16, %v7687_v15  ;;  %v7690_v18 = vpop.f32.mrb[34].mxu1  ;;  %8171 = vmatprep.subr.bf16.mxu0 %v10163_v5 }
 0x1cd   : > { %v7691_v20 = vpop.f32.mrb[35].mxu1 }
 0x1ce   : > { %v7692_v21 = vadd.f32 %v7691_v20, %v7690_v18  ;;  %2806 = vmatmul.mubr.bf16.gmra.mrb[68].mxu0 %v9565_v35  ;;  %v9300_v35 = vld [vmem:[#allocation8 + $0x74] ss:$8 sps:$4 sm:$0xff]  }
 0x1cf   : > { %8172 = vmatpush3.bf16.msra.mxu0 %v10166_v9  ;;  %2813 = vmatprep.mubr.bf16.mxu0 %v9270_v38 }
 0x1d0   : > { %v843_v23 = vpack.c.bf16 %v7692_v21, %v7689_v17  ;;  %8173 = vmatprep.subr.bf16.mxu0 %v10172_v24 }
 0x1d2   : > { %v7693_v27 = vpop.f32.mrb[36].mxu1  ;;  %8471 = vmatprep.mubr.bf16.mxu1 %v843_v23 }
 0x1d3   : > { %v7694_v29 = vpop.f32.mrb[37].mxu1  ;;  %8174 = vmatpush3.bf16.msra.mxu0 %v10176_v30 }
 0x1d4   : > { %v7695_v32 = vadd.f32 %v7694_v29, %v7693_v27  ;;  %v7696_v31 = vpop.f32.mrb[38].mxu1  ;;  %8175 = vmatprep.subr.bf16.mxu0 %v10185_v61 }
 0x1d5   : > { %v7697_v34 = vpop.f32.mrb[39].mxu1 }
 0x1d6   : > { %v7698_v33 = vadd.f32 %v7697_v34, %v7696_v31  ;;  %2814 = vmatmul.mubr.bf16.gmra.mrb[72].mxu0 %v9272_v40 }
 0x1d7   : > { %8176 = vmatpush3.bf16.msra.mxu0 %v10188_v0  ;;  %2821 = vmatprep.mubr.bf16.mxu0 %v9276_v49  ;;  %v10254_v49 = vld [vmem:[#allocation8 + $0x100] ss:$8 sps:$4 sm:$0xff]  }
 0x1d8   : > { %v844_v36 = vpack.c.bf16 %v7698_v33, %v7695_v32  ;;  %8177 = vmatprep.subr.bf16.mxu0 %v10203_v26 }
 0x1da   : > { %v7699_v37 = vpop.f32.mrb[40].mxu1  ;;  %8472 = vmatmul.mubr.bf16.gmra.mrb[80].mxu1 %v844_v36 }
 0x1db   : > { %v7700_v39 = vpop.f32.mrb[41].mxu1  ;;  %8178 = vmatpush3.bf16.msra.mxu0 %v10206_v28 }
 0x1dc   : > { %v7701_v3 = vadd.f32 %v7700_v39, %v7699_v37  ;;  %v7702_v41 = vpop.f32.mrb[42].mxu1  ;;  %8179 = vmatprep.subr.bf16.mxu0 %v10218_v46  ;;  %v9302_v37 = vld [vmem:[#allocation8 + $0x70] ss:$8 sps:$4 sm:$0xff]  }
 0x1dd   : > { %v7703_v42 = vpop.f32.mrb[43].mxu1 }
 0x1de   : > { %v7704_v44 = vadd.f32 %v7703_v42, %v7702_v41  ;;  %2822 = vmatmul.mubr.bf16.gmra.mrb[76].mxu0 %v9278_v52  ;;  %v10251_v41 = vld [vmem:[#allocation8 + $0x104] ss:$8 sps:$4 sm:$0xff]   ;;  %v10256_v52 = vld [vmem:[#allocation8 + $0x114] ss:$8 sps:$4 sm:$0xff]  }
 0x1df   : > { %8180 = vmatpush3.bf16.msra.mxu0 %v10221_v55  ;;  %2829 = vmatprep.mubr.bf16.mxu0 %v9282_v62  ;;  %v9333_v62 = vld [vmem:[#allocation10 + $0x58] sm:$0xff]  }
 0x1e0   : > { %v845_v43 = vpack.c.bf16 %v7704_v44, %v7701_v3  ;;  %8181 = vmatprep.subr.bf16.mxu0 %v10227_v13  ;;  %v9306_v44 = vld [vmem:[#allocation8 + $0x84] ss:$8 sps:$4 sm:$0xff]  }
 0x1e2   : > { %v7705_v45 = vpop.f32.mrb[44].mxu1  ;;  %8475 = vmatprep.mubr.bf16.mxu1 %v845_v43  ;;  %v9308_v43 = vld [vmem:[#allocation8 + $0x80] ss:$8 sps:$4 sm:$0xff]  }
 0x1e3   : > { %v7706_v51 = vpop.f32.mrb[45].mxu1  ;;  %8182 = vmatpush3.bf16.msra.mxu0 %v10231_v19 }
 0x1e4   : > { %v7707_v53 = vadd.f32 %v7706_v51, %v7705_v45  ;;  %v7708_v54 = vpop.f32.mrb[46].mxu1  ;;  %v9309_v45 = vld [vmem:[#allocation8 + $0x94] ss:$8 sps:$4 sm:$0xff]   ;;  %v9324_v51 = vld [vmem:[#allocation10 + $0x40] sm:$0xff]  }
 0x1e5   : > { %v7709_v48 = vpop.f32.mrb[47].mxu1  ;;  %8487 = vmatprep.subr.bf16.mxu1 %v9324_v51 }
 0x1e6   : > { %v7710_v56 = vadd.f32 %v7709_v48, %v7708_v54  ;;  %2830 = vmatmul.mubr.bf16.gmra.mrb[80].mxu0 %v9284_v1  ;;  %v9311_v54 = vld [vmem:[#allocation8 + $0x90] ss:$8 sps:$4 sm:$0xff]   ;;  %v9312_v48 = vld [vmem:[#allocation8 + $0xa4] ss:$8 sps:$4 sm:$0xff]   ;;  %v9315_v1 = vld [vmem:[#allocation8 + $0xb4] ss:$8 sps:$4 sm:$0xff]  }
 0x1e7   : > { %2837 = vmatprep.mubr.bf16.mxu0 %v9288_v11 }
 0x1e8   : > { %v846_v57 = vpack.c.bf16 %v7710_v56, %v7707_v53  ;;  %v9331_v53 = vld [vmem:[#allocation10 + $0x48] sm:$0xff]   ;;  %v9332_v56 = vld [vmem:[#allocation10 + $0x50] sm:$0xff]  }
 0x1ea   : > { %v7711_v59 = vpop.f32.mrb[48].mxu1  ;;  %8476 = vmatmul.mubr.bf16.gmra.mrb[84].mxu1 %v846_v57  ;;  %v10260_v57 = vld [vmem:[#allocation8 + $0x110] ss:$8 sps:$4 sm:$0xff]  }
 0x1eb   : > { %v7712_v63 = vpop.f32.mrb[49].mxu1 }
 0x1ec   : > { %v7713_v7 = vadd.f32 %v7712_v63, %v7711_v59  ;;  %v7714_v2 = vpop.f32.mrb[50].mxu1  ;;  %v10262_v59 = vld [vmem:[#allocation8 + $0x124] ss:$8 sps:$4 sm:$0xff]   ;;  %v9314_v63 = vld [vmem:[#allocation8 + $0xa0] ss:$8 sps:$4 sm:$0xff]  }
 0x1ed   : > { %v7715_v8 = vpop.f32.mrb[51].mxu1 }
 0x1ee   : > { %v7716_v4 = vadd.f32 %v7715_v8, %v7714_v2  ;;  %2838 = vmatmul.mubr.bf16.gmra.mrb[84].mxu0 %v9290_v14  ;;  %v10268_v2 = vld [vmem:[#allocation8 + $0x134] ss:$8 sps:$4 sm:$0xff]   ;;  %v7911_v8 = vpop.f32.mrb[0].mxu0 }
 0x1ef   : > { %2845 = vmatprep.mubr.bf16.mxu0 %v9294_v22  ;;  %v9320_v22 = vld [vmem:[#allocation8 + $0xc0] ss:$8 sps:$4 sm:$0xff]  }
 0x1f0   : > { %v847_v6 = vpack.c.bf16 %v7716_v4, %v7713_v7  ;;  %v10266_v7 = vld [vmem:[#allocation8 + $0x120] ss:$8 sps:$4 sm:$0xff]   ;;  %v7912_v4 = vpop.f32.mrb[1].mxu0 }
 0x1f1   : > { %v7914_v11 = vpop.f32.mrb[2].mxu0 }
 0x1f2   : > { %v7717_v10 = vpop.f32.mrb[52].mxu1  ;;  %8479 = vmatprep.mubr.bf16.mxu1 %v847_v6  ;;  %v9317_v6 = vld [vmem:[#allocation8 + $0xb0] ss:$8 sps:$4 sm:$0xff]   ;;  %v7915_v14 = vpop.f32.mrb[3].mxu0 }
 0x1f3   : > { %v7718_v12 = vpop.f32.mrb[53].mxu1 }
 0x1f4   : > { %v7719_v15 = vadd.f32 %v7718_v12, %v7717_v10  ;;  %v7720_v16 = vpop.f32.mrb[54].mxu1  ;;  %v10272_v10 = vadd.f32 %v7912_v4, %v7911_v8  ;;  %v9318_v12 = vld [vmem:[#allocation8 + $0xc4] ss:$8 sps:$4 sm:$0xff]   ;;  %v10314_v4 = vld [vmem:[#allocation8 + $0x174] ss:$8 sps:$4 sm:$0xff]  }
 0x1f5   : > { %v7721_v17 = vpop.f32.mrb[55].mxu1 }
 0x1f6   : > { %v7722_v18 = vadd.f32 %v7721_v17, %v7720_v16  ;;  %2846 = vmatmul.mubr.bf16.gmra.mrb[88].mxu0 %v9296_v25  ;;  %v10276_v16 = vadd.f32 %v7915_v14, %v7914_v11  ;;  %v10278_v17 = vld [vmem:[#allocation8 + $0x144] ss:$8 sps:$4 sm:$0xff]   ;;  %v9330_v14 = vld [vmem:[#allocation8 + $0xf0] ss:$8 sps:$4 sm:$0xff]  }
 0x1f7   : > { %2853 = vmatprep.mubr.bf16.mxu0 %v9300_v35 }
 0x1f8   : > { %v848_v20 = vpack.c.bf16 %v7722_v18, %v7719_v15  ;;  %v10274_v15 = vld [vmem:[#allocation8 + $0x130] ss:$8 sps:$4 sm:$0xff]  }
 0x1fa   : > { %v7723_v21 = vpop.f32.mrb[56].mxu1  ;;  %8480 = vmatmul.mubr.bf16.gmra.mrb[88].mxu1 %v848_v20  ;;  %v7917_v20 = vpop.f32.mrb[4].mxu0 }
 0x1fb   : > { %v7724_v23 = vpop.f32.mrb[57].mxu1 }
 0x1fc   : > { %v7725_v27 = vadd.f32 %v7724_v23, %v7723_v21  ;;  %v7726_v29 = vpop.f32.mrb[58].mxu1  ;;  %v7918_v21 = vpop.f32.mrb[5].mxu0 }
 0x1fd   : > { %v7727_v32 = vpop.f32.mrb[59].mxu1  ;;  %v10284_v23 = vadd.f32 %v7918_v21, %v7917_v20  ;;  %v7920_v25 = vpop.f32.mrb[6].mxu0 }
 0x1fe   : > { %v7728_v31 = vadd.f32 %v7727_v32, %v7726_v29  ;;  %2854 = vmatmul.mubr.bf16.gmra.mrb[92].mxu0 %v9302_v37  ;;  %v7921_v29 = vpop.f32.mrb[7].mxu0  ;;  %v10286_v32 = vld [vmem:[#allocation8 + $0x140] ss:$8 sps:$4 sm:$0xff]   ;;  %v9323_v37 = vld [vmem:[#allocation8 + $0xd0] ss:$8 sps:$4 sm:$0xff]  }
 0x1ff   : > { %2861 = vmatprep.mubr.bf16.mxu0 %v9306_v44  ;;  %v7923_v35 = vpop.f32.mrb[8].mxu0 }
 0x200   : > { %v849_v34 = vpack.c.bf16 %v7728_v31, %v7725_v27  ;;  %v9321_v27 = vld [vmem:[#allocation8 + $0xd4] ss:$8 sps:$4 sm:$0xff]   ;;  %v10288_v31 = vadd.f32 %v7921_v29, %v7920_v25  ;;  %v10322_v25 = vld [vmem:[#allocation8 + $0x170] ss:$8 sps:$4 sm:$0xff]   ;;  %v10326_v29 = vld [vmem:[#allocation8 + $0x184] ss:$8 sps:$4 sm:$0xff]  }
 0x202   : > { %v7729_v33 = vpop.f32.mrb[60].mxu1  ;;  %8483 = vmatprep.mubr.bf16.mxu1 %v849_v34  ;;  %v10290_v34 = vld [vmem:[#allocation8 + $0x154] ss:$8 sps:$4 sm:$0xff]  }
 0x203   : > { %v7730_v36 = vpop.f32.mrb[61].mxu1 }
 0x204   : > { %v7731_v38 = vadd.f32 %v7730_v36, %v7729_v33  ;;  %v7732_v39 = vpop.f32.mrb[62].mxu1  ;;  %v7924_v36 = vpop.f32.mrb[9].mxu0  ;;  %v10409_v33 = vld [vmem:[#allocation8 + $0x1e4] ss:$8 sps:$4 sm:$0xff]  }
 0x205   : > { %v7733_v40 = vpop.f32.mrb[63].mxu1 }
 0x206   : > { %v7734_v3 = vadd.f32 %v7733_v40, %v7732_v39  ;;  %2862 = vmatmul.mubr.bf16.gmra.mrb[96].mxu0 %v9308_v43  ;;  %v7926_v39 = vpop.f32.mrb[10].mxu0  ;;  %v9325_v40 = vld [vmem:[#allocation8 + $0xe4] ss:$8 sps:$4 sm:$0xff]  }
 0x207   : > { %2869 = vmatprep.mubr.bf16.mxu0 %v9309_v45  ;;  %v10302_v43 = vld [vmem:[#allocation8 + $0x164] ss:$8 sps:$4 sm:$0xff]   ;;  %v10405_v45 = vld [vmem:[#allocation8 + $0x1d0] ss:$8 sps:$4 sm:$0xff]  }
 0x208   : > { %v850_v42 = vpack.c.bf16 %v7734_v3, %v7731_v38  ;;  %v10296_v38 = vadd.f32 %v7924_v36, %v7923_v35  ;;  %v7927_v3 = vpop.f32.mrb[11].mxu0  ;;  %v10391_v35 = vld [vmem:[#allocation8 + $0x1c0] ss:$8 sps:$4 sm:$0xff]  }
 0x209   : > { %v10300_v44 = vadd.f32 %v7927_v3, %v7926_v39 }
 0x20a   : > { %8484 = vmatmul.mubr.bf16.gmra.mrb[92].mxu1 %v850_v42  ;;  %v10298_v42 = vld [vmem:[#allocation8 + $0x150] ss:$8 sps:$4 sm:$0xff]  }
 0x20b   : > { %1333 = vmatprep.mubr.bf16.mxu1 %v10251_v41 }
 0x20e   : > { %2870 = vmatmul.mubr.bf16.gmra.mrb[100].mxu0 %v9311_v54  ;;  %v9327_v54 = vld [vmem:[#allocation8 + $0xe0] ss:$8 sps:$4 sm:$0xff]  }
 0x20f   : > { %2877 = vmatprep.mubr.bf16.mxu0 %v9312_v48 }
 0x212   : > { %1334 = vmatmul.mubr.bf16.vlgmr.msra.gmra.mrb[96].mxu1 %v10254_v49 }
 0x213   : > { %1341 = vmatprep.mubr.bf16.mxu1 %v10256_v52  ;;  %8488 = vmatpush3.bf16.msra.mxu1 %v9324_v51  ;;  %v7929_v51 = vpop.f32.mrb[12].mxu0 }
 0x214   : > { %8489 = vmatprep.subr.bf16.mxu1 %v9331_v53 }
 0x216   : > { %2878 = vmatmul.mubr.bf16.gmra.mrb[104].mxu0 %v9314_v63 }
 0x217   : > { %8490 = vmatpush3.bf16.msra.mxu1 %v9331_v53  ;;  %2885 = vmatprep.mubr.bf16.mxu0 %v9315_v1  ;;  %v7930_v53 = vpop.f32.mrb[13].mxu0  ;;  %v10310_v1 = vld [vmem:[#allocation8 + $0x160] ss:$8 sps:$4 sm:$0xff]  }
 0x218   : > { %8491 = vmatprep.subr.bf16.mxu1 %v9332_v56  ;;  %v10308_v48 = vadd.f32 %v7930_v53, %v7929_v51  ;;  %v10335_v51 = vld [vmem:[#allocation8 + $0x180] ss:$8 sps:$4 sm:$0xff]  }
 0x21a   : > { %1342 = vmatmul.mubr.bf16.gmra.mrb[100].mxu1 %v10260_v57 }
 0x21b   : > { %1349 = vmatprep.mubr.bf16.mxu1 %v10262_v59  ;;  %8492 = vmatpush3.bf16.msra.mxu1 %v9332_v56  ;;  %v7932_v56 = vpop.f32.mrb[14].mxu0 }
 0x21c   : > { %8493 = vmatprep.subr.bf16.mxu1 %v9333_v62  ;;  %v7933_v63 = vpop.f32.mrb[15].mxu0 }
 0x21d   : > { %v10312_v8 = vadd.f32 %v7933_v63, %v7932_v56  ;;  %v7935_v11 = vpop.f32.mrb[16].mxu0 }
 0x21e   : > { %2886 = vmatmul.mubr.bf16.gmra.mrb[108].mxu0 %v9317_v6 }
 0x21f   : > { %8494 = vmatpush3.bf16.msra.mxu1 %v9333_v62  ;;  %2893 = vmatprep.mubr.bf16.mxu0 %v9318_v12  ;;  %v9328_v62 = vld [vmem:[#allocation8 + $0xf4] ss:$8 sps:$4 sm:$0xff]   ;;  %v7936_v12 = vpop.f32.mrb[17].mxu0 }
 0x220   : > { %v10320_v20 = vadd.f32 %v7936_v12, %v7935_v11  ;;  %v7938_v21 = vpop.f32.mrb[18].mxu0 }
 0x222   : > { %1350 = vmatmul.mubr.bf16.gmra.mrb[104].mxu1 %v10266_v7 }
 0x223   : > { %1357 = vmatprep.mubr.bf16.mxu1 %v10268_v2 }
 0x226   : > { %2894 = vmatmul.mubr.bf16.gmra.mrb[112].mxu0 %v9320_v22  ;;  %v7939_v22 = vpop.f32.mrb[19].mxu0 }
 0x227   : > { %2901 = vmatprep.mubr.bf16.mxu0 %v9321_v27  ;;  %v10324_v27 = vadd.f32 %v7939_v22, %v7938_v21  ;;  %v7941_v36 = vpop.f32.mrb[20].mxu0 }
 0x22a   : > { %1358 = vmatmul.mubr.bf16.gmra.mrb[108].mxu1 %v10274_v15 }
 0x22b   : > { %1365 = vmatprep.mubr.bf16.mxu1 %v10278_v17 }
 0x22e   : > { %2902 = vmatmul.mubr.bf16.gmra.mrb[116].mxu0 %v9323_v37  ;;  %v7942_v37 = vpop.f32.mrb[21].mxu0 }
 0x22f   : > { %2909 = vmatprep.mubr.bf16.mxu0 %v9325_v40  ;;  %v10333_v39 = vadd.f32 %v7942_v37, %v7941_v36  ;;  %v7944_v40 = vpop.f32.mrb[22].mxu0 }
 0x230   : > { %v7945_v3 = vpop.f32.mrb[23].mxu0 }
 0x231   : > { %v10337_v53 = vadd.f32 %v7945_v3, %v7944_v40  ;;  %v7947_v56 = vpop.f32.mrb[24].mxu0 }
 0x232   : > { %1366 = vmatmul.mubr.bf16.gmra.mrb[112].mxu1 %v10286_v32 }
 0x233   : > { %1373 = vmatprep.mubr.bf16.mxu1 %v10290_v34 }
 0x236   : > { %2910 = vmatmul.mubr.bf16.gmra.mrb[120].mxu0 %v9327_v54  ;;  %v10339_v54 = vld [vmem:[#allocation8 + $0x194] ss:$8 sps:$4 sm:$0xff]  }
 0x237   : > { %2917 = vmatprep.mubr.bf16.mxu0 %v9328_v62  ;;  %v7948_v62 = vpop.f32.mrb[25].mxu0 }
 0x238   : > { %v10347_v63 = vadd.f32 %v7948_v62, %v7947_v56  ;;  %v7950_v11 = vpop.f32.mrb[26].mxu0  ;;  %v10363_v56 = vld [vmem:[#allocation8 + $0x1a0] ss:$8 sps:$4 sm:$0xff]  }
 0x239   : > { %v7951_v12 = vpop.f32.mrb[27].mxu0 }
 0x23a   : > { %1374 = vmatmul.mubr.bf16.gmra.mrb[116].mxu1 %v10298_v42  ;;  %v10351_v21 = vadd.f32 %v7951_v12, %v7950_v11  ;;  %v7953_v22 = vpop.f32.mrb[28].mxu0 }
 0x23b   : > { %1381 = vmatprep.mubr.bf16.mxu1 %v10302_v43  ;;  %v7954_v36 = vpop.f32.mrb[29].mxu0 }
 0x23c   : > { %v10361_v37 = vadd.f32 %v7954_v36, %v7953_v22  ;;  %v7956_v40 = vpop.f32.mrb[30].mxu0  ;;  %v9334_v22 = vld [vmem:[#allocation10 + $0x60] sm:$0xff]  }
 0x23d   : > { %v7957_v3 = vpop.f32.mrb[31].mxu0  ;;  %8495 = vmatprep.subr.bf16.mxu1 %v9334_v22 }
 0x23e   : > { %2918 = vmatmul.mubr.bf16.gmra.mrb[124].mxu0 %v9330_v14  ;;  %v10349_v14 = vld [vmem:[#allocation8 + $0x190] ss:$8 sps:$4 sm:$0xff]   ;;  %v10365_v62 = vadd.f32 %v7957_v3, %v7956_v40  ;;  %v7959_v11 = vpop.f32.mrb[32].mxu0  ;;  %8496 = vmatpush3.bf16.msra.mxu1 %v9334_v22 }
 0x23f   : > { %3423 = vmatprep.mubr.bf16.mxu0 %v10251_v41  ;;  %v7960_v12 = vpop.f32.mrb[33].mxu0  ;;  %v10395_v41 = vld [vmem:[#allocation8 + $0x1d4] ss:$8 sps:$4 sm:$0xff]  }
 0x240   : > { %v10375_v36 = vadd.f32 %v7960_v12, %v7959_v11  ;;  %v7962_v40 = vpop.f32.mrb[34].mxu0 }
 0x241   : > { %v7963_v3 = vpop.f32.mrb[35].mxu0 }
 0x242   : > { %1382 = vmatmul.mubr.bf16.gmra.mrb[120].mxu1 %v10310_v1  ;;  %v7965_v11 = vpop.f32.mrb[36].mxu0 }
 0x243   : > { %1389 = vmatprep.mubr.bf16.mxu1 %v10314_v4  ;;  %v7966_v12 = vpop.f32.mrb[37].mxu0 }
 0x244   : > { %v10389_v22 = vadd.f32 %v7966_v12, %v7965_v11 }
 0x246   : > { %3424 = vmatmul.mubr.bf16.vlgmr.msra.gmra.mrb[128].mxu0 %v10254_v49  ;;  %v10353_v49 = vld [vmem:[#allocation8 + $0x1a4] ss:$8 sps:$4 sm:$0xff]  }
 0x247   : > { %3431 = vmatprep.mubr.bf16.mxu0 %v10256_v52  ;;  %v10377_v52 = vld [vmem:[#allocation8 + $0x1b0] ss:$8 sps:$4 sm:$0xff]  }
 0x24a   : > { %1390 = vmatmul.mubr.bf16.gmra.mrb[124].mxu1 %v10322_v25 }
 0x24b   : > { %1397 = vmatprep.mubr.bf16.mxu1 %v10326_v29 }
 0x24e   : > { %3432 = vmatmul.mubr.bf16.gmra.mrb[132].mxu0 %v10260_v57  ;;  %v10367_v57 = vld [vmem:[#allocation8 + $0x1b4] ss:$8 sps:$4 sm:$0xff]  }
 0x24f   : > { %3439 = vmatprep.mubr.bf16.mxu0 %v10262_v59  ;;  %v10381_v59 = vld [vmem:[#allocation8 + $0x1c4] ss:$8 sps:$4 sm:$0xff]  }
 0x252   : > { %1398 = vmatmul.mubr.bf16.gmra.mrb[128].mxu1 %v10335_v51 }
 0x253   : > { %1405 = vmatprep.mubr.bf16.mxu1 %v10339_v54 }
 0x256   : > { %3440 = vmatmul.mubr.bf16.gmra.mrb[136].mxu0 %v10266_v7  ;;  %v10379_v7 = vadd.f32 %v7963_v3, %v7962_v40  ;;  %v9336_v40 = vld [vmem:[#allocation10 + $0x70] sm:$0xff]   ;;  %v7968_v3 = vpop.f32.mrb[38].mxu0 }
 0x257   : > { %3447 = vmatprep.mubr.bf16.mxu0 %v10268_v2  ;;  %v9335_v2 = vld [vmem:[#allocation10 + $0x68] sm:$0xff]  }
 0x258   : > { %8497 = vmatprep.subr.bf16.mxu1 %v9335_v2 }
 0x259   : > { %8498 = vmatpush3.bf16.msra.mxu1 %v9335_v2 }
 0x25a   : > { %1406 = vmatmul.mubr.bf16.gmra.mrb[132].mxu1 %v10349_v14  ;;  %8499 = vmatprep.subr.bf16.mxu1 %v9336_v40 }
 0x25b   : > { %1413 = vmatprep.mubr.bf16.mxu1 %v10353_v49 }
 0x25d   : > { %8500 = vmatpush3.bf16.msra.mxu1 %v9336_v40 }
 0x25e   : > { %3448 = vmatmul.mubr.bf16.gmra.mrb[140].mxu0 %v10274_v15  ;;  %v7969_v15 = vpop.f32.mrb[39].mxu0 }
 0x25f   : > { %3455 = vmatprep.mubr.bf16.mxu0 %v10278_v17  ;;  %v10393_v6 = vadd.f32 %v7969_v15, %v7968_v3  ;;  %v9337_v17 = vld [vmem:[#allocation10 + $0x78] sm:$0xff]   ;;  %v7971_v11 = vpop.f32.mrb[40].mxu0 }
 0x260   : > { %8501 = vmatprep.subr.bf16.mxu1 %v9337_v17  ;;  %v7972_v12 = vpop.f32.mrb[41].mxu0 }
 0x261   : > { %8502 = vmatpush3.bf16.msra.mxu1 %v9337_v17  ;;  %v10403_v3 = vadd.f32 %v7972_v12, %v7971_v11  ;;  %v7974_v15 = vpop.f32.mrb[42].mxu0 }
 0x262   : > { %1414 = vmatmul.mubr.bf16.gmra.mrb[136].mxu1 %v10363_v56  ;;  %v7975_v40 = vpop.f32.mrb[43].mxu0 }
 0x263   : > { %1421 = vmatprep.mubr.bf16.mxu1 %v10367_v57 }
 0x266   : > { %3456 = vmatmul.mubr.bf16.gmra.mrb[144].mxu0 %v10286_v32  ;;  %v10407_v32 = vadd.f32 %v7975_v40, %v7974_v15  ;;  %v10419_v40 = vld [vmem:[#allocation8 + $0x1e0] ss:$8 sps:$4 sm:$0xff]  }
 0x267   : > { %3463 = vmatprep.mubr.bf16.mxu0 %v10290_v34 }
 0x26a   : > { %1422 = vmatmul.mubr.bf16.gmra.mrb[140].mxu1 %v10377_v52 }
 0x26b   : > { %1429 = vmatprep.mubr.bf16.mxu1 %v10381_v59 }
 0x26e   : > { %3464 = vmatmul.mubr.bf16.gmra.mrb[148].mxu0 %v10298_v42  ;;  %v10423_v42 = vld [vmem:[#allocation8 + $0x1f4] ss:$8 sps:$4 sm:$0xff]  }
 0x26f   : > { %3471 = vmatprep.mubr.bf16.mxu0 %v10302_v43 }
 0x271   : > { %v7977_v17 = vpop.f32.mrb[44].mxu0 }
 0x272   : > { %1430 = vmatmul.mubr.bf16.gmra.mrb[144].mxu1 %v10391_v35  ;;  %v7978_v11 = vpop.f32.mrb[45].mxu0 }
 0x273   : > { %1437 = vmatprep.mubr.bf16.mxu1 %v10395_v41  ;;  %v10417_v12 = vadd.f32 %v7978_v11, %v7977_v17  ;;  %v7980_v2 = vpop.f32.mrb[46].mxu0 }
 0x274   : > { %v7981_v15 = vpop.f32.mrb[47].mxu0 }
 0x275   : > { %v10421_v18 = vadd.f32 %v7981_v15, %v7980_v2  ;;  %v10433_v15 = vld [vmem:[#allocation8 + $0x1f0] ss:$8 sps:$4 sm:$0xff]  }
 0x276   : > { %3472 = vmatmul.mubr.bf16.gmra.mrb[152].mxu0 %v10310_v1 }
 0x277   : > { %3479 = vmatprep.mubr.bf16.mxu0 %v10314_v4 }
 0x279   : > { %v7983_v34 = vpop.f32.mrb[48].mxu0 }
 0x27a   : > { %1438 = vmatmul.mubr.bf16.gmra.mrb[148].mxu1 %v10405_v45  ;;  %v7984_v17 = vpop.f32.mrb[49].mxu0 }
 0x27b   : > { %1445 = vmatprep.mubr.bf16.mxu1 %v10409_v33  ;;  %v10431_v11 = vadd.f32 %v7984_v17, %v7983_v34  ;;  %v7986_v19 = vpop.f32.mrb[50].mxu0 }
 0x27c   : > { %v7987_v2 = vpop.f32.mrb[51].mxu0 }
 0x27d   : > { %v10435_v13 = vadd.f32 %v7987_v2, %v7986_v19 }
 0x27e   : > { %3480 = vmatmul.mubr.bf16.gmra.mrb[156].mxu0 %v10322_v25 }
 0x27f   : > { %3487 = vmatprep.mubr.bf16.mxu0 %v10326_v29 }
 0x281   : > { %v7989_v4 = vpop.f32.mrb[52].mxu0 }
 0x282   : > { %1446 = vmatmul.mubr.bf16.gmra.mrb[152].mxu1 %v10419_v40  ;;  %v7990_v43 = vpop.f32.mrb[53].mxu0 }
 0x283   : > { %1453 = vmatprep.mubr.bf16.mxu1 %v10423_v42  ;;  %v10442_v55 = vadd.f32 %v7990_v43, %v7989_v4  ;;  %v7992_v34 = vpop.f32.mrb[54].mxu0 }
 0x284   : > { %v7993_v17 = vpop.f32.mrb[55].mxu0 }
 0x285   : > { %v10444_v46 = vadd.f32 %v7993_v17, %v7992_v34 }
 0x286   : > { %3488 = vmatmul.mubr.bf16.gmra.mrb[160].mxu0 %v10335_v51 }
 0x287   : > { %3495 = vmatprep.mubr.bf16.mxu0 %v10339_v54 }
 0x289   : > { %v7995_v25 = vpop.f32.mrb[56].mxu0 }
 0x28a   : > { %1454 = vmatmul.mubr.bf16.gmra.mrb[156].mxu1 %v10433_v15  ;;  %v7996_v2 = vpop.f32.mrb[57].mxu0 }
 0x28b   : > { %v10450_v29 = vadd.f32 %v7996_v2, %v7995_v25  ;;  %v7998_v1 = vpop.f32.mrb[58].mxu0 }
 0x28c   : > { %v7999_v28 = vpop.f32.mrb[59].mxu0 }
 0x28d   : > { %v10452_v26 = vadd.f32 %v7999_v28, %v7998_v1 }
 0x28e   : > { %3496 = vmatmul.mubr.bf16.gmra.mrb[164].mxu0 %v10349_v14 }
 0x28f   : > { %3503 = vmatprep.mubr.bf16.mxu0 %v10353_v49 }
 0x291   : > { %v8001_v51 = vpop.f32.mrb[60].mxu0 }
 0x292   : > { %v8002_v4 = vpop.f32.mrb[61].mxu0 }
 0x293   : > { %v10458_v34 = vadd.f32 %v8002_v4, %v8001_v51  ;;  %v8004_v54 = vpop.f32.mrb[62].mxu0 }
 0x294   : > { %v8005_v17 = vpop.f32.mrb[63].mxu0 }
 0x295   : > { %v10460_v19 = vadd.f32 %v8005_v17, %v8004_v54 }
 0x296   : > { %3504 = vmatmul.mubr.bf16.gmra.mrb[168].mxu0 %v10363_v56 }
 0x297   : > { %3511 = vmatprep.mubr.bf16.mxu0 %v10367_v57 }
 0x299   : > { %v8047_v14 = vpop.f32.mrb[64].mxu0 }
 0x29a   : > { %v8048_v1 = vpop.f32.mrb[65].mxu0 }
 0x29b   : > { %v10466_v25 = vadd.f32 %v8048_v1, %v8047_v14  ;;  %v8050_v49 = vpop.f32.mrb[66].mxu0 }
 0x29c   : > { %v8051_v2 = vpop.f32.mrb[67].mxu0 }
 0x29d   : > { %v10468_v43 = vadd.f32 %v8051_v2, %v8050_v49 }
 0x29e   : > { %3512 = vmatmul.mubr.bf16.gmra.mrb[172].mxu0 %v10377_v52 }
 0x29f   : > { %3519 = vmatprep.mubr.bf16.mxu0 %v10381_v59 }
 0x2a1   : > { %v8053_v56 = vpop.f32.mrb[68].mxu0 }
 0x2a2   : > { %v8054_v4 = vpop.f32.mrb[69].mxu0 }
 0x2a3   : > { %v10474_v54 = vadd.f32 %v8054_v4, %v8053_v56  ;;  %v8056_v57 = vpop.f32.mrb[70].mxu0  ;;  %v10490_v4 = vld [vmem:[#allocation10 + $0x80] sm:$0xff]  }
 0x2a4   : > { %v8057_v17 = vpop.f32.mrb[71].mxu0  ;;  %8535 = vmatprep.subr.bf16.mxu1 %v10490_v4 }
 0x2a5   : > { %v10476_v28 = vadd.f32 %v8057_v17, %v8056_v57 }
 0x2a6   : > { %3520 = vmatmul.mubr.bf16.gmra.mrb[176].mxu0 %v10391_v35 }
 0x2a7   : > { %3527 = vmatprep.mubr.bf16.mxu0 %v10395_v41 }
 0x2a9   : > { %v8059_v52 = vpop.f32.mrb[72].mxu0 }
 0x2aa   : > { %v8060_v1 = vpop.f32.mrb[73].mxu0 }
 0x2ab   : > { %v10482_v49 = vadd.f32 %v8060_v1, %v8059_v52  ;;  %v8062_v59 = vpop.f32.mrb[74].mxu0 }
 0x2ac   : > { %v8063_v2 = vpop.f32.mrb[75].mxu0 }
 0x2ad   : > { %v10484_v51 = vadd.f32 %v8063_v2, %v8062_v59 }
 0x2ae   : > { %3528 = vmatmul.mubr.bf16.gmra.mrb[180].mxu0 %v10405_v45 }
 0x2af   : > { %3535 = vmatprep.mubr.bf16.mxu0 %v10409_v33 }
 0x2b1   : > { %v8065_v35 = vpop.f32.mrb[76].mxu0 }
 0x2b2   : > { %v8066_v57 = vpop.f32.mrb[77].mxu0 }
 0x2b3   : > { %v10492_v41 = vadd.f32 %v8066_v57, %v8065_v35  ;;  %v8068_v17 = vpop.f32.mrb[78].mxu0 }
 0x2b4   : > { %v8069_v52 = vpop.f32.mrb[79].mxu0 }
 0x2b5   : > { %v10495_v1 = vadd.f32 %v8069_v52, %v8068_v17 }
 0x2b6   : > { %3536 = vmatmul.mubr.bf16.gmra.mrb[184].mxu0 %v10419_v40 }
 0x2b7   : > { %3543 = vmatprep.mubr.bf16.mxu0 %v10423_v42 }
 0x2b9   : > { %v8071_v33 = vpop.f32.mrb[80].mxu0 }
 0x2ba   : > { %v8072_v59 = vpop.f32.mrb[81].mxu0 }
 0x2bb   : > { %v10501_v2 = vadd.f32 %v8072_v59, %v8071_v33  ;;  %v8074_v56 = vpop.f32.mrb[82].mxu0 }
 0x2bc   : > { %v8075_v35 = vpop.f32.mrb[83].mxu0 }
 0x2bd   : > { %v10503_v57 = vadd.f32 %v8075_v35, %v8074_v56 }
 0x2be   : > { %3544 = vmatmul.mubr.bf16.gmra.mrb[188].mxu0 %v10433_v15 }
 0x2c1   : > { %v8077_v52 = vpop.f32.mrb[84].mxu0 }
 0x2c2   : > { %v8078_v40 = vpop.f32.mrb[85].mxu0 }
 0x2c3   : > { %v10508_v14 = vadd.f32 %v8078_v40, %v8077_v52  ;;  %v8080_v45 = vpop.f32.mrb[86].mxu0 }
 0x2c4   : > { %v8081_v0 = vpop.f32.mrb[87].mxu0 }
 0x2c5   : > { %12892 = vst [vmem:[#allocation35_spill] sm:$0xff] %v10508_v14  ;;  %v10510_v42 = vadd.f32 %v8081_v0, %v8080_v45 }
 0x2c9   : > { %v8083_v59 = vpop.f32.mrb[88].mxu0 }
 0x2ca   : > { %v8084_v61 = vpop.f32.mrb[89].mxu0 }
 0x2cb   : > { %v10514_v56 = vadd.f32 %v8084_v61, %v8083_v59  ;;  %v8086_v35 = vpop.f32.mrb[90].mxu0 }
 0x2cc   : > { %v8087_v15 = vpop.f32.mrb[91].mxu0 }
 0x2cd   : > { %12893 = vst [vmem:[#allocation36_spill] sm:$0xff] %v10514_v56  ;;  %v10516_v30 = vadd.f32 %v8087_v15, %v8086_v35 }
 0x2cf   : > { %12894 = vst [vmem:[#allocation37_spill] sm:$0xff] %v10516_v30 }
 0x2d1   : > { %v8089_v52 = vpop.f32.mrb[92].mxu0 }
 0x2d2   : > { %v8090_v40 = vpop.f32.mrb[93].mxu0 }
 0x2d3   : > { %v10520_v24 = vadd.f32 %v8090_v40, %v8089_v52  ;;  %v8092_v0 = vpop.f32.mrb[94].mxu0 }
 0x2d4   : > { %v8093_v45 = vpop.f32.mrb[95].mxu0 }
 0x2d5   : > { %12895 = vst [vmem:[#allocation38_spill] sm:$0xff] %v10520_v24  ;;  %v10522_v9 = vadd.f32 %v8093_v45, %v8092_v0 }
 0x2d7   : > { %12896 = vst [vmem:[#allocation39_spill] sm:$0xff] %v10522_v9 }
 0x2d9   : > { %v8095_v61 = vpop.f32.mrb[96].mxu0 }
 0x2da   : > { %v8096_v59 = vpop.f32.mrb[97].mxu0 }
 0x2db   : > { %v10526_v5 = vadd.f32 %v8096_v59, %v8095_v61  ;;  %v8098_v35 = vpop.f32.mrb[98].mxu0 }
 0x2dc   : > { %v8099_v60 = vpop.f32.mrb[99].mxu0 }
 0x2dd   : > { %12897 = vst [vmem:[#allocation40_spill] sm:$0xff] %v10526_v5  ;;  %v10528_v17 = vadd.f32 %v8099_v60, %v8098_v35 }
 0x2df   : > { %12898 = vst [vmem:[#allocation41_spill] sm:$0xff] %v10528_v17 }
 0x2e1   : > { %v8101_v47 = vpop.f32.mrb[100].mxu0 }
 0x2e2   : > { %v8102_v33 = vpop.f32.mrb[101].mxu0 }
 0x2e3   : > { %v10532_v24 = vadd.f32 %v8102_v33, %v8101_v47  ;;  %v8104_v61 = vpop.f32.mrb[102].mxu0 }
 0x2e4   : > { %v8105_v9 = vpop.f32.mrb[103].mxu0 }
 0x2e5   : > { %v7775_v15 = vpop.f32.mrb[96].mxu1  ;;  %12899 = vst [vmem:[#allocation42_spill] sm:$0xff] %v10532_v24  ;;  %v10534_v14 = vadd.f32 %v8105_v9, %v8104_v61 }
 0x2e6   : > { %v7776_v58 = vpop.f32.mrb[97].mxu1 }
 0x2e7   : > { %v7777_v50 = vadd.f32 %v7776_v58, %v7775_v15  ;;  %v7778_v52 = vpop.f32.mrb[98].mxu1  ;;  %12900 = vst [vmem:[#allocation43_spill] sm:$0xff] %v10534_v14 }
 0x2e8   : > { %v7779_v40 = vpop.f32.mrb[99].mxu1 }
 0x2e9   : > { %v7780_v45 = vadd.f32 %v7779_v40, %v7778_v52  ;;  %v8107_v52 = vpop.f32.mrb[104].mxu0 }
 0x2eb   : > { %v1462_v56 = vpack.c.bf16 %v7780_v45, %v7777_v50  ;;  %v9339_v50 = vld [vmem:[#allocation10 + $0x88] sm:$0xff]   ;;  %v8108_v45 = vpop.f32.mrb[105].mxu0 }
 0x2ec   : > { %v10538_v47 = vadd.f32 %v8108_v45, %v8107_v52  ;;  %v8110_v33 = vpop.f32.mrb[106].mxu0 }
 0x2ed   : > { %v7781_v59 = vpop.f32.mrb[100].mxu1  ;;  %8503 = vmatprep.mubr.bf16.mxu1 %v1462_v56  ;;  %v8111_v56 = vpop.f32.mrb[107].mxu0 }
 0x2ee   : > { %v7782_v30 = vpop.f32.mrb[101].mxu1  ;;  %12901 = vst [vmem:[#allocation44_spill] sm:$0xff] %v10538_v47  ;;  %v10541_v9 = vadd.f32 %v8111_v56, %v8110_v33 }
 0x2ef   : > { %v7783_v60 = vadd.f32 %v7782_v30, %v7781_v59  ;;  %v7784_v58 = vpop.f32.mrb[102].mxu1  ;;  %v9340_v59 = vld [vmem:[#allocation10 + $0x90] sm:$0xff]  }
 0x2f0   : > { %v7785_v35 = vpop.f32.mrb[103].mxu1  ;;  %12902 = vst [vmem:[#allocation45_spill] sm:$0xff] %v10541_v9 }
 0x2f1   : > { %v7786_v0 = vadd.f32 %v7785_v35, %v7784_v58  ;;  %v8113_v35 = vpop.f32.mrb[108].mxu0 }
 0x2f2   : > { %v8114_v45 = vpop.f32.mrb[109].mxu0 }
 0x2f3   : > { %v1463_v40 = vpack.c.bf16 %v7786_v0, %v7783_v60  ;;  %v10545_v15 = vadd.f32 %v8114_v45, %v8113_v35  ;;  %v9343_v45 = vld [vmem:[#allocation10 + $0xa8] sm:$0xff]  }
 0x2f5   : > { %v7787_v5 = vpop.f32.mrb[104].mxu1  ;;  %8504 = vmatmul.mubr.bf16.vlgmr.msra.gmra.mrb[64].mxu1 %v1463_v40  ;;  %v9341_v40 = vld [vmem:[#allocation10 + $0x98] sm:$0xff]   ;;  %12903 = vst [vmem:[#allocation46_spill] sm:$0xff] %v10545_v15 }
 0x2f6   : > { %v7788_v17 = vpop.f32.mrb[105].mxu1  ;;  %8536 = vmatpush3.bf16.msra.mxu1 %v10490_v4  ;;  %v8116_v4 = vpop.f32.mrb[110].mxu0 }
 0x2f7   : > { %v7789_v30 = vadd.f32 %v7788_v17, %v7787_v5  ;;  %v7790_v61 = vpop.f32.mrb[106].mxu1  ;;  %8537 = vmatprep.subr.bf16.mxu1 %v9339_v50  ;;  %v8117_v5 = vpop.f32.mrb[111].mxu0 }
 0x2f8   : > { %v7791_v58 = vpop.f32.mrb[107].mxu1  ;;  %v10547_v56 = vadd.f32 %v8117_v5, %v8116_v4 }
 0x2f9   : > { %v7792_v60 = vadd.f32 %v7791_v58, %v7790_v61  ;;  %v9342_v61 = vld [vmem:[#allocation10 + $0xa0] sm:$0xff]  }
 0x2fa   : > { %8538 = vmatpush3.bf16.msra.mxu1 %v9339_v50  ;;  %12904 = vst [vmem:[#allocation47_spill] sm:$0xff] %v10547_v56 }
 0x2fb   : > { %v1464_v52 = vpack.c.bf16 %v7792_v60, %v7789_v30  ;;  %8539 = vmatprep.subr.bf16.mxu1 %v9340_v59  ;;  %v8119_v60 = vpop.f32.mrb[112].mxu0 }
 0x2fd   : > { %v7793_v33 = vpop.f32.mrb[108].mxu1  ;;  %8507 = vmatprep.mubr.bf16.mxu1 %v1464_v52  ;;  %v8120_v52 = vpop.f32.mrb[113].mxu0 }
 0x2fe   : > { %v7794_v17 = vpop.f32.mrb[109].mxu1  ;;  %8540 = vmatpush3.bf16.msra.mxu1 %v9340_v59  ;;  %v10551_v0 = vadd.f32 %v8120_v52, %v8119_v60  ;;  %v8122_v59 = vpop.f32.mrb[114].mxu0  ;;  %v9345_v52 = vld [vmem:[#allocation10 + $0xb8] sm:$0xff]  }
 0x2ff   : > { %v7795_v24 = vadd.f32 %v7794_v17, %v7793_v33  ;;  %v7796_v14 = vpop.f32.mrb[110].mxu1  ;;  %8541 = vmatprep.subr.bf16.mxu1 %v9341_v40  ;;  %v8123_v33 = vpop.f32.mrb[115].mxu0 }
 0x300   : > { %v7797_v50 = vpop.f32.mrb[111].mxu1  ;;  %12905 = vst [vmem:[#allocation48_spill] sm:$0xff] %v10551_v0  ;;  %v10553_v17 = vadd.f32 %v8123_v33, %v8122_v59 }
 0x301   : > { %v7798_v58 = vadd.f32 %v7797_v50, %v7796_v14  ;;  %v9344_v14 = vld [vmem:[#allocation10 + $0xb0] sm:$0xff]  }
 0x302   : > { %8542 = vmatpush3.bf16.msra.mxu1 %v9341_v40  ;;  %12906 = vst [vmem:[#allocation49_spill] sm:$0xff] %v10553_v17 }
 0x303   : > { %v1465_v35 = vpack.c.bf16 %v7798_v58, %v7795_v24  ;;  %8543 = vmatprep.subr.bf16.mxu1 %v9342_v61  ;;  %v8125_v58 = vpop.f32.mrb[116].mxu0 }
 0x305   : > { %v7799_v4 = vpop.f32.mrb[112].mxu1  ;;  %8508 = vmatmul.mubr.bf16.gmra.mrb[68].mxu1 %v1465_v35  ;;  %v8126_v35 = vpop.f32.mrb[117].mxu0 }
 0x306   : > { %v7800_v5 = vpop.f32.mrb[113].mxu1  ;;  %8544 = vmatpush3.bf16.msra.mxu1 %v9342_v61  ;;  %v10557_v30 = vadd.f32 %v8126_v35, %v8125_v58  ;;  %v8128_v61 = vpop.f32.mrb[118].mxu0 }
 0x307   : > { %v7801_v47 = vadd.f32 %v7800_v5, %v7799_v4  ;;  %v7802_v9 = vpop.f32.mrb[114].mxu1  ;;  %8545 = vmatprep.subr.bf16.mxu1 %v9343_v45  ;;  %v8129_v4 = vpop.f32.mrb[119].mxu0 }
 0x308   : > { %v7803_v40 = vpop.f32.mrb[115].mxu1  ;;  %12907 = vst [vmem:[#allocation50_spill] sm:$0xff] %v10557_v30  ;;  %v10559_v5 = vadd.f32 %v8129_v4, %v8128_v61 }
 0x309   : > { %v7804_v50 = vadd.f32 %v7803_v40, %v7802_v9  ;;  %v10561_v9 = vld [vmem:[#allocation10] sm:$0xff]  }
 0x30a   : > { %8546 = vmatpush3.bf16.msra.mxu1 %v9343_v45  ;;  %12908 = vst [vmem:[#allocation51_spill] sm:$0xff] %v10559_v5 }
 0x30b   : > { %v1466_v60 = vpack.c.bf16 %v7804_v50, %v7801_v47  ;;  %8547 = vmatprep.subr.bf16.mxu1 %v9344_v14  ;;  %v8131_v50 = vpop.f32.mrb[120].mxu0 }
 0x30d   : > { %v7805_v59 = vpop.f32.mrb[116].mxu1  ;;  %8511 = vmatprep.mubr.bf16.mxu1 %v1466_v60  ;;  %v8132_v60 = vpop.f32.mrb[121].mxu0 }
 0x30e   : > { %v7806_v33 = vpop.f32.mrb[117].mxu1  ;;  %8548 = vmatpush3.bf16.msra.mxu1 %v9344_v14  ;;  %v10566_v35 = vadd.f32 %v8132_v60, %v8131_v50  ;;  %v8134_v14 = vpop.f32.mrb[122].mxu0 }
 0x30f   : > { %v7807_v15 = vadd.f32 %v7806_v33, %v7805_v59  ;;  %v7808_v56 = vpop.f32.mrb[118].mxu1  ;;  %8549 = vmatprep.subr.bf16.mxu1 %v9345_v52  ;;  %v8135_v59 = vpop.f32.mrb[123].mxu0 }
 0x310   : > { %v7809_v45 = vpop.f32.mrb[119].mxu1  ;;  %12909 = vst [vmem:[#allocation52_spill] sm:$0xff] %v10566_v35  ;;  %v10568_v33 = vadd.f32 %v8135_v59, %v8134_v14 }
 0x311   : > { %v7810_v40 = vadd.f32 %v7809_v45, %v7808_v56 }
 0x312   : > { %8550 = vmatpush3.bf16.msra.mxu1 %v9345_v52  ;;  %12910 = vst [vmem:[#allocation53_spill] sm:$0xff] %v10568_v33 }
 0x313   : > { %v1467_v58 = vpack.c.bf16 %v7810_v40, %v7807_v15  ;;  %8583 = vmatprep.subr.bf16.mxu1 %v10561_v9  ;;  %v8137_v15 = vpop.f32.mrb[124].mxu0 }
 0x314   : > { %v8138_v40 = vpop.f32.mrb[125].mxu0 }
 0x315   : > { %v7811_v61 = vpop.f32.mrb[120].mxu1  ;;  %8512 = vmatmul.mubr.bf16.gmra.mrb[72].mxu1 %v1467_v58  ;;  %v10572_v47 = vadd.f32 %v8138_v40, %v8137_v15  ;;  %v8140_v50 = vpop.f32.mrb[126].mxu0 }
 0x316   : > { %v7812_v4 = vpop.f32.mrb[121].mxu1  ;;  %v8141_v58 = vpop.f32.mrb[127].mxu0 }
 0x317   : > { %v7813_v24 = vadd.f32 %v7812_v4, %v7811_v61  ;;  %v7814_v0 = vpop.f32.mrb[122].mxu1  ;;  %12911 = vst [vmem:[#allocation54_spill] sm:$0xff] %v10572_v47  ;;  %v10574_v5 = vadd.f32 %v8141_v58, %v8140_v50 }
 0x318   : > { %v7815_v17 = vpop.f32.mrb[123].mxu1 }
 0x319   : > { %v7816_v52 = vadd.f32 %v7815_v17, %v7814_v0  ;;  %12912 = vst [vmem:[#allocation55_spill] sm:$0xff] %v10574_v5  ;;  %v8183_v0 = vpop.f32.mrb[128].mxu0 }
 0x31b   : > { %v1468_v45 = vpack.c.bf16 %v7816_v52, %v7813_v24  ;;  %v8184_v24 = vpop.f32.mrb[129].mxu0 }
 0x31c   : > { %v10578_v52 = vadd.f32 %v8184_v24, %v8183_v0  ;;  %v8186_v15 = vpop.f32.mrb[130].mxu0 }
 0x31d   : > { %v7817_v60 = vpop.f32.mrb[124].mxu1  ;;  %8515 = vmatprep.mubr.bf16.mxu1 %v1468_v45  ;;  %v8187_v45 = vpop.f32.mrb[131].mxu0 }
 0x31e   : > { %v7818_v30 = vpop.f32.mrb[125].mxu1  ;;  %12913 = vst [vmem:[#allocation56_spill] sm:$0xff] %v10578_v52  ;;  %v10580_v33 = vadd.f32 %v8187_v45, %v8186_v15 }
 0x31f   : > { %v7819_v14 = vadd.f32 %v7818_v30, %v7817_v60  ;;  %v7820_v61 = vpop.f32.mrb[126].mxu1 }
 0x320   : > { %v7821_v59 = vpop.f32.mrb[127].mxu1  ;;  %12914 = vst [vmem:[#allocation57_spill] sm:$0xff] %v10580_v33 }
 0x321   : > { %v7822_v56 = vadd.f32 %v7821_v59, %v7820_v61  ;;  %v8189_v61 = vpop.f32.mrb[132].mxu0 }
 0x323   : > { %v1469_v17 = vpack.c.bf16 %v7822_v56, %v7819_v14  ;;  %v8190_v56 = vpop.f32.mrb[133].mxu0 }
 0x324   : > { %v10584_v14 = vadd.f32 %v8190_v56, %v8189_v61  ;;  %v8192_v0 = vpop.f32.mrb[134].mxu0 }
 0x325   : > { %v7823_v40 = vpop.f32.mrb[128].mxu1  ;;  %8516 = vmatmul.mubr.bf16.gmra.mrb[76].mxu1 %v1469_v17  ;;  %v8193_v17 = vpop.f32.mrb[135].mxu0 }
 0x326   : > { %v7824_v35 = vpop.f32.mrb[129].mxu1  ;;  %12915 = vst [vmem:[#allocation58_spill] sm:$0xff] %v10584_v14  ;;  %v10586_v5 = vadd.f32 %v8193_v17, %v8192_v0 }
 0x327   : > { %v7825_v50 = vadd.f32 %v7824_v35, %v7823_v40  ;;  %v7826_v30 = vpop.f32.mrb[130].mxu1 }
 0x328   : > { %v7827_v60 = vpop.f32.mrb[131].mxu1  ;;  %12916 = vst [vmem:[#allocation59_spill] sm:$0xff] %v10586_v5 }
 0x329   : > { %v7828_v4 = vadd.f32 %v7827_v60, %v7826_v30  ;;  %v8195_v30 = vpop.f32.mrb[136].mxu0 }
 0x32b   : > { %v1470_v59 = vpack.c.bf16 %v7828_v4, %v7825_v50  ;;  %v8196_v4 = vpop.f32.mrb[137].mxu0 }
 0x32c   : > { %v10590_v50 = vadd.f32 %v8196_v4, %v8195_v30  ;;  %v8198_v61 = vpop.f32.mrb[138].mxu0 }
 0x32d   : > { %v7829_v24 = vpop.f32.mrb[132].mxu1  ;;  %8519 = vmatprep.mubr.bf16.mxu1 %v1470_v59  ;;  %v8199_v59 = vpop.f32.mrb[139].mxu0 }
 0x32e   : > { %v7830_v47 = vpop.f32.mrb[133].mxu1  ;;  %12917 = vst [vmem:[#allocation60_spill] sm:$0xff] %v10590_v50  ;;  %v10592_v33 = vadd.f32 %v8199_v59, %v8198_v61 }
 0x32f   : > { %v7831_v15 = vadd.f32 %v7830_v47, %v7829_v24  ;;  %v7832_v35 = vpop.f32.mrb[134].mxu1 }
 0x330   : > { %v7833_v40 = vpop.f32.mrb[135].mxu1  ;;  %12918 = vst [vmem:[#allocation61_spill] sm:$0xff] %v10592_v33 }
 0x331   : > { %v7834_v58 = vadd.f32 %v7833_v40, %v7832_v35  ;;  %v8201_v35 = vpop.f32.mrb[140].mxu0 }
 0x333   : > { %v1471_v60 = vpack.c.bf16 %v7834_v58, %v7831_v15  ;;  %v8202_v58 = vpop.f32.mrb[141].mxu0 }
 0x334   : > { %v10596_v15 = vadd.f32 %v8202_v58, %v8201_v35  ;;  %v8204_v30 = vpop.f32.mrb[142].mxu0 }
 0x335   : > { %v7835_v56 = vpop.f32.mrb[136].mxu1  ;;  %8520 = vmatmul.mubr.bf16.gmra.mrb[80].mxu1 %v1471_v60  ;;  %v8205_v60 = vpop.f32.mrb[143].mxu0 }
 0x336   : > { %v7836_v52 = vpop.f32.mrb[137].mxu1  ;;  %12919 = vst [vmem:[#allocation62_spill] sm:$0xff] %v10596_v15  ;;  %v10598_v5 = vadd.f32 %v8205_v60, %v8204_v30 }
 0x337   : > { %v7837_v0 = vadd.f32 %v7836_v52, %v7835_v56  ;;  %v7838_v47 = vpop.f32.mrb[138].mxu1 }
 0x338   : > { %v7839_v24 = vpop.f32.mrb[139].mxu1  ;;  %12920 = vst [vmem:[#allocation63_spill] sm:$0xff] %v10598_v5 }
 0x339   : > { %v7840_v45 = vadd.f32 %v7839_v24, %v7838_v47  ;;  %v8207_v47 = vpop.f32.mrb[144].mxu0 }
 0x33b   : > { %v1472_v40 = vpack.c.bf16 %v7840_v45, %v7837_v0  ;;  %v8208_v45 = vpop.f32.mrb[145].mxu0 }
 0x33c   : > { %v10602_v0 = vadd.f32 %v8208_v45, %v8207_v47  ;;  %v8210_v35 = vpop.f32.mrb[146].mxu0 }
 0x33d   : > { %v7841_v4 = vpop.f32.mrb[140].mxu1  ;;  %8523 = vmatprep.mubr.bf16.mxu1 %v1472_v40  ;;  %v8211_v40 = vpop.f32.mrb[147].mxu0 }
 0x33e   : > { %v7842_v14 = vpop.f32.mrb[141].mxu1  ;;  %12921 = vst [vmem:[#allocation64_spill] sm:$0xff] %v10602_v0  ;;  %v10604_v33 = vadd.f32 %v8211_v40, %v8210_v35 }
 0x33f   : > { %v7843_v61 = vadd.f32 %v7842_v14, %v7841_v4  ;;  %v7844_v52 = vpop.f32.mrb[142].mxu1 }
 0x340   : > { %v7845_v56 = vpop.f32.mrb[143].mxu1  ;;  %12922 = vst [vmem:[#allocation65_spill] sm:$0xff] %v10604_v33 }
 0x341   : > { %v7846_v17 = vadd.f32 %v7845_v56, %v7844_v52  ;;  %v8213_v52 = vpop.f32.mrb[148].mxu0 }
 0x343   : > { %v1473_v24 = vpack.c.bf16 %v7846_v17, %v7843_v61  ;;  %v8214_v17 = vpop.f32.mrb[149].mxu0 }
 0x344   : > { %v10608_v61 = vadd.f32 %v8214_v17, %v8213_v52  ;;  %v8216_v47 = vpop.f32.mrb[150].mxu0 }
 0x345   : > { %v7847_v58 = vpop.f32.mrb[144].mxu1  ;;  %8524 = vmatmul.mubr.bf16.gmra.mrb[84].mxu1 %v1473_v24  ;;  %v8217_v24 = vpop.f32.mrb[151].mxu0 }
 0x346   : > { %v7848_v50 = vpop.f32.mrb[145].mxu1  ;;  %12923 = vst [vmem:[#allocation66_spill] sm:$0xff] %v10608_v61  ;;  %v10610_v5 = vadd.f32 %v8217_v24, %v8216_v47 }
 0x347   : > { %v7849_v30 = vadd.f32 %v7848_v50, %v7847_v58  ;;  %v7850_v14 = vpop.f32.mrb[146].mxu1 }
 0x348   : > { %v7851_v4 = vpop.f32.mrb[147].mxu1  ;;  %12924 = vst [vmem:[#allocation67_spill] sm:$0xff] %v10610_v5 }
 0x349   : > { %v7852_v59 = vadd.f32 %v7851_v4, %v7850_v14  ;;  %v8219_v14 = vpop.f32.mrb[152].mxu0 }
 0x34b   : > { %v1474_v56 = vpack.c.bf16 %v7852_v59, %v7849_v30  ;;  %v8220_v59 = vpop.f32.mrb[153].mxu0 }
 0x34c   : > { %v10614_v30 = vadd.f32 %v8220_v59, %v8219_v14  ;;  %v8222_v52 = vpop.f32.mrb[154].mxu0 }
 0x34d   : > { %v7853_v45 = vpop.f32.mrb[148].mxu1  ;;  %8527 = vmatprep.mubr.bf16.mxu1 %v1474_v56  ;;  %v8223_v56 = vpop.f32.mrb[155].mxu0 }
 0x34e   : > { %v7854_v15 = vpop.f32.mrb[149].mxu1  ;;  %v10616_v33 = vadd.f32 %v8223_v56, %v8222_v52 }
 0x34f   : > { %v7855_v35 = vadd.f32 %v7854_v15, %v7853_v45  ;;  %v7856_v50 = vpop.f32.mrb[150].mxu1 }
 0x350   : > { %v7857_v58 = vpop.f32.mrb[151].mxu1 }
 0x351   : > { %v7858_v60 = vadd.f32 %v7857_v58, %v7856_v50  ;;  %v8225_v50 = vpop.f32.mrb[156].mxu0 }
 0x353   : > { %v1475_v4 = vpack.c.bf16 %v7858_v60, %v7855_v35  ;;  %v8226_v60 = vpop.f32.mrb[157].mxu0 }
 0x354   : > { %v10620_v35 = vadd.f32 %v8226_v60, %v8225_v50  ;;  %v8228_v14 = vpop.f32.mrb[158].mxu0 }
 0x355   : > { %v7859_v17 = vpop.f32.mrb[152].mxu1  ;;  %8528 = vmatmul.mubr.bf16.gmra.mrb[88].mxu1 %v1475_v4  ;;  %v8229_v4 = vpop.f32.mrb[159].mxu0 }
 0x356   : > { %v7860_v0 = vpop.f32.mrb[153].mxu1  ;;  %v10622_v5 = vadd.f32 %v8229_v4, %v8228_v14  ;;  %v9347_v4 = vld [vmem:[#allocation10 + $0x8] sm:$0xff]  }
 0x357   : > { %v7861_v47 = vadd.f32 %v7860_v0, %v7859_v17  ;;  %v7862_v15 = vpop.f32.mrb[154].mxu1 }
 0x358   : > { %v7863_v45 = vpop.f32.mrb[155].mxu1  ;;  %v3559_v56 = vpack.c.bf16 %v10622_v5, %v10620_v35  ;;  %v9364_v5 = vld [vmem:[#allocation8 + $0x204] ss:$8 sps:$4 sm:$0xff]   ;;  %v9362_v35 = vld [vmem:[#allocation8 + $0x200] ss:$8 sps:$4 sm:$0xff]  }
 0x359   : > { %v7864_v40 = vadd.f32 %v7863_v45, %v7862_v15  ;;  %v8231_v15 = vpop.f32.mrb[160].mxu0 }
 0x35b   : > { %v1476_v58 = vpack.c.bf16 %v7864_v40, %v7861_v47  ;;  %v8232_v40 = vpop.f32.mrb[161].mxu0 }
 0x35c   : > { %v10626_v47 = vadd.f32 %v8232_v40, %v8231_v15  ;;  %v8234_v50 = vpop.f32.mrb[162].mxu0 }
 0x35d   : > { %v7865_v59 = vpop.f32.mrb[156].mxu1  ;;  %8531 = vmatprep.mubr.bf16.mxu1 %v1476_v58  ;;  %v8235_v60 = vpop.f32.mrb[163].mxu0  ;;  %v12925_v58 = vpack.c.bf16 %v10276_v16, %v10272_v10  ;;  %v12927_v10 = vpack.c.bf16 %v10300_v44, %v10296_v38  ;;  %v12928_v38 = vpack.c.bf16 %v10312_v8, %v10308_v48 }
 0x35e   : > { %v7866_v61 = vpop.f32.mrb[157].mxu1  ;;  %v10631_v14 = vadd.f32 %v8235_v60, %v8234_v50  ;;  %v9349_v60 = vld [vmem:[#allocation10 + $0x18] sm:$0xff]  }
 0x35f   : > { %v7867_v52 = vadd.f32 %v7866_v61, %v7865_v59  ;;  %v7868_v0 = vpop.f32.mrb[158].mxu1 }
 0x360   : > { %v7869_v17 = vpop.f32.mrb[159].mxu1  ;;  %v3560_v61 = vpack.c.bf16 %v10631_v14, %v10626_v47  ;;  %v9367_v47 = vld [vmem:[#allocation8 + $0x210] ss:$8 sps:$4 sm:$0xff]   ;;  %v9368_v14 = vld [vmem:[#allocation8 + $0x224] ss:$8 sps:$4 sm:$0xff]  }
 0x361   : > { %v7870_v24 = vadd.f32 %v7869_v17, %v7868_v0  ;;  %v8237_v59 = vpop.f32.mrb[164].mxu0 }
 0x362   : > { %v8238_v0 = vpop.f32.mrb[165].mxu0 }
 0x363   : > { %v1477_v45 = vpack.c.bf16 %v7870_v24, %v7867_v52  ;;  %v10635_v17 = vadd.f32 %v8238_v0, %v8237_v59  ;;  %v8240_v24 = vpop.f32.mrb[166].mxu0  ;;  %v12926_v52 = vpack.c.bf16 %v10288_v31, %v10284_v23 }
 0x364   : > { %v8241_v15 = vpop.f32.mrb[167].mxu0 }
 0x365   : > { %8532 = vmatmul.mubr.bf16.gmra.mrb[92].mxu1 %v1477_v45  ;;  %v10644_v16 = vadd.f32 %v8241_v15, %v8240_v24  ;;  %v9348_v45 = vld [vmem:[#allocation10 + $0x10] sm:$0xff]  }
 0x366   : > { %8551 = vmatprep.mubr.bf16.mxu1 %v12925_v58 }
 0x367   : > { %v3561_v40 = vpack.c.bf16 %v10644_v16, %v10635_v17  ;;  %v9371_v17 = vld [vmem:[#allocation8 + $0x234] ss:$8 sps:$4 sm:$0xff]  }
 0x368   : > { %v10838_v16 = vld [vmem:[%s12703_s3 + $0x10] sm:$0xff] }
 0x369   : > { %v8243_v50 = vpop.f32.mrb[168].mxu0 }
 0x36a   : > { %v8244_v23 = vpop.f32.mrb[169].mxu0 }
 0x36b   : > { %v10648_v31 = vadd.f32 %v8244_v23, %v8243_v50  ;;  %v8246_v58 = vpop.f32.mrb[170].mxu0  ;;  %v9352_v50 = vld [vmem:[#allocation10 + $0x30] sm:$0xff]  }
 0x36c   : > { %v8247_v44 = vpop.f32.mrb[171].mxu0 }
 0x36d   : > { %8552 = vmatmul.mubr.bf16.vlgmr.msra.gmra.mrb[64].mxu1 %v12926_v52  ;;  %v10656_v59 = vadd.f32 %v8247_v44, %v8246_v58  ;;  %v9351_v52 = vld [vmem:[#allocation10 + $0x28] sm:$0xff]   ;;  %v9353_v58 = vld [vmem:[#allocation10 + $0x38] sm:$0xff]   ;;  %v12933_v44 = vpack.c.bf16 %v10379_v7, %v10375_v36  ;;  %v12935_v7 = vpack.c.bf16 %v10407_v32, %v10403_v3 }
 0x36e   : > { %8555 = vmatprep.mubr.bf16.mxu1 %v12927_v10  ;;  %8584 = vmatpush3.bf16.msra.mxu1 %v10561_v9  ;;  %v12929_v9 = vpack.c.bf16 %v10324_v27, %v10320_v20  ;;  %v12930_v20 = vpack.c.bf16 %v10337_v53, %v10333_v39  ;;  %v12931_v10 = vpack.c.bf16 %v10351_v21, %v10347_v63 }
 0x36f   : > { %8585 = vmatprep.subr.bf16.mxu1 %v9347_v4  ;;  %v3562_v0 = vpack.c.bf16 %v10656_v59, %v10648_v31  ;;  %v12932_v63 = vpack.c.bf16 %v10365_v62, %v10361_v37  ;;  %v12934_v62 = vpack.c.bf16 %v10393_v6, %v10389_v22  ;;  %v12937_v22 = vpack.c.bf16 %v10435_v13, %v10431_v11 }
 0x370   : > { %v10845_v59 = vstv %s401_s17 }
 0x371   : > { %v8249_v24 = vpop.f32.mrb[172].mxu0 }
 0x372   : > { %8586 = vmatpush3.bf16.msra.mxu1 %v9347_v4  ;;  %v9350_v4 = vld [vmem:[#allocation10 + $0x20] sm:$0xff]   ;;  %v8250_v15 = vpop.f32.mrb[173].mxu0 }
 0x373   : > { %8587 = vmatprep.subr.bf16.mxu1 %v9348_v45  ;;  %v10660_v48 = vadd.f32 %v8250_v15, %v8249_v24  ;;  %v8252_v8 = vpop.f32.mrb[174].mxu0 }
 0x374   : > { %v8253_v27 = vpop.f32.mrb[175].mxu0 }
 0x375   : > { %8556 = vmatmul.mubr.bf16.gmra.mrb[68].mxu1 %v12928_v38 }
 0x376   : > { %8559 = vmatprep.mubr.bf16.mxu1 %v12929_v9  ;;  %8588 = vmatpush3.bf16.msra.mxu1 %v9348_v45  ;;  %v10668_v45 = vadd.f32 %v8253_v27, %v8252_v8 }
 0x377   : > { %8589 = vmatprep.subr.bf16.mxu1 %v9349_v60 }
 0x379   : > { %v8255_v23 = vpop.f32.mrb[176].mxu0 }
 0x37a   : > { %8590 = vmatpush3.bf16.msra.mxu1 %v9349_v60  ;;  %v3563_v60 = vpack.c.bf16 %v10668_v45, %v10660_v48  ;;  %v8256_v38 = vpop.f32.mrb[177].mxu0 }
 0x37b   : > { %8591 = vmatprep.subr.bf16.mxu1 %v9350_v4  ;;  %v10672_v39 = vadd.f32 %v8256_v38, %v8255_v23  ;;  %v8258_v53 = vpop.f32.mrb[178].mxu0  ;;  %v12936_v38 = vpack.c.bf16 %v10421_v18, %v10417_v12  ;;  %v12939_v12 = vpack.c.bf16 %v10452_v26, %v10450_v29  ;;  %v12943_v26 = vpack.c.bf16 %v10484_v51, %v10482_v49  ;;  %v9356_v29 = vld [vmem:[#allocation10 + $0x50] sm:$0xff]   ;;  %v12946_v51 = vld [vmem:[#allocation35_spill] sm:$0xff] }
 0x37c   : > { %v8259_v21 = vpop.f32.mrb[179].mxu0  ;;  %v12948_v49 = vld [vmem:[#allocation37_spill] sm:$0xff] }
 0x37d   : > { %8560 = vmatmul.mubr.bf16.gmra.mrb[72].mxu1 %v12930_v20  ;;  %v10680_v9 = vadd.f32 %v8259_v21, %v8258_v53 }
 0x37e   : > { %8563 = vmatprep.mubr.bf16.mxu1 %v12931_v10  ;;  %8592 = vmatpush3.bf16.msra.mxu1 %v9350_v4  ;;  %v9354_v4 = vld [vmem:[#allocation10 + $0x40] sm:$0xff]  }
 0x37f   : > { %8593 = vmatprep.subr.bf16.mxu1 %v9351_v52  ;;  %v3564_v24 = vpack.c.bf16 %v10680_v9, %v10672_v39 }
 0x382   : > { %8594 = vmatpush3.bf16.msra.mxu1 %v9351_v52  ;;  %v8261_v52 = vpop.f32.mrb[180].mxu0 }
 0x383   : > { %8595 = vmatprep.subr.bf16.mxu1 %v9352_v50  ;;  %v8262_v15 = vpop.f32.mrb[181].mxu0 }
 0x384   : > { %v10684_v8 = vadd.f32 %v8262_v15, %v8261_v52  ;;  %v8264_v37 = vpop.f32.mrb[182].mxu0  ;;  %v12938_v52 = vpack.c.bf16 %v10444_v46, %v10442_v55  ;;  %v12940_v15 = vpack.c.bf16 %v10460_v19, %v10458_v34  ;;  %v9355_v46 = vld [vmem:[#allocation10 + $0x48] sm:$0xff]   ;;  %v12942_v55 = vpack.c.bf16 %v10476_v28, %v10474_v54  ;;  %v9357_v19 = vld [vmem:[#allocation10 + $0x58] sm:$0xff]   ;;  %v9358_v28 = vld [vmem:[#allocation10 + $0x60] sm:$0xff]  }
 0x385   : > { %8564 = vmatmul.mubr.bf16.gmra.mrb[76].mxu1 %v12932_v63  ;;  %v8265_v36 = vpop.f32.mrb[183].mxu0  ;;  %v12944_v34 = vpack.c.bf16 %v10495_v1, %v10492_v41  ;;  %v12947_v54 = vpack.c.bf16 %v10510_v42, %v12946_v51  ;;  %v9360_v41 = vld [vmem:[#allocation10 + $0x70] sm:$0xff]   ;;  %v9361_v1 = vld [vmem:[#allocation10 + $0x78] sm:$0xff]   ;;  %v12957_v42 = vld [vmem:[#allocation19_spill] sm:$0xff] }
 0x386   : > { %8567 = vmatprep.mubr.bf16.mxu1 %v12933_v44  ;;  %8596 = vmatpush3.bf16.msra.mxu1 %v9352_v50  ;;  %v10692_v20 = vadd.f32 %v8265_v36, %v8264_v37  ;;  %v12941_v37 = vpack.c.bf16 %v10468_v43, %v10466_v25  ;;  %v12945_v43 = vpack.c.bf16 %v10503_v57, %v10501_v2  ;;  %v9359_v25 = vld [vmem:[#allocation10 + $0x68] sm:$0xff]   ;;  %v12951_v2 = vld [vmem:[#allocation39_spill] sm:$0xff]  ;;  %v12952_v57 = vld [vmem:[#allocation38_spill] sm:$0xff] }
 0x387   : > { %8597 = vmatprep.subr.bf16.mxu1 %v9353_v58  ;;  %v12953_v36 = vpack.c.bf16 %v12951_v2, %v12952_v57  ;;  %v12979_v51 = vld [vmem:[#allocation57_spill] sm:$0xff]  ;;  %v12986_v2 = vld [vmem:[#allocation60_spill] sm:$0xff] }
 0x388   : > { %v3565_v27 = vpack.c.bf16 %v10692_v20, %v10684_v8  ;;  %v9374_v8 = vld [vmem:[#allocation8 + $0x244] ss:$8 sps:$4 sm:$0xff]  }
 0x389   : > { %v8267_v10 = vpop.f32.mrb[184].mxu0 }
 0x38a   : > { %8598 = vmatpush3.bf16.msra.mxu1 %v9353_v58  ;;  %v8268_v50 = vpop.f32.mrb[185].mxu0 }
 0x38b   : > { %8631 = vmatprep.subr.bf16.mxu1 %v9354_v4  ;;  %v10696_v23 = vadd.f32 %v8268_v50, %v8267_v10  ;;  %v8270_v58 = vpop.f32.mrb[186].mxu0  ;;  %v12955_v10 = vld [vmem:[#allocation40_spill] sm:$0xff] }
 0x38c   : > { %v8271_v6 = vpop.f32.mrb[187].mxu0 }
 0x38d   : > { %8568 = vmatmul.mubr.bf16.gmra.mrb[80].mxu1 %v12934_v62  ;;  %v10704_v3 = vadd.f32 %v8271_v6, %v8270_v58  ;;  %v12958_v58 = vld [vmem:[#allocation43_spill] sm:$0xff] }
 0x38e   : > { %8571 = vmatprep.mubr.bf16.mxu1 %v12935_v7  ;;  %v12954_v7 = vld [vmem:[#allocation41_spill] sm:$0xff] }
 0x38f   : > { %v3566_v32 = vpack.c.bf16 %v10704_v3, %v10696_v23  ;;  %v12956_v50 = vpack.c.bf16 %v12954_v7, %v12955_v10  ;;  %v12989_v7 = vld [vmem:[#allocation21_spill] sm:$0xff]  ;;  %v12990_v10 = vld [vmem:[#allocation22_spill] sm:$0xff] }
 0x391   : > { %v8273_v53 = vpop.f32.mrb[188].mxu0 }
 0x392   : > { %v8274_v63 = vpop.f32.mrb[189].mxu0 }
 0x393   : > { %v10708_v21 = vadd.f32 %v8274_v63, %v8273_v53  ;;  %v8276_v44 = vpop.f32.mrb[190].mxu0  ;;  %v12962_v53 = vld [vmem:[#allocation44_spill] sm:$0xff] }
 0x394   : > { %v8277_v18 = vpop.f32.mrb[191].mxu0 }
 0x395   : > { %8572 = vmatmul.mubr.bf16.gmra.mrb[84].mxu1 %v12936_v38  ;;  %v10716_v13 = vadd.f32 %v8277_v18, %v8276_v44  ;;  %v12959_v38 = vld [vmem:[#allocation42_spill] sm:$0xff]  ;;  %v12964_v44 = vld [vmem:[#allocation47_spill] sm:$0xff] }
 0x396   : > { %8575 = vmatprep.mubr.bf16.mxu1 %v12937_v22  ;;  %v12960_v6 = vpack.c.bf16 %v12958_v58, %v12959_v38  ;;  %v12961_v22 = vld [vmem:[#allocation45_spill] sm:$0xff]  ;;  %v12993_v58 = vld [vmem:[#allocation62_spill] sm:$0xff] }
 0x397   : > { %v3567_v11 = vpack.c.bf16 %v10716_v13, %v10708_v21  ;;  %v12963_v63 = vpack.c.bf16 %v12961_v22, %v12962_v53  ;;  %v12996_v22 = vld [vmem:[#allocation64_spill] sm:$0xff] }
 0x39d   : > { %8576 = vmatmul.mubr.bf16.gmra.mrb[88].mxu1 %v12938_v52  ;;  %v12965_v52 = vld [vmem:[#allocation46_spill] sm:$0xff] }
 0x39e   : > { %8579 = vmatprep.mubr.bf16.mxu1 %v12939_v12  ;;  %v12966_v18 = vpack.c.bf16 %v12964_v44, %v12965_v52  ;;  %v12967_v12 = vld [vmem:[#allocation49_spill] sm:$0xff]  ;;  %v13000_v52 = vld [vmem:[#allocation26_spill] sm:$0xff] }
 0x39f   : > { %v12999_v44 = vld [vmem:[#allocation25_spill] sm:$0xff] }
 0x3a5   : > { %8580 = vmatmul.mubr.bf16.gmra.mrb[92].mxu1 %v12940_v15  ;;  %v12968_v15 = vld [vmem:[#allocation48_spill] sm:$0xff] }
 0x3a6   : > { %8599 = vmatprep.mubr.bf16.mxu1 %v12941_v37  ;;  %v12969_v37 = vpack.c.bf16 %v12967_v12, %v12968_v15  ;;  %v13002_v12 = vld [vmem:[#allocation67_spill] sm:$0xff]  ;;  %v13003_v15 = vld [vmem:[#allocation66_spill] sm:$0xff] }
 0x3ad   : > { %8600 = vmatmul.mubr.bf16.vlgmr.msra.gmra.mrb[160].mxu1 %v12942_v55  ;;  %v12971_v55 = vld [vmem:[#allocation50_spill] sm:$0xff] }
 0x3ae   : > { %8603 = vmatprep.mubr.bf16.mxu1 %v12943_v26  ;;  %8632 = vmatpush3.bf16.msra.mxu1 %v9354_v4  ;;  %v12949_v4 = vld [vmem:[#allocation36_spill] sm:$0xff] }
 0x3af   : > { %8633 = vmatprep.subr.bf16.mxu1 %v9355_v46  ;;  %v12950_v62 = vpack.c.bf16 %v12948_v49, %v12949_v4  ;;  %v12982_v4 = vld [vmem:[#allocation59_spill] sm:$0xff] }
 0x3b2   : > { %8634 = vmatpush3.bf16.msra.mxu1 %v9355_v46  ;;  %v12970_v46 = vld [vmem:[#allocation51_spill] sm:$0xff] }
 0x3b3   : > { %8635 = vmatprep.subr.bf16.mxu1 %v9356_v29  ;;  %v12972_v26 = vpack.c.bf16 %v12970_v46, %v12971_v55  ;;  %v13005_v46 = vpack.c.bf16 %v10616_v33, %v10614_v30  ;;  %v13006_v55 = vld [vmem:[#allocation28_spill] sm:$0xff]  ;;  %v13011_v33 = vld [vmem:[#allocation33_spill] sm:$0xff]  ;;  %v13012_v30 = vld [vmem:[#allocation34_spill] sm:$0xff] }
 0x3b5   : > { %8604 = vmatmul.mubr.bf16.gmra.mrb[164].mxu1 %v12944_v34 }
 0x3b6   : > { %8607 = vmatprep.mubr.bf16.mxu1 %v12945_v43  ;;  %8636 = vmatpush3.bf16.msra.mxu1 %v9356_v29  ;;  %v12973_v29 = vld [vmem:[#allocation53_spill] sm:$0xff]  ;;  %v12976_v43 = vld [vmem:[#allocation55_spill] sm:$0xff] }
 0x3b7   : > { %8637 = vmatprep.subr.bf16.mxu1 %v9357_v19 }
 0x3ba   : > { %8638 = vmatpush3.bf16.msra.mxu1 %v9357_v19  ;;  %v12974_v19 = vld [vmem:[#allocation52_spill] sm:$0xff] }
 0x3bb   : > { %8639 = vmatprep.subr.bf16.mxu1 %v9358_v28  ;;  %v12975_v34 = vpack.c.bf16 %v12973_v29, %v12974_v19  ;;  %v13008_v29 = vld [vmem:[#allocation30_spill] sm:$0xff]  ;;  %v13009_v19 = vld [vmem:[#allocation31_spill] sm:$0xff] }
 0x3bd   : > { %8608 = vmatmul.mubr.bf16.gmra.mrb[168].mxu1 %v12947_v54  ;;  %v12980_v54 = vld [vmem:[#allocation56_spill] sm:$0xff] }
 0x3be   : > { %8611 = vmatprep.mubr.bf16.mxu1 %v12950_v62  ;;  %8640 = vmatpush3.bf16.msra.mxu1 %v9358_v28  ;;  %v12977_v28 = vld [vmem:[#allocation54_spill] sm:$0xff]  ;;  %v12981_v49 = vpack.c.bf16 %v12979_v51, %v12980_v54 }
 0x3bf   : > { %8641 = vmatprep.subr.bf16.mxu1 %v9359_v25  ;;  %v12983_v62 = vld [vmem:[#allocation58_spill] sm:$0xff] }
 0x3c2   : > { %8642 = vmatpush3.bf16.msra.mxu1 %v9359_v25  ;;  %v12978_v25 = vpack.c.bf16 %v12976_v43, %v12977_v28 }
 0x3c3   : > { %8643 = vmatprep.subr.bf16.mxu1 %v9360_v41 }
 0x3c5   : > { %8612 = vmatmul.mubr.bf16.gmra.mrb[172].mxu1 %v12953_v36  ;;  %v12988_v36 = vld [vmem:[#allocation20_spill] sm:$0xff] }
 0x3c6   : > { %8615 = vmatprep.mubr.bf16.mxu1 %v12956_v50  ;;  %8644 = vmatpush3.bf16.msra.mxu1 %v9360_v41  ;;  %v12984_v41 = vpack.c.bf16 %v12982_v4, %v12983_v62  ;;  %v12991_v50 = vld [vmem:[#allocation23_spill] sm:$0xff] }
 0x3c7   : > { %8645 = vmatprep.subr.bf16.mxu1 %v9361_v1 }
 0x3ca   : > { %8646 = vmatpush3.bf16.msra.mxu1 %v9361_v1  ;;  %v12985_v1 = vld [vmem:[#allocation61_spill] sm:$0xff] }
 0x3cb   : > { %8303 = vmatprep.subr.bf16.mxu1 %v12957_v42  ;;  %v12987_v57 = vpack.c.bf16 %v12985_v1, %v12986_v2  ;;  %v12992_v42 = vld [vmem:[#allocation63_spill] sm:$0xff] }
 0x3cc   : > { %v12994_v38 = vpack.c.bf16 %v12992_v42, %v12993_v58  ;;  %v9376_v1 = vld [vmem:[#allocation8 + $0x240] ss:$8 sps:$4 sm:$0xff]  }
 0x3cd   : > { %8616 = vmatmul.mubr.bf16.gmra.mrb[176].mxu1 %v12960_v6  ;;  %v12995_v6 = vld [vmem:[#allocation65_spill] sm:$0xff] }
 0x3ce   : > { %8619 = vmatprep.mubr.bf16.mxu1 %v12963_v63  ;;  %v12997_v53 = vpack.c.bf16 %v12995_v6, %v12996_v22  ;;  %v12998_v63 = vld [vmem:[#allocation24_spill] sm:$0xff]  ;;  %v10910_v6 = vld [vmem:[%s12703_s3 + $0x50] sm:$0xff]  ;;  %v9410_v22 = vld [vmem:[#allocation10 + $0x80] sm:$0xff]  }
 0x3d5   : > { %8620 = vmatmul.mubr.bf16.gmra.mrb[180].mxu1 %v12966_v18  ;;  %v13001_v18 = vld [vmem:[#allocation27_spill] sm:$0xff] }
 0x3d6   : > { %8623 = vmatprep.mubr.bf16.mxu1 %v12969_v37  ;;  %v13004_v37 = vpack.c.bf16 %v13002_v12, %v13003_v15 }
 0x3dd   : > { %8624 = vmatmul.mubr.bf16.gmra.mrb[184].mxu1 %v12972_v26  ;;  %v13007_v26 = vld [vmem:[#allocation29_spill] sm:$0xff] }
 0x3de   : > { %8627 = vmatprep.mubr.bf16.mxu1 %v12975_v34  ;;  %v13010_v34 = vld [vmem:[#allocation32_spill] sm:$0xff] }
 0x3e5   : > { %8628 = vmatmul.mubr.bf16.gmra.mrb[188].mxu1 %v12978_v25  ;;  %v10880_v25 = vld [vmem:[%s12703_s3 + $0x38] sm:$0xff] }
 0x3e6   : > { %8647 = vmatprep.mubr.bf16.mxu1 %v12981_v49  ;;  %v10887_v49 = vld [vmem:[%s12703_s3 + $0x20] sm:$0xff] }
 0x3ed   : > { %8648 = vmatmul.mubr.bf16.vlgmr.msra.gmra.mrb[160].mxu1 %v12984_v41  ;;  %v10894_v41 = vld [vmem:[%s12703_s3 + $0x28] sm:$0xff] }
 0x3ee   : > { %8651 = vmatprep.mubr.bf16.mxu1 %v12987_v57  ;;  %8304 = vmatpush3.bf16.msra.mxu1 %v12988_v36  ;;  %v9377_v57 = vld [vmem:[#allocation8 + $0x254] ss:$8 sps:$4 sm:$0xff]  }
 0x3ef   : > { %8305 = vmatprep.subr.bf16.mxu1 %v12989_v7 }
 0x3f2   : > { %8306 = vmatpush3.bf16.msra.mxu1 %v12990_v10 }
 0x3f3   : > { %8307 = vmatprep.subr.bf16.mxu1 %v12991_v50 }
 0x3f5   : > { %8652 = vmatmul.mubr.bf16.gmra.mrb[164].mxu1 %v12994_v38 }
 0x3f6   : > { %8655 = vmatprep.mubr.bf16.mxu1 %v12997_v53  ;;  %8308 = vmatpush3.bf16.msra.mxu1 %v12998_v63 }
 0x3f7   : > { %8309 = vmatprep.subr.bf16.mxu1 %v12999_v44 }
 0x3fa   : > { %8310 = vmatpush3.bf16.msra.mxu1 %v13000_v52 }
 0x3fb   : > { %8311 = vmatprep.subr.bf16.mxu1 %v13001_v18  ;;  %v10921_v18 = vld [vmem:[%s12703_s3 + $0x58] sm:$0xff] }
 0x3fd   : > { %8656 = vmatmul.mubr.bf16.gmra.mrb[168].mxu1 %v13004_v37 }
 0x3fe   : > { %8659 = vmatprep.mubr.bf16.mxu1 %v13005_v46  ;;  %8312 = vmatpush3.bf16.msra.mxu1 %v13006_v55  ;;  %v10929_v46 = vld [vmem:[%s12703_s3 + $0x48] sm:$0xff]  ;;  %v9379_v55 = vld [vmem:[#allocation8 + $0x250] ss:$8 sps:$4 sm:$0xff]  }
 0x3ff   : > { %8313 = vmatprep.subr.bf16.mxu1 %v13007_v26  ;;  %v10934_v26 = vld [vmem:[%s12703_s3 + $0x40] sm:$0xff] }
 0x402   : > { %8314 = vmatpush3.bf16.msra.mxu1 %v13008_v29 }
 0x403   : > { %8315 = vmatprep.subr.bf16.mxu1 %v13009_v19  ;;  %v9380_v19 = vld [vmem:[#allocation8 + $0x264] ss:$8 sps:$4 sm:$0xff]  }
 0x405   : > { %8660 = vmatmul.mubr.bf16.gmra.mrb[172].mxu1 %v3559_v56  ;;  %v9365_v56 = vld [vmem:[#allocation8 + $0x214] ss:$8 sps:$4 sm:$0xff]  }
 0x406   : > { %8663 = vmatprep.mubr.bf16.mxu1 %v3560_v61  ;;  %8316 = vmatpush3.bf16.msra.mxu1 %v13010_v34  ;;  %v9370_v61 = vld [vmem:[#allocation8 + $0x220] ss:$8 sps:$4 sm:$0xff]  }
 0x407   : > { %8317 = vmatprep.subr.bf16.mxu1 %v13011_v33 }
 0x40a   : > { %8318 = vmatpush3.bf16.msra.mxu1 %v13012_v30 }
 0x40b   : > { %8679 = vmatprep.subr.bf16.mxu1 %v9410_v22 }
 0x40d   : > { %8664 = vmatmul.mubr.bf16.gmra.mrb[176].mxu1 %v3561_v40  ;;  %v10843_v40 = vld [vmem:[%s12703_s3] sm:$0xff] }
 0x40e   : > { %8667 = vmatprep.mubr.bf16.mxu1 %v3562_v0  ;;  %v10850_v0 = vld [vmem:[%s12703_s3 + $0x18] sm:$0xff] }
 0x415   : > { %8668 = vmatmul.mubr.bf16.gmra.mrb[180].mxu1 %v3563_v60  ;;  %v9373_v60 = vld [vmem:[#allocation8 + $0x230] ss:$8 sps:$4 sm:$0xff]  }
 0x416   : > { %8671 = vmatprep.mubr.bf16.mxu1 %v3564_v24  ;;  %v10857_v24 = vld [vmem:[%s12703_s3 + $0x8] sm:$0xff] }
 0x41d   : > { %8672 = vmatmul.mubr.bf16.gmra.mrb[184].mxu1 %v3565_v27 }
 0x41e   : > { %8675 = vmatprep.mubr.bf16.mxu1 %v3566_v32 }
 0x425   : > { %8676 = vmatmul.mubr.bf16.gmra.mrb[188].mxu1 %v3567_v11  ;;  %v10871_v11 = vld [vmem:[%s12703_s3 + $0x30] sm:$0xff] }
 0x426   : > { %4049 = vmatprep.mubr.bf16.mxu1 %v9364_v5 }
 0x42d   : > { %4050 = vmatmul.mubr.bf16.vlgmr.msra.gmra.mrb[192].mxu1 %v9362_v35 }
 0x42e   : > { %4057 = vmatprep.mubr.bf16.mxu1 %v9365_v56  ;;  %8680 = vmatpush3.bf16.msra.mxu1 %v9410_v22  ;;  %v11009_v22 = vld [vmem:[%s12703_s3 + $0x98] sm:$0xff] }
 0x435   : > { %4058 = vmatmul.mubr.bf16.gmra.mrb[196].mxu1 %v9367_v47 }
 0x436   : > { %4065 = vmatprep.mubr.bf16.mxu1 %v9368_v14 }
 0x43d   : > { %4066 = vmatmul.mubr.bf16.gmra.mrb[200].mxu1 %v9370_v61  ;;  %v10954_v61 = vld [vmem:[%s12703_s3 + $0x70] sm:$0xff] }
 0x43e   : > { %4073 = vmatprep.mubr.bf16.mxu1 %v9371_v17 }
 0x440   : > { %v8553_v31 = vpop.f32.mrb[64].mxu1 }
 0x441   : > { %v8727_v48 = vadd.f32 %v8553_v31, %v10838_v16  ;;  %v2205_v45 = vpop.f32.mrb[65].mxu1 }
 0x442   : > { %v8728_v39 = vadd.f32 %v2205_v45, %v10843_v40  ;;  %v8554_v9 = vpop.f32.mrb[66].mxu1  ;;  %v10964_v45 = vld [vmem:[%s12703_s3 + $0x78] sm:$0xff] }
 0x443   : > { %v2399_v20 = vmul.f32 %v8727_v48, %v10845_v59  ;;  %v8729_v27 = vadd.f32 %v8554_v9, %v10850_v0  ;;  %v2208_v23 = vpop.f32.mrb[67].mxu1  ;;  %vm2366_vm0 = vcmp.ge.f32.partialorder %v8727_v48, 0.0  ;;  %v10971_v9 = vld [vmem:[%s12703_s3 + $0x60] sm:$0xff] }
 0x444   : > { %v2397_v3 = vmul.f32 %v8728_v39, %v10845_v59  ;;  %v8730_v21 = vadd.f32 %v2208_v23, %v10857_v24  ;;  %vm2364_vm2 = vcmp.ge.f32.partialorder %v8728_v39, 0.0  ;;  %v9382_v23 = vld [vmem:[#allocation8 + $0x260] ss:$8 sps:$4 sm:$0xff]  }
 0x445   : > { %v2400_v32 = vmul.f32 %v8729_v27, %v10845_v59  ;;  %4074 = vmatmul.mubr.bf16.gmra.mrb[204].mxu1 %v9373_v60  ;;  %v10864_v13 = vsel %vm2366_vm0, %v8727_v48, %v2399_v20  ;;  %vm2367_vm1 = vcmp.ge.f32.partialorder %v8729_v27, 0.0 }
 0x446   : > { %4712 = vrot.lane.b32.xlu0 %v10864_v13, %s9766_s21  ;;  %4081 = vmatprep.mubr.bf16.mxu1 %v9374_v8  ;;  %v2398_v51 = vmul.f32 %v8730_v21, %v10845_v59  ;;  %v10889_v62 = vsel %vm2364_vm2, %v8728_v39, %v2397_v3  ;;  %vm2365_vm3 = vcmp.ge.f32.partialorder %v8730_v21, 0.0 }
 0x447   : > { %v10873_v43 = vsel %vm2367_vm1, %v8729_v27, %v2400_v32  ;;  %13013 = vst [vmem:[#allocation35_spill] sm:$0xff] %v10889_v62  ;;  %v10978_v27 = vld [vmem:[%s12703_s3 + $0x68] sm:$0xff]  ;;  %v9383_v32 = vld [vmem:[#allocation8 + $0x274] ss:$8 sps:$4 sm:$0xff]  }
 0x448   : > { %v8557_v28 = vpop.f32.mrb[68].mxu1  ;;  %4714 = vrot.lane.b32.xlu1 %v10873_v43, %s9766_s21  ;;  %v10903_v38 = vsel %vm2365_vm3, %v8730_v21, %v2398_v51 }
 0x449   : > { %v8731_v54 = vadd.f32 %v8557_v28, %v10871_v11  ;;  %v2221_v4 = vpop.f32.mrb[69].mxu1  ;;  %13014 = vst [vmem:[#allocation37_spill] sm:$0xff] %v10903_v38 }
 0x44a   : > { %v8558_v2 = vpop.f32.mrb[70].mxu1  ;;  %4708 = vrot.lane.b32.xlu0 %v10889_v62, %s9766_s21  ;;  %v8732_v10 = vadd.f32 %v2221_v4, %v10887_v49 }
 0x44b   : > { %v8733_v36 = vadd.f32 %v8558_v2, %v10880_v25  ;;  %v2224_v7 = vpop.f32.mrb[71].mxu1  ;;  %v2403_v42 = vmul.f32 %v8731_v54, %v10845_v59  ;;  %vm2370_vm5 = vcmp.ge.f32.partialorder %v8731_v54, 0.0 }
 0x44c   : > { %v8734_v50 = vadd.f32 %v2224_v7, %v10894_v41  ;;  %v2401_v44 = vmul.f32 %v8732_v10, %v10845_v59  ;;  %vm2368_vm7 = vcmp.ge.f32.partialorder %v8732_v10, 0.0  ;;  %v9411_v7 = vld [vmem:[#allocation10 + $0x88] sm:$0xff]  }
 0x44d   : > { %v2404_v58 = vmul.f32 %v8733_v36, %v10845_v59  ;;  %4082 = vmatmul.mubr.bf16.gmra.mrb[208].mxu1 %v9376_v1  ;;  %vm2371_vm4 = vcmp.ge.f32.partialorder %v8733_v36, 0.0  ;;  %v10924_v37 = vsel %vm2370_vm5, %v8731_v54, %v2403_v42  ;;  %8681 = vmatprep.subr.bf16.mxu1 %v9411_v7 }
 0x44e   : > { %4710 = vrot.lane.b32.xlu0 %v10903_v38, %s9766_s21  ;;  %4089 = vmatprep.mubr.bf16.mxu1 %v9377_v57  ;;  %v2402_v53 = vmul.f32 %v8734_v50, %v10845_v59  ;;  %vm2369_vm6 = vcmp.ge.f32.partialorder %v8734_v50, 0.0  ;;  %v10944_v35 = vsel %vm2368_vm7, %v8732_v10, %v2401_v44 }
 0x44f   : > { %v10913_v63 = vsel %vm2371_vm4, %v8733_v36, %v2404_v58  ;;  %v10998_v36 = vld [vmem:[%s12703_s3 + $0x90] sm:$0xff]  ;;  %8682 = vmatpush3.bf16.msra.mxu1 %v9411_v7 }
 0x450   : > { %v8561_v52 = vpop.f32.mrb[72].mxu1  ;;  %4722 = vrot.lane.b32.xlu1 %v10913_v63, %s9766_s21  ;;  %v10939_v30 = vsel %vm2369_vm6, %v8734_v50, %v2402_v53 }
 0x451   : > { %v8735_v12 = vadd.f32 %v8561_v52, %v10910_v6  ;;  %v2237_v15 = vpop.f32.mrb[73].mxu1 }
 0x452   : > { %v8562_v29 = vpop.f32.mrb[74].mxu1  ;;  %4720 = vrot.lane.b32.xlu0 %v10924_v37, %s9766_s21  ;;  %v8736_v47 = vadd.f32 %v2237_v15, %v10934_v26  ;;  %v9385_v15 = vld [vmem:[#allocation8 + $0x270] ss:$8 sps:$4 sm:$0xff]  }
 0x453   : > { %v8737_v34 = vadd.f32 %v8562_v29, %v10921_v18  ;;  %v2240_v33 = vpop.f32.mrb[75].mxu1  ;;  %v2407_v56 = vmul.f32 %v8735_v12, %v10845_v59  ;;  %vm2374_vm9 = vcmp.ge.f32.partialorder %v8735_v12, 0.0 }
 0x454   : > { %v8738_v5 = vadd.f32 %v2240_v33, %v10929_v46  ;;  %4718 = vrot.lane.b32.xlu1 %v10939_v30, %s9766_s21  ;;  %v2405_v60 = vmul.f32 %v8736_v47, %v10845_v59  ;;  %vm2372_vm11 = vcmp.ge.f32.partialorder %v8736_v47, 0.0 }
 0x455   : > { %v2408_v14 = vmul.f32 %v8737_v34, %v10845_v59  ;;  %4090 = vmatmul.mubr.bf16.gmra.mrb[212].mxu1 %v9379_v55  ;;  %vm2375_vm8 = vcmp.ge.f32.partialorder %v8737_v34, 0.0  ;;  %v10973_v20 = vsel %vm2374_vm9, %v8735_v12, %v2407_v56  ;;  %v11017_v12 = vld [vmem:[%s12703_s3 + $0x88] sm:$0xff]  ;;  %v11022_v55 = vld [vmem:[%s12703_s3 + $0x80] sm:$0xff] }
 0x456   : > { %4716 = vrot.lane.b32.xlu0 %v10944_v35, %s9766_s21  ;;  %4097 = vmatprep.mubr.bf16.mxu1 %v9380_v19  ;;  %v2406_v17 = vmul.f32 %v8738_v5, %v10845_v59  ;;  %vm2373_vm10 = vcmp.ge.f32.partialorder %v8738_v5, 0.0  ;;  %v10991_v57 = vsel %vm2372_vm11, %v8736_v47, %v2405_v60  ;;  %v9386_v19 = vld [vmem:[#allocation8 + $0x284] ss:$8 sps:$4 sm:$0xff]   ;;  %v11042_v60 = vld [vmem:[%s12703_s3 + $0xb0] sm:$0xff] }
 0x457   : > { %v10957_v31 = vsel %vm2375_vm8, %v8737_v34, %v2408_v14 }
 0x458   : > { %13015 = vst [vmem:[#allocation36_spill] sm:$0xff] %v10957_v31  ;;  %v8565_v48 = vpop.f32.mrb[76].mxu1  ;;  %4730 = vrot.lane.b32.xlu1 %v10957_v31, %s9766_s21  ;;  %v10983_v51 = vsel %vm2373_vm10, %v8738_v5, %v2406_v17 }
 0x459   : > { %v8739_v39 = vadd.f32 %v8565_v48, %v10954_v61  ;;  %v2253_v8 = vpop.f32.mrb[77].mxu1 }
 0x45a   : > { %v8566_v3 = vpop.f32.mrb[78].mxu1  ;;  %4728 = vrot.lane.b32.xlu0 %v10973_v20, %s9766_s21  ;;  %v8740_v54 = vadd.f32 %v2253_v8, %v10971_v9 }
 0x45b   : > { %v8741_v21 = vadd.f32 %v8566_v3, %v10964_v45  ;;  %v2256_v28 = vpop.f32.mrb[79].mxu1  ;;  %v2411_v1 = vmul.f32 %v8739_v39, %v10845_v59  ;;  %vm2378_vm13 = vcmp.ge.f32.partialorder %v8739_v39, 0.0  ;;  %v11052_v3 = vld [vmem:[%s12703_s3 + $0xb8] sm:$0xff] }
 0x45c   : > { %v8742_v4 = vadd.f32 %v2256_v28, %v10978_v27  ;;  %4726 = vrot.lane.b32.xlu1 %v10983_v51, %s9766_s21  ;;  %v2409_v42 = vmul.f32 %v8740_v54, %v10845_v59  ;;  %vm2376_vm15 = vcmp.ge.f32.partialorder %v8740_v54, 0.0  ;;  %v11059_v28 = vld [vmem:[%s12703_s3 + $0xa0] sm:$0xff] }
 0x45d   : > { %v2412_v2 = vmul.f32 %v8741_v21, %v10845_v59  ;;  %4098 = vmatmul.mubr.bf16.gmra.mrb[216].mxu1 %v9382_v23  ;;  %vm2379_vm12 = vcmp.ge.f32.partialorder %v8741_v21, 0.0  ;;  %v11012_v52 = vsel %vm2378_vm13, %v8739_v39, %v2411_v1  ;;  %v11066_v1 = vld [vmem:[%s12703_s3 + $0xa8] sm:$0xff] }
 0x45e   : > { %4724 = vrot.lane.b32.xlu0 %v10991_v57, %s9766_s21  ;;  %4105 = vmatprep.mubr.bf16.mxu1 %v9383_v32  ;;  %v2410_v10 = vmul.f32 %v8742_v4, %v10845_v59  ;;  %vm2377_vm14 = vcmp.ge.f32.partialorder %v8742_v4, 0.0  ;;  %13017 = vst [vmem:[#allocation38_spill] sm:$0xff] %v11012_v52  ;;  %v11032_v47 = vsel %vm2376_vm15, %v8740_v54, %v2409_v42 }
 0x45f   : > { %v11001_v50 = vsel %vm2379_vm12, %v8741_v21, %v2412_v2  ;;  %13019 = vst [vmem:[#allocation40_spill] sm:$0xff] %v11032_v47  ;;  %v9388_v2 = vld [vmem:[#allocation8 + $0x280] ss:$8 sps:$4 sm:$0xff]  }
 0x460   : > { %13016 = vst [vmem:[#allocation39_spill] sm:$0xff] %v11001_v50  ;;  %v8569_v58 = vpop.f32.mrb[80].mxu1  ;;  %4738 = vrot.lane.b32.xlu1 %v11001_v50, %s9766_s21  ;;  %v11027_v5 = vsel %vm2377_vm14, %v8742_v4, %v2410_v10  ;;  %v9389_v10 = vld [vmem:[#allocation8 + $0x294] ss:$8 sps:$4 sm:$0xff]  }
 0x461   : > { %v8743_v53 = vadd.f32 %v8569_v58, %v10998_v36  ;;  %v2269_v44 = vpop.f32.mrb[81].mxu1  ;;  %13018 = vst [vmem:[#allocation41_spill] sm:$0xff] %v11027_v5 }
 0x462   : > { %v8570_v29 = vpop.f32.mrb[82].mxu1  ;;  %4736 = vrot.lane.b32.xlu0 %v11012_v52, %s9766_s21  ;;  %v8744_v17 = vadd.f32 %v2269_v44, %v11022_v55 }
 0x463   : > { %v8745_v34 = vadd.f32 %v8570_v29, %v11009_v22  ;;  %v2272_v33 = vpop.f32.mrb[83].mxu1  ;;  %v2415_v14 = vmul.f32 %v8743_v53, %v10845_v59  ;;  %vm2382_vm1 = vcmp.ge.f32.partialorder %v8743_v53, 0.0 }
 0x464   : > { %v8746_v56 = vadd.f32 %v2272_v33, %v11017_v12  ;;  %4734 = vrot.lane.b32.xlu1 %v11027_v5, %s9766_s21  ;;  %v2413_v32 = vmul.f32 %v8744_v17, %v10845_v59  ;;  %vm2380_vm3 = vcmp.ge.f32.partialorder %v8744_v17, 0.0  ;;  %v11086_v33 = vld [vmem:[%s12703_s3 + $0xd0] sm:$0xff] }
 0x465   : > { %v2416_v48 = vmul.f32 %v8745_v34, %v10845_v59  ;;  %4106 = vmatmul.mubr.bf16.gmra.mrb[220].mxu1 %v9385_v15  ;;  %vm2383_vm0 = vcmp.ge.f32.partialorder %v8745_v34, 0.0  ;;  %v11061_v4 = vsel %vm2382_vm1, %v8743_v53, %v2415_v14 }
 0x466   : > { %4732 = vrot.lane.b32.xlu0 %v11032_v47, %s9766_s21  ;;  %4113 = vmatprep.mubr.bf16.mxu1 %v9386_v19  ;;  %v2414_v39 = vmul.f32 %v8746_v56, %v10845_v59  ;;  %vm2381_vm2 = vcmp.ge.f32.partialorder %v8746_v56, 0.0  ;;  %13021 = vst [vmem:[#allocation43_spill] sm:$0xff] %v11061_v4 }
 0x467   : > { %v11045_v8 = vsel %vm2383_vm0, %v8745_v34, %v2416_v48  ;;  %v11079_v34 = vsel %vm2380_vm3, %v8744_v17, %v2413_v32 }
 0x468   : > { %13020 = vst [vmem:[#allocation19_spill] sm:$0xff] %v11045_v8  ;;  %v8573_v23 = vpop.f32.mrb[84].mxu1  ;;  %4746 = vrot.lane.b32.xlu1 %v11045_v8, %s9766_s21  ;;  %v11071_v44 = vsel %vm2381_vm2, %v8746_v56, %v2414_v39  ;;  %13023 = vst [vmem:[#allocation45_spill] sm:$0xff] %v11079_v34  ;;  %v9412_v56 = vld [vmem:[#allocation10 + $0x90] sm:$0xff]   ;;  %v9413_v8 = vld [vmem:[#allocation10 + $0x98] sm:$0xff]  }
 0x469   : > { %v8747_v21 = vadd.f32 %v8573_v23, %v11042_v60  ;;  %v2285_v54 = vpop.f32.mrb[85].mxu1  ;;  %13022 = vst [vmem:[#allocation42_spill] sm:$0xff] %v11071_v44  ;;  %v11097_v23 = vld [vmem:[%s12703_s3 + $0xd8] sm:$0xff]  ;;  %8683 = vmatprep.subr.bf16.mxu1 %v9412_v56 }
 0x46a   : > { %v8574_v7 = vpop.f32.mrb[86].mxu1  ;;  %4744 = vrot.lane.b32.xlu0 %v11061_v4, %s9766_s21  ;;  %v8748_v53 = vadd.f32 %v2285_v54, %v11059_v28  ;;  %8684 = vmatpush3.bf16.msra.mxu1 %v9412_v56 }
 0x46b   : > { %v8749_v42 = vadd.f32 %v8574_v7, %v11052_v3  ;;  %v2288_v58 = vpop.f32.mrb[87].mxu1  ;;  %v2419_v29 = vmul.f32 %v8747_v21, %v10845_v59  ;;  %vm2386_vm5 = vcmp.ge.f32.partialorder %v8747_v21, 0.0  ;;  %v11105_v7 = vld [vmem:[%s12703_s3 + $0xc8] sm:$0xff]  ;;  %8685 = vmatprep.subr.bf16.mxu1 %v9413_v8 }
 0x46c   : > { %v8750_v15 = vadd.f32 %v2288_v58, %v11066_v1  ;;  %4742 = vrot.lane.b32.xlu1 %v11071_v44, %s9766_s21  ;;  %v2417_v39 = vmul.f32 %v8748_v53, %v10845_v59  ;;  %vm2384_vm7 = vcmp.ge.f32.partialorder %v8748_v53, 0.0 }
 0x46d   : > { %v2420_v19 = vmul.f32 %v8749_v42, %v10845_v59  ;;  %4114 = vmatmul.mubr.bf16.gmra.mrb[224].mxu1 %v9388_v2  ;;  %vm2387_vm4 = vcmp.ge.f32.partialorder %v8749_v42, 0.0  ;;  %v11100_v2 = vsel %vm2386_vm5, %v8747_v21, %v2419_v29 }
 0x46e   : > { %4740 = vrot.lane.b32.xlu0 %v11079_v34, %s9766_s21  ;;  %4121 = vmatprep.mubr.bf16.mxu1 %v9389_v10  ;;  %v2418_v14 = vmul.f32 %v8750_v15, %v10845_v59  ;;  %vm2385_vm6 = vcmp.ge.f32.partialorder %v8750_v15, 0.0  ;;  %13025 = vst [vmem:[#allocation47_spill] sm:$0xff] %v11100_v2  ;;  %v9391_v10 = vld [vmem:[#allocation8 + $0x290] ss:$8 sps:$4 sm:$0xff]   ;;  %v11120_v56 = vsel %vm2384_vm7, %v8748_v53, %v2417_v39  ;;  %v11133_v53 = vld [vmem:[%s12703_s3 + $0xe0] sm:$0xff] }
 0x46f   : > { %v11089_v48 = vsel %vm2387_vm4, %v8749_v42, %v2420_v19  ;;  %v11110_v42 = vld [vmem:[%s12703_s3 + $0xc0] sm:$0xff]  ;;  %13027 = vst [vmem:[#allocation49_spill] sm:$0xff] %v11120_v56  ;;  %8686 = vmatpush3.bf16.msra.mxu1 %v9413_v8  ;;  %v9395_v8 = vld [vmem:[#allocation8 + $0x2b4] ss:$8 sps:$4 sm:$0xff]  }
 0x470   : > { %13024 = vst [vmem:[#allocation44_spill] sm:$0xff] %v11089_v48  ;;  %v8577_v17 = vpop.f32.mrb[88].mxu1  ;;  %4754 = vrot.lane.b32.xlu1 %v11089_v48, %s9766_s21  ;;  %v9392_v19 = vld [vmem:[#allocation8 + $0x2a4] ss:$8 sps:$4 sm:$0xff]  }
 0x471   : > { %v8751_v32 = vadd.f32 %v8577_v17, %v11086_v33  ;;  %v2301_v54 = vpop.f32.mrb[89].mxu1  ;;  %v11115_v17 = vsel %vm2385_vm6, %v8750_v15, %v2418_v14 }
 0x472   : > { %v8578_v58 = vpop.f32.mrb[90].mxu1  ;;  %4752 = vrot.lane.b32.xlu0 %v11100_v2, %s9766_s21  ;;  %13026 = vst [vmem:[#allocation46_spill] sm:$0xff] %v11115_v17  ;;  %v8752_v44 = vadd.f32 %v2301_v54, %v11110_v42 }
 0x473   : > { %v8753_v21 = vadd.f32 %v8578_v58, %v11097_v23  ;;  %v2304_v29 = vpop.f32.mrb[91].mxu1  ;;  %v2423_v4 = vmul.f32 %v8751_v32, %v10845_v59  ;;  %vm2390_vm9 = vcmp.ge.f32.partialorder %v8751_v32, 0.0 }
 0x474   : > { %v8754_v48 = vadd.f32 %v2304_v29, %v11105_v7  ;;  %4750 = vrot.lane.b32.xlu1 %v11115_v17, %s9766_s21  ;;  %v2421_v54 = vmul.f32 %v8752_v44, %v10845_v59  ;;  %vm2388_vm11 = vcmp.ge.f32.partialorder %v8752_v44, 0.0 }
 0x475   : > { %v2424_v2 = vmul.f32 %v8753_v21, %v10845_v59  ;;  %4122 = vmatmul.mubr.bf16.gmra.mrb[228].mxu1 %v9391_v10  ;;  %vm2391_vm8 = vcmp.ge.f32.partialorder %v8753_v21, 0.0  ;;  %v11140_v58 = vsel %vm2390_vm9, %v8751_v32, %v2423_v4 }
 0x476   : > { %4748 = vrot.lane.b32.xlu0 %v11120_v56, %s9766_s21  ;;  %4129 = vmatprep.mubr.bf16.mxu1 %v9392_v19  ;;  %v2422_v15 = vmul.f32 %v8754_v48, %v10845_v59  ;;  %vm2389_vm10 = vcmp.ge.f32.partialorder %v8754_v48, 0.0  ;;  %13029 = vst [vmem:[#allocation51_spill] sm:$0xff] %v11140_v58  ;;  %v9394_v19 = vld [vmem:[#allocation8 + $0x2a0] ss:$8 sps:$4 sm:$0xff]   ;;  %v11158_v56 = vsel %vm2388_vm11, %v8752_v44, %v2421_v54  ;;  %v9398_v44 = vld [vmem:[#allocation8 + $0x2c4] ss:$8 sps:$4 sm:$0xff]  }
 0x477   : > { %v11128_v14 = vsel %vm2391_vm8, %v8753_v21, %v2424_v2  ;;  %v11145_v2 = vld [vmem:[%s12703_s3 + $0xe8] sm:$0xff]  ;;  %13031 = vst [vmem:[#allocation53_spill] sm:$0xff] %v11158_v56 }
 0x478   : > { %13028 = vst [vmem:[#allocation48_spill] sm:$0xff] %v11128_v14  ;;  %v11135_v39 = vpop.f32.mrb[92].mxu1  ;;  %4762 = vrot.lane.b32.xlu1 %v11128_v14, %s9766_s21  ;;  %v11152_v17 = vsel %vm2389_vm10, %v8754_v48, %v2422_v15  ;;  %v9414_v48 = vld [vmem:[#allocation10 + $0xa0] sm:$0xff]   ;;  %v9415_v54 = vld [vmem:[#allocation10 + $0xa8] sm:$0xff]  }
 0x479   : > { %v2317_v10 = vpop.f32.mrb[93].mxu1  ;;  %13030 = vst [vmem:[#allocation50_spill] sm:$0xff] %v11152_v17  ;;  %8687 = vmatprep.subr.bf16.mxu1 %v9414_v48 }
 0x47a   : > { %v8756_v21 = vadd.f32 %v2317_v10, %v11133_v53  ;;  %v11148_v29 = vpop.f32.mrb[94].mxu1  ;;  %4760 = vrot.lane.b32.xlu0 %v11140_v58, %s9766_s21  ;;  %8688 = vmatpush3.bf16.msra.mxu1 %v9414_v48  ;;  %v9417_v58 = vld [vmem:[#allocation10 + $0xb8] sm:$0xff]   ;;  %v9406_v48 = vld [vmem:[#allocation8 + $0x2e0] ss:$8 sps:$4 sm:$0xff]  }
 0x47b   : > { %v2320_v14 = vpop.f32.mrb[95].mxu1  ;;  %8689 = vmatprep.subr.bf16.mxu1 %v9415_v54 }
 0x47c   : > { %v8758_v4 = vadd.f32 %v2320_v14, %v11145_v2  ;;  %4758 = vrot.lane.b32.xlu1 %v11152_v17, %s9766_s21  ;;  %v2425_v32 = vmul.f32 %v8756_v21, %v10845_v59  ;;  %vm2392_vm13 = vcmp.ge.f32.partialorder %v8756_v21, 0.0 }
 0x47d   : > { %4130 = vmatmul.mubr.bf16.gmra.mrb[232].mxu1 %v9394_v19  ;;  %v9397_v19 = vld [vmem:[#allocation8 + $0x2b0] ss:$8 sps:$4 sm:$0xff]  }
 0x47e   : > { %v2426_v10 = vmul.f32 %v8758_v4, %v10845_v59  ;;  %4756 = vrot.lane.b32.xlu0 %v11158_v56, %s9766_s21  ;;  %vm2393_vm12 = vcmp.ge.f32.partialorder %v8758_v4, 0.0  ;;  %4137 = vmatprep.mubr.bf16.mxu1 %v9395_v8  ;;  %v11167_v14 = vsel %vm2392_vm13, %v8756_v21, %v2425_v32  ;;  %v9416_v8 = vld [vmem:[#allocation10 + $0xb0] sm:$0xff]   ;;  %v9404_v32 = vld [vmem:[#allocation8 + $0x2e4] ss:$8 sps:$4 sm:$0xff]  }
 0x47f   : > { %13033 = vst [vmem:[#allocation55_spill] sm:$0xff] %v11167_v14  ;;  %8690 = vmatpush3.bf16.msra.mxu1 %v9415_v54  ;;  %v9403_v21 = vld [vmem:[#allocation8 + $0x2d0] ss:$8 sps:$4 sm:$0xff]  }
 0x480   : > { %v11163_v15 = vsel %vm2393_vm12, %v8758_v4, %v2426_v10  ;;  %8691 = vmatprep.subr.bf16.mxu1 %v9416_v8  ;;  %v9400_v4 = vld [vmem:[#allocation8 + $0x2c0] ss:$8 sps:$4 sm:$0xff]   ;;  %v9401_v10 = vld [vmem:[#allocation8 + $0x2d4] ss:$8 sps:$4 sm:$0xff]  }
 0x481   : > { %13032 = vst [vmem:[#allocation52_spill] sm:$0xff] %v11163_v15  ;;  %4766 = vrot.lane.b32.xlu1 %v11163_v15, %s9766_s21  ;;  %v9407_v15 = vld [vmem:[#allocation8 + $0x2f4] ss:$8 sps:$4 sm:$0xff]  }
 0x482   : > { %4764 = vrot.lane.b32.xlu0 %v11167_v14, %s9766_s21 }
 0x483   : > { %8692 = vmatpush3.bf16.msra.mxu1 %v9416_v8 }
 0x484   : > { %8693 = vmatprep.subr.bf16.mxu1 %v9417_v58 }
 0x485   : > { %4138 = vmatmul.mubr.bf16.gmra.mrb[236].mxu1 %v9397_v19  ;;  %v9409_v19 = vld [vmem:[#allocation8 + $0x2f0] ss:$8 sps:$4 sm:$0xff]  }
 0x486   : > { %4145 = vmatprep.mubr.bf16.mxu1 %v9398_v44 }
 0x487   : > { %8694 = vmatpush3.bf16.msra.mxu1 %v9417_v58 }
 0x48d   : > { %4146 = vmatmul.mubr.bf16.gmra.mrb[240].mxu1 %v9400_v4 }
 0x48e   : > { %4153 = vmatprep.mubr.bf16.mxu1 %v9401_v10 }
 0x495   : > { %4154 = vmatmul.mubr.bf16.gmra.mrb[244].mxu1 %v9403_v21 }
 0x496   : > { %4161 = vmatprep.mubr.bf16.mxu1 %v9404_v32 }
 0x49d   : > { %4162 = vmatmul.mubr.bf16.gmra.mrb[248].mxu1 %v9406_v48 }
 0x49e   : > { %4169 = vmatprep.mubr.bf16.mxu1 %v9407_v15 }
 0x4a5   : > { %4170 = vmatmul.mubr.bf16.gmra.mrb[252].mxu1 %v9409_v19 }
 0x500   : > { %v8319_v44 = vpop.f32.mrb[192].mxu1 }
 0x501   : > { %v8320_v54 = vpop.f32.mrb[193].mxu1 }
 0x502   : > { %v8321_v14 = vadd.f32 %v8320_v54, %v8319_v44  ;;  %v8322_v17 = vpop.f32.mrb[194].mxu1 }
 0x503   : > { %v8323_v8 = vpop.f32.mrb[195].mxu1 }
 0x504   : > { %v8324_v56 = vadd.f32 %v8323_v8, %v8322_v17 }
 0x506   : > { %v4178_v34 = vpack.c.bf16 %v8324_v56, %v8321_v14 }
 0x508   : > { %v8325_v4 = vpop.f32.mrb[196].mxu1  ;;  %8695 = vmatprep.mubr.bf16.mxu1 %v4178_v34 }
 0x509   : > { %v8326_v58 = vpop.f32.mrb[197].mxu1 }
 0x50a   : > { %v8327_v10 = vadd.f32 %v8326_v58, %v8325_v4  ;;  %v8328_v50 = vpop.f32.mrb[198].mxu1 }
 0x50b   : > { %v8329_v21 = vpop.f32.mrb[199].mxu1 }
 0x50c   : > { %v8330_v32 = vadd.f32 %v8329_v21, %v8328_v50 }
 0x50e   : > { %v4179_v52 = vpack.c.bf16 %v8330_v32, %v8327_v10 }
 0x510   : > { %v8331_v5 = vpop.f32.mrb[200].mxu1  ;;  %8696 = vmatmul.mubr.bf16.vlgmr.msra.gmra.mrb[160].mxu1 %v4179_v52 }
 0x511   : > { %v8332_v15 = vpop.f32.mrb[201].mxu1 }
 0x512   : > { %v8333_v48 = vadd.f32 %v8332_v15, %v8331_v5  ;;  %v8334_v19 = vpop.f32.mrb[202].mxu1 }
 0x513   : > { %v8335_v47 = vpop.f32.mrb[203].mxu1 }
 0x514   : > { %v8336_v31 = vadd.f32 %v8335_v47, %v8334_v19 }
 0x516   : > { %v4180_v44 = vpack.c.bf16 %v8336_v31, %v8333_v48 }
 0x518   : > { %v8337_v54 = vpop.f32.mrb[204].mxu1  ;;  %8699 = vmatprep.mubr.bf16.mxu1 %v4180_v44 }
 0x519   : > { %v8338_v17 = vpop.f32.mrb[205].mxu1 }
 0x51a   : > { %v8339_v56 = vadd.f32 %v8338_v17, %v8337_v54  ;;  %v8340_v14 = vpop.f32.mrb[206].mxu1 }
 0x51b   : > { %v8341_v34 = vpop.f32.mrb[207].mxu1 }
 0x51c   : > { %v8342_v8 = vadd.f32 %v8341_v34, %v8340_v14 }
 0x51e   : > { %v4181_v4 = vpack.c.bf16 %v8342_v8, %v8339_v56 }
 0x520   : > { %v8343_v58 = vpop.f32.mrb[208].mxu1  ;;  %8700 = vmatmul.mubr.bf16.gmra.mrb[164].mxu1 %v4181_v4 }
 0x521   : > { %v8344_v50 = vpop.f32.mrb[209].mxu1 }
 0x522   : > { %v8345_v10 = vadd.f32 %v8344_v50, %v8343_v58  ;;  %v8346_v21 = vpop.f32.mrb[210].mxu1 }
 0x523   : > { %v8347_v52 = vpop.f32.mrb[211].mxu1 }
 0x524   : > { %v8348_v32 = vadd.f32 %v8347_v52, %v8346_v21 }
 0x526   : > { %v4182_v5 = vpack.c.bf16 %v8348_v32, %v8345_v10 }
 0x528   : > { %v8349_v15 = vpop.f32.mrb[212].mxu1  ;;  %8703 = vmatprep.mubr.bf16.mxu1 %v4182_v5 }
 0x529   : > { %v8350_v47 = vpop.f32.mrb[213].mxu1 }
 0x52a   : > { %v8351_v31 = vadd.f32 %v8350_v47, %v8349_v15  ;;  %v8352_v48 = vpop.f32.mrb[214].mxu1 }
 0x52b   : > { %v8353_v19 = vpop.f32.mrb[215].mxu1 }
 0x52c   : > { %v8354_v44 = vadd.f32 %v8353_v19, %v8352_v48 }
 0x52e   : > { %v4183_v54 = vpack.c.bf16 %v8354_v44, %v8351_v31 }
 0x530   : > { %v8355_v17 = vpop.f32.mrb[216].mxu1  ;;  %8704 = vmatmul.mubr.bf16.gmra.mrb[168].mxu1 %v4183_v54 }
 0x531   : > { %v8356_v14 = vpop.f32.mrb[217].mxu1 }
 0x532   : > { %v8357_v56 = vadd.f32 %v8356_v14, %v8355_v17  ;;  %v8358_v34 = vpop.f32.mrb[218].mxu1 }
 0x533   : > { %v8359_v8 = vpop.f32.mrb[219].mxu1 }
 0x534   : > { %v8360_v4 = vadd.f32 %v8359_v8, %v8358_v34 }
 0x536   : > { %v4184_v58 = vpack.c.bf16 %v8360_v4, %v8357_v56 }
 0x538   : > { %v8361_v50 = vpop.f32.mrb[220].mxu1  ;;  %8707 = vmatprep.mubr.bf16.mxu1 %v4184_v58 }
 0x539   : > { %v8362_v21 = vpop.f32.mrb[221].mxu1 }
 0x53a   : > { %v8363_v10 = vadd.f32 %v8362_v21, %v8361_v50  ;;  %v8364_v52 = vpop.f32.mrb[222].mxu1 }
 0x53b   : > { %v8365_v32 = vpop.f32.mrb[223].mxu1 }
 0x53c   : > { %v8366_v5 = vadd.f32 %v8365_v32, %v8364_v52 }
 0x53e   : > { %v4185_v15 = vpack.c.bf16 %v8366_v5, %v8363_v10 }
 0x540   : > { %v8367_v47 = vpop.f32.mrb[224].mxu1  ;;  %8708 = vmatmul.mubr.bf16.gmra.mrb[172].mxu1 %v4185_v15 }
 0x541   : > { %v8368_v48 = vpop.f32.mrb[225].mxu1 }
 0x542   : > { %v8369_v31 = vadd.f32 %v8368_v48, %v8367_v47  ;;  %v8370_v19 = vpop.f32.mrb[226].mxu1 }
 0x543   : > { %v8371_v44 = vpop.f32.mrb[227].mxu1 }
 0x544   : > { %v8372_v54 = vadd.f32 %v8371_v44, %v8370_v19 }
 0x546   : > { %v4186_v17 = vpack.c.bf16 %v8372_v54, %v8369_v31 }
 0x548   : > { %v8373_v14 = vpop.f32.mrb[228].mxu1  ;;  %8711 = vmatprep.mubr.bf16.mxu1 %v4186_v17 }
 0x549   : > { %v8374_v34 = vpop.f32.mrb[229].mxu1 }
 0x54a   : > { %v8375_v56 = vadd.f32 %v8374_v34, %v8373_v14  ;;  %v8376_v8 = vpop.f32.mrb[230].mxu1 }
 0x54b   : > { %v8377_v4 = vpop.f32.mrb[231].mxu1 }
 0x54c   : > { %v8378_v58 = vadd.f32 %v8377_v4, %v8376_v8 }
 0x54e   : > { %v4187_v50 = vpack.c.bf16 %v8378_v58, %v8375_v56 }
 0x550   : > { %v8379_v21 = vpop.f32.mrb[232].mxu1  ;;  %8712 = vmatmul.mubr.bf16.gmra.mrb[176].mxu1 %v4187_v50 }
 0x551   : > { %v8380_v52 = vpop.f32.mrb[233].mxu1 }
 0x552   : > { %v8381_v10 = vadd.f32 %v8380_v52, %v8379_v21  ;;  %v8382_v32 = vpop.f32.mrb[234].mxu1 }
 0x553   : > { %v8383_v5 = vpop.f32.mrb[235].mxu1 }
 0x554   : > { %v8384_v15 = vadd.f32 %v8383_v5, %v8382_v32 }
 0x556   : > { %v4188_v47 = vpack.c.bf16 %v8384_v15, %v8381_v10 }
 0x558   : > { %v8385_v48 = vpop.f32.mrb[236].mxu1  ;;  %8715 = vmatprep.mubr.bf16.mxu1 %v4188_v47 }
 0x559   : > { %v8386_v19 = vpop.f32.mrb[237].mxu1 }
 0x55a   : > { %v8387_v31 = vadd.f32 %v8386_v19, %v8385_v48  ;;  %v8388_v44 = vpop.f32.mrb[238].mxu1 }
 0x55b   : > { %v8389_v54 = vpop.f32.mrb[239].mxu1 }
 0x55c   : > { %v8390_v17 = vadd.f32 %v8389_v54, %v8388_v44 }
 0x55e   : > { %v4189_v14 = vpack.c.bf16 %v8390_v17, %v8387_v31 }
 0x560   : > { %v8391_v34 = vpop.f32.mrb[240].mxu1  ;;  %8716 = vmatmul.mubr.bf16.gmra.mrb[180].mxu1 %v4189_v14 }
 0x561   : > { %v8392_v8 = vpop.f32.mrb[241].mxu1 }
 0x562   : > { %v8393_v56 = vadd.f32 %v8392_v8, %v8391_v34  ;;  %v8394_v4 = vpop.f32.mrb[242].mxu1 }
 0x563   : > { %v8395_v58 = vpop.f32.mrb[243].mxu1 }
 0x564   : > { %v8396_v50 = vadd.f32 %v8395_v58, %v8394_v4 }
 0x566   : > { %v4190_v21 = vpack.c.bf16 %v8396_v50, %v8393_v56 }
 0x568   : > { %v8397_v52 = vpop.f32.mrb[244].mxu1  ;;  %8719 = vmatprep.mubr.bf16.mxu1 %v4190_v21 }
 0x569   : > { %v8398_v32 = vpop.f32.mrb[245].mxu1 }
 0x56a   : > { %v8399_v10 = vadd.f32 %v8398_v32, %v8397_v52  ;;  %v8400_v5 = vpop.f32.mrb[246].mxu1 }
 0x56b   : > { %v8401_v15 = vpop.f32.mrb[247].mxu1 }
 0x56c   : > { %v8402_v47 = vadd.f32 %v8401_v15, %v8400_v5 }
 0x56e   : > { %v4191_v48 = vpack.c.bf16 %v8402_v47, %v8399_v10 }
 0x570   : > { %8720 = vmatmul.mubr.bf16.gmra.mrb[184].mxu1 %v4191_v48  ;;  %v8403_v19 = vpop.f32.mrb[248].mxu1 }
 0x571   : > { %v8404_v44 = vpop.f32.mrb[249].mxu1 }
 0x572   : > { %v8405_v31 = vadd.f32 %v8404_v44, %v8403_v19  ;;  %v8406_v54 = vpop.f32.mrb[250].mxu1 }
 0x573   : > { %v8407_v17 = vpop.f32.mrb[251].mxu1 }
 0x574   : > { %v8408_v14 = vadd.f32 %v8407_v17, %v8406_v54 }
 0x576   : > { %v4192_v34 = vpack.c.bf16 %v8408_v14, %v8405_v31 }
 0x578   : > { %v8409_v8 = vpop.f32.mrb[252].mxu1  ;;  %8723 = vmatprep.mubr.bf16.mxu1 %v4192_v34 }
 0x579   : > { %v8410_v4 = vpop.f32.mrb[253].mxu1 }
 0x57a   : > { %v8411_v56 = vadd.f32 %v8410_v4, %v8409_v8  ;;  %v8412_v58 = vpop.f32.mrb[254].mxu1 }
 0x57b   : > { %v8413_v50 = vpop.f32.mrb[255].mxu1 }
 0x57c   : > { %v8414_v21 = vadd.f32 %v8413_v50, %v8412_v58 }
 0x57e   : > { %v4193_v52 = vpack.c.bf16 %v8414_v21, %v8411_v56 }
 0x580   : > { %8724 = vmatmul.mubr.bf16.gmra.mrb[188].mxu1 %v4193_v52 }
 0x5e3   : > { %v8697_v32 = vpop.f32.mrb[160].mxu1 }
 0x5e4   : > { %v8759_v10 = vadd.f32 %v8697_v32, %v10838_v16  ;;  %v4292_v5 = vpop.f32.mrb[161].mxu1 }
 0x5e5   : > { %v8760_v15 = vadd.f32 %v4292_v5, %v10843_v40  ;;  %v8698_v47 = vpop.f32.mrb[162].mxu1 }
 0x5e6   : > { %v4485_v48 = vmul.f32 %v8759_v10, %v10845_v59  ;;  %v8761_v19 = vadd.f32 %v8698_v47, %v10850_v0  ;;  %v4295_v44 = vpop.f32.mrb[163].mxu1  ;;  %vm4453_vm14 = vcmp.ge.f32.partialorder %v8759_v10, 0.0  ;;  %v11219_v47 = vpop.permute.xlu0 %4712 }
 0x5e7   : > { %v4483_v31 = vmul.f32 %v8760_v15, %v10845_v59  ;;  %vm4451_vm15 = vcmp.ge.f32.partialorder %v8760_v15, 0.0  ;;  %v8762_v14 = vadd.f32 %v4295_v44, %v10857_v24 }
 0x5e8   : > { %v11176_v54 = vsel %vm4453_vm14, %v8759_v10, %v4485_v48  ;;  %v4486_v17 = vmul.f32 %v8761_v19, %v10845_v59  ;;  %vm4454_vm0 = vcmp.ge.f32.partialorder %v8761_v19, 0.0 }
 0x5e9   : > { %4776 = vrot.lane.b32.xlu0 %v11176_v54, %s9766_s21  ;;  %v11182_v16 = vsel %vm4451_vm15, %v8760_v15, %v4483_v31  ;;  %v4484_v40 = vmul.f32 %v8762_v14, %v10845_v59  ;;  %vm4452_vm1 = vcmp.ge.f32.partialorder %v8762_v14, 0.0 }
 0x5ea   : > { %4772 = vrot.lane.b32.xlu1 %v11182_v16, %s9766_s21  ;;  %v11187_v0 = vsel %vm4454_vm0, %v8761_v19, %v4486_v17 }
 0x5eb   : > { %v11191_v34 = vsel %vm4452_vm1, %v8762_v14, %v4484_v40 }
 0x5ee   : > { %4778 = vrot.lane.b32.xlu1 %v11187_v0, %s9766_s21 }
 0x5f2   : > { %4774 = vrot.lane.b32.xlu1 %v11191_v34, %s9766_s21 }
 0x5f3   : > { %v8701_v24 = vpop.f32.mrb[164].mxu1 }
 0x5f4   : > { %v8763_v8 = vadd.f32 %v8701_v24, %v10871_v11  ;;  %v4308_v4 = vpop.f32.mrb[165].mxu1 }
 0x5f5   : > { %v8764_v56 = vadd.f32 %v4308_v4, %v10887_v49  ;;  %v8702_v58 = vpop.f32.mrb[166].mxu1 }
 0x5f6   : > { %v4489_v50 = vmul.f32 %v8763_v8, %v10845_v59  ;;  %v8765_v21 = vadd.f32 %v8702_v58, %v10880_v25  ;;  %v4311_v52 = vpop.f32.mrb[167].mxu1  ;;  %vm4457_vm2 = vcmp.ge.f32.partialorder %v8763_v8, 0.0 }
 0x5f7   : > { %v8766_v32 = vadd.f32 %v4311_v52, %v10894_v41  ;;  %v4487_v10 = vmul.f32 %v8764_v56, %v10845_v59  ;;  %vm4455_vm4 = vcmp.ge.f32.partialorder %v8764_v56, 0.0 }
 0x5f8   : > { %v4490_v5 = vmul.f32 %v8765_v21, %v10845_v59  ;;  %v11202_v15 = vsel %vm4457_vm2, %v8763_v8, %v4489_v50  ;;  %vm4458_vm3 = vcmp.ge.f32.partialorder %v8765_v21, 0.0 }
 0x5f9   : > { %4784 = vrot.lane.b32.xlu0 %v11202_v15, %s9766_s21  ;;  %v4488_v11 = vmul.f32 %v8766_v32, %v10845_v59  ;;  %vm4456_vm5 = vcmp.ge.f32.partialorder %v8766_v32, 0.0  ;;  %v11211_v25 = vsel %vm4455_vm4, %v8764_v56, %v4487_v10 }
 0x5fa   : > { %v11207_v49 = vsel %vm4458_vm3, %v8765_v21, %v4490_v5 }
 0x5fb   : > { %4786 = vrot.lane.b32.xlu1 %v11207_v49, %s9766_s21  ;;  %v11215_v41 = vsel %vm4456_vm5, %v8766_v32, %v4488_v11 }
 0x5fd   : > { %4780 = vrot.lane.b32.xlu0 %v11211_v25, %s9766_s21 }
 0x5ff   : > { %4782 = vrot.lane.b32.xlu1 %v11215_v41, %s9766_s21 }
 0x603   : > { %v8705_v48 = vpop.f32.mrb[168].mxu1 }
 0x604   : > { %v8767_v19 = vadd.f32 %v8705_v48, %v10910_v6  ;;  %v4324_v44 = vpop.f32.mrb[169].mxu1  ;;  %v11230_v6 = vpop.permute.xlu0 %4708 }
 0x605   : > { %v8768_v31 = vadd.f32 %v4324_v44, %v10934_v26  ;;  %v8706_v17 = vpop.f32.mrb[170].mxu1 }
 0x606   : > { %v4493_v14 = vmul.f32 %v8767_v19, %v10845_v59  ;;  %v8769_v40 = vadd.f32 %v8706_v17, %v10921_v18  ;;  %v4327_v24 = vpop.f32.mrb[171].mxu1  ;;  %vm4461_vm6 = vcmp.ge.f32.partialorder %v8767_v19, 0.0 }
 0x607   : > { %v8770_v8 = vadd.f32 %v4327_v24, %v10929_v46  ;;  %v4491_v4 = vmul.f32 %v8768_v31, %v10845_v59  ;;  %vm4459_vm8 = vcmp.ge.f32.partialorder %v8768_v31, 0.0  ;;  %v11239_v46 = vpop.permute.xlu1 %4714 }
 0x608   : > { %v4494_v56 = vmul.f32 %v8769_v40, %v10845_v59  ;;  %v11228_v58 = vsel %vm4461_vm6, %v8767_v19, %v4493_v14  ;;  %vm4462_vm7 = vcmp.ge.f32.partialorder %v8769_v40, 0.0  ;;  %v11247_v52 = vpop.permute.xlu0 %4710 }
 0x609   : > { %4792 = vrot.lane.b32.xlu0 %v11228_v58, %s9766_s21  ;;  %v4492_v26 = vmul.f32 %v8770_v8, %v10845_v59  ;;  %vm4460_vm9 = vcmp.ge.f32.partialorder %v8770_v8, 0.0  ;;  %v11241_v50 = vsel %vm4459_vm8, %v8768_v31, %v4491_v4 }
 0x60a   : > { %v11235_v18 = vsel %vm4462_vm7, %v8769_v40, %v4494_v56 }
 0x60b   : > { %4794 = vrot.lane.b32.xlu1 %v11235_v18, %s9766_s21  ;;  %v11245_v21 = vsel %vm4460_vm9, %v8770_v8, %v4492_v26  ;;  %v11251_v32 = vpop.permute.xlu1 %4722 }
 0x60c   : > { %v11254_v48 = vpop.permute.xlu0 %4720 }
 0x60d   : > { %4788 = vrot.lane.b32.xlu0 %v11241_v50, %s9766_s21 }
 0x60f   : > { %4790 = vrot.lane.b32.xlu1 %v11245_v21, %s9766_s21  ;;  %v11257_v31 = vpop.permute.xlu1 %4718 }
 0x613   : > { %v8709_v10 = vpop.f32.mrb[172].mxu1 }
 0x614   : > { %v8771_v5 = vadd.f32 %v8709_v10, %v10954_v61  ;;  %v4340_v11 = vpop.f32.mrb[173].mxu1 }
 0x615   : > { %v8772_v19 = vadd.f32 %v4340_v11, %v10971_v9  ;;  %v8710_v44 = vpop.f32.mrb[174].mxu1 }
 0x616   : > { %v4497_v17 = vmul.f32 %v8771_v5, %v10845_v59  ;;  %v8773_v14 = vadd.f32 %v8710_v44, %v10964_v45  ;;  %v4343_v40 = vpop.f32.mrb[175].mxu1  ;;  %vm4465_vm10 = vcmp.ge.f32.partialorder %v8771_v5, 0.0  ;;  %v11271_v45 = vpop.permute.xlu0 %4716 }
 0x617   : > { %v8774_v24 = vadd.f32 %v4343_v40, %v10978_v27  ;;  %v4495_v8 = vmul.f32 %v8772_v19, %v10845_v59  ;;  %vm4463_vm12 = vcmp.ge.f32.partialorder %v8772_v19, 0.0  ;;  %v11275_v27 = vpop.permute.xlu1 %4730 }
 0x618   : > { %v4498_v61 = vmul.f32 %v8773_v14, %v10845_v59  ;;  %v11264_v4 = vsel %vm4465_vm10, %v8771_v5, %v4497_v17  ;;  %vm4466_vm11 = vcmp.ge.f32.partialorder %v8773_v14, 0.0 }
 0x619   : > { %13034 = vst [vmem:[#allocation54_spill] sm:$0xff] %v11264_v4  ;;  %4800 = vrot.lane.b32.xlu0 %v11264_v4, %s9766_s21  ;;  %v4496_v9 = vmul.f32 %v8774_v24, %v10845_v59  ;;  %vm4464_vm13 = vcmp.ge.f32.partialorder %v8774_v24, 0.0  ;;  %v11277_v26 = vsel %vm4463_vm12, %v8772_v19, %v4495_v8 }
 0x61a   : > { %v11269_v56 = vsel %vm4466_vm11, %v8773_v14, %v4498_v61  ;;  %13036 = vst [vmem:[#allocation56_spill] sm:$0xff] %v11277_v26  ;;  %v11285_v5 = vpop.permute.xlu0 %4728 }
 0x61b   : > { %13035 = vst [vmem:[#allocation57_spill] sm:$0xff] %v11269_v56  ;;  %4802 = vrot.lane.b32.xlu1 %v11269_v56, %s9766_s21  ;;  %v11281_v10 = vsel %vm4464_vm13, %v8774_v24, %v4496_v9  ;;  %v11287_v11 = vpop.permute.xlu1 %4726 }
 0x61c   : > { %13037 = vst [vmem:[#allocation59_spill] sm:$0xff] %v11281_v10 }
 0x61d   : > { %4796 = vrot.lane.b32.xlu0 %v11277_v26, %s9766_s21 }
 0x61e   : > { %v11293_v9 = vpop.permute.xlu0 %4724 }
 0x61f   : > { %4798 = vrot.lane.b32.xlu1 %v11281_v10, %s9766_s21  ;;  %v11296_v4 = vpop.permute.xlu1 %4738 }
 0x623   : > { %v8713_v44 = vpop.f32.mrb[176].mxu1 }
 0x624   : > { %v8775_v17 = vadd.f32 %v8713_v44, %v10998_v36  ;;  %v4356_v14 = vpop.f32.mrb[177].mxu1 }
 0x625   : > { %v8776_v40 = vadd.f32 %v4356_v14, %v11022_v55  ;;  %v8714_v19 = vpop.f32.mrb[178].mxu1  ;;  %v11311_v14 = vpop.permute.xlu0 %4736 }
 0x626   : > { %v4501_v8 = vmul.f32 %v8775_v17, %v10845_v59  ;;  %v8777_v61 = vadd.f32 %v8714_v19, %v11009_v22  ;;  %v4359_v24 = vpop.f32.mrb[179].mxu1  ;;  %vm4469_vm14 = vcmp.ge.f32.partialorder %v8775_v17, 0.0 }
 0x627   : > { %v8778_v56 = vadd.f32 %v4359_v24, %v11017_v12  ;;  %v4499_v10 = vmul.f32 %v8776_v40, %v10845_v59  ;;  %vm4467_vm0 = vcmp.ge.f32.partialorder %v8776_v40, 0.0 }
 0x628   : > { %v4502_v36 = vmul.f32 %v8777_v61, %v10845_v59  ;;  %v11300_v44 = vsel %vm4469_vm14, %v8775_v17, %v4501_v8  ;;  %vm4470_vm15 = vcmp.ge.f32.partialorder %v8777_v61, 0.0  ;;  %v11315_v17 = vpop.permute.xlu1 %4734 }
 0x629   : > { %13038 = vst [vmem:[#allocation58_spill] sm:$0xff] %v11300_v44  ;;  %4808 = vrot.lane.b32.xlu0 %v11300_v44, %s9766_s21  ;;  %v4500_v22 = vmul.f32 %v8778_v56, %v10845_v59  ;;  %vm4468_vm1 = vcmp.ge.f32.partialorder %v8778_v56, 0.0  ;;  %v11309_v12 = vsel %vm4467_vm0, %v8776_v40, %v4499_v10  ;;  %13041 = vst [vmem:[#allocation20_spill] sm:$0xff] %v11315_v17  ;;  %v11321_v8 = vpop.permute.xlu0 %4732 }
 0x62a   : > { %v11305_v55 = vsel %vm4470_vm15, %v8777_v61, %v4502_v36  ;;  %13040 = vst [vmem:[#allocation60_spill] sm:$0xff] %v11309_v12 }
 0x62b   : > { %13039 = vst [vmem:[#allocation61_spill] sm:$0xff] %v11305_v55  ;;  %4810 = vrot.lane.b32.xlu1 %v11305_v55, %s9766_s21  ;;  %v11317_v19 = vsel %vm4468_vm1, %v8778_v56, %v4500_v22 }
 0x62c   : > { %13042 = vst [vmem:[#allocation21_spill] sm:$0xff] %v11317_v19  ;;  %v11323_v24 = vpop.permute.xlu1 %4746 }
 0x62d   : > { %4804 = vrot.lane.b32.xlu0 %v11309_v12, %s9766_s21 }
 0x62f   : > { %4806 = vrot.lane.b32.xlu1 %v11317_v19, %s9766_s21 }
 0x633   : > { %v8717_v61 = vpop.f32.mrb[180].mxu1 }
 0x634   : > { %v8779_v10 = vadd.f32 %v8717_v61, %v11042_v60  ;;  %v4372_v40 = vpop.f32.mrb[181].mxu1  ;;  %v11334_v60 = vpop.permute.xlu0 %4744 }
 0x635   : > { %v8780_v36 = vadd.f32 %v4372_v40, %v11059_v28  ;;  %v8718_v55 = vpop.f32.mrb[182].mxu1  ;;  %v11338_v28 = vpop.permute.xlu1 %4742 }
 0x636   : > { %v4505_v44 = vmul.f32 %v8779_v10, %v10845_v59  ;;  %v8781_v12 = vadd.f32 %v8718_v55, %v11052_v3  ;;  %v4375_v56 = vpop.f32.mrb[183].mxu1  ;;  %vm4473_vm2 = vcmp.ge.f32.partialorder %v8779_v10, 0.0 }
 0x637   : > { %v8782_v22 = vadd.f32 %v4375_v56, %v11066_v1  ;;  %v4503_v19 = vmul.f32 %v8780_v36, %v10845_v59  ;;  %vm4471_vm4 = vcmp.ge.f32.partialorder %v8780_v36, 0.0 }
 0x638   : > { %v4506_v26 = vmul.f32 %v8781_v12, %v10845_v59  ;;  %v11332_v17 = vsel %vm4473_vm2, %v8779_v10, %v4505_v44  ;;  %vm4474_vm3 = vcmp.ge.f32.partialorder %v8781_v12, 0.0  ;;  %v11351_v61 = vpop.permute.xlu0 %4740 }
 0x639   : > { %13043 = vst [vmem:[#allocation22_spill] sm:$0xff] %v11332_v17  ;;  %4816 = vrot.lane.b32.xlu0 %v11332_v17, %s9766_s21  ;;  %v4504_v3 = vmul.f32 %v8782_v22, %v10845_v59  ;;  %vm4472_vm5 = vcmp.ge.f32.partialorder %v8782_v22, 0.0  ;;  %v11345_v1 = vsel %vm4471_vm4, %v8780_v36, %v4503_v19  ;;  %v11355_v10 = vpop.permute.xlu1 %4754 }
 0x63a   : > { %v11341_v55 = vsel %vm4474_vm3, %v8781_v12, %v4506_v26  ;;  %13045 = vst [vmem:[#allocation63_spill] sm:$0xff] %v11345_v1  ;;  %v480_v12 = vld [vmem:[%s12703_s3 + $0xf0] sm:$0xff] }
 0x63b   : > { %13044 = vst [vmem:[#allocation23_spill] sm:$0xff] %v11341_v55  ;;  %4818 = vrot.lane.b32.xlu1 %v11341_v55, %s9766_s21  ;;  %v11349_v44 = vsel %vm4472_vm5, %v8782_v22, %v4504_v3 }
 0x63c   : > { %13046 = vst [vmem:[#allocation62_spill] sm:$0xff] %v11349_v44  ;;  %v11361_v36 = vpop.permute.xlu0 %4752 }
 0x63d   : > { %4812 = vrot.lane.b32.xlu0 %v11345_v1, %s9766_s21  ;;  %13047 = vst [vmem:[#allocation65_spill] sm:$0xff] %v11361_v36  ;;  %v11364_v3 = vpop.permute.xlu1 %4750  ;;  %v8755_v1 = vadd.f32 %v11135_v39, %v480_v12 }
 0x63e   : > { %13048 = vst [vmem:[#allocation64_spill] sm:$0xff] %v11364_v3 }
 0x63f   : > { %4814 = vrot.lane.b32.xlu1 %v11349_v44, %s9766_s21  ;;  %vm2394_vm10 = vcmp.ge.f32.partialorder %v8755_v1, 0.0 }
 0x640   : > { %v11383_v3 = vpop.permute.xlu0 %4748 }
 0x643   : > { %v8721_v26 = vpop.f32.mrb[184].mxu1 }
 0x644   : > { %v8783_v19 = vadd.f32 %v8721_v26, %v11086_v33  ;;  %v4388_v40 = vpop.f32.mrb[185].mxu1  ;;  %v481_v33 = vld [vmem:[%s12703_s3 + $0xf8] sm:$0xff] }
 0x645   : > { %v8784_v56 = vadd.f32 %v4388_v40, %v11110_v42  ;;  %v8722_v22 = vpop.f32.mrb[186].mxu1 }
 0x646   : > { %v4509_v55 = vmul.f32 %v8783_v19, %v10845_v59  ;;  %v8785_v17 = vadd.f32 %v8722_v22, %v11097_v23  ;;  %v4391_v44 = vpop.f32.mrb[187].mxu1  ;;  %vm4477_vm6 = vcmp.ge.f32.partialorder %v8783_v19, 0.0  ;;  %v8757_v23 = vadd.f32 %v11148_v29, %v481_v33 }
 0x647   : > { %v8786_v26 = vadd.f32 %v4391_v44, %v11105_v7  ;;  %v4507_v36 = vmul.f32 %v8784_v56, %v10845_v59  ;;  %vm4475_vm8 = vcmp.ge.f32.partialorder %v8784_v56, 0.0  ;;  %v2427_v7 = vmul.f32 %v8755_v1, %v10845_v59 }
 0x648   : > { %v4510_v42 = vmul.f32 %v8785_v17, %v10845_v59  ;;  %v11375_v40 = vsel %vm4477_vm6, %v8783_v19, %v4509_v55  ;;  %vm4478_vm7 = vcmp.ge.f32.partialorder %v8785_v17, 0.0  ;;  %v11388_v55 = vpop.permute.xlu1 %4762  ;;  %v2428_v29 = vmul.f32 %v8757_v23, %v10845_v59 }
 0x649   : > { %13049 = vst [vmem:[#allocation24_spill] sm:$0xff] %v11375_v40  ;;  %4824 = vrot.lane.b32.xlu0 %v11375_v40, %s9766_s21  ;;  %v4508_v39 = vmul.f32 %v8786_v26, %v10845_v59  ;;  %vm4476_vm9 = vcmp.ge.f32.partialorder %v8786_v26, 0.0  ;;  %v11390_v44 = vsel %vm4475_vm8, %v8784_v56, %v4507_v36  ;;  %vm2395_vm11 = vcmp.ge.f32.partialorder %v8757_v23, 0.0 }
 0x64a   : > { %v11381_v22 = vsel %vm4478_vm7, %v8785_v17, %v4510_v42  ;;  %13051 = vst [vmem:[#allocation26_spill] sm:$0xff] %v11390_v44  ;;  %v11399_v19 = vsel %vm2394_vm10, %v8755_v1, %v2427_v7  ;;  %v11401_v42 = vpop.permute.xlu0 %4760  ;;  %v11407_v56 = vsel %vm2395_vm11, %v8757_v23, %v2428_v29 }
 0x64b   : > { %13050 = vst [vmem:[#allocation25_spill] sm:$0xff] %v11381_v22  ;;  %4826 = vrot.lane.b32.xlu1 %v11381_v22, %s9766_s21  ;;  %v11395_v17 = vsel %vm4476_vm9, %v8786_v26, %v4508_v39  ;;  %13053 = vst [vmem:[#allocation67_spill] sm:$0xff] %v11399_v19  ;;  %v4836_v39 = vlaneseq }
 0x64c   : > { %13052 = vst [vmem:[#allocation27_spill] sm:$0xff] %v11395_v17  ;;  %13054 = vst [vmem:[#allocation66_spill] sm:$0xff] %v11401_v42  ;;  %v11405_v36 = vpop.permute.xlu1 %4758 }
 0x64d   : > { %4820 = vrot.lane.b32.xlu0 %v11390_v44, %s9766_s21  ;;  %13055 = vst [vmem:[#allocation28_spill] sm:$0xff] %v11405_v36  ;;  %13056 = vst [vmem:[#allocation29_spill] sm:$0xff] %v11407_v56  ;;  %v11418_v29 = vshrl.u32 %v4836_v39, 7 }
 0x64e   : > { %v11412_v44 = vpop.permute.xlu0 %4756 }
 0x64f   : > { %4822 = vrot.lane.b32.xlu1 %v11395_v17, %s9766_s21 }
 0x650   : > { %v11416_v23 = vpop.permute.xlu1 %4766 }
 0x651   : > { %4768 = vrot.lane.b32.xlu0 %v11399_v19, %s9766_s21 }
 0x653   : > { %v8725_v22 = vpop.f32.mrb[188].mxu1  ;;  %4770 = vrot.lane.b32.xlu1 %v11407_v56, %s9766_s21 }
 0x654   : > { %v4404_v26 = vpop.f32.mrb[189].mxu1  ;;  %v8787_v40 = vadd.f32 %v8725_v22, %v480_v12 }
 0x655   : > { %v8788_v17 = vadd.f32 %v4404_v26, %v11133_v53  ;;  %v8726_v1 = vpop.f32.mrb[190].mxu1  ;;  %v9420_v53 = vld [vmem:[#allocation11 + $0x4] ss:$8 sps:$4 sm:$0xff]  }
 0x656   : > { %v4407_v7 = vpop.f32.mrb[191].mxu1  ;;  %v8789_v19 = vadd.f32 %v8726_v1, %v481_v33  ;;  %v4513_v56 = vmul.f32 %v8787_v40, %v10845_v59  ;;  %vm4481_vm14 = vcmp.ge.f32.partialorder %v8787_v40, 0.0  ;;  %5235 = vmatprep.mubr.bf16.mxu0 %v9420_v53 }
 0x657   : > { %v4511_v42 = vmul.f32 %v8788_v17, %v10845_v59  ;;  %v8790_v36 = vadd.f32 %v4407_v7, %v11145_v2  ;;  %vm4479_vm12 = vcmp.ge.f32.partialorder %v8788_v17, 0.0  ;;  %v11427_v2 = vand.u32 127, %v4836_v39 }
 0x658   : > { %v4514_v33 = vmul.f32 %v8789_v19, %v10845_v59  ;;  %vm4482_vm15 = vcmp.ge.f32.partialorder %v8789_v19, 0.0  ;;  %v12846_v7 = vsub.s32 1, %v11418_v29 }
 0x659   : > { %v4512_v12 = vmul.f32 %v8790_v36, %v10845_v59  ;;  %v11422_v22 = vsel %vm4479_vm12, %v8788_v17, %v4511_v42  ;;  %vm4480_vm13 = vcmp.ge.f32.partialorder %v8790_v36, 0.0  ;;  %v11433_v17 = vpop.permute.xlu0 %4764  ;;  %v12847_v42 = vsub.s32 0, %v11418_v29  ;;  %v4903_v59 = vld [vmem:[%s12706_s6] sm:$0x3] }
 0x65a   : > { %13057 = vst [vmem:[#allocation30_spill] sm:$0xff] %v11422_v22  ;;  %4828 = vrot.lane.b32.xlu0 %v11422_v22, %s9766_s21  ;;  %v11437_v22 = vsel %vm4481_vm14, %v8787_v40, %v4513_v56  ;;  %vm4838_vm0 = vcmp.lt.s32.totalorder %v11427_v2, 16  ;;  %v11455_v40 = vrot.slane %v4903_v59, %v12846_v7  ;;  %vm5877_vm1 = vcmp.lt.s32.totalorder %v11427_v2, 112  ;;  %v9495_v2 = vld [vmem:[#allocation11 + $0x190] ss:$8 sps:$4 sm:$0xff]  }
 0x65b   : > { %v11429_v26 = vsel %vm4480_vm13, %v8790_v36, %v4512_v12  ;;  %13059 = vst [vmem:[#allocation32_spill] sm:$0xff] %v11437_v22  ;;  %v11445_v36 = vsel %vm4482_vm15, %v8789_v19, %v4514_v33  ;;  %v11451_v12 = vrot.slane %v4903_v59, %v12847_v42 }
 0x65c   : > { %13058 = vst [vmem:[#allocation31_spill] sm:$0xff] %v11429_v26  ;;  %4830 = vrot.lane.b32.xlu1 %v11429_v26, %s9766_s21  ;;  %v4773_v1 = vpop.permute.xlu1 %4772  ;;  %13060 = vst [vmem:[#allocation33_spill] sm:$0xff] %v11445_v36 }
 0x65d   : > { %v4777_v56 = vpop.permute.xlu0 %4776  ;;  %v4839_v53 = vsel %vm4838_vm0, %v11230_v6, %v4773_v1  ;;  %v4871_v19 = vsel %vm4838_vm0, %v4773_v1, %v11230_v6 }
 0x65e   : > { %4832 = vrot.lane.b32.xlu0 %v11437_v22, %s9766_s21  ;;  %v4841_v59 = vsel %vm4838_vm0, %v11219_v47, %v4777_v56  ;;  %v4915_v42 = vmul.f32 %v11451_v12, %v4871_v19  ;;  %v4916_v6 = vmul.f32 %v11455_v40, %v4839_v53  ;;  %v4873_v53 = vsel %vm4838_vm0, %v4777_v56, %v11219_v47 }
 0x660   : > { %4834 = vrot.lane.b32.xlu1 %v11445_v36, %s9766_s21  ;;  %v4779_v39 = vpop.permute.xlu1 %4778 }
 0x661   : > { %v4842_v33 = vsel %vm4838_vm0, %v11239_v46, %v4779_v39  ;;  %v4874_v22 = vsel %vm4838_vm0, %v4779_v39, %v11239_v46  ;;  %v4919_v39 = vmul.f32 %v11451_v12, %v4873_v53 }
 0x662   : > { %5749 = vrot.lane.b32.xlu0 %v10889_v62, %s9767_s11  ;;  %v4922_v26 = vmul.f32 %v11455_v40, %v4842_v33  ;;  %v4920_v62 = vmul.f32 %v11455_v40, %v4841_v59 }
 0x664   : > { %v4775_v7 = vpop.permute.xlu1 %4774  ;;  %5751 = vrot.lane.b32.xlu1 %v10903_v38, %s9767_s11 }
 0x665   : > { %v4840_v1 = vsel %vm4838_vm0, %v11247_v52, %v4775_v7  ;;  %v4872_v36 = vsel %vm4838_vm0, %v4775_v7, %v11247_v52  ;;  %v4921_v7 = vmul.f32 %v11451_v12, %v4874_v22 }
 0x666   : > { %v4917_v38 = vmul.f32 %v11451_v12, %v4872_v36  ;;  %v4918_v19 = vmul.f32 %v11455_v40, %v4840_v1  ;;  %5813 = vrot.lane.b32.xlu0 %v11182_v16, %s9767_s11  ;;  %v5014_v36 = vpack.c.bf16 %v4922_v26, %v4920_v62 }
 0x668   : > { %v5011_v52 = vpack.c.bf16 %v4917_v38, %v4915_v42  ;;  %5815 = vrot.lane.b32.xlu1 %v11191_v34, %s9767_s11  ;;  %v5012_v46 = vpack.c.bf16 %v4918_v19, %v4916_v6  ;;  %v5013_v38 = vpack.c.bf16 %v4921_v7, %v4919_v39 }
 0x66a   : > { %5753 = vrot.lane.b32.xlu0 %v10864_v13, %s9767_s11  ;;  %5203 = vmatprep.subr.bf16.mxu0 %v5012_v46 }
 0x66b   : > { %5204 = vmatpush1.bf16.msra.mxu0 %v5011_v52  ;;  %v4785_v33 = vpop.permute.xlu0 %4784 }
 0x66c   : > { %5755 = vrot.lane.b32.xlu1 %v10873_v43, %s9767_s11  ;;  %5205 = vmatprep.subr.bf16.mxu0 %v5014_v36  ;;  %v4845_v56 = vsel %vm4838_vm0, %v11254_v48, %v4785_v33  ;;  %v4877_v7 = vsel %vm4838_vm0, %v4785_v33, %v11254_v48 }
 0x66d   : > { %v4787_v47 = vpop.permute.xlu1 %4786 }
 0x66e   : > { %5817 = vrot.lane.b32.xlu0 %v11176_v54, %s9767_s11  ;;  %v4846_v22 = vsel %vm4838_vm0, %v11251_v32, %v4787_v47  ;;  %v4878_v6 = vsel %vm4838_vm0, %v4787_v47, %v11251_v32 }
 0x66f   : > { %5206 = vmatpush1.bf16.msra.mxu0 %v5013_v38  ;;  %v4781_v42 = vpop.permute.xlu0 %4780  ;;  %v4930_v1 = vmul.f32 %v11455_v40, %v4846_v22  ;;  %v4929_v38 = vmul.f32 %v11451_v12, %v4878_v6  ;;  %v4927_v22 = vmul.f32 %v11451_v12, %v4877_v7 }
 0x670   : > { %v4843_v62 = vsel %vm4838_vm0, %v11271_v45, %v4781_v42  ;;  %v4875_v26 = vsel %vm4838_vm0, %v4781_v42, %v11271_v45  ;;  %5819 = vrot.lane.b32.xlu1 %v11187_v0, %s9767_s11 }
 0x671   : > { %v4783_v59 = vpop.permute.xlu1 %4782  ;;  %v4923_v53 = vmul.f32 %v11451_v12, %v4875_v26  ;;  %v4924_v52 = vmul.f32 %v11455_v40, %v4843_v62  ;;  %v5017_v42 = vpack.c.bf16 %v4929_v38, %v4927_v22 }
 0x672   : > { %v4844_v19 = vsel %vm4838_vm0, %v11257_v31, %v4783_v59  ;;  %v4876_v45 = vsel %vm4838_vm0, %v4783_v59, %v11257_v31  ;;  %5757 = vrot.lane.b32.xlu0 %v10944_v35, %s9767_s11  ;;  %v4928_v31 = vmul.f32 %v11455_v40, %v4845_v56 }
 0x673   : > { %v4925_v46 = vmul.f32 %v11451_v12, %v4876_v45  ;;  %v4926_v32 = vmul.f32 %v11455_v40, %v4844_v19 }
 0x674   : > { %5759 = vrot.lane.b32.xlu1 %v10939_v30, %s9767_s11  ;;  %v5018_v47 = vpack.c.bf16 %v4930_v1, %v4928_v31 }
 0x675   : > { %v5015_v36 = vpack.c.bf16 %v4925_v46, %v4923_v53  ;;  %v5016_v39 = vpack.c.bf16 %v4926_v32, %v4924_v52 }
 0x676   : > { %5821 = vrot.lane.b32.xlu0 %v11211_v25, %s9767_s11 }
 0x677   : > { %5207 = vmatprep.subr.bf16.mxu0 %v5016_v39 }
 0x678   : > { %5823 = vrot.lane.b32.xlu1 %v11215_v41, %s9767_s11  ;;  %5208 = vmatpush1.bf16.msra.mxu0 %v5015_v36 }
 0x679   : > { %5209 = vmatprep.subr.bf16.mxu0 %v5018_v47 }
 0x67a   : > { %5761 = vrot.lane.b32.xlu0 %v10924_v37, %s9767_s11 }
 0x67b   : > { %v4793_v48 = vpop.permute.xlu0 %4792 }
 0x67c   : > { %5763 = vrot.lane.b32.xlu1 %v10913_v63, %s9767_s11  ;;  %5210 = vmatpush1.bf16.msra.mxu0 %v5017_v42  ;;  %v4849_v6 = vsel %vm4838_vm0, %v11285_v5, %v4793_v48  ;;  %v4881_v7 = vsel %vm4838_vm0, %v4793_v48, %v11285_v5  ;;  %v13061_v42 = vld [vmem:[#allocation36_spill] sm:$0xff] }
 0x67d   : > { %v4795_v33 = vpop.permute.xlu1 %4794  ;;  %v4935_v47 = vmul.f32 %v11451_v12, %v4881_v7 }
 0x67e   : > { %5825 = vrot.lane.b32.xlu0 %v11202_v15, %s9767_s11  ;;  %v4850_v62 = vsel %vm4838_vm0, %v11275_v27, %v4795_v33  ;;  %v4882_v19 = vsel %vm4838_vm0, %v4795_v33, %v11275_v27 }
 0x67f   : > { %v4789_v26 = vpop.permute.xlu0 %4788  ;;  %v4938_v45 = vmul.f32 %v11455_v40, %v4850_v62  ;;  %v4937_v39 = vmul.f32 %v11451_v12, %v4882_v19 }
 0x680   : > { %v4847_v56 = vsel %vm4838_vm0, %v11293_v9, %v4789_v26  ;;  %v4879_v59 = vsel %vm4838_vm0, %v4789_v26, %v11293_v9  ;;  %5827 = vrot.lane.b32.xlu1 %v11207_v49, %s9767_s11 }
 0x681   : > { %v4791_v1 = vpop.permute.xlu1 %4790  ;;  %v4931_v52 = vmul.f32 %v11451_v12, %v4879_v59  ;;  %v4932_v46 = vmul.f32 %v11455_v40, %v4847_v56  ;;  %v5021_v22 = vpack.c.bf16 %v4937_v39, %v4935_v47 }
 0x682   : > { %v4848_v53 = vsel %vm4838_vm0, %v11287_v11, %v4791_v1  ;;  %v4880_v9 = vsel %vm4838_vm0, %v4791_v1, %v11287_v11  ;;  %5765 = vrot.lane.b32.xlu0 %v10991_v57, %s9767_s11  ;;  %v4936_v11 = vmul.f32 %v11455_v40, %v4849_v6 }
 0x683   : > { %v4933_v32 = vmul.f32 %v11451_v12, %v4880_v9  ;;  %v4934_v27 = vmul.f32 %v11455_v40, %v4848_v53  ;;  %v13063_v9 = vld [vmem:[#allocation40_spill] sm:$0xff] }
 0x684   : > { %5767 = vrot.lane.b32.xlu1 %v10983_v51, %s9767_s11  ;;  %v5022_v38 = vpack.c.bf16 %v4938_v45, %v4936_v11  ;;  %v13062_v45 = vld [vmem:[#allocation20_spill] sm:$0xff] }
 0x685   : > { %v5019_v31 = vpack.c.bf16 %v4933_v32, %v4931_v52  ;;  %v5020_v36 = vpack.c.bf16 %v4934_v27, %v4932_v46  ;;  %v13064_v27 = vld [vmem:[#allocation41_spill] sm:$0xff] }
 0x686   : > { %5829 = vrot.lane.b32.xlu0 %v11241_v50, %s9767_s11 }
 0x687   : > { %5211 = vmatprep.subr.bf16.mxu0 %v5020_v36 }
 0x688   : > { %5831 = vrot.lane.b32.xlu1 %v11245_v21, %s9767_s11  ;;  %5212 = vmatpush1.bf16.msra.mxu0 %v5019_v31 }
 0x689   : > { %5213 = vmatprep.subr.bf16.mxu0 %v5022_v38  ;;  %v13065_v38 = vld [vmem:[#allocation56_spill] sm:$0xff] }
 0x68a   : > { %5769 = vrot.lane.b32.xlu0 %v10973_v20, %s9767_s11 }
 0x68b   : > { %v4801_v5 = vpop.permute.xlu0 %4800 }
 0x68c   : > { %5771 = vrot.lane.b32.xlu1 %v13061_v42, %s9767_s11  ;;  %5214 = vmatpush1.bf16.msra.mxu0 %v5021_v22  ;;  %v4853_v59 = vsel %vm4838_vm0, %v11311_v14, %v4801_v5  ;;  %v4885_v7 = vsel %vm4838_vm0, %v4801_v5, %v11311_v14  ;;  %v13067_v14 = vld [vmem:[#allocation38_spill] sm:$0xff] }
 0x68d   : > { %v4803_v48 = vpop.permute.xlu1 %4802  ;;  %v4944_v11 = vmul.f32 %v11455_v40, %v4853_v59  ;;  %v4943_v22 = vmul.f32 %v11451_v12, %v4885_v7 }
 0x68e   : > { %5833 = vrot.lane.b32.xlu0 %v11228_v58, %s9767_s11  ;;  %v4854_v33 = vsel %vm4838_vm0, %v11296_v4, %v4803_v48  ;;  %v4886_v1 = vsel %vm4838_vm0, %v4803_v48, %v11296_v4  ;;  %v13066_v48 = vld [vmem:[#allocation59_spill] sm:$0xff] }
 0x68f   : > { %v4797_v62 = vpop.permute.xlu0 %4796  ;;  %v4946_v19 = vmul.f32 %v11455_v40, %v4854_v33  ;;  %v4945_v39 = vmul.f32 %v11451_v12, %v4886_v1 }
 0x690   : > { %v4851_v26 = vsel %vm4838_vm0, %v11321_v8, %v4797_v62  ;;  %v4883_v56 = vsel %vm4838_vm0, %v4797_v62, %v11321_v8  ;;  %5835 = vrot.lane.b32.xlu1 %v11235_v18, %s9767_s11  ;;  %v13068_v62 = vld [vmem:[#allocation39_spill] sm:$0xff] }
 0x691   : > { %v4799_v6 = vpop.permute.xlu1 %4798  ;;  %v4939_v52 = vmul.f32 %v11451_v12, %v4883_v56  ;;  %v4940_v46 = vmul.f32 %v11455_v40, %v4851_v26  ;;  %v5026_v47 = vpack.c.bf16 %v4946_v19, %v4944_v11  ;;  %v5025_v33 = vpack.c.bf16 %v4945_v39, %v4943_v22  ;;  %v13069_v56 = vld [vmem:[#allocation54_spill] sm:$0xff] }
 0x692   : > { %v4852_v53 = vsel %vm4838_vm0, %v13062_v45, %v4799_v6  ;;  %v4884_v8 = vsel %vm4838_vm0, %v4799_v6, %v13062_v45  ;;  %5773 = vrot.lane.b32.xlu0 %v13063_v9, %s9767_s11  ;;  %v13070_v45 = vld [vmem:[#allocation57_spill] sm:$0xff] }
 0x693   : > { %v4941_v32 = vmul.f32 %v11451_v12, %v4884_v8  ;;  %v4942_v4 = vmul.f32 %v11455_v40, %v4852_v53 }
 0x694   : > { %5775 = vrot.lane.b32.xlu1 %v13064_v27, %s9767_s11 }
 0x695   : > { %v5023_v31 = vpack.c.bf16 %v4941_v32, %v4939_v52  ;;  %v5024_v36 = vpack.c.bf16 %v4942_v4, %v4940_v46  ;;  %v13071_v4 = vld [vmem:[#allocation45_spill] sm:$0xff] }
 0x696   : > { %5837 = vrot.lane.b32.xlu0 %v13065_v38, %s9767_s11 }
 0x697   : > { %5215 = vmatprep.subr.bf16.mxu0 %v5024_v36  ;;  %v13072_v36 = vld [vmem:[#allocation42_spill] sm:$0xff] }
 0x698   : > { %5839 = vrot.lane.b32.xlu1 %v13066_v48, %s9767_s11  ;;  %5216 = vmatpush1.bf16.msra.mxu0 %v5023_v31 }
 0x699   : > { %5217 = vmatprep.subr.bf16.mxu0 %v5026_v47 }
 0x69a   : > { %5777 = vrot.lane.b32.xlu0 %v13067_v14, %s9767_s11 }
 0x69b   : > { %v4809_v5 = vpop.permute.xlu0 %4808 }
 0x69c   : > { %5779 = vrot.lane.b32.xlu1 %v13068_v62, %s9767_s11  ;;  %5218 = vmatpush1.bf16.msra.mxu0 %v5025_v33  ;;  %v4857_v53 = vsel %vm4838_vm0, %v11334_v60, %v4809_v5  ;;  %v4889_v39 = vsel %vm4838_vm0, %v4809_v5, %v11334_v60  ;;  %v13075_v60 = vld [vmem:[#allocation43_spill] sm:$0xff] }
 0x69d   : > { %v4811_v26 = vpop.permute.xlu1 %4810 }
 0x69e   : > { %5841 = vrot.lane.b32.xlu0 %v13069_v56, %s9767_s11  ;;  %v4858_v59 = vsel %vm4838_vm0, %v11323_v24, %v4811_v26  ;;  %v4890_v52 = vsel %vm4838_vm0, %v4811_v26, %v11323_v24  ;;  %v13073_v26 = vld [vmem:[#allocation60_spill] sm:$0xff] }
 0x69f   : > { %v4805_v6 = vpop.permute.xlu0 %4804  ;;  %v4954_v46 = vmul.f32 %v11455_v40, %v4858_v59  ;;  %v4953_v33 = vmul.f32 %v11451_v12, %v4890_v52  ;;  %v13077_v52 = vld [vmem:[#allocation58_spill] sm:$0xff] }
 0x6a0   : > { %v4855_v1 = vsel %vm4838_vm0, %v11351_v61, %v4805_v6  ;;  %v4887_v19 = vsel %vm4838_vm0, %v4805_v6, %v11351_v61  ;;  %5843 = vrot.lane.b32.xlu1 %v13070_v45, %s9767_s11  ;;  %v4951_v6 = vmul.f32 %v11451_v12, %v4889_v39 }
 0x6a1   : > { %v4807_v8 = vpop.permute.xlu1 %4806  ;;  %v4947_v7 = vmul.f32 %v11451_v12, %v4887_v19  ;;  %v4948_v11 = vmul.f32 %v11455_v40, %v4855_v1  ;;  %v13074_v1 = vld [vmem:[#allocation21_spill] sm:$0xff] }
 0x6a2   : > { %v4856_v32 = vsel %vm4838_vm0, %v11338_v28, %v4807_v8  ;;  %v4888_v61 = vsel %vm4838_vm0, %v4807_v8, %v11338_v28  ;;  %5781 = vrot.lane.b32.xlu0 %v13071_v4, %s9767_s11  ;;  %v4952_v28 = vmul.f32 %v11455_v40, %v4857_v53  ;;  %v5029_v19 = vpack.c.bf16 %v4953_v33, %v4951_v6  ;;  %v13076_v53 = vld [vmem:[#allocation19_spill] sm:$0xff] }
 0x6a3   : > { %v4949_v31 = vmul.f32 %v11451_v12, %v4888_v61  ;;  %v4950_v24 = vmul.f32 %v11455_v40, %v4856_v32 }
 0x6a4   : > { %5783 = vrot.lane.b32.xlu1 %v13072_v36, %s9767_s11  ;;  %v5030_v59 = vpack.c.bf16 %v4954_v46, %v4952_v28 }
 0x6a5   : > { %v5027_v47 = vpack.c.bf16 %v4949_v31, %v4947_v7  ;;  %v5028_v22 = vpack.c.bf16 %v4950_v24, %v4948_v11  ;;  %v13078_v11 = vld [vmem:[#allocation61_spill] sm:$0xff] }
 0x6a6   : > { %5845 = vrot.lane.b32.xlu0 %v13073_v26, %s9767_s11  ;;  %v13079_v31 = vld [vmem:[#allocation65_spill] sm:$0xff] }
 0x6a7   : > { %5219 = vmatprep.subr.bf16.mxu0 %v5028_v22  ;;  %v13080_v22 = vld [vmem:[#allocation64_spill] sm:$0xff] }
 0x6a8   : > { %5847 = vrot.lane.b32.xlu1 %v13074_v1, %s9767_s11  ;;  %5220 = vmatpush1.bf16.msra.mxu0 %v5027_v47 }
 0x6a9   : > { %5221 = vmatprep.subr.bf16.mxu0 %v5030_v59  ;;  %v13081_v59 = vld [vmem:[#allocation49_spill] sm:$0xff] }
 0x6aa   : > { %5785 = vrot.lane.b32.xlu0 %v13075_v60, %s9767_s11 }
 0x6ab   : > { %v4817_v5 = vpop.permute.xlu0 %4816 }
 0x6ac   : > { %5787 = vrot.lane.b32.xlu1 %v13076_v53, %s9767_s11  ;;  %5222 = vmatpush1.bf16.msra.mxu0 %v5029_v19  ;;  %v4861_v24 = vsel %vm4838_vm0, %v13079_v31, %v4817_v5 }
 0x6ad   : > { %v4819_v8 = vpop.permute.xlu1 %4818 }
 0x6ae   : > { %5849 = vrot.lane.b32.xlu0 %v13077_v52, %s9767_s11  ;;  %v4862_v46 = vsel %vm4838_vm0, %v11355_v10, %v4819_v8  ;;  %v4894_v28 = vsel %vm4838_vm0, %v4819_v8, %v11355_v10  ;;  %v13082_v8 = vld [vmem:[#allocation46_spill] sm:$0xff] }
 0x6af   : > { %v4813_v32 = vpop.permute.xlu0 %4812  ;;  %v4962_v47 = vmul.f32 %v11455_v40, %v4862_v46  ;;  %v4893_v46 = vsel %vm4838_vm0, %v4817_v5, %v13079_v31  ;;  %v13085_v5 = vld [vmem:[#allocation47_spill] sm:$0xff] }
 0x6b0   : > { %v4859_v61 = vsel %vm4838_vm0, %v11383_v3, %v4813_v32  ;;  %v4891_v7 = vsel %vm4838_vm0, %v4813_v32, %v11383_v3  ;;  %5851 = vrot.lane.b32.xlu1 %v13078_v11, %s9767_s11 }
 0x6b1   : > { %v4815_v39 = vpop.permute.xlu1 %4814  ;;  %v4955_v6 = vmul.f32 %v11451_v12, %v4891_v7  ;;  %v4956_v19 = vmul.f32 %v11455_v40, %v4859_v61  ;;  %v13083_v7 = vld [vmem:[#allocation63_spill] sm:$0xff] }
 0x6b2   : > { %v4860_v33 = vsel %vm4838_vm0, %v13080_v22, %v4815_v39  ;;  %v4892_v3 = vsel %vm4838_vm0, %v4815_v39, %v13080_v22  ;;  %5789 = vrot.lane.b32.xlu0 %v13081_v59, %s9767_s11  ;;  %v4960_v39 = vmul.f32 %v11455_v40, %v4861_v24  ;;  %v4961_v59 = vmul.f32 %v11451_v12, %v4894_v28  ;;  %v13086_v24 = vld [vmem:[#allocation44_spill] sm:$0xff] }
 0x6b3   : > { %v4957_v32 = vmul.f32 %v11451_v12, %v4892_v3  ;;  %v4958_v10 = vmul.f32 %v11455_v40, %v4860_v33  ;;  %v4959_v33 = vmul.f32 %v11451_v12, %v4893_v46  ;;  %v13084_v3 = vld [vmem:[#allocation62_spill] sm:$0xff] }
 0x6b4   : > { %5791 = vrot.lane.b32.xlu1 %v13082_v8, %s9767_s11  ;;  %v5034_v61 = vpack.c.bf16 %v4962_v47, %v4960_v39 }
 0x6b5   : > { %v5031_v22 = vpack.c.bf16 %v4957_v32, %v4955_v6  ;;  %v5032_v53 = vpack.c.bf16 %v4958_v10, %v4956_v19  ;;  %v5033_v8 = vpack.c.bf16 %v4961_v59, %v4959_v33  ;;  %v13088_v32 = vld [vmem:[#allocation23_spill] sm:$0xff]  ;;  %v13089_v10 = vld [vmem:[#allocation66_spill] sm:$0xff] }
 0x6b6   : > { %5853 = vrot.lane.b32.xlu0 %v13083_v7, %s9767_s11 }
 0x6b7   : > { %5223 = vmatprep.subr.bf16.mxu0 %v5032_v53  ;;  %v13087_v53 = vld [vmem:[#allocation22_spill] sm:$0xff] }
 0x6b8   : > { %5855 = vrot.lane.b32.xlu1 %v13084_v3, %s9767_s11  ;;  %5224 = vmatpush1.bf16.msra.mxu0 %v5031_v22 }
 0x6b9   : > { %5225 = vmatprep.subr.bf16.mxu0 %v5034_v61  ;;  %v13090_v61 = vld [vmem:[#allocation28_spill] sm:$0xff] }
 0x6ba   : > { %5793 = vrot.lane.b32.xlu0 %v13085_v5, %s9767_s11 }
 0x6bb   : > { %v4825_v31 = vpop.permute.xlu0 %4824 }
 0x6bc   : > { %5795 = vrot.lane.b32.xlu1 %v13086_v24, %s9767_s11  ;;  %5226 = vmatpush1.bf16.msra.mxu0 %v5033_v8  ;;  %v4865_v8 = vsel %vm4838_vm0, %v13089_v10, %v4825_v31 }
 0x6bd   : > { %v4827_v28 = vpop.permute.xlu1 %4826 }
 0x6be   : > { %5857 = vrot.lane.b32.xlu0 %v13087_v53, %s9767_s11  ;;  %v4866_v47 = vsel %vm4838_vm0, %v11388_v55, %v4827_v28  ;;  %v4898_v39 = vsel %vm4838_vm0, %v4827_v28, %v11388_v55  ;;  %v13092_v28 = vld [vmem:[#allocation50_spill] sm:$0xff] }
 0x6bf   : > { %v4821_v6 = vpop.permute.xlu0 %4820  ;;  %v4970_v22 = vmul.f32 %v11455_v40, %v4866_v47  ;;  %v4897_v47 = vsel %vm4838_vm0, %v4825_v31, %v13089_v10 }
 0x6c0   : > { %v4863_v59 = vsel %vm4838_vm0, %v11412_v44, %v4821_v6  ;;  %v4895_v19 = vsel %vm4838_vm0, %v4821_v6, %v11412_v44  ;;  %5859 = vrot.lane.b32.xlu1 %v13088_v32, %s9767_s11  ;;  %v13091_v6 = vld [vmem:[#allocation53_spill] sm:$0xff] }
 0x6c1   : > { %v4823_v46 = vpop.permute.xlu1 %4822  ;;  %v4963_v24 = vmul.f32 %v11451_v12, %v4895_v19  ;;  %v4964_v5 = vmul.f32 %v11455_v40, %v4863_v59  ;;  %v13093_v19 = vld [vmem:[#allocation26_spill] sm:$0xff] }
 0x6c2   : > { %v4864_v33 = vsel %vm4838_vm0, %v13090_v61, %v4823_v46  ;;  %v4896_v44 = vsel %vm4838_vm0, %v4823_v46, %v13090_v61  ;;  %5797 = vrot.lane.b32.xlu0 %v13091_v6, %s9767_s11  ;;  %v4968_v46 = vmul.f32 %v11455_v40, %v4865_v8  ;;  %v4969_v6 = vmul.f32 %v11451_v12, %v4898_v39 }
 0x6c3   : > { %v4965_v32 = vmul.f32 %v11451_v12, %v4896_v44  ;;  %v4966_v55 = vmul.f32 %v11455_v40, %v4864_v33  ;;  %v4967_v33 = vmul.f32 %v11451_v12, %v4897_v47  ;;  %v4769_v44 = vpop.permute.xlu0 %4768 }
 0x6c4   : > { %5799 = vrot.lane.b32.xlu1 %v13092_v28, %s9767_s11  ;;  %v5038_v59 = vpack.c.bf16 %v4970_v22, %v4968_v46  ;;  %v13094_v28 = vld [vmem:[#allocation27_spill] sm:$0xff]  ;;  %v13097_v22 = vld [vmem:[#allocation24_spill] sm:$0xff] }
 0x6c5   : > { %v5035_v61 = vpack.c.bf16 %v4965_v32, %v4963_v24  ;;  %v5036_v53 = vpack.c.bf16 %v4966_v55, %v4964_v5  ;;  %v5037_v31 = vpack.c.bf16 %v4969_v6, %v4967_v33  ;;  %v4771_v10 = vpop.permute.xlu1 %4770  ;;  %v13095_v24 = vld [vmem:[#allocation51_spill] sm:$0xff]  ;;  %v13096_v5 = vld [vmem:[#allocation48_spill] sm:$0xff] }
 0x6c6   : > { %5861 = vrot.lane.b32.xlu0 %v13093_v19, %s9767_s11 }
 0x6c7   : > { %5227 = vmatprep.subr.bf16.mxu0 %v5036_v53 }
 0x6c8   : > { %5863 = vrot.lane.b32.xlu1 %v13094_v28, %s9767_s11  ;;  %5228 = vmatpush1.bf16.msra.mxu0 %v5035_v61 }
 0x6c9   : > { %5229 = vmatprep.subr.bf16.mxu0 %v5038_v59  ;;  %v13098_v59 = vld [vmem:[#allocation25_spill] sm:$0xff] }
 0x6ca   : > { %5801 = vrot.lane.b32.xlu0 %v13095_v24, %s9767_s11  ;;  %v11823_v24 = vld [vmem:[%s12706_s6 + $0x4] sm:$0x3] }
 0x6cc   : > { %5803 = vrot.lane.b32.xlu1 %v13096_v5, %s9767_s11  ;;  %5230 = vmatpush1.bf16.msra.mxu0 %v5037_v31  ;;  %v4829_v32 = vpop.permute.xlu0 %4828 }
 0x6cd   : > { %v4867_v53 = vsel %vm4838_vm0, %v11433_v17, %v4829_v32  ;;  %v4899_v8 = vsel %vm4838_vm0, %v4829_v32, %v11433_v17 }
 0x6ce   : > { %v4831_v39 = vpop.permute.xlu1 %4830  ;;  %5865 = vrot.lane.b32.xlu0 %v13097_v22, %s9767_s11  ;;  %v4971_v47 = vmul.f32 %v11451_v12, %v4899_v8  ;;  %v4972_v46 = vmul.f32 %v11455_v40, %v4867_v53  ;;  %v13099_v8 = vld [vmem:[#allocation55_spill] sm:$0xff] }
 0x6cf   : > { %v4868_v6 = vsel %vm4838_vm0, %v11416_v23, %v4831_v39  ;;  %v4900_v55 = vsel %vm4838_vm0, %v4831_v39, %v11416_v23 }
 0x6d0   : > { %v4973_v61 = vmul.f32 %v11451_v12, %v4900_v55  ;;  %v4974_v17 = vmul.f32 %v11455_v40, %v4868_v6  ;;  %5867 = vrot.lane.b32.xlu1 %v13098_v59, %s9767_s11  ;;  %v4833_v33 = vpop.permute.xlu0 %4832 }
 0x6d1   : > { %v4869_v31 = vsel %vm4838_vm0, %v4769_v44, %v4833_v33  ;;  %v4901_v32 = vsel %vm4838_vm0, %v4833_v33, %v4769_v44 }
 0x6d2   : > { %v5039_v5 = vpack.c.bf16 %v4973_v61, %v4971_v47  ;;  %v4835_v23 = vpop.permute.xlu1 %4834  ;;  %5805 = vrot.lane.b32.xlu0 %v13099_v8, %s9767_s11  ;;  %v5040_v53 = vpack.c.bf16 %v4974_v17, %v4972_v46  ;;  %v4975_v39 = vmul.f32 %v11451_v12, %v4901_v32  ;;  %v4976_v44 = vmul.f32 %v11455_v40, %v4869_v31  ;;  %v13100_v46 = vld [vmem:[#allocation52_spill] sm:$0xff]  ;;  %v13101_v32 = vld [vmem:[#allocation30_spill] sm:$0xff] }
 0x6d3   : > { %v4870_v6 = vsel %vm4838_vm0, %v4771_v10, %v4835_v23  ;;  %v4902_v55 = vsel %vm4838_vm0, %v4835_v23, %v4771_v10  ;;  %v13103_v23 = vld [vmem:[#allocation29_spill] sm:$0xff] }
 0x6d4   : > { %v4977_v47 = vmul.f32 %v11451_v12, %v4902_v55  ;;  %v4978_v61 = vmul.f32 %v11455_v40, %v4870_v6  ;;  %5807 = vrot.lane.b32.xlu1 %v13100_v46, %s9767_s11  ;;  %5231 = vmatprep.subr.bf16.mxu0 %v5040_v53  ;;  %v11830_v17 = vpop.permute.xlu0 %5749  ;;  %v13102_v12 = vsub.s32 0, %v11418_v29  ;;  %v9421_v55 = vld [vmem:[#allocation11 + $0x14] ss:$8 sps:$4 sm:$0xff]  }
 0x6d5   : > { %5232 = vmatpush1.bf16.msra.mxu0 %v5039_v5  ;;  %v4677_v5 = vpack.c.bf16 %v11191_v34, %v11182_v16 }
 0x6d6   : > { %v5041_v10 = vpack.c.bf16 %v4977_v47, %v4975_v39  ;;  %v11833_v33 = vpop.permute.xlu1 %5751  ;;  %5869 = vrot.lane.b32.xlu0 %v13101_v32, %s9767_s11  ;;  %v5042_v31 = vpack.c.bf16 %v4978_v61, %v4976_v44  ;;  %v11840_v40 = vrot.slane %v11823_v24, %v13102_v12  ;;  %v9418_v39 = vld [vmem:[#allocation11] ss:$8 sps:$4 sm:$0xff]   ;;  %v13107_v12 = vld [vmem:[#allocation37_spill] sm:$0xff] }
 0x6d7   : > { %v13105_v61 = vld [vmem:[#allocation67_spill] sm:$0xff] }
 0x6d8   : > { %5811 = vrot.lane.b32.xlu1 %v13103_v23, %s9767_s11  ;;  %5233 = vmatprep.subr.bf16.mxu0 %v5042_v31  ;;  %v11844_v53 = vpop.permute.xlu0 %5813  ;;  %v13106_v31 = vld [vmem:[#allocation35_spill] sm:$0xff]  ;;  %v4679_v23 = vpack.c.bf16 %v11187_v0, %v11176_v54  ;;  %v4681_v54 = vpack.c.bf16 %v11215_v41, %v11211_v25  ;;  %v9423_v0 = vld [vmem:[#allocation11 + $0x10] ss:$8 sps:$4 sm:$0xff]   ;;  %v4685_v41 = vpack.c.bf16 %v11245_v21, %v11241_v50 }
 0x6d9   : > { %v5878_v6 = vsel %vm5877_vm1, %v11830_v17, %v11844_v53  ;;  %5234 = vmatpush1.bf16.msra.mxu0 %v5041_v10  ;;  %v4676_v16 = vpack.c.bf16 %v13107_v12, %v13106_v31  ;;  %v4689_v21 = vpack.c.bf16 %v13066_v48, %v13065_v38  ;;  %v4693_v38 = vpack.c.bf16 %v13074_v1, %v13073_v26  ;;  %v9432_v48 = vld [vmem:[#allocation11 + $0x40] ss:$8 sps:$4 sm:$0xff]  }
 0x6da   : > { %v11853_v44 = vmul.f32 %v11840_v40, %v5878_v6  ;;  %v11855_v47 = vpop.permute.xlu1 %5815  ;;  %5809 = vrot.lane.b32.xlu0 %v13105_v61, %s9767_s11  ;;  %5556 = vmatprep.subr.bf16.mxu0 %v4677_v5  ;;  %v13108_v6 = vld [vmem:[#allocation31_spill] sm:$0xff]  ;;  %v13109_v61 = vld [vmem:[#allocation32_spill] sm:$0xff]  ;;  %v4680_v5 = vpack.c.bf16 %v10939_v30, %v10944_v35  ;;  %v9427_v30 = vld [vmem:[#allocation11 + $0x34] ss:$8 sps:$4 sm:$0xff]   ;;  %v4697_v1 = vpack.c.bf16 %v13084_v3, %v13083_v7 }
 0x6db   : > { %v5879_v34 = vsel %vm5877_vm1, %v11833_v33, %v11855_v47  ;;  %v13117_v7 = vld [vmem:[#allocation44_spill] sm:$0xff] }
 0x6dc   : > { %13104 = vst [vmem:[#allocation34_spill] sm:$0xff] %v11853_v44  ;;  %v11866_v10 = vmul.f32 %v11840_v40, %v5879_v34  ;;  %5871 = vrot.lane.b32.xlu1 %v13108_v6, %s9767_s11  ;;  %5236 = vmatmul.mubr.bf16.vlgmr.msra.gmra.mrb[192].mxu0 %v9418_v39  ;;  %v11874_v31 = vpop.permute.xlu0 %5753  ;;  %v4678_v34 = vpack.c.bf16 %v10873_v43, %v10864_v13  ;;  %v13110_v39 = vld [vmem:[#allocation33_spill] sm:$0xff] }
 0x6dd   : > { %5557 = vmatpush1.bf16.msra.mxu0 %v4676_v16  ;;  %5245 = vmatprep.mubr.bf16.mxu0 %v9421_v55  ;;  %v9424_v55 = vld [vmem:[#allocation11 + $0x24] ss:$8 sps:$4 sm:$0xff]   ;;  %v4683_v13 = vpack.c.bf16 %v11207_v49, %v11202_v15  ;;  %v4682_v43 = vpack.c.bf16 %v10913_v63, %v10924_v37  ;;  %v4684_v15 = vpack.c.bf16 %v10983_v51, %v10991_v57 }
 0x6de   : > { %v11876_v12 = vpop.permute.xlu1 %5755  ;;  %5873 = vrot.lane.b32.xlu0 %v13109_v61, %s9767_s11  ;;  %5558 = vmatprep.subr.bf16.mxu0 %v4679_v23  ;;  %v9426_v23 = vld [vmem:[#allocation11 + $0x20] ss:$8 sps:$4 sm:$0xff]   ;;  %v4687_v49 = vpack.c.bf16 %v11235_v18, %v11228_v58  ;;  %v4686_v37 = vpack.c.bf16 %v13061_v42, %v10973_v20  ;;  %v9430_v51 = vld [vmem:[#allocation11 + $0x44] ss:$8 sps:$4 sm:$0xff]   ;;  %v4688_v57 = vpack.c.bf16 %v13064_v27, %v13063_v9  ;;  %v9433_v9 = vld [vmem:[#allocation11 + $0x54] ss:$8 sps:$4 sm:$0xff]  }
 0x6df   : > { %v4691_v18 = vpack.c.bf16 %v13070_v45, %v13069_v56  ;;  %v4690_v42 = vpack.c.bf16 %v13068_v62, %v13067_v14  ;;  %v4692_v56 = vpack.c.bf16 %v13072_v36, %v13071_v4  ;;  %v13111_v14 = vld [vmem:[#allocation19_spill] sm:$0xff] }
 0x6e0   : > { %5875 = vrot.lane.b32.xlu1 %v13110_v39, %s9767_s11  ;;  %v11890_v44 = vpop.permute.xlu0 %5817  ;;  %v4694_v62 = vpack.c.bf16 %v13111_v14, %v13075_v60  ;;  %v9436_v4 = vld [vmem:[#allocation11 + $0x64] ss:$8 sps:$4 sm:$0xff]   ;;  %v4704_v14 = vpack.c.bf16 %v13100_v46, %v13099_v8  ;;  %v13124_v8 = vld [vmem:[#allocation29_spill] sm:$0xff]  ;;  %s9680_s11 = scalar_lea.vmem %s12653_s8, 8192 }
 0x6e1   : > { %5559 = vmatpush1.bf16.msra.mxu0 %v4678_v34  ;;  %v4695_v34 = vpack.c.bf16 %v13078_v11, %v13077_v52  ;;  %v13114_v11 = vld [vmem:[#allocation22_spill] sm:$0xff]  ;;  %p9681_p10 = scmp.ne.s32.totalorder %s12653_s8, %s9680_s11  ;;  %p9688_p1 = scmp.lt.s32.totalorder %s9686_s18, %s9680_s11 }
 0x6e2   : > { %v11886_v16 = vpop.permute.xlu1 %5819  ;;  %5560 = vmatprep.subr.bf16.mxu0 %v4681_v54  ;;  %v9435_v54 = vld [vmem:[#allocation11 + $0x50] ss:$8 sps:$4 sm:$0xff]  }
 0x6e3   : > { %p9682_p3 = pnand %p9681_p10, %p9975_p5  ;;  %p9689_p2 = por %p9688_p1, %p9687_p12 }
 0x6e4   : > { %5246 = vmatmul.mubr.bf16.gmra.mrb[196].mxu0 %v9423_v0  ;;  %v11900_v35 = vpop.permute.xlu0 %5757  ;;  %v13112_v0 = vld [vmem:[#allocation49_spill] sm:$0xff] }
 0x6e5   : > { %5561 = vmatpush1.bf16.msra.mxu0 %v4680_v5  ;;  %5255 = vmatprep.mubr.bf16.mxu0 %v9424_v55  ;;  %v9429_v5 = vld [vmem:[#allocation11 + $0x30] ss:$8 sps:$4 sm:$0xff]   ;;  %p9683_p7 = pneg %p9682_p3 }
 0x6e6   : > { %5562 = vmatprep.subr.bf16.mxu0 %v4683_v13  ;;  %v11896_v25 = vpop.permute.xlu1 %5759  ;;  %v13113_v55 = vld [vmem:[#allocation46_spill] sm:$0xff]  ;;  %v13115_v13 = vld [vmem:[#allocation23_spill] sm:$0xff] }
 0x6e7   : > { %v4696_v52 = vpack.c.bf16 %v13113_v55, %v13112_v0  ;;  %v9448_v0 = vld [vmem:[#allocation11 + $0xa4] ss:$8 sps:$4 sm:$0xff]   ;;  %p9690_p4 = pnand %p9689_p2, %p9683_p7 }
 0x6e8   : > { %v11910_v50 = vpop.permute.xlu0 %5821 }
 0x6e9   : > { %5563 = vmatpush1.bf16.msra.mxu0 %v4682_v43  ;;  %v4699_v43 = vpack.c.bf16 %v13115_v13, %v13114_v11  ;;  %v9450_v11 = vld [vmem:[#allocation11 + $0xa0] ss:$8 sps:$4 sm:$0xff]   ;;  %v9451_v13 = vld [vmem:[#allocation11 + $0xb4] ss:$8 sps:$4 sm:$0xff]  }
 0x6ea   : > { %5564 = vmatprep.subr.bf16.mxu0 %v4685_v41  ;;  %v11906_v63 = vpop.permute.xlu1 %5823  ;;  %v13116_v41 = vld [vmem:[#allocation47_spill] sm:$0xff] }
 0x6eb   : > { %v4698_v3 = vpack.c.bf16 %v13117_v7, %v13116_v41 }
 0x6ec   : > { %5256 = vmatmul.mubr.bf16.gmra.mrb[200].mxu0 %v9426_v23  ;;  %v11920_v20 = vpop.permute.xlu0 %5761 }
 0x6ed   : > { %5565 = vmatpush1.bf16.msra.mxu0 %v4684_v15  ;;  %5265 = vmatprep.mubr.bf16.mxu0 %v9427_v30  ;;  %v4701_v30 = vpack.c.bf16 %v13094_v28, %v13093_v19  ;;  %v9438_v15 = vld [vmem:[#allocation11 + $0x60] ss:$8 sps:$4 sm:$0xff]  }
 0x6ee   : > { %5566 = vmatprep.subr.bf16.mxu0 %v4687_v49  ;;  %v11916_v58 = vpop.permute.xlu1 %5763  ;;  %v9439_v49 = vld [vmem:[#allocation11 + $0x74] ss:$8 sps:$4 sm:$0xff]   ;;  %v13121_v28 = vld [vmem:[#allocation48_spill] sm:$0xff] }
 0x6f0   : > { %v11930_v45 = vpop.permute.xlu0 %5825 }
 0x6f1   : > { %5567 = vmatpush1.bf16.msra.mxu0 %v4686_v37  ;;  %v13118_v37 = vld [vmem:[#allocation53_spill] sm:$0xff] }
 0x6f2   : > { %5568 = vmatprep.subr.bf16.mxu0 %v4689_v21  ;;  %v11926_v27 = vpop.permute.xlu1 %5827  ;;  %v13119_v21 = vld [vmem:[#allocation50_spill] sm:$0xff] }
 0x6f4   : > { %5266 = vmatmul.mubr.bf16.gmra.mrb[204].mxu0 %v9429_v5  ;;  %v11940_v36 = vpop.permute.xlu0 %5765  ;;  %v4700_v5 = vpack.c.bf16 %v13119_v21, %v13118_v37  ;;  %v9456_v21 = vld [vmem:[#allocation11 + $0xc0] ss:$8 sps:$4 sm:$0xff]  }
 0x6f5   : > { %5569 = vmatpush1.bf16.msra.mxu0 %v4688_v57  ;;  %5275 = vmatprep.mubr.bf16.mxu0 %v9430_v51  ;;  %v4703_v57 = vpack.c.bf16 %v13098_v59, %v13097_v22  ;;  %v13122_v22 = vsub.s32 1, %v11418_v29  ;;  %v4707_v29 = vpack.c.bf16 %v13110_v39, %v13109_v61 }
 0x6f6   : > { %5570 = vmatprep.subr.bf16.mxu0 %v4691_v18  ;;  %v11936_v26 = vpop.permute.xlu1 %5767 }
 0x6f7   : > { %v11973_v59 = vrot.slane %v11823_v24, %v13122_v22  ;;  %v9463_v22 = vld [vmem:[#allocation11 + $0xf4] ss:$8 sps:$4 sm:$0xff]  }
 0x6f8   : > { %v11950_v23 = vpop.permute.xlu0 %5829 }
 0x6f9   : > { %5571 = vmatpush1.bf16.msra.mxu0 %v4690_v42  ;;  %v13120_v42 = vld [vmem:[#allocation51_spill] sm:$0xff] }
 0x6fa   : > { %5572 = vmatprep.subr.bf16.mxu0 %v4693_v38  ;;  %v11946_v60 = vpop.permute.xlu1 %5831  ;;  %v4702_v19 = vpack.c.bf16 %v13121_v28, %v13120_v42  ;;  %v4705_v38 = vpack.c.bf16 %v13108_v6, %v13101_v32  ;;  %v5910_v32 = vsel %vm5877_vm1, %v11844_v53, %v11830_v17  ;;  %v13123_v6 = vld [vmem:[#allocation67_spill] sm:$0xff]  ;;  %v9445_v53 = vld [vmem:[#allocation11 + $0x94] ss:$8 sps:$4 sm:$0xff]   ;;  %v9459_v28 = vld [vmem:[#allocation11 + $0xd0] ss:$8 sps:$4 sm:$0xff]  }
 0x6fb   : > { %v5956_v24 = vmul.f32 %v11973_v59, %v5910_v32  ;;  %v4706_v46 = vpack.c.bf16 %v13124_v8, %v13123_v6  ;;  %v9444_v17 = vld [vmem:[#allocation11 + $0x80] ss:$8 sps:$4 sm:$0xff]   ;;  %v5913_v8 = vsel %vm5877_vm1, %v11886_v16, %v11876_v12 }
 0x6fc   : > { %5276 = vmatmul.mubr.bf16.gmra.mrb[208].mxu0 %v9432_v48  ;;  %v11960_v18 = vpop.permute.xlu0 %5769  ;;  %v9441_v48 = vld [vmem:[#allocation11 + $0x70] ss:$8 sps:$4 sm:$0xff]  }
 0x6fd   : > { %5573 = vmatpush1.bf16.msra.mxu0 %v4692_v56  ;;  %5285 = vmatprep.mubr.bf16.mxu0 %v9433_v9  ;;  %v5911_v9 = vsel %vm5877_vm1, %v11855_v47, %v11833_v33  ;;  %v9442_v56 = vld [vmem:[#allocation11 + $0x84] ss:$8 sps:$4 sm:$0xff]  }
 0x6fe   : > { %5574 = vmatprep.subr.bf16.mxu0 %v4695_v34  ;;  %v11956_v51 = vpop.permute.xlu1 %5771  ;;  %v5958_v33 = vmul.f32 %v11973_v59, %v5911_v9 }
 0x700   : > { %v11984_v47 = vpop.permute.xlu0 %5833 }
 0x701   : > { %5575 = vmatpush1.bf16.msra.mxu0 %v4694_v62 }
 0x702   : > { %5576 = vmatprep.subr.bf16.mxu0 %v4697_v1  ;;  %v11975_v34 = vpop.permute.xlu1 %5835  ;;  %v6053_v1 = vpack.c.bf16 %v5958_v33, %v5956_v24  ;;  %v9468_v24 = vld [vmem:[#allocation11 + $0x104] ss:$8 sps:$4 sm:$0xff]  }
 0x704   : > { %5286 = vmatmul.mubr.bf16.gmra.mrb[212].mxu0 %v9435_v54  ;;  %v11993_v54 = vpop.permute.xlu0 %5773 }
 0x705   : > { %5577 = vmatpush1.bf16.msra.mxu0 %v4696_v52  ;;  %5295 = vmatprep.mubr.bf16.mxu0 %v9436_v4  ;;  %v9447_v4 = vld [vmem:[#allocation11 + $0x90] ss:$8 sps:$4 sm:$0xff]  }
 0x706   : > { %5578 = vmatprep.subr.bf16.mxu0 %v4699_v43  ;;  %v11991_v62 = vpop.permute.xlu1 %5775 }
 0x708   : > { %v11997_v39 = vpop.permute.xlu0 %5837 }
 0x709   : > { %5579 = vmatpush1.bf16.msra.mxu0 %v4698_v3  ;;  %v9453_v3 = vld [vmem:[#allocation11 + $0xb0] ss:$8 sps:$4 sm:$0xff]  }
 0x70a   : > { %5580 = vmatprep.subr.bf16.mxu0 %v4701_v30  ;;  %v11995_v61 = vpop.permute.xlu1 %5839  ;;  %v9454_v30 = vld [vmem:[#allocation11 + $0xc4] ss:$8 sps:$4 sm:$0xff]  }
 0x70c   : > { %5296 = vmatmul.mubr.bf16.gmra.mrb[216].mxu0 %v9438_v15  ;;  %v12001_v52 = vpop.permute.xlu0 %5777 }
 0x70d   : > { %5581 = vmatpush1.bf16.msra.mxu0 %v4700_v5  ;;  %5305 = vmatprep.mubr.bf16.mxu0 %v9439_v49  ;;  %v9457_v5 = vld [vmem:[#allocation11 + $0xd4] ss:$8 sps:$4 sm:$0xff]  }
 0x70e   : > { %5582 = vmatprep.subr.bf16.mxu0 %v4703_v57  ;;  %v11999_v55 = vpop.permute.xlu1 %5779 }
 0x710   : > { %v12005_v41 = vpop.permute.xlu0 %5841 }
 0x711   : > { %5583 = vmatpush1.bf16.msra.mxu0 %v4702_v19  ;;  %v9460_v19 = vld [vmem:[#allocation11 + $0xe4] ss:$8 sps:$4 sm:$0xff]  }
 0x712   : > { %5584 = vmatprep.subr.bf16.mxu0 %v4705_v38  ;;  %v12003_v43 = vpop.permute.xlu1 %5843 }
 0x714   : > { %5306 = vmatmul.mubr.bf16.gmra.mrb[220].mxu0 %v9441_v48  ;;  %v12009_v15 = vpop.permute.xlu0 %5781 }
 0x715   : > { %5585 = vmatpush1.bf16.msra.mxu0 %v4704_v14  ;;  %5315 = vmatprep.mubr.bf16.mxu0 %v9442_v56  ;;  %v9462_v56 = vld [vmem:[#allocation11 + $0xe0] ss:$8 sps:$4 sm:$0xff]  }
 0x716   : > { %5586 = vmatprep.subr.bf16.mxu0 %v4707_v29  ;;  %v12007_v7 = vpop.permute.xlu1 %5783  ;;  %v9465_v29 = vld [vmem:[#allocation11 + $0xf0] ss:$8 sps:$4 sm:$0xff]  }
 0x718   : > { %v12013_v37 = vpop.permute.xlu0 %5845 }
 0x719   : > { %5587 = vmatpush1.bf16.msra.mxu0 %v4706_v46 }
 0x71a   : > { %6244 = vmatprep.subr.bf16.mxu0 %v6053_v1  ;;  %v12011_v49 = vpop.permute.xlu1 %5847  ;;  %v5912_v1 = vsel %vm5877_vm1, %v11890_v44, %v11874_v31 }
 0x71c   : > { %5316 = vmatmul.mubr.bf16.gmra.mrb[224].mxu0 %v9444_v17  ;;  %v12017_v42 = vpop.permute.xlu0 %5785  ;;  %v5881_v17 = vsel %vm5877_vm1, %v11876_v12, %v11886_v16  ;;  %v5914_v16 = vsel %vm5877_vm1, %v11910_v50, %v11900_v35 }
 0x71d   : > { %5325 = vmatprep.mubr.bf16.mxu0 %v9445_v53  ;;  %v5962_v53 = vmul.f32 %v11973_v59, %v5913_v8  ;;  %v5961_v12 = vmul.f32 %v11840_v40, %v5881_v17  ;;  %v5916_v8 = vsel %vm5877_vm1, %v11930_v45, %v11920_v20 }
 0x71e   : > { %v12015_v57 = vpop.permute.xlu1 %5787 }
 0x720   : > { %v12021_v48 = vpop.permute.xlu0 %5849 }
 0x722   : > { %v12019_v38 = vpop.permute.xlu1 %5851 }
 0x724   : > { %5326 = vmatmul.mubr.bf16.gmra.mrb[228].mxu0 %v9447_v4  ;;  %v12025_v14 = vpop.permute.xlu0 %5789  ;;  %v9466_v4 = vld [vmem:[#allocation11 + $0x100] ss:$8 sps:$4 sm:$0xff]  }
 0x725   : > { %5335 = vmatprep.mubr.bf16.mxu0 %v9448_v0  ;;  %v5915_v0 = vsel %vm5877_vm1, %v11906_v63, %v11896_v25 }
 0x726   : > { %v12023_v9 = vpop.permute.xlu1 %5791 }
 0x728   : > { %v12029_v33 = vpop.permute.xlu0 %5853 }
 0x72a   : > { %v12027_v32 = vpop.permute.xlu1 %5855 }
 0x72c   : > { %5336 = vmatmul.mubr.bf16.gmra.mrb[232].mxu0 %v9450_v11  ;;  %v12037_v46 = vpop.permute.xlu0 %5793  ;;  %v9469_v11 = vld [vmem:[#allocation11 + $0x114] ss:$8 sps:$4 sm:$0xff]  }
 0x72d   : > { %5345 = vmatprep.mubr.bf16.mxu0 %v9451_v13  ;;  %v5880_v13 = vsel %vm5877_vm1, %v11874_v31, %v11890_v44 }
 0x72e   : > { %v12031_v6 = vpop.permute.xlu1 %5795  ;;  %v5959_v31 = vmul.f32 %v11840_v40, %v5880_v13 }
 0x734   : > { %5346 = vmatmul.mubr.bf16.gmra.mrb[236].mxu0 %v9453_v3  ;;  %v5960_v3 = vmul.f32 %v11973_v59, %v5912_v1 }
 0x735   : > { %5355 = vmatprep.mubr.bf16.mxu0 %v9454_v30  ;;  %v12057_v30 = vpop.permute.xlu1 %5859 }
 0x736   : > { %v6055_v44 = vpack.c.bf16 %v5962_v53, %v5960_v3 }
 0x739   : > { %v12094_v17 = vpop.permute.xlu1 %5799 }
 0x73c   : > { %5356 = vmatmul.mubr.bf16.gmra.mrb[240].mxu0 %v9456_v21  ;;  %v5883_v21 = vsel %vm5877_vm1, %v11896_v25, %v11906_v63  ;;  %v5882_v25 = vsel %vm5877_vm1, %v11900_v35, %v11910_v50  ;;  %v5964_v63 = vmul.f32 %v11973_v59, %v5914_v16  ;;  %v9471_v50 = vld [vmem:[#allocation11 + $0x110] ss:$8 sps:$4 sm:$0xff]   ;;  %v5887_v16 = vsel %vm5877_vm1, %v11936_v26, %v11946_v60 }
 0x73d   : > { %5365 = vmatprep.mubr.bf16.mxu0 %v9457_v5  ;;  %v5966_v5 = vmul.f32 %v11973_v59, %v5915_v0  ;;  %v5963_v53 = vmul.f32 %v11840_v40, %v5882_v25  ;;  %v9472_v0 = vld [vmem:[#allocation11 + $0x124] ss:$8 sps:$4 sm:$0xff]  }
 0x73f   : > { %v6057_v35 = vpack.c.bf16 %v5966_v5, %v5964_v63  ;;  %v5921_v5 = vsel %vm5877_vm1, %v11975_v34, %v11956_v51  ;;  %v9474_v63 = vld [vmem:[#allocation11 + $0x120] ss:$8 sps:$4 sm:$0xff]  }
 0x744   : > { %5366 = vmatmul.mubr.bf16.gmra.mrb[244].mxu0 %v9459_v28  ;;  %v12069_v28 = vpop.permute.xlu0 %5857 }
 0x745   : > { %5375 = vmatprep.mubr.bf16.mxu0 %v9460_v19  ;;  %v5917_v19 = vsel %vm5877_vm1, %v11926_v27, %v11916_v58 }
 0x746   : > { %v5970_v1 = vmul.f32 %v11973_v59, %v5917_v19  ;;  %v5973_v19 = vmul.f32 %v11840_v40, %v5887_v16  ;;  %v9477_v16 = vld [vmem:[#allocation11 + $0x130] ss:$8 sps:$4 sm:$0xff]  }
 0x74c   : > { %5376 = vmatmul.mubr.bf16.gmra.mrb[248].mxu0 %v9462_v56  ;;  %v13125_v56 = vld [vmem:[#allocation34_spill] sm:$0xff] }
 0x74d   : > { %5385 = vmatprep.mubr.bf16.mxu0 %v9463_v22  ;;  %v13126_v22 = vpack.c.bf16 %v11866_v10, %v13125_v56  ;;  %v5885_v10 = vsel %vm5877_vm1, %v11916_v58, %v11926_v27  ;;  %v5884_v58 = vsel %vm5877_vm1, %v11920_v20, %v11930_v45  ;;  %v5968_v27 = vmul.f32 %v11973_v59, %v5916_v8  ;;  %v9475_v8 = vld [vmem:[#allocation11 + $0x134] ss:$8 sps:$4 sm:$0xff]  }
 0x74e   : > { %v5969_v3 = vmul.f32 %v11840_v40, %v5885_v10  ;;  %v5920_v56 = vsel %vm5877_vm1, %v11984_v47, %v11960_v18 }
 0x74f   : > { %v6059_v45 = vpack.c.bf16 %v5970_v1, %v5968_v27 }
 0x754   : > { %5386 = vmatmul.mubr.bf16.gmra.mrb[252].mxu0 %v9465_v29  ;;  %v6054_v29 = vpack.c.bf16 %v5961_v12, %v5959_v31  ;;  %v5918_v12 = vsel %vm5877_vm1, %v11950_v23, %v11940_v36 }
 0x755   : > { %5588 = vmatprep.mubr.bf16.mxu0 %v9468_v24  ;;  %v5965_v24 = vmul.f32 %v11840_v40, %v5883_v21  ;;  %v5967_v21 = vmul.f32 %v11840_v40, %v5884_v58 }
 0x757   : > { %v6056_v13 = vpack.c.bf16 %v5965_v24, %v5963_v53  ;;  %v6058_v31 = vpack.c.bf16 %v5969_v3, %v5967_v21  ;;  %v5923_v24 = vsel %vm5877_vm1, %v11995_v61, %v11991_v62  ;;  %v5924_v3 = vsel %vm5877_vm1, %v12005_v41, %v12001_v52  ;;  %v9478_v21 = vld [vmem:[#allocation11 + $0x144] ss:$8 sps:$4 sm:$0xff]  }
 0x758   : > { %v5982_v53 = vmul.f32 %v11973_v59, %v5923_v24  ;;  %v5897_v24 = vsel %vm5877_vm1, %v12015_v57, %v12019_v38 }
 0x75c   : > { %5589 = vmatmul.mubr.bf16.vlgmr.msra.gmra.mrb[192].mxu0 %v9466_v4  ;;  %v5919_v4 = vsel %vm5877_vm1, %v11946_v60, %v11936_v26  ;;  %v5972_v26 = vmul.f32 %v11973_v59, %v5918_v12  ;;  %v12128_v60 = vpop.permute.xlu1 %5863  ;;  %v5893_v12 = vsel %vm5877_vm1, %v11999_v55, %v12003_v43 }
 0x75d   : > { %6245 = vmatpush1.bf16.msra.mxu0 %v13126_v22  ;;  %5598 = vmatprep.mubr.bf16.mxu0 %v9469_v11  ;;  %v12106_v11 = vpop.permute.xlu0 %5797  ;;  %v5974_v20 = vmul.f32 %v11973_v59, %v5919_v4  ;;  %v5889_v22 = vsel %vm5877_vm1, %v11956_v51, %v11975_v34  ;;  %v5888_v51 = vsel %vm5877_vm1, %v11960_v18, %v11984_v47 }
 0x75e   : > { %6246 = vmatprep.subr.bf16.mxu0 %v6055_v44  ;;  %v5886_v44 = vsel %vm5877_vm1, %v11940_v36, %v11950_v23  ;;  %v5978_v36 = vmul.f32 %v11973_v59, %v5921_v5  ;;  %v5976_v34 = vmul.f32 %v11973_v59, %v5920_v56  ;;  %v5977_v1 = vmul.f32 %v11840_v40, %v5889_v22 }
 0x75f   : > { %v6061_v25 = vpack.c.bf16 %v5974_v20, %v5972_v26  ;;  %v5975_v47 = vmul.f32 %v11840_v40, %v5888_v51  ;;  %v5892_v5 = vsel %vm5877_vm1, %v12001_v52, %v12005_v41  ;;  %v5985_v26 = vmul.f32 %v11840_v40, %v5893_v12 }
 0x760   : > { %v12162_v4 = vpop.permute.xlu1 %5803  ;;  %v6063_v18 = vpack.c.bf16 %v5978_v36, %v5976_v34  ;;  %v5983_v22 = vmul.f32 %v11840_v40, %v5892_v5  ;;  %v5929_v36 = vsel %vm5877_vm1, %v12019_v38, %v12015_v57  ;;  %v5896_v57 = vsel %vm5877_vm1, %v12017_v42, %v12021_v48 }
 0x761   : > { %6247 = vmatpush1.bf16.msra.mxu0 %v6054_v29  ;;  %v12140_v23 = vpop.permute.xlu0 %5861  ;;  %v5971_v29 = vmul.f32 %v11840_v40, %v5886_v44  ;;  %v6062_v27 = vpack.c.bf16 %v5977_v1, %v5975_v47  ;;  %v9481_v1 = vld [vmem:[#allocation11 + $0x154] ss:$8 sps:$4 sm:$0xff]   ;;  %v5899_v47 = vsel %vm5877_vm1, %v12023_v9, %v12027_v32  ;;  %v5901_v12 = vsel %vm5877_vm1, %v12031_v6, %v12057_v30 }
 0x762   : > { %6248 = vmatprep.subr.bf16.mxu0 %v6057_v35  ;;  %v5922_v35 = vsel %vm5877_vm1, %v11997_v39, %v11993_v54  ;;  %v6001_v5 = vmul.f32 %v11840_v40, %v5901_v12 }
 0x763   : > { %v6060_v10 = vpack.c.bf16 %v5973_v19, %v5971_v29  ;;  %v5895_v19 = vsel %vm5877_vm1, %v12007_v7, %v12011_v49  ;;  %v5928_v29 = vsel %vm5877_vm1, %v12021_v48, %v12017_v42 }
 0x764   : > { %5599 = vmatmul.mubr.bf16.gmra.mrb[196].mxu0 %v9471_v50  ;;  %v5891_v50 = vsel %vm5877_vm1, %v11991_v62, %v11995_v61  ;;  %v5890_v62 = vsel %vm5877_vm1, %v11993_v54, %v11997_v39  ;;  %v5980_v61 = vmul.f32 %v11973_v59, %v5922_v35  ;;  %v5992_v38 = vmul.f32 %v11973_v59, %v5928_v29  ;;  %v9487_v29 = vld [vmem:[#allocation11 + $0x174] ss:$8 sps:$4 sm:$0xff]  }
 0x765   : > { %6249 = vmatpush1.bf16.msra.mxu0 %v6056_v13  ;;  %5608 = vmatprep.mubr.bf16.mxu0 %v9472_v0  ;;  %v5925_v0 = vsel %vm5877_vm1, %v12003_v43, %v11999_v55  ;;  %v12174_v58 = vpop.permute.xlu0 %5801  ;;  %v5981_v13 = vmul.f32 %v11840_v40, %v5891_v50  ;;  %v5979_v20 = vmul.f32 %v11840_v40, %v5890_v62  ;;  %v12196_v43 = vpop.permute.xlu1 %5867 }
 0x766   : > { %6250 = vmatprep.subr.bf16.mxu0 %v6059_v45  ;;  %v5986_v54 = vmul.f32 %v11973_v59, %v5925_v0  ;;  %v6065_v39 = vpack.c.bf16 %v5982_v53, %v5980_v61  ;;  %v5927_v45 = vsel %vm5877_vm1, %v12011_v49, %v12007_v7  ;;  %v5984_v55 = vmul.f32 %v11973_v59, %v5924_v3 }
 0x767   : > { %v6064_v44 = vpack.c.bf16 %v5981_v13, %v5979_v20  ;;  %v5990_v52 = vmul.f32 %v11973_v59, %v5927_v45  ;;  %v5894_v7 = vsel %vm5877_vm1, %v12009_v15, %v12013_v37  ;;  %v5993_v53 = vmul.f32 %v11840_v40, %v5897_v24  ;;  %v9484_v45 = vld [vmem:[#allocation11 + $0x164] ss:$8 sps:$4 sm:$0xff]  }
 0x768   : > { %v6067_v56 = vpack.c.bf16 %v5986_v54, %v5984_v55  ;;  %v5987_v34 = vmul.f32 %v11840_v40, %v5894_v7  ;;  %v5991_v0 = vmul.f32 %v11840_v40, %v5896_v57  ;;  %v5933_v62 = vsel %vm5877_vm1, %v12057_v30, %v12031_v6 }
 0x769   : > { %6251 = vmatpush1.bf16.msra.mxu0 %v6058_v31  ;;  %v5926_v31 = vsel %vm5877_vm1, %v12013_v37, %v12009_v15  ;;  %v12208_v41 = vpop.permute.xlu0 %5865  ;;  %v12230_v51 = vpop.permute.xlu1 %5807  ;;  %v9480_v37 = vld [vmem:[#allocation11 + $0x140] ss:$8 sps:$4 sm:$0xff]   ;;  %v5898_v61 = vsel %vm5877_vm1, %v12025_v14, %v12029_v33  ;;  %v5997_v13 = vmul.f32 %v11840_v40, %v5899_v47  ;;  %v5932_v3 = vsel %vm5877_vm1, %v12069_v28, %v12037_v46 }
 0x76a   : > { %6252 = vmatprep.subr.bf16.mxu0 %v6061_v25  ;;  %v5988_v49 = vmul.f32 %v11973_v59, %v5926_v31  ;;  %v6066_v25 = vpack.c.bf16 %v5985_v26, %v5983_v22  ;;  %v5935_v20 = vsel %vm5877_vm1, %v12128_v60, %v12094_v17  ;;  %v6000_v6 = vmul.f32 %v11973_v59, %v5932_v3 }
 0x76b   : > { %v5934_v55 = vsel %vm5877_vm1, %v12140_v23, %v12106_v11  ;;  %v6006_v26 = vmul.f32 %v11973_v59, %v5935_v20  ;;  %v5905_v7 = vsel %vm5877_vm1, %v12162_v4, %v12196_v43  ;;  %v5904_v24 = vsel %vm5877_vm1, %v12174_v58, %v12208_v41 }
 0x76c   : > { %5609 = vmatmul.mubr.bf16.gmra.mrb[200].mxu0 %v9474_v63  ;;  %v5989_v63 = vmul.f32 %v11840_v40, %v5895_v19  ;;  %v6069_v15 = vpack.c.bf16 %v5990_v52, %v5988_v49  ;;  %v5937_v19 = vsel %vm5877_vm1, %v12196_v43, %v12162_v4  ;;  %v5902_v52 = vsel %vm5877_vm1, %v12106_v11, %v12140_v23  ;;  %v9486_v23 = vld [vmem:[#allocation11 + $0x160] ss:$8 sps:$4 sm:$0xff]  }
 0x76d   : > { %6253 = vmatpush1.bf16.msra.mxu0 %v6060_v10  ;;  %5618 = vmatprep.mubr.bf16.mxu0 %v9475_v8  ;;  %v5994_v8 = vmul.f32 %v11973_v59, %v5929_v36  ;;  %v5931_v10 = vsel %vm5877_vm1, %v12027_v32, %v12023_v9  ;;  %v12242_v35 = vpop.permute.xlu0 %5805  ;;  %v12264_v32 = vpop.permute.xlu1 %5811  ;;  %v5936_v36 = vsel %vm5877_vm1, %v12208_v41, %v12174_v58  ;;  %v9768_v20 = vmov 0  }
 0x76e   : > { %6254 = vmatprep.subr.bf16.mxu0 %v6063_v18  ;;  %v6068_v50 = vpack.c.bf16 %v5989_v63, %v5987_v34  ;;  %v5930_v18 = vsel %vm5877_vm1, %v12029_v33, %v12025_v14  ;;  %v5998_v42 = vmul.f32 %v11973_v59, %v5931_v10  ;;  %v6002_v14 = vmul.f32 %v11973_v59, %v5933_v62 }
 0x76f   : > { %v6071_v48 = vpack.c.bf16 %v5994_v8, %v5992_v38  ;;  %v5996_v9 = vmul.f32 %v11973_v59, %v5930_v18  ;;  %v6010_v49 = vmul.f32 %v11973_v59, %v5937_v19  ;;  %v6008_v8 = vmul.f32 %v11973_v59, %v5936_v36  ;;  %9134 = vset.pattern.permute.xlu0 %v9768_v20  ;;  %v9508_v19 = vld [vmem:[#allocation11 + $0x1e4] ss:$8 sps:$4 sm:$0xff]   ;;  %v9511_v36 = vld [vmem:[#allocation11 + $0x1f4] ss:$8 sps:$4 sm:$0xff]  }
 0x770   : > { %v6007_v41 = vmul.f32 %v11840_v40, %v5904_v24  ;;  %9135 = vset.pattern.permute.xlu1 %v9768_v20  ;;  %v6518_v24 = vld [vmem:[%s12705_s5 + $0x88] sm:$0xff] }
 0x771   : > { %6255 = vmatpush1.bf16.msra.mxu0 %v6062_v27  ;;  %v6070_v27 = vpack.c.bf16 %v5993_v53, %v5991_v0  ;;  %v5870_v33 = vpop.permute.xlu0 %5869  ;;  %v6073_v54 = vpack.c.bf16 %v5998_v42, %v5996_v9  ;;  %v5872_v31 = vpop.permute.xlu1 %5871  ;;  %v6079_v58 = vpack.c.bf16 %v6010_v49, %v6008_v8  ;;  %v9489_v0 = vld [vmem:[#allocation11 + $0x170] ss:$8 sps:$4 sm:$0xff]   ;;  %v6514_v49 = vld [vmem:[%s12705_s5 + $0x68] sm:$0xff] }
 0x772   : > { %6256 = vmatprep.subr.bf16.mxu0 %v6065_v39  ;;  %v9483_v39 = vld [vmem:[#allocation11 + $0x150] ss:$8 sps:$4 sm:$0xff]   ;;  %v5939_v63 = vsel %vm5877_vm1, %v5872_v31, %v12230_v51  ;;  %v5907_v34 = vsel %vm5877_vm1, %v12230_v51, %v5872_v31  ;;  %v5906_v38 = vsel %vm5877_vm1, %v12242_v35, %v5870_v33  ;;  %v9550_v20 = vld [vmem:[#allocation11 + $0x2c4] ss:$8 sps:$4 sm:$0xff]  }
 0x773   : > { %v6014_v10 = vmul.f32 %v11973_v59, %v5939_v63  ;;  %v6013_v53 = vmul.f32 %v11840_v40, %v5907_v34  ;;  %v6011_v62 = vmul.f32 %v11840_v40, %v5906_v38  ;;  %v6507_v31 = vld [vmem:[%s12705_s5 + $0x30] sm:$0xff]  ;;  %v9516_v63 = vld [vmem:[#allocation11 + $0x204] ss:$8 sps:$4 sm:$0xff]  }
 0x774   : > { %5619 = vmatmul.mubr.bf16.gmra.mrb[204].mxu0 %v9477_v16  ;;  %v5995_v16 = vmul.f32 %v11840_v40, %v5898_v61  ;;  %v6519_v8 = vld [vmem:[%s12705_s5 + $0x90] sm:$0xff]  ;;  %v6522_v34 = vld [vmem:[%s12705_s5 + $0xa8] sm:$0xff] }
 0x775   : > { %6257 = vmatpush1.bf16.msra.mxu0 %v6064_v44  ;;  %5628 = vmatprep.mubr.bf16.mxu0 %v9478_v21  ;;  %v5900_v21 = vsel %vm5877_vm1, %v12037_v46, %v12069_v28  ;;  %v5903_v44 = vsel %vm5877_vm1, %v12094_v17, %v12128_v60  ;;  %v6075_v46 = vpack.c.bf16 %v6002_v14, %v6000_v6  ;;  %v5810_v60 = vpop.permute.xlu0 %5809  ;;  %v5876_v4 = vpop.permute.xlu1 %5875  ;;  %v9492_v14 = vld [vmem:[#allocation11 + $0x180] ss:$8 sps:$4 sm:$0xff]   ;;  %v6503_v6 = vld [vmem:[%s12705_s5 + $0x10] sm:$0xff] }
 0x776   : > { %6258 = vmatprep.subr.bf16.mxu0 %v6067_v56  ;;  %v6072_v30 = vpack.c.bf16 %v5997_v13, %v5995_v16  ;;  %v5999_v28 = vmul.f32 %v11840_v40, %v5900_v21  ;;  %v6004_v17 = vmul.f32 %v11973_v59, %v5934_v55  ;;  %v6005_v22 = vmul.f32 %v11840_v40, %v5903_v44  ;;  %v6502_v16 = vld [vmem:[%s12705_s5 + $0x8] sm:$0xff]  ;;  %v9505_v55 = vld [vmem:[#allocation11 + $0x1d4] ss:$8 sps:$4 sm:$0xff]   ;;  %v6505_v44 = vld [vmem:[%s12705_s5 + $0x20] sm:$0xff] }
 0x777   : > { %v5941_v57 = vsel %vm5877_vm1, %v5876_v4, %v12264_v32  ;;  %v5909_v47 = vsel %vm5877_vm1, %v12264_v32, %v5876_v4  ;;  %6540 = vperm.xlu1 %9135, %v6502_v16   ;;  %v9502_v21 = vld [vmem:[#allocation11 + $0x1c4] ss:$8 sps:$4 sm:$0xff]   ;;  %v6520_v4 = vld [vmem:[%s12705_s5 + $0x98] sm:$0xff] }
 0x778   : > { %v6074_v56 = vpack.c.bf16 %v6001_v5, %v5999_v28  ;;  %v6077_v11 = vpack.c.bf16 %v6006_v26, %v6004_v17  ;;  %v6018_v42 = vmul.f32 %v11973_v59, %v5941_v57  ;;  %v6017_v13 = vmul.f32 %v11840_v40, %v5909_v47  ;;  %v9504_v5 = vld [vmem:[#allocation11 + $0x1c0] ss:$8 sps:$4 sm:$0xff]   ;;  %v9507_v28 = vld [vmem:[#allocation11 + $0x1d0] ss:$8 sps:$4 sm:$0xff]  }
 0x779   : > { %6259 = vmatpush1.bf16.msra.mxu0 %v6066_v25  ;;  %v6003_v25 = vmul.f32 %v11840_v40, %v5902_v52  ;;  %v6506_v26 = vld [vmem:[%s12705_s5 + $0x28] sm:$0xff]  ;;  %v6509_v52 = vld [vmem:[%s12705_s5 + $0x40] sm:$0xff]  ;;  %v9549_v16 = vld [vmem:[#allocation11 + $0x2b0] ss:$8 sps:$4 sm:$0xff]  }
 0x77a   : > { %6260 = vmatprep.subr.bf16.mxu0 %v6069_v15  ;;  %v6009_v15 = vmul.f32 %v11840_v40, %v5905_v7  ;;  %v6510_v17 = vld [vmem:[%s12705_s5 + $0x48] sm:$0xff]  ;;  %v6513_v7 = vld [vmem:[%s12705_s5 + $0x60] sm:$0xff] }
 0x77b   : > { %v6076_v43 = vpack.c.bf16 %v6005_v22, %v6003_v25  ;;  %6545 = vperm.xlu1 %9135, %v6503_v6   ;;  %v9510_v22 = vld [vmem:[#allocation11 + $0x1e0] ss:$8 sps:$4 sm:$0xff]   ;;  %v9513_v25 = vld [vmem:[#allocation11 + $0x1f0] ss:$8 sps:$4 sm:$0xff]  }
 0x77c   : > { %5629 = vmatmul.mubr.bf16.gmra.mrb[208].mxu0 %v9480_v37  ;;  %v5938_v37 = vsel %vm5877_vm1, %v5870_v33, %v12242_v35  ;;  %v6078_v51 = vpack.c.bf16 %v6009_v15, %v6007_v41  ;;  %v9490_v35 = vld [vmem:[#allocation11 + $0x184] ss:$8 sps:$4 sm:$0xff]   ;;  %v9493_v33 = vld [vmem:[#allocation11 + $0x194] ss:$8 sps:$4 sm:$0xff]   ;;  %v9555_v6 = vld [vmem:[#allocation11 + $0x2d0] ss:$8 sps:$4 sm:$0xff]  }
 0x77d   : > { %6261 = vmatpush1.bf16.msra.mxu0 %v6068_v50  ;;  %5638 = vmatprep.mubr.bf16.mxu0 %v9481_v1  ;;  %v5874_v1 = vpop.permute.xlu0 %5873  ;;  %v6012_v50 = vmul.f32 %v11973_v59, %v5938_v37  ;;  %v9517_v15 = vld [vmem:[#allocation11 + $0x214] ss:$8 sps:$4 sm:$0xff]   ;;  %v6521_v37 = vld [vmem:[%s12705_s5 + $0xa0] sm:$0xff]  ;;  %v6526_v38 = vld [vmem:[%s12705_s5 + $0xc8] sm:$0xff] }
 0x77e   : > { %6262 = vmatprep.subr.bf16.mxu0 %v6071_v48  ;;  %v5940_v18 = vsel %vm5877_vm1, %v5874_v1, %v5810_v60  ;;  %v5908_v61 = vsel %vm5877_vm1, %v5810_v60, %v5874_v1  ;;  %v6511_v60 = vld [vmem:[%s12705_s5 + $0x50] sm:$0xff]  ;;  %v6524_v1 = vld [vmem:[%s12705_s5 + $0xb8] sm:$0xff]  ;;  %v9520_v41 = vld [vmem:[#allocation11 + $0x224] ss:$8 sps:$4 sm:$0xff]  }
 0x77f   : > { %v6081_v48 = vpack.c.bf16 %v6014_v10, %v6012_v50  ;;  %v6016_v9 = vmul.f32 %v11973_v59, %v5940_v18  ;;  %v6015_v32 = vmul.f32 %v11840_v40, %v5908_v61  ;;  %v9498_v59 = vld [vmem:[#allocation11 + $0x1a0] ss:$8 sps:$4 sm:$0xff]   ;;  %6555 = vperm.xlu1 %9135, %v6505_v44   ;;  %v6523_v10 = vld [vmem:[%s12705_s5 + $0xb0] sm:$0xff] }
 0x780   : > { %v6501_v40 = vld [vmem:[%s12705_s5] sm:$0xff]  ;;  %v6527_v50 = vld [vmem:[%s12705_s5 + $0xd0] sm:$0xff] }
 0x781   : > { %6263 = vmatpush1.bf16.msra.mxu0 %v6070_v27  ;;  %v6080_v27 = vpack.c.bf16 %v6013_v53, %v6011_v62  ;;  %v6083_v3 = vpack.c.bf16 %v6018_v42, %v6016_v9  ;;  %v6082_v12 = vpack.c.bf16 %v6017_v13, %v6015_v32  ;;  %6535 = vperm.xlu0 %9134, %v6501_v40   ;;  %v6525_v57 = vld [vmem:[%s12705_s5 + $0xc0] sm:$0xff]  ;;  %v9523_v18 = vld [vmem:[#allocation11 + $0x234] ss:$8 sps:$4 sm:$0xff]   ;;  %v6530_v42 = vld [vmem:[%s12705_s5 + $0xe8] sm:$0xff] }
 0x782   : > { %6264 = vmatprep.subr.bf16.mxu0 %v6073_v54  ;;  %v9496_v54 = vld [vmem:[#allocation11 + $0x1a4] ss:$8 sps:$4 sm:$0xff]   ;;  %v9522_v53 = vld [vmem:[#allocation11 + $0x220] ss:$8 sps:$4 sm:$0xff]   ;;  %v9525_v62 = vld [vmem:[#allocation11 + $0x230] ss:$8 sps:$4 sm:$0xff]  }
 0x783   : > { %6565 = vperm.xlu1 %9135, %v6507_v31   ;;  %v6529_v47 = vld [vmem:[%s12705_s5 + $0xe0] sm:$0xff]  ;;  %v9529_v9 = vld [vmem:[#allocation11 + $0x254] ss:$8 sps:$4 sm:$0xff]   ;;  %v9561_v44 = vld [vmem:[#allocation11 + $0x2f0] ss:$8 sps:$4 sm:$0xff]  }
 0x784   : > { %5639 = vmatmul.mubr.bf16.gmra.mrb[212].mxu0 %v9483_v39  ;;  %v9499_v39 = vld [vmem:[#allocation11 + $0x1b4] ss:$8 sps:$4 sm:$0xff]   ;;  %v9528_v61 = vld [vmem:[#allocation11 + $0x240] ss:$8 sps:$4 sm:$0xff]   ;;  %v9532_v13 = vld [vmem:[#allocation11 + $0x264] ss:$8 sps:$4 sm:$0xff]  }
 0x785   : > { %6265 = vmatpush1.bf16.msra.mxu0 %v6072_v30  ;;  %5648 = vmatprep.mubr.bf16.mxu0 %v9484_v45  ;;  %v9501_v45 = vld [vmem:[#allocation11 + $0x1b0] ss:$8 sps:$4 sm:$0xff]   ;;  %v9535_v32 = vld [vmem:[#allocation11 + $0x274] ss:$8 sps:$4 sm:$0xff]  }
 0x786   : > { %6266 = vmatprep.subr.bf16.mxu0 %v6075_v46  ;;  %v6504_v30 = vld [vmem:[%s12705_s5 + $0x18] sm:$0xff] }
 0x787   : > { %6550 = vperm.xlu0 %9134, %v6504_v30   ;;  %v6508_v46 = vld [vmem:[%s12705_s5 + $0x38] sm:$0xff]  ;;  %6575 = vperm.xlu1 %9135, %v6509_v52   ;;  %v9556_v30 = vld [vmem:[#allocation11 + $0x2e4] ss:$8 sps:$4 sm:$0xff]  }
 0x788   : > { %v9547_v40 = vld [vmem:[#allocation11 + $0x2b4] ss:$8 sps:$4 sm:$0xff]  }
 0x789   : > { %6267 = vmatpush1.bf16.msra.mxu0 %v6074_v56  ;;  %v6512_v56 = vld [vmem:[%s12705_s5 + $0x58] sm:$0xff] }
 0x78a   : > { %6268 = vmatprep.subr.bf16.mxu0 %v6077_v11  ;;  %v6515_v11 = vld [vmem:[%s12705_s5 + $0x70] sm:$0xff] }
 0x78b   : > { %6560 = vperm.xlu0 %9134, %v6506_v26   ;;  %6585 = vperm.xlu1 %9135, %v6511_v60   ;;  %v12452_v60 = vstv %s6885_s29 }
 0x78c   : > { %5649 = vmatmul.mubr.bf16.gmra.mrb[216].mxu0 %v9486_v23  ;;  %v6516_v23 = vld [vmem:[%s12705_s5 + $0x78] sm:$0xff] }
 0x78d   : > { %6269 = vmatpush1.bf16.msra.mxu0 %v6076_v43  ;;  %5658 = vmatprep.mubr.bf16.mxu0 %v9487_v29  ;;  %v6517_v29 = vld [vmem:[%s12705_s5 + $0x80] sm:$0xff] }
 0x78e   : > { %6270 = vmatprep.subr.bf16.mxu0 %v6079_v58  ;;  %v9514_v43 = vld [vmem:[#allocation11 + $0x200] ss:$8 sps:$4 sm:$0xff]   ;;  %v9519_v58 = vld [vmem:[#allocation11 + $0x210] ss:$8 sps:$4 sm:$0xff]  }
 0x78f   : > { %6570 = vperm.xlu0 %9134, %v6508_v46   ;;  %6595 = vperm.xlu1 %9135, %v6513_v7   ;;  %v6757_v46 = vld [vmem:[%s10029_s28] sm:$0xff] }
 0x791   : > { %6271 = vmatpush1.bf16.msra.mxu0 %v6078_v51  ;;  %v6528_v51 = vld [vmem:[%s12705_s5 + $0xd8] sm:$0xff] }
 0x792   : > { %6272 = vmatprep.subr.bf16.mxu0 %v6081_v48  ;;  %v6531_v48 = vld [vmem:[%s12705_s5 + $0xf0] sm:$0xff] }
 0x793   : > { %6580 = vperm.xlu0 %9134, %v6510_v17   ;;  %6605 = vperm.xlu1 %9135, %v6515_v11   ;;  %v6758_v17 = vld [vmem:[%s10029_s28 + $0x8] sm:$0xff] }
 0x794   : > { %5659 = vmatmul.mubr.bf16.gmra.mrb[220].mxu0 %v9489_v0  ;;  %v6532_v0 = vld [vmem:[%s12705_s5 + $0xf8] sm:$0xff] }
 0x795   : > { %6273 = vmatpush1.bf16.msra.mxu0 %v6080_v27  ;;  %5668 = vmatprep.mubr.bf16.mxu0 %v9490_v35  ;;  %v9526_v35 = vld [vmem:[#allocation11 + $0x244] ss:$8 sps:$4 sm:$0xff]   ;;  %v9531_v27 = vld [vmem:[#allocation11 + $0x250] ss:$8 sps:$4 sm:$0xff]  }
 0x796   : > { %6274 = vmatprep.subr.bf16.mxu0 %v6083_v3  ;;  %v9534_v3 = vld [vmem:[#allocation11 + $0x260] ss:$8 sps:$4 sm:$0xff]  }
 0x797   : > { %6590 = vperm.xlu0 %9134, %v6512_v56   ;;  %6615 = vperm.xlu1 %9135, %v6517_v29  }
 0x799   : > { %6275 = vmatpush1.bf16.msra.mxu0 %v6082_v12  ;;  %v9537_v12 = vld [vmem:[#allocation11 + $0x270] ss:$8 sps:$4 sm:$0xff]  }
 0x79b   : > { %6600 = vperm.xlu0 %9134, %v6514_v49   ;;  %6625 = vperm.xlu1 %9135, %v6519_v8  }
 0x79c   : > { %5669 = vmatmul.mubr.bf16.gmra.mrb[224].mxu0 %v9492_v14  ;;  %v9538_v14 = vld [vmem:[#allocation11 + $0x284] ss:$8 sps:$4 sm:$0xff]  }
 0x79d   : > { %5678 = vmatprep.mubr.bf16.mxu0 %v9493_v33  ;;  %v9540_v33 = vld [vmem:[#allocation11 + $0x280] ss:$8 sps:$4 sm:$0xff]  }
 0x79f   : > { %6610 = vperm.xlu0 %9134, %v6516_v23   ;;  %6635 = vperm.xlu1 %9135, %v6521_v37   ;;  %v6760_v23 = vld [vmem:[%s10029_s28 + $0x18] sm:$0xff] }
 0x7a3   : > { %6620 = vperm.xlu0 %9134, %v6518_v24   ;;  %6645 = vperm.xlu1 %9135, %v6523_v10  }
 0x7a4   : > { %5679 = vmatmul.mubr.bf16.gmra.mrb[228].mxu0 %v9495_v2  ;;  %v9541_v2 = vld [vmem:[#allocation11 + $0x294] ss:$8 sps:$4 sm:$0xff]  }
 0x7a5   : > { %5688 = vmatprep.mubr.bf16.mxu0 %v9496_v54  ;;  %v9543_v54 = vld [vmem:[#allocation11 + $0x290] ss:$8 sps:$4 sm:$0xff]  }
 0x7a7   : > { %6630 = vperm.xlu0 %9134, %v6520_v4   ;;  %6655 = vperm.xlu1 %9135, %v6525_v57  }
 0x7ab   : > { %6640 = vperm.xlu0 %9134, %v6522_v34   ;;  %6665 = vperm.xlu1 %9135, %v6527_v50   ;;  %v6762_v50 = vld [vmem:[%s10029_s28 + $0x28] sm:$0xff] }
 0x7ac   : > { %5689 = vmatmul.mubr.bf16.gmra.mrb[232].mxu0 %v9498_v59  ;;  %v9544_v59 = vld [vmem:[#allocation11 + $0x2a4] ss:$8 sps:$4 sm:$0xff]  }
 0x7ad   : > { %5698 = vmatprep.mubr.bf16.mxu0 %v9499_v39  ;;  %v9546_v39 = vld [vmem:[#allocation11 + $0x2a0] ss:$8 sps:$4 sm:$0xff]  }
 0x7af   : > { %6650 = vperm.xlu0 %9134, %v6524_v1   ;;  %6675 = vperm.xlu1 %9135, %v6529_v47  }
 0x7b3   : > { %6660 = vperm.xlu0 %9134, %v6526_v38   ;;  %6685 = vperm.xlu1 %9135, %v6531_v48  }
 0x7b4   : > { %5699 = vmatmul.mubr.bf16.gmra.mrb[236].mxu0 %v9501_v45  ;;  %v9552_v45 = vld [vmem:[#allocation11 + $0x2c0] ss:$8 sps:$4 sm:$0xff]  }
 0x7b5   : > { %5708 = vmatprep.mubr.bf16.mxu0 %v9502_v21  ;;  %v9553_v21 = vld [vmem:[#allocation11 + $0x2d4] ss:$8 sps:$4 sm:$0xff]  }
 0x7b7   : > { %6670 = vperm.xlu0 %9134, %v6528_v51  }
 0x7bb   : > { %6680 = vperm.xlu0 %9134, %v6530_v42   ;;  %v6763_v42 = vld [vmem:[%s10029_s28 + $0x30] sm:$0xff] }
 0x7bc   : > { %5709 = vmatmul.mubr.bf16.gmra.mrb[240].mxu0 %v9504_v5  ;;  %v9558_v5 = vld [vmem:[#allocation11 + $0x2e0] ss:$8 sps:$4 sm:$0xff]  }
 0x7bd   : > { %5718 = vmatprep.mubr.bf16.mxu0 %v9505_v55  ;;  %v9559_v55 = vld [vmem:[#allocation11 + $0x2f4] ss:$8 sps:$4 sm:$0xff]  }
 0x7bf   : > { %6690 = vperm.xlu0 %9134, %v6532_v0  }
 0x7c4   : > { %5719 = vmatmul.mubr.bf16.gmra.mrb[244].mxu0 %v9507_v28 }
 0x7c5   : > { %5728 = vmatprep.mubr.bf16.mxu0 %v9508_v19 }
 0x7cc   : > { %5729 = vmatmul.mubr.bf16.gmra.mrb[248].mxu0 %v9510_v22 }
 0x7cd   : > { %5738 = vmatprep.mubr.bf16.mxu0 %v9511_v36  ;;  %v6759_v36 = vld [vmem:[%s10029_s28 + $0x10] sm:$0xff] }
 0x7d4   : > { %5739 = vmatmul.mubr.bf16.gmra.mrb[252].mxu0 %v9513_v25 }
 0x7d5   : > { %6276 = vmatprep.mubr.bf16.mxu0 %v9516_v63 }
 0x7dc   : > { %6277 = vmatmul.mubr.bf16.vlgmr.msra.gmra.mrb[192].mxu0 %v9514_v43 }
 0x7dd   : > { %6286 = vmatprep.mubr.bf16.mxu0 %v9517_v15 }
 0x7e4   : > { %6287 = vmatmul.mubr.bf16.gmra.mrb[196].mxu0 %v9519_v58  ;;  %v6761_v58 = vld [vmem:[%s10029_s28 + $0x20] sm:$0xff] }
 0x7e5   : > { %6296 = vmatprep.mubr.bf16.mxu0 %v9520_v41 }
 0x7ec   : > { %6297 = vmatmul.mubr.bf16.gmra.mrb[200].mxu0 %v9522_v53 }
 0x7ed   : > { %6306 = vmatprep.mubr.bf16.mxu0 %v9523_v18 }
 0x7f4   : > { %6307 = vmatmul.mubr.bf16.gmra.mrb[204].mxu0 %v9525_v62 }
 0x7f5   : > { %6316 = vmatprep.mubr.bf16.mxu0 %v9526_v35  ;;  %v6764_v35 = vld [vmem:[%s10029_s28 + $0x38] sm:$0xff] }
 0x7f6   : > { %v6541_v28 = vpop.permute.xlu1 %6540 }
 0x7fa   : > { %v6546_v43 = vpop.permute.xlu1 %6545 }
 0x7fc   : > { %6317 = vmatmul.mubr.bf16.gmra.mrb[208].mxu0 %v9528_v61 }
 0x7fd   : > { %6326 = vmatprep.mubr.bf16.mxu0 %v9529_v9 }
 0x800   : > { %v6536_v26 = vpop.permute.xlu0 %6535 }
 0x804   : > { %6327 = vmatmul.mubr.bf16.gmra.mrb[212].mxu0 %v9531_v27 }
 0x805   : > { %6336 = vmatprep.mubr.bf16.mxu0 %v9532_v13 }
 0x806   : > { %v6551_v18 = vpop.permute.xlu0 %6550 }
 0x80c   : > { %6337 = vmatmul.mubr.bf16.gmra.mrb[216].mxu0 %v9534_v3 }
 0x80d   : > { %6346 = vmatprep.mubr.bf16.mxu0 %v9535_v32 }
 0x814   : > { %6347 = vmatmul.mubr.bf16.gmra.mrb[220].mxu0 %v9537_v12 }
 0x815   : > { %6356 = vmatprep.mubr.bf16.mxu0 %v9538_v14 }
 0x81c   : > { %6357 = vmatmul.mubr.bf16.gmra.mrb[224].mxu0 %v9540_v33 }
 0x81d   : > { %6366 = vmatprep.mubr.bf16.mxu0 %v9541_v2 }
 0x824   : > { %6367 = vmatmul.mubr.bf16.gmra.mrb[228].mxu0 %v9543_v54  ;;  %v6556_v54 = vpop.permute.xlu1 %6555 }
 0x825   : > { %6376 = vmatprep.mubr.bf16.mxu0 %v9544_v59 }
 0x82c   : > { %6377 = vmatmul.mubr.bf16.gmra.mrb[232].mxu0 %v9546_v39  ;;  %v6765_v39 = vld [vmem:[%s10029_s28 + $0x40] sm:$0xff] }
 0x82d   : > { %6386 = vmatprep.mubr.bf16.mxu0 %v9547_v40 }
 0x834   : > { %6387 = vmatmul.mubr.bf16.gmra.mrb[236].mxu0 %v9549_v16 }
 0x835   : > { %6396 = vmatprep.mubr.bf16.mxu0 %v9550_v20 }
 0x83c   : > { %6397 = vmatmul.mubr.bf16.gmra.mrb[240].mxu0 %v9552_v45  ;;  %v6766_v45 = vld [vmem:[%s10029_s28 + $0x48] sm:$0xff] }
 0x83d   : > { %6406 = vmatprep.mubr.bf16.mxu0 %v9553_v21 }
 0x844   : > { %6407 = vmatmul.mubr.bf16.gmra.mrb[244].mxu0 %v9555_v6 }
 0x845   : > { %6416 = vmatprep.mubr.bf16.mxu0 %v9556_v30  ;;  %v6561_v30 = vpop.permute.xlu0 %6560 }
 0x84c   : > { %6417 = vmatmul.mubr.bf16.gmra.mrb[248].mxu0 %v9558_v5 }
 0x84d   : > { %6426 = vmatprep.mubr.bf16.mxu0 %v9559_v55  ;;  %v6767_v55 = vld [vmem:[%s10029_s28 + $0x50] sm:$0xff] }
 0x854   : > { %6427 = vmatmul.mubr.bf16.gmra.mrb[252].mxu0 %v9561_v44 }
 0x8af   : > { %v6278_v31 = vpop.f32.mrb[192].mxu0 }
 0x8b0   : > { %v6693_v19 = vadd.f32 %v6536_v26, %v6278_v31  ;;  %v6280_v52 = vpop.f32.mrb[193].mxu0 }
 0x8b1   : > { %v6694_v56 = vadd.f32 %v6536_v26, %v6280_v52  ;;  %v6282_v22 = vpop.f32.mrb[194].mxu0 }
 0x8b2   : > { %v6821_v7 = vadd.f32 %v6757_v46, %v6693_v19  ;;  %v6695_v49 = vadd.f32 %v6541_v28, %v6282_v22  ;;  %v6284_v11 = vpop.f32.mrb[195].mxu0  ;;  %v6768_v46 = vld [vmem:[%s10029_s28 + $0x58] sm:$0xff] }
 0x8b3   : > { %v6822_v25 = vadd.f32 %v6758_v17, %v6694_v56  ;;  %v6696_v63 = vadd.f32 %v6541_v28, %v6284_v11 }
 0x8b4   : > { %vm6886_vm2 = vcmp.ge.f32.partialorder %v6821_v7, 0.0  ;;  %v6951_v29 = vmul.f32 %v12452_v60, %v6821_v7  ;;  %v6823_v24 = vadd.f32 %v6759_v36, %v6695_v49 }
 0x8b5   : > { %vm6887_vm3 = vcmp.ge.f32.partialorder %v6822_v25, 0.0  ;;  %v6952_v8 = vmul.f32 %v12452_v60, %v6822_v25  ;;  %v6824_v4 = vadd.f32 %v6760_v23, %v6696_v63  ;;  %v6566_v23 = vpop.permute.xlu1 %6565  ;;  %v6769_v63 = vld [vmem:[%s10029_s28 + $0x60] sm:$0xff] }
 0x8b6   : > { %v7015_v15 = vsel %vm6886_vm2, %v6821_v7, %v6951_v29  ;;  %vm6888_vm4 = vcmp.ge.f32.partialorder %v6823_v24, 0.0  ;;  %v6953_v37 = vmul.f32 %v12452_v60, %v6823_v24 }
 0x8b7   : > { %7079 = vst [vmem:[%s12461_s24] sm:$0xff] %v7015_v15  ;;  %v7016_v34 = vsel %vm6887_vm3, %v6822_v25, %v6952_v8  ;;  %vm6889_vm5 = vcmp.ge.f32.partialorder %v6824_v4, 0.0  ;;  %v6954_v10 = vmul.f32 %v12452_v60, %v6824_v4  ;;  %v6288_v1 = vpop.f32.mrb[196].mxu0 }
 0x8b8   : > { %7080 = vst [vmem:[%s12461_s24 + $0x8] sm:$0xff] %v7016_v34  ;;  %v7017_v41 = vsel %vm6888_vm4, %v6823_v24, %v6953_v37  ;;  %v6697_v57 = vadd.f32 %v6546_v43, %v6288_v1  ;;  %v6290_v38 = vpop.f32.mrb[197].mxu0  ;;  %v6571_v37 = vpop.permute.xlu0 %6570 }
 0x8b9   : > { %7081 = vst [vmem:[%s12461_s24 + $0x10] sm:$0xff] %v7017_v41  ;;  %v7018_v51 = vsel %vm6889_vm5, %v6824_v4, %v6954_v10  ;;  %v6698_v53 = vadd.f32 %v6546_v43, %v6290_v38  ;;  %v6292_v47 = vpop.f32.mrb[198].mxu0  ;;  %v6770_v4 = vld [vmem:[%s10029_s28 + $0x68] sm:$0xff]  ;;  %v6771_v10 = vld [vmem:[%s10029_s28 + $0x70] sm:$0xff] }
 0x8ba   : > { %7082 = vst [vmem:[%s12461_s24 + $0x18] sm:$0xff] %v7018_v51  ;;  %v6825_v48 = vadd.f32 %v6761_v58, %v6697_v57  ;;  %v6699_v0 = vadd.f32 %v6551_v18, %v6292_v47  ;;  %v6294_v62 = vpop.f32.mrb[199].mxu0  ;;  %v6772_v57 = vld [vmem:[%s10029_s28 + $0x78] sm:$0xff] }
 0x8bb   : > { %v6826_v61 = vadd.f32 %v6762_v50, %v6698_v53  ;;  %v6700_v9 = vadd.f32 %v6551_v18, %v6294_v62 }
 0x8bc   : > { %vm6890_vm6 = vcmp.ge.f32.partialorder %v6825_v48, 0.0  ;;  %v6955_v27 = vmul.f32 %v12452_v60, %v6825_v48  ;;  %v6827_v13 = vadd.f32 %v6763_v42, %v6699_v0 }
 0x8bd   : > { %vm6891_vm7 = vcmp.ge.f32.partialorder %v6826_v61, 0.0  ;;  %v6956_v3 = vmul.f32 %v12452_v60, %v6826_v61  ;;  %v6828_v32 = vadd.f32 %v6764_v35, %v6700_v9  ;;  %v6576_v35 = vpop.permute.xlu1 %6575  ;;  %v6773_v9 = vld [vmem:[%s10029_s28 + $0x80] sm:$0xff] }
 0x8be   : > { %v7019_v12 = vsel %vm6890_vm6, %v6825_v48, %v6955_v27  ;;  %vm6892_vm8 = vcmp.ge.f32.partialorder %v6827_v13, 0.0  ;;  %v6957_v14 = vmul.f32 %v12452_v60, %v6827_v13 }
 0x8bf   : > { %7083 = vst [vmem:[%s12461_s24 + $0x20] sm:$0xff] %v7019_v12  ;;  %v7020_v33 = vsel %vm6891_vm7, %v6826_v61, %v6956_v3  ;;  %vm6893_vm9 = vcmp.ge.f32.partialorder %v6828_v32, 0.0  ;;  %v6958_v2 = vmul.f32 %v12452_v60, %v6828_v32  ;;  %v6298_v59 = vpop.f32.mrb[200].mxu0 }
 0x8c0   : > { %7084 = vst [vmem:[%s12461_s24 + $0x28] sm:$0xff] %v7020_v33  ;;  %v7021_v40 = vsel %vm6892_vm8, %v6827_v13, %v6957_v14  ;;  %v6701_v16 = vadd.f32 %v6556_v54, %v6298_v59  ;;  %v6300_v20 = vpop.f32.mrb[201].mxu0  ;;  %v6581_v33 = vpop.permute.xlu0 %6580 }
 0x8c1   : > { %7085 = vst [vmem:[%s12461_s24 + $0x30] sm:$0xff] %v7021_v40  ;;  %v7022_v21 = vsel %vm6893_vm9, %v6828_v32, %v6958_v2  ;;  %v6702_v6 = vadd.f32 %v6556_v54, %v6300_v20  ;;  %v6302_v5 = vpop.f32.mrb[202].mxu0  ;;  %v6774_v32 = vld [vmem:[%s10029_s28 + $0x88] sm:$0xff]  ;;  %v6775_v54 = vld [vmem:[%s10029_s28 + $0x90] sm:$0xff] }
 0x8c2   : > { %7086 = vst [vmem:[%s12461_s24 + $0x38] sm:$0xff] %v7022_v21  ;;  %v6829_v44 = vadd.f32 %v6765_v39, %v6701_v16  ;;  %v6703_v26 = vadd.f32 %v6561_v30, %v6302_v5  ;;  %v6304_v31 = vpop.f32.mrb[203].mxu0  ;;  %v6776_v16 = vld [vmem:[%s10029_s28 + $0x98] sm:$0xff] }
 0x8c3   : > { %v6830_v28 = vadd.f32 %v6766_v45, %v6702_v6  ;;  %v6704_v19 = vadd.f32 %v6561_v30, %v6304_v31 }
 0x8c4   : > { %vm6894_vm10 = vcmp.ge.f32.partialorder %v6829_v44, 0.0  ;;  %v6959_v52 = vmul.f32 %v12452_v60, %v6829_v44  ;;  %v6831_v17 = vadd.f32 %v6767_v55, %v6703_v26 }
 0x8c5   : > { %vm6895_vm11 = vcmp.ge.f32.partialorder %v6830_v28, 0.0  ;;  %v6960_v56 = vmul.f32 %v12452_v60, %v6830_v28  ;;  %v6832_v22 = vadd.f32 %v6768_v46, %v6704_v19  ;;  %v6586_v46 = vpop.permute.xlu1 %6585  ;;  %v6777_v19 = vld [vmem:[%s10029_s28 + $0xa0] sm:$0xff] }
 0x8c6   : > { %v7023_v36 = vsel %vm6894_vm10, %v6829_v44, %v6959_v52  ;;  %vm6896_vm12 = vcmp.ge.f32.partialorder %v6831_v17, 0.0  ;;  %v6961_v7 = vmul.f32 %v12452_v60, %v6831_v17 }
 0x8c7   : > { %7087 = vst [vmem:[%s12461_s24 + $0x40] sm:$0xff] %v7023_v36  ;;  %v7024_v49 = vsel %vm6895_vm11, %v6830_v28, %v6960_v56  ;;  %vm6897_vm13 = vcmp.ge.f32.partialorder %v6832_v22, 0.0  ;;  %v6962_v11 = vmul.f32 %v12452_v60, %v6832_v22  ;;  %v6308_v25 = vpop.f32.mrb[204].mxu0 }
 0x8c8   : > { %7088 = vst [vmem:[%s12461_s24 + $0x48] sm:$0xff] %v7024_v49  ;;  %v7025_v29 = vsel %vm6896_vm12, %v6831_v17, %v6961_v7  ;;  %v6705_v24 = vadd.f32 %v6566_v23, %v6308_v25  ;;  %v6310_v8 = vpop.f32.mrb[205].mxu0  ;;  %v6591_v7 = vpop.permute.xlu0 %6590 }
 0x8c9   : > { %7089 = vst [vmem:[%s12461_s24 + $0x50] sm:$0xff] %v7025_v29  ;;  %v7026_v43 = vsel %vm6897_vm13, %v6832_v22, %v6962_v11  ;;  %v6706_v15 = vadd.f32 %v6566_v23, %v6310_v8  ;;  %v6312_v34 = vpop.f32.mrb[206].mxu0  ;;  %v6778_v22 = vld [vmem:[%s10029_s28 + $0xa8] sm:$0xff]  ;;  %v6779_v23 = vld [vmem:[%s10029_s28 + $0xb0] sm:$0xff] }
 0x8ca   : > { %7090 = vst [vmem:[%s12461_s24 + $0x58] sm:$0xff] %v7026_v43  ;;  %v6833_v1 = vadd.f32 %v6769_v63, %v6705_v24  ;;  %v6707_v58 = vadd.f32 %v6571_v37, %v6312_v34  ;;  %v6314_v41 = vpop.f32.mrb[207].mxu0  ;;  %v6780_v24 = vld [vmem:[%s10029_s28 + $0xb8] sm:$0xff] }
 0x8cb   : > { %v6834_v38 = vadd.f32 %v6770_v4, %v6706_v15  ;;  %v6708_v50 = vadd.f32 %v6571_v37, %v6314_v41  ;;  %v6596_v41 = vpop.permute.xlu1 %6595 }
 0x8cc   : > { %vm6898_vm14 = vcmp.ge.f32.partialorder %v6833_v1, 0.0  ;;  %v6963_v51 = vmul.f32 %v12452_v60, %v6833_v1  ;;  %v6835_v53 = vadd.f32 %v6771_v10, %v6707_v58 }
 0x8cd   : > { %vm6899_vm15 = vcmp.ge.f32.partialorder %v6834_v38, 0.0  ;;  %v6964_v18 = vmul.f32 %v12452_v60, %v6834_v38  ;;  %v6836_v47 = vadd.f32 %v6772_v57, %v6708_v50  ;;  %v6781_v50 = vld [vmem:[%s10029_s28 + $0xc0] sm:$0xff] }
 0x8ce   : > { %v7027_v42 = vsel %vm6898_vm14, %v6833_v1, %v6963_v51  ;;  %vm6900_vm0 = vcmp.ge.f32.partialorder %v6835_v53, 0.0  ;;  %v6965_v48 = vmul.f32 %v12452_v60, %v6835_v53 }
 0x8cf   : > { %7091 = vst [vmem:[%s12461_s24 + $0x60] sm:$0xff] %v7027_v42  ;;  %v7028_v0 = vsel %vm6899_vm15, %v6834_v38, %v6964_v18  ;;  %vm6901_vm1 = vcmp.ge.f32.partialorder %v6836_v47, 0.0  ;;  %v6966_v62 = vmul.f32 %v12452_v60, %v6836_v47  ;;  %v6318_v61 = vpop.f32.mrb[208].mxu0  ;;  %v6601_v42 = vpop.permute.xlu0 %6600 }
 0x8d0   : > { %7092 = vst [vmem:[%s12461_s24 + $0x68] sm:$0xff] %v7028_v0  ;;  %v7029_v27 = vsel %vm6900_vm0, %v6835_v53, %v6965_v48  ;;  %v6709_v13 = vadd.f32 %v6576_v35, %v6318_v61  ;;  %v6320_v3 = vpop.f32.mrb[209].mxu0 }
 0x8d1   : > { %7093 = vst [vmem:[%s12461_s24 + $0x70] sm:$0xff] %v7029_v27  ;;  %v7030_v12 = vsel %vm6901_vm1, %v6836_v47, %v6966_v62  ;;  %v6710_v14 = vadd.f32 %v6576_v35, %v6320_v3  ;;  %v6322_v2 = vpop.f32.mrb[210].mxu0  ;;  %v6782_v47 = vld [vmem:[%s10029_s28 + $0xc8] sm:$0xff]  ;;  %v6783_v35 = vld [vmem:[%s10029_s28 + $0xd0] sm:$0xff] }
 0x8d2   : > { %7094 = vst [vmem:[%s12461_s24 + $0x78] sm:$0xff] %v7030_v12  ;;  %v6837_v59 = vadd.f32 %v6773_v9, %v6709_v13  ;;  %v6711_v39 = vadd.f32 %v6581_v33, %v6322_v2  ;;  %v6324_v40 = vpop.f32.mrb[211].mxu0  ;;  %v6784_v13 = vld [vmem:[%s10029_s28 + $0xd8] sm:$0xff] }
 0x8d3   : > { %v6838_v20 = vadd.f32 %v6774_v32, %v6710_v14  ;;  %v6712_v45 = vadd.f32 %v6581_v33, %v6324_v40 }
 0x8d4   : > { %vm6902_vm2 = vcmp.ge.f32.partialorder %v6837_v59, 0.0  ;;  %v6967_v21 = vmul.f32 %v12452_v60, %v6837_v59  ;;  %v6839_v6 = vadd.f32 %v6775_v54, %v6711_v39  ;;  %v6606_v39 = vpop.permute.xlu1 %6605 }
 0x8d5   : > { %vm6903_vm3 = vcmp.ge.f32.partialorder %v6838_v20, 0.0  ;;  %v6968_v30 = vmul.f32 %v12452_v60, %v6838_v20  ;;  %v6840_v5 = vadd.f32 %v6776_v16, %v6712_v45  ;;  %v6785_v45 = vld [vmem:[%s10029_s28 + $0xe0] sm:$0xff] }
 0x8d6   : > { %v7031_v55 = vsel %vm6902_vm2, %v6837_v59, %v6967_v21  ;;  %vm6904_vm4 = vcmp.ge.f32.partialorder %v6839_v6, 0.0  ;;  %v6969_v44 = vmul.f32 %v12452_v60, %v6839_v6 }
 0x8d7   : > { %7095 = vst [vmem:[%s12461_s24 + $0x80] sm:$0xff] %v7031_v55  ;;  %v7032_v26 = vsel %vm6903_vm3, %v6838_v20, %v6968_v30  ;;  %vm6905_vm5 = vcmp.ge.f32.partialorder %v6840_v5, 0.0  ;;  %v6970_v31 = vmul.f32 %v12452_v60, %v6840_v5  ;;  %v6328_v28 = vpop.f32.mrb[212].mxu0  ;;  %v6611_v55 = vpop.permute.xlu0 %6610 }
 0x8d8   : > { %7096 = vst [vmem:[%s12461_s24 + $0x88] sm:$0xff] %v7032_v26  ;;  %v7033_v52 = vsel %vm6904_vm4, %v6839_v6, %v6969_v44  ;;  %v6713_v17 = vadd.f32 %v6586_v46, %v6328_v28  ;;  %v6330_v56 = vpop.f32.mrb[213].mxu0 }
 0x8d9   : > { %7097 = vst [vmem:[%s12461_s24 + $0x90] sm:$0xff] %v7033_v52  ;;  %v7034_v36 = vsel %vm6905_vm5, %v6840_v5, %v6970_v31  ;;  %v6714_v49 = vadd.f32 %v6586_v46, %v6330_v56  ;;  %v6332_v11 = vpop.f32.mrb[214].mxu0  ;;  %v6786_v5 = vld [vmem:[%s10029_s28 + $0xe8] sm:$0xff]  ;;  %v6787_v46 = vld [vmem:[%s10029_s28 + $0xf0] sm:$0xff] }
 0x8da   : > { %7098 = vst [vmem:[%s12461_s24 + $0x98] sm:$0xff] %v7034_v36  ;;  %v6841_v25 = vadd.f32 %v6777_v19, %v6713_v17  ;;  %v6715_v63 = vadd.f32 %v6591_v7, %v6332_v11  ;;  %v6334_v29 = vpop.f32.mrb[215].mxu0  ;;  %v6788_v17 = vld [vmem:[%s10029_s28 + $0xf8] sm:$0xff] }
 0x8db   : > { %v6842_v8 = vadd.f32 %v6778_v22, %v6714_v49  ;;  %v6716_v4 = vadd.f32 %v6591_v7, %v6334_v29 }
 0x8dc   : > { %vm6906_vm6 = vcmp.ge.f32.partialorder %v6841_v25, 0.0  ;;  %v6971_v43 = vmul.f32 %v12452_v60, %v6841_v25  ;;  %v6843_v15 = vadd.f32 %v6779_v23, %v6715_v63  ;;  %v6616_v63 = vpop.permute.xlu1 %6615 }
 0x8dd   : > { %vm6907_vm7 = vcmp.ge.f32.partialorder %v6842_v8, 0.0  ;;  %v6972_v37 = vmul.f32 %v12452_v60, %v6842_v8  ;;  %v6844_v34 = vadd.f32 %v6780_v24, %v6716_v4  ;;  %v6789_v4 = vld [vmem:[%s10029_s28 + $0x100] sm:$0xff] }
 0x8de   : > { %v7035_v10 = vsel %vm6906_vm6, %v6841_v25, %v6971_v43  ;;  %vm6908_vm8 = vcmp.ge.f32.partialorder %v6843_v15, 0.0  ;;  %v6973_v1 = vmul.f32 %v12452_v60, %v6843_v15 }
 0x8df   : > { %7099 = vst [vmem:[%s12461_s24 + $0xa0] sm:$0xff] %v7035_v10  ;;  %v7036_v58 = vsel %vm6907_vm7, %v6842_v8, %v6972_v37  ;;  %vm6909_vm9 = vcmp.ge.f32.partialorder %v6844_v34, 0.0  ;;  %v6974_v57 = vmul.f32 %v12452_v60, %v6844_v34  ;;  %v6338_v38 = vpop.f32.mrb[216].mxu0  ;;  %v6621_v10 = vpop.permute.xlu0 %6620 }
 0x8e0   : > { %7100 = vst [vmem:[%s12461_s24 + $0xa8] sm:$0xff] %v7036_v58  ;;  %v7037_v51 = vsel %vm6908_vm8, %v6843_v15, %v6973_v1  ;;  %v6717_v53 = vadd.f32 %v6596_v41, %v6338_v38  ;;  %v6340_v18 = vpop.f32.mrb[217].mxu0 }
 0x8e1   : > { %7101 = vst [vmem:[%s12461_s24 + $0xb0] sm:$0xff] %v7037_v51  ;;  %v7038_v48 = vsel %vm6909_vm9, %v6844_v34, %v6974_v57  ;;  %v6718_v0 = vadd.f32 %v6596_v41, %v6340_v18  ;;  %v6342_v62 = vpop.f32.mrb[218].mxu0  ;;  %v6790_v34 = vld [vmem:[%s10029_s28 + $0x108] sm:$0xff]  ;;  %v6791_v57 = vld [vmem:[%s10029_s28 + $0x110] sm:$0xff] }
 0x8e2   : > { %7102 = vst [vmem:[%s12461_s24 + $0xb8] sm:$0xff] %v7038_v48  ;;  %v6845_v61 = vadd.f32 %v6781_v50, %v6717_v53  ;;  %v6719_v9 = vadd.f32 %v6601_v42, %v6342_v62  ;;  %v6344_v27 = vpop.f32.mrb[219].mxu0  ;;  %v6792_v53 = vld [vmem:[%s10029_s28 + $0x118] sm:$0xff] }
 0x8e3   : > { %v6846_v3 = vadd.f32 %v6782_v47, %v6718_v0  ;;  %v6720_v32 = vadd.f32 %v6601_v42, %v6344_v27 }
 0x8e4   : > { %vm6910_vm10 = vcmp.ge.f32.partialorder %v6845_v61, 0.0  ;;  %v6975_v12 = vmul.f32 %v12452_v60, %v6845_v61  ;;  %v6847_v14 = vadd.f32 %v6783_v35, %v6719_v9  ;;  %v6626_v9 = vpop.permute.xlu1 %6625 }
 0x8e5   : > { %vm6911_vm11 = vcmp.ge.f32.partialorder %v6846_v3, 0.0  ;;  %v6976_v33 = vmul.f32 %v12452_v60, %v6846_v3  ;;  %v6848_v2 = vadd.f32 %v6784_v13, %v6720_v32  ;;  %v6793_v32 = vld [vmem:[%s10029_s28 + $0x120] sm:$0xff] }
 0x8e6   : > { %v7039_v54 = vsel %vm6910_vm10, %v6845_v61, %v6975_v12  ;;  %vm6912_vm12 = vcmp.ge.f32.partialorder %v6847_v14, 0.0  ;;  %v6977_v59 = vmul.f32 %v12452_v60, %v6847_v14 }
 0x8e7   : > { %7103 = vst [vmem:[%s12461_s24 + $0xc0] sm:$0xff] %v7039_v54  ;;  %v7040_v40 = vsel %vm6911_vm11, %v6846_v3, %v6976_v33  ;;  %vm6913_vm13 = vcmp.ge.f32.partialorder %v6848_v2, 0.0  ;;  %v6978_v16 = vmul.f32 %v12452_v60, %v6848_v2  ;;  %v6348_v20 = vpop.f32.mrb[220].mxu0  ;;  %v6631_v54 = vpop.permute.xlu0 %6630 }
 0x8e8   : > { %7104 = vst [vmem:[%s12461_s24 + $0xc8] sm:$0xff] %v7040_v40  ;;  %v7041_v21 = vsel %vm6912_vm12, %v6847_v14, %v6977_v59  ;;  %v6721_v6 = vadd.f32 %v6606_v39, %v6348_v20  ;;  %v6350_v30 = vpop.f32.mrb[221].mxu0 }
 0x8e9   : > { %7105 = vst [vmem:[%s12461_s24 + $0xd0] sm:$0xff] %v7041_v21  ;;  %v7042_v44 = vsel %vm6913_vm13, %v6848_v2, %v6978_v16  ;;  %v6722_v26 = vadd.f32 %v6606_v39, %v6350_v30  ;;  %v6352_v31 = vpop.f32.mrb[222].mxu0  ;;  %v6794_v2 = vld [vmem:[%s10029_s28 + $0x128] sm:$0xff]  ;;  %v6795_v16 = vld [vmem:[%s10029_s28 + $0x130] sm:$0xff] }
 0x8ea   : > { %7106 = vst [vmem:[%s12461_s24 + $0xd8] sm:$0xff] %v7042_v44  ;;  %v6849_v28 = vadd.f32 %v6785_v45, %v6721_v6  ;;  %v6723_v19 = vadd.f32 %v6611_v55, %v6352_v31  ;;  %v6354_v52 = vpop.f32.mrb[223].mxu0  ;;  %v6796_v6 = vld [vmem:[%s10029_s28 + $0x138] sm:$0xff] }
 0x8eb   : > { %v6850_v56 = vadd.f32 %v6786_v5, %v6722_v26  ;;  %v6724_v22 = vadd.f32 %v6611_v55, %v6354_v52 }
 0x8ec   : > { %vm6914_vm14 = vcmp.ge.f32.partialorder %v6849_v28, 0.0  ;;  %v6979_v36 = vmul.f32 %v12452_v60, %v6849_v28  ;;  %v6851_v7 = vadd.f32 %v6787_v46, %v6723_v19  ;;  %v6636_v19 = vpop.permute.xlu1 %6635 }
 0x8ed   : > { %vm6915_vm15 = vcmp.ge.f32.partialorder %v6850_v56, 0.0  ;;  %v6980_v49 = vmul.f32 %v12452_v60, %v6850_v56  ;;  %v6852_v11 = vadd.f32 %v6788_v17, %v6724_v22  ;;  %v6797_v22 = vld [vmem:[%s10029_s28 + $0x140] sm:$0xff] }
 0x8ee   : > { %v7043_v23 = vsel %vm6914_vm14, %v6849_v28, %v6979_v36  ;;  %vm6916_vm0 = vcmp.ge.f32.partialorder %v6851_v7, 0.0  ;;  %v6981_v25 = vmul.f32 %v12452_v60, %v6851_v7 }
 0x8ef   : > { %7107 = vst [vmem:[%s12461_s24 + $0xe0] sm:$0xff] %v7043_v23  ;;  %v7044_v29 = vsel %vm6915_vm15, %v6850_v56, %v6980_v49  ;;  %vm6917_vm1 = vcmp.ge.f32.partialorder %v6852_v11, 0.0  ;;  %v6982_v24 = vmul.f32 %v12452_v60, %v6852_v11  ;;  %v6358_v8 = vpop.f32.mrb[224].mxu0  ;;  %v6641_v23 = vpop.permute.xlu0 %6640 }
 0x8f0   : > { %7108 = vst [vmem:[%s12461_s24 + $0xe8] sm:$0xff] %v7044_v29  ;;  %v7045_v43 = vsel %vm6916_vm0, %v6851_v7, %v6981_v25  ;;  %v6725_v15 = vadd.f32 %v6616_v63, %v6358_v8  ;;  %v6360_v37 = vpop.f32.mrb[225].mxu0 }
 0x8f1   : > { %7109 = vst [vmem:[%s12461_s24 + $0xf0] sm:$0xff] %v7045_v43  ;;  %v7046_v1 = vsel %vm6917_vm1, %v6852_v11, %v6982_v24  ;;  %v6726_v58 = vadd.f32 %v6616_v63, %v6360_v37  ;;  %v6362_v41 = vpop.f32.mrb[226].mxu0  ;;  %v6798_v11 = vld [vmem:[%s10029_s28 + $0x148] sm:$0xff]  ;;  %v6799_v24 = vld [vmem:[%s10029_s28 + $0x150] sm:$0xff] }
 0x8f2   : > { %7110 = vst [vmem:[%s12461_s24 + $0xf8] sm:$0xff] %v7046_v1  ;;  %v6853_v38 = vadd.f32 %v6789_v4, %v6725_v15  ;;  %v6727_v50 = vadd.f32 %v6621_v10, %v6362_v41  ;;  %v6364_v51 = vpop.f32.mrb[227].mxu0  ;;  %v6800_v15 = vld [vmem:[%s10029_s28 + $0x158] sm:$0xff] }
 0x8f3   : > { %v6854_v18 = vadd.f32 %v6790_v34, %v6726_v58  ;;  %v6728_v47 = vadd.f32 %v6621_v10, %v6364_v51 }
 0x8f4   : > { %vm6918_vm2 = vcmp.ge.f32.partialorder %v6853_v38, 0.0  ;;  %v6983_v42 = vmul.f32 %v12452_v60, %v6853_v38  ;;  %v6855_v48 = vadd.f32 %v6791_v57, %v6727_v50  ;;  %v6646_v50 = vpop.permute.xlu1 %6645 }
 0x8f5   : > { %vm6919_vm3 = vcmp.ge.f32.partialorder %v6854_v18, 0.0  ;;  %v6984_v0 = vmul.f32 %v12452_v60, %v6854_v18  ;;  %v6856_v62 = vadd.f32 %v6792_v53, %v6728_v47  ;;  %v6801_v47 = vld [vmem:[%s10029_s28 + $0x160] sm:$0xff] }
 0x8f6   : > { %v7047_v35 = vsel %vm6918_vm2, %v6853_v38, %v6983_v42  ;;  %vm6920_vm4 = vcmp.ge.f32.partialorder %v6855_v48, 0.0  ;;  %v6985_v61 = vmul.f32 %v12452_v60, %v6855_v48 }
 0x8f7   : > { %7111 = vst [vmem:[%s12461_s24 + $0x100] sm:$0xff] %v7047_v35  ;;  %v7048_v27 = vsel %vm6919_vm3, %v6854_v18, %v6984_v0  ;;  %vm6921_vm5 = vcmp.ge.f32.partialorder %v6856_v62, 0.0  ;;  %v6986_v13 = vmul.f32 %v12452_v60, %v6856_v62  ;;  %v6368_v3 = vpop.f32.mrb[228].mxu0  ;;  %v6651_v35 = vpop.permute.xlu0 %6650 }
 0x8f8   : > { %7112 = vst [vmem:[%s12461_s24 + $0x108] sm:$0xff] %v7048_v27  ;;  %v7049_v12 = vsel %vm6920_vm4, %v6855_v48, %v6985_v61  ;;  %v6729_v14 = vadd.f32 %v6626_v9, %v6368_v3  ;;  %v6370_v33 = vpop.f32.mrb[229].mxu0 }
 0x8f9   : > { %7113 = vst [vmem:[%s12461_s24 + $0x110] sm:$0xff] %v7049_v12  ;;  %v7050_v59 = vsel %vm6921_vm5, %v6856_v62, %v6986_v13  ;;  %v6730_v39 = vadd.f32 %v6626_v9, %v6370_v33  ;;  %v6372_v40 = vpop.f32.mrb[230].mxu0  ;;  %v6802_v62 = vld [vmem:[%s10029_s28 + $0x168] sm:$0xff]  ;;  %v6803_v13 = vld [vmem:[%s10029_s28 + $0x170] sm:$0xff] }
 0x8fa   : > { %7114 = vst [vmem:[%s12461_s24 + $0x118] sm:$0xff] %v7050_v59  ;;  %v6857_v20 = vadd.f32 %v6793_v32, %v6729_v14  ;;  %v6731_v45 = vadd.f32 %v6631_v54, %v6372_v40  ;;  %v6374_v21 = vpop.f32.mrb[231].mxu0  ;;  %v6804_v14 = vld [vmem:[%s10029_s28 + $0x178] sm:$0xff] }
 0x8fb   : > { %v6858_v30 = vadd.f32 %v6794_v2, %v6730_v39  ;;  %v6732_v5 = vadd.f32 %v6631_v54, %v6374_v21 }
 0x8fc   : > { %vm6922_vm6 = vcmp.ge.f32.partialorder %v6857_v20, 0.0  ;;  %v6987_v55 = vmul.f32 %v12452_v60, %v6857_v20  ;;  %v6859_v44 = vadd.f32 %v6795_v16, %v6731_v45  ;;  %v6656_v45 = vpop.permute.xlu1 %6655 }
 0x8fd   : > { %vm6923_vm7 = vcmp.ge.f32.partialorder %v6858_v30, 0.0  ;;  %v6988_v26 = vmul.f32 %v12452_v60, %v6858_v30  ;;  %v6860_v31 = vadd.f32 %v6796_v6, %v6732_v5  ;;  %v6805_v5 = vld [vmem:[%s10029_s28 + $0x180] sm:$0xff] }
 0x8fe   : > { %v7051_v46 = vsel %vm6922_vm6, %v6857_v20, %v6987_v55  ;;  %vm6924_vm8 = vcmp.ge.f32.partialorder %v6859_v44, 0.0  ;;  %v6989_v28 = vmul.f32 %v12452_v60, %v6859_v44 }
 0x8ff   : > { %7115 = vst [vmem:[%s12461_s24 + $0x120] sm:$0xff] %v7051_v46  ;;  %v7052_v52 = vsel %vm6923_vm7, %v6858_v30, %v6988_v26  ;;  %vm6925_vm9 = vcmp.ge.f32.partialorder %v6860_v31, 0.0  ;;  %v6990_v17 = vmul.f32 %v12452_v60, %v6860_v31  ;;  %v6378_v56 = vpop.f32.mrb[232].mxu0  ;;  %v6661_v46 = vpop.permute.xlu0 %6660 }
 0x900   : > { %7116 = vst [vmem:[%s12461_s24 + $0x128] sm:$0xff] %v7052_v52  ;;  %v7053_v36 = vsel %vm6924_vm8, %v6859_v44, %v6989_v28  ;;  %v6733_v7 = vadd.f32 %v6636_v19, %v6378_v56  ;;  %v6380_v49 = vpop.f32.mrb[233].mxu0 }
 0x901   : > { %7117 = vst [vmem:[%s12461_s24 + $0x130] sm:$0xff] %v7053_v36  ;;  %v7054_v25 = vsel %vm6925_vm9, %v6860_v31, %v6990_v17  ;;  %v6734_v63 = vadd.f32 %v6636_v19, %v6380_v49  ;;  %v6382_v29 = vpop.f32.mrb[234].mxu0  ;;  %v6806_v31 = vld [vmem:[%s10029_s28 + $0x188] sm:$0xff]  ;;  %v6807_v17 = vld [vmem:[%s10029_s28 + $0x190] sm:$0xff] }
 0x902   : > { %7118 = vst [vmem:[%s12461_s24 + $0x138] sm:$0xff] %v7054_v25  ;;  %v6861_v8 = vadd.f32 %v6797_v22, %v6733_v7  ;;  %v6735_v4 = vadd.f32 %v6641_v23, %v6382_v29  ;;  %v6384_v43 = vpop.f32.mrb[235].mxu0  ;;  %v6808_v7 = vld [vmem:[%s10029_s28 + $0x198] sm:$0xff] }
 0x903   : > { %v6862_v37 = vadd.f32 %v6798_v11, %v6734_v63  ;;  %v6736_v34 = vadd.f32 %v6641_v23, %v6384_v43 }
 0x904   : > { %vm6926_vm10 = vcmp.ge.f32.partialorder %v6861_v8, 0.0  ;;  %v6991_v10 = vmul.f32 %v12452_v60, %v6861_v8  ;;  %v6863_v1 = vadd.f32 %v6799_v24, %v6735_v4  ;;  %v6666_v4 = vpop.permute.xlu1 %6665 }
 0x905   : > { %vm6927_vm11 = vcmp.ge.f32.partialorder %v6862_v37, 0.0  ;;  %v6992_v58 = vmul.f32 %v12452_v60, %v6862_v37  ;;  %v6864_v41 = vadd.f32 %v6800_v15, %v6736_v34  ;;  %v6809_v34 = vld [vmem:[%s10029_s28 + $0x1a0] sm:$0xff] }
 0x906   : > { %v7055_v57 = vsel %vm6926_vm10, %v6861_v8, %v6991_v10  ;;  %vm6928_vm12 = vcmp.ge.f32.partialorder %v6863_v1, 0.0  ;;  %v6993_v38 = vmul.f32 %v12452_v60, %v6863_v1 }
 0x907   : > { %7119 = vst [vmem:[%s12461_s24 + $0x140] sm:$0xff] %v7055_v57  ;;  %v7056_v51 = vsel %vm6927_vm11, %v6862_v37, %v6992_v58  ;;  %vm6929_vm13 = vcmp.ge.f32.partialorder %v6864_v41, 0.0  ;;  %v6994_v53 = vmul.f32 %v12452_v60, %v6864_v41  ;;  %v6388_v18 = vpop.f32.mrb[236].mxu0  ;;  %v6671_v57 = vpop.permute.xlu0 %6670 }
 0x908   : > { %7120 = vst [vmem:[%s12461_s24 + $0x148] sm:$0xff] %v7056_v51  ;;  %v7057_v42 = vsel %vm6928_vm12, %v6863_v1, %v6993_v38  ;;  %v6737_v48 = vadd.f32 %v6646_v50, %v6388_v18  ;;  %v6390_v0 = vpop.f32.mrb[237].mxu0 }
 0x909   : > { %7121 = vst [vmem:[%s12461_s24 + $0x150] sm:$0xff] %v7057_v42  ;;  %v7058_v61 = vsel %vm6929_vm13, %v6864_v41, %v6994_v53  ;;  %v6738_v9 = vadd.f32 %v6646_v50, %v6390_v0  ;;  %v6392_v27 = vpop.f32.mrb[238].mxu0  ;;  %v6810_v41 = vld [vmem:[%s10029_s28 + $0x1a8] sm:$0xff]  ;;  %v6811_v53 = vld [vmem:[%s10029_s28 + $0x1b0] sm:$0xff] }
 0x90a   : > { %7122 = vst [vmem:[%s12461_s24 + $0x158] sm:$0xff] %v7058_v61  ;;  %v6865_v3 = vadd.f32 %v6801_v47, %v6737_v48  ;;  %v6739_v32 = vadd.f32 %v6651_v35, %v6392_v27  ;;  %v6394_v12 = vpop.f32.mrb[239].mxu0  ;;  %v6812_v48 = vld [vmem:[%s10029_s28 + $0x1b8] sm:$0xff] }
 0x90b   : > { %v6866_v33 = vadd.f32 %v6802_v62, %v6738_v9  ;;  %v6740_v2 = vadd.f32 %v6651_v35, %v6394_v12 }
 0x90c   : > { %vm6930_vm14 = vcmp.ge.f32.partialorder %v6865_v3, 0.0  ;;  %v6995_v54 = vmul.f32 %v12452_v60, %v6865_v3  ;;  %v6867_v59 = vadd.f32 %v6803_v13, %v6739_v32  ;;  %v6676_v32 = vpop.permute.xlu1 %6675 }
 0x90d   : > { %vm6931_vm15 = vcmp.ge.f32.partialorder %v6866_v33, 0.0  ;;  %v6996_v39 = vmul.f32 %v12452_v60, %v6866_v33  ;;  %v6868_v40 = vadd.f32 %v6804_v14, %v6740_v2  ;;  %v6813_v2 = vld [vmem:[%s10029_s28 + $0x1c0] sm:$0xff] }
 0x90e   : > { %v7059_v16 = vsel %vm6930_vm14, %v6865_v3, %v6995_v54  ;;  %vm6932_vm0 = vcmp.ge.f32.partialorder %v6867_v59, 0.0  ;;  %v6997_v20 = vmul.f32 %v12452_v60, %v6867_v59 }
 0x90f   : > { %7123 = vst [vmem:[%s12461_s24 + $0x160] sm:$0xff] %v7059_v16  ;;  %v7060_v21 = vsel %vm6931_vm15, %v6866_v33, %v6996_v39  ;;  %vm6933_vm1 = vcmp.ge.f32.partialorder %v6868_v40, 0.0  ;;  %v6998_v6 = vmul.f32 %v12452_v60, %v6868_v40  ;;  %v6398_v30 = vpop.f32.mrb[240].mxu0  ;;  %v6681_v16 = vpop.permute.xlu0 %6680 }
 0x910   : > { %7124 = vst [vmem:[%s12461_s24 + $0x168] sm:$0xff] %v7060_v21  ;;  %v7061_v55 = vsel %vm6932_vm0, %v6867_v59, %v6997_v20  ;;  %v6741_v44 = vadd.f32 %v6656_v45, %v6398_v30  ;;  %v6400_v26 = vpop.f32.mrb[241].mxu0 }
 0x911   : > { %7125 = vst [vmem:[%s12461_s24 + $0x170] sm:$0xff] %v7061_v55  ;;  %v7062_v28 = vsel %vm6933_vm1, %v6868_v40, %v6998_v6  ;;  %v6742_v19 = vadd.f32 %v6656_v45, %v6400_v26  ;;  %v6402_v52 = vpop.f32.mrb[242].mxu0  ;;  %v6814_v40 = vld [vmem:[%s10029_s28 + $0x1c8] sm:$0xff]  ;;  %v6815_v6 = vld [vmem:[%s10029_s28 + $0x1d0] sm:$0xff] }
 0x912   : > { %7126 = vst [vmem:[%s12461_s24 + $0x178] sm:$0xff] %v7062_v28  ;;  %v6869_v56 = vadd.f32 %v6805_v5, %v6741_v44  ;;  %v6743_v22 = vadd.f32 %v6661_v46, %v6402_v52  ;;  %v6404_v36 = vpop.f32.mrb[243].mxu0  ;;  %v6816_v44 = vld [vmem:[%s10029_s28 + $0x1d8] sm:$0xff] }
 0x913   : > { %v6870_v49 = vadd.f32 %v6806_v31, %v6742_v19  ;;  %v6744_v11 = vadd.f32 %v6661_v46, %v6404_v36 }
 0x914   : > { %vm6934_vm2 = vcmp.ge.f32.partialorder %v6869_v56, 0.0  ;;  %v6999_v23 = vmul.f32 %v12452_v60, %v6869_v56  ;;  %v6871_v25 = vadd.f32 %v6807_v17, %v6743_v22  ;;  %v6686_v22 = vpop.permute.xlu1 %6685 }
 0x915   : > { %vm6935_vm3 = vcmp.ge.f32.partialorder %v6870_v49, 0.0  ;;  %v7000_v63 = vmul.f32 %v12452_v60, %v6870_v49  ;;  %v6872_v29 = vadd.f32 %v6808_v7, %v6744_v11  ;;  %v6817_v11 = vld [vmem:[%s10029_s28 + $0x1e0] sm:$0xff] }
 0x916   : > { %v7063_v24 = vsel %vm6934_vm2, %v6869_v56, %v6999_v23  ;;  %vm6936_vm4 = vcmp.ge.f32.partialorder %v6871_v25, 0.0  ;;  %v7001_v8 = vmul.f32 %v12452_v60, %v6871_v25 }
 0x917   : > { %7127 = vst [vmem:[%s12461_s24 + $0x180] sm:$0xff] %v7063_v24  ;;  %v7064_v43 = vsel %vm6935_vm3, %v6870_v49, %v7000_v63  ;;  %vm6937_vm5 = vcmp.ge.f32.partialorder %v6872_v29, 0.0  ;;  %v7002_v15 = vmul.f32 %v12452_v60, %v6872_v29  ;;  %v6408_v37 = vpop.f32.mrb[244].mxu0  ;;  %v6691_v24 = vpop.permute.xlu0 %6690 }
 0x918   : > { %7128 = vst [vmem:[%s12461_s24 + $0x188] sm:$0xff] %v7064_v43  ;;  %v7065_v10 = vsel %vm6936_vm4, %v6871_v25, %v7001_v8  ;;  %v6745_v1 = vadd.f32 %v6666_v4, %v6408_v37  ;;  %v6410_v58 = vpop.f32.mrb[245].mxu0 }
 0x919   : > { %7129 = vst [vmem:[%s12461_s24 + $0x190] sm:$0xff] %v7065_v10  ;;  %v7066_v38 = vsel %vm6937_vm5, %v6872_v29, %v7002_v15  ;;  %v6746_v50 = vadd.f32 %v6666_v4, %v6410_v58  ;;  %v6412_v51 = vpop.f32.mrb[246].mxu0  ;;  %v6818_v29 = vld [vmem:[%s10029_s28 + $0x1e8] sm:$0xff]  ;;  %v6819_v15 = vld [vmem:[%s10029_s28 + $0x1f0] sm:$0xff] }
 0x91a   : > { %7130 = vst [vmem:[%s12461_s24 + $0x198] sm:$0xff] %v7066_v38  ;;  %v6873_v18 = vadd.f32 %v6809_v34, %v6745_v1  ;;  %v6747_v47 = vadd.f32 %v6671_v57, %v6412_v51  ;;  %v6414_v42 = vpop.f32.mrb[247].mxu0  ;;  %v6820_v1 = vld [vmem:[%s10029_s28 + $0x1f8] sm:$0xff] }
 0x91b   : > { %v6874_v0 = vadd.f32 %v6810_v41, %v6746_v50  ;;  %v6748_v62 = vadd.f32 %v6671_v57, %v6414_v42 }
 0x91c   : > { %vm6938_vm6 = vcmp.ge.f32.partialorder %v6873_v18, 0.0  ;;  %v7003_v35 = vmul.f32 %v12452_v60, %v6873_v18  ;;  %v6875_v61 = vadd.f32 %v6811_v53, %v6747_v47 }
 0x91d   : > { %vm6939_vm7 = vcmp.ge.f32.partialorder %v6874_v0, 0.0  ;;  %v7004_v9 = vmul.f32 %v12452_v60, %v6874_v0  ;;  %v6876_v27 = vadd.f32 %v6812_v48, %v6748_v62 }
 0x91e   : > { %v7067_v13 = vsel %vm6938_vm6, %v6873_v18, %v7003_v35  ;;  %vm6940_vm8 = vcmp.ge.f32.partialorder %v6875_v61, 0.0  ;;  %v7005_v3 = vmul.f32 %v12452_v60, %v6875_v61 }
 0x91f   : > { %7131 = vst [vmem:[%s12461_s24 + $0x1a0] sm:$0xff] %v7067_v13  ;;  %v7068_v12 = vsel %vm6939_vm7, %v6874_v0, %v7004_v9  ;;  %vm6941_vm9 = vcmp.ge.f32.partialorder %v6876_v27, 0.0  ;;  %v7006_v14 = vmul.f32 %v12452_v60, %v6876_v27  ;;  %v6418_v33 = vpop.f32.mrb[248].mxu0 }
 0x920   : > { %7132 = vst [vmem:[%s12461_s24 + $0x1a8] sm:$0xff] %v7068_v12  ;;  %v7069_v54 = vsel %vm6940_vm8, %v6875_v61, %v7005_v3  ;;  %v6749_v59 = vadd.f32 %v6676_v32, %v6418_v33  ;;  %v6420_v39 = vpop.f32.mrb[249].mxu0 }
 0x921   : > { %7133 = vst [vmem:[%s12461_s24 + $0x1b0] sm:$0xff] %v7069_v54  ;;  %v7070_v20 = vsel %vm6941_vm9, %v6876_v27, %v7006_v14  ;;  %v6750_v45 = vadd.f32 %v6676_v32, %v6420_v39  ;;  %v6422_v21 = vpop.f32.mrb[250].mxu0 }
 0x922   : > { %7134 = vst [vmem:[%s12461_s24 + $0x1b8] sm:$0xff] %v7070_v20  ;;  %v6877_v30 = vadd.f32 %v6813_v2, %v6749_v59  ;;  %v6751_v5 = vadd.f32 %v6681_v16, %v6422_v21  ;;  %v6424_v55 = vpop.f32.mrb[251].mxu0 }
 0x923   : > { %v6878_v26 = vadd.f32 %v6814_v40, %v6750_v45  ;;  %v6752_v31 = vadd.f32 %v6681_v16, %v6424_v55 }
 0x924   : > { %vm6942_vm10 = vcmp.ge.f32.partialorder %v6877_v30, 0.0  ;;  %v7007_v46 = vmul.f32 %v12452_v60, %v6877_v30  ;;  %v6879_v28 = vadd.f32 %v6815_v6, %v6751_v5 }
 0x925   : > { %vm6943_vm11 = vcmp.ge.f32.partialorder %v6878_v26, 0.0  ;;  %v7008_v19 = vmul.f32 %v12452_v60, %v6878_v26  ;;  %v6880_v52 = vadd.f32 %v6816_v44, %v6752_v31 }
 0x926   : > { %v7071_v17 = vsel %vm6942_vm10, %v6877_v30, %v7007_v46  ;;  %vm6944_vm12 = vcmp.ge.f32.partialorder %v6879_v28, 0.0  ;;  %v7009_v56 = vmul.f32 %v12452_v60, %v6879_v28 }
 0x927   : > { %7135 = vst [vmem:[%s12461_s24 + $0x1c0] sm:$0xff] %v7071_v17  ;;  %v7072_v36 = vsel %vm6943_vm11, %v6878_v26, %v7008_v19  ;;  %vm6945_vm13 = vcmp.ge.f32.partialorder %v6880_v52, 0.0  ;;  %v7010_v7 = vmul.f32 %v12452_v60, %v6880_v52  ;;  %v6428_v49 = vpop.f32.mrb[252].mxu0 }
 0x928   : > { %7136 = vst [vmem:[%s12461_s24 + $0x1c8] sm:$0xff] %v7072_v36  ;;  %v7073_v23 = vsel %vm6944_vm12, %v6879_v28, %v7009_v56  ;;  %v6753_v25 = vadd.f32 %v6686_v22, %v6428_v49  ;;  %v6430_v63 = vpop.f32.mrb[253].mxu0 }
 0x929   : > { %7137 = vst [vmem:[%s12461_s24 + $0x1d0] sm:$0xff] %v7073_v23  ;;  %v7074_v8 = vsel %vm6945_vm13, %v6880_v52, %v7010_v7  ;;  %v6754_v4 = vadd.f32 %v6686_v22, %v6430_v63  ;;  %v6432_v43 = vpop.f32.mrb[254].mxu0 }
 0x92a   : > { %7138 = vst [vmem:[%s12461_s24 + $0x1d8] sm:$0xff] %v7074_v8  ;;  %v6881_v37 = vadd.f32 %v6817_v11, %v6753_v25  ;;  %v6755_v34 = vadd.f32 %v6691_v24, %v6432_v43  ;;  %v6434_v10 = vpop.f32.mrb[255].mxu0 }
 0x92b   : > { %v6882_v58 = vadd.f32 %v6818_v29, %v6754_v4  ;;  %v6756_v41 = vadd.f32 %v6691_v24, %v6434_v10 }
 0x92c   : > { %vm6946_vm14 = vcmp.ge.f32.partialorder %v6881_v37, 0.0  ;;  %v7011_v57 = vmul.f32 %v12452_v60, %v6881_v37  ;;  %v6883_v38 = vadd.f32 %v6819_v15, %v6755_v34 }
 0x92d   : > { %vm6947_vm15 = vcmp.ge.f32.partialorder %v6882_v58, 0.0  ;;  %v7012_v50 = vmul.f32 %v12452_v60, %v6882_v58  ;;  %v6884_v51 = vadd.f32 %v6820_v1, %v6756_v41 }
 0x92e   : > { %v7075_v53 = vsel %vm6946_vm14, %v6881_v37, %v7011_v57  ;;  %vm6948_vm0 = vcmp.ge.f32.partialorder %v6883_v38, 0.0  ;;  %v7013_v18 = vmul.f32 %v12452_v60, %v6883_v38 }
 0x92f   : > { %7139 = vst [vmem:[%s12461_s24 + $0x1e0] sm:$0xff] %v7075_v53  ;;  %v7076_v47 = vsel %vm6947_vm15, %v6882_v58, %v7012_v50  ;;  %vm6949_vm1 = vcmp.ge.f32.partialorder %v6884_v51, 0.0  ;;  %v7014_v42 = vmul.f32 %v12452_v60, %v6884_v51 }
 0x930   : > { %7140 = vst [vmem:[%s12461_s24 + $0x1e8] sm:$0xff] %v7076_v47  ;;  %v7077_v48 = vsel %vm6948_vm0, %v6883_v38, %v7013_v18 }
 0x931   : > { %7141 = vst [vmem:[%s12461_s24 + $0x1f0] sm:$0xff] %v7077_v48  ;;  %v7078_v0 = vsel %vm6949_vm1, %v6884_v51, %v7014_v42 }
 0x932   : > { %7142 = vst [vmem:[%s12461_s24 + $0x1f8] sm:$0xff] %v7078_v0 }
 0x933   : > { %9693 = shalt.err (!%p9690_p4)
}
 0x934   : > { %s9694_s27 = scalar_lea.hbm %s12650_s20, 8192  ;;  %s9698_s29 = scalar_lea.hbm %s12709_s9, 16384 }
 0x935   : > { %p9695_p9 = scmp.ne.s32.totalorder %s12650_s20, %s9694_s27  ;;  %p9699_p8 = scmp.lt.u32.totalorder %s12650_s20, %s12709_s9 }
 0x936   : > { %p9700_p13 = scmp.lt.u32.totalorder %s9698_s29, %s9694_s27  ;;  %p9702_p10 = scmp.lt.u32.totalorder %s9694_s27, %s12650_s20 }
 0x937   : > { %p9696_p0 = pnand %p9695_p9, %p9975_p5 }
 0x938   : > { %p9701_p6 = por %p9700_p13, %p9699_p8 }
 0x939   : > { %p9697_p11 = pneg %p9696_p0 }
 0x93a   : > { %p9703_p3 = por %p9702_p10, %p9701_p6 }
 0x93c   : > { %p9704_p7 = pnand %p9703_p3, %p9697_p11 }
 0x93e   : > { %9707 = shalt.err (!%p9704_p7)
}
 0x93f   : > { %s9770_s28 = smov 256  }
 0x940   : > { %9061 = dma.vmem_to_hbm [thread:$0]  (%p9975_p5), %s12653_s8, 8192, %s12650_s20, %s7144_s26, %s9770_s28, %s9770_s28, %s9766_s21  }
 0x941 PF: > { %s13127_s7 = sld [smem:[#allocation18_spill]]  ;;  %s7173_s11 = sand.u32 1, %s9742_s13  }
 0x942   : > { %p13129_p1 = scmp.ge.s32.totalorder %s9754_s16, 2  ;;  %s7174_s12 = scalar_lea.sflag [#allocation7], %s7173_s11 }
 0x947   : > { %p13128_p12 = scmp.ne.s32.totalorder %s13127_s7, 0 }
 0x949   : > { %p9078_p2 = pnand %p13129_p1, %p13128_p12 }
 0x94b   : > { %9737 = dma.done.wait (!%p9078_p2), %s7174_s12, 8192  }
 0x94c   : > { %9739 = vsyncadd (!%p9078_p2), %s7174_s12, 4294959104  ;;  %p26_p4 = scmp.ge.s32.totalorder %s9940_s10, 4   ;;  %s13130_s13 = smov %s9746_s14 }
 0x94d   : > { %s13131_s14 = smov %s9750_s15  ;;  %s13132_s15 = smov %s9971_s23 }
 0x94e   : > { %s13133_s16 = smov %s9940_s10  ;;  %28 = sbr.rel (!%p26_p4) target bundleno = 11 (0xb), region = 120 }
 0x955   :  { %7179 = vsyncpa [#allocation6], 1 }
 0x956   :  { %7181 = vsyncpa [#allocation6 + $0x1], 1 }
 0x957   :  { %7182 = vsyncpa [#allocation9], 1 }
 0x958   :  { %7183 = vsyncpa [#allocation12], 1 }
 0x959   :  { %7184 = vsyncpa [#allocation7], 1 }
 0x95a   :  { %7186 = vsyncpa [#allocation7 + $0x1], 1 }

</bundles_post_ra>
